<compile_context>
chip_gen: v7x
topology: tpu7x:2x2x1
jax: 0.10.0
libtpu: 0.0.40
codegen_flags: <defaults>
</compile_context>

<pallas_src>
import functools
import math

import numpy as np

import jax
import jax.numpy as jnp
from jax.experimental import pallas as pl
from jax.experimental.pallas import tpu as pltpu  # noqa: F401  (TPU backend; tuning hooks)


# ======================================================================================
# Host-side constant builders (numpy; run once at setup, outside jit)
# ======================================================================================

def _s1_row_maps(h):
    """Per-sample row-selection maps for a 3x3 stride-1 conv (zero pad = 1)."""
    mats = []
    for k in range(3):
        a = np.zeros((h, h), np.float32)
        for ho in range(h):
            hi = ho + k - 1
            if 0 <= hi < h:
                a[ho, hi] = 1.0
        mats.append(a)
    return mats


def _s2_row_maps(h):
    """Per-sample row-selection maps for a 3x3 stride-2 conv (pad=1)."""
    h2 = (h - 1) // 2 + 1
    mats = []
    for k in range(3):
        a = np.zeros((h2, h), np.float32)
        for ho in range(h2):
            hi = 2 * ho + k - 1
            if 0 <= hi < h:
                a[ho, hi] = 1.0
        mats.append(a)
    return mats


def _convt_row_maps(h_in, h_t):
    """Row maps for ConvTranspose2d(3, stride=2, pad=1) incl. centered zero-pad to h_t."""
    h_raw = 2 * h_in - 1
    if h_t < h_raw:
        raise NotImplementedError("ConvTranspose output larger than target not supported")
    r0 = (h_t - h_raw) // 2
    mats = []
    for k in range(3):
        a = np.zeros((h_t, h_in), np.float32)
        for p in range(h_t):
            pr = p - r0
            if 0 <= pr <= h_raw - 1 and (pr + k) % 2 == 1:
                hi = (pr + k - 1) // 2
                if 0 <= hi < h_in:
                    a[p, hi] = 1.0
        mats.append(a)
    return mats


def _stack_rows_batched(mats, n):
    """Block-diagonal over batch + stack the 3 taps along rows -> (3*n*ho, n*hi) bf16."""
    eye = np.eye(n, dtype=np.float32)
    stacked = np.concatenate([np.kron(eye, m) for m in mats], axis=0)
    return jnp.asarray(stacked, dtype=jnp.bfloat16)


def _conv_col_mats(w, w_in, stride=1):
    """w: (3,3,Cin,Cout) -> per-tap banded weights (3, w_in*Cin, w_out*Cout) bf16."""
    w = np.asarray(w, np.float32)
    cin, cout = w.shape[2], w.shape[3]
    w_out = (w_in - 1) // stride + 1
    mats = np.zeros((3, w_in * cin, w_out * cout), np.float32)
    for kh in range(3):
        for kw in range(3):
            sel = np.zeros((w_in, w_out), np.float32)
            for wo in range(w_out):
                wi = stride * wo + kw - 1
                if 0 <= wi < w_in:
                    sel[wi, wo] = 1.0
            mats[kh] += np.kron(sel, w[kh, kw])
    return jnp.asarray(mats, dtype=jnp.bfloat16)


def _convt_col_mats(w_eff, w_in, w_t):
    """ConvTranspose weights (dense-conv layout) -> (3, w_in*Cin, w_t*Cout) bf16."""
    w_eff = np.asarray(w_eff, np.float32)
    cin, cout = w_eff.shape[2], w_eff.shape[3]
    w_raw = 2 * w_in - 1
    if w_t < w_raw:
        raise NotImplementedError("ConvTranspose output larger than target not supported")
    c0 = (w_t - w_raw) // 2
    mats = np.zeros((3, w_in * cin, w_t * cout), np.float32)
    for kh in range(3):
        for kw in range(3):
            sel = np.zeros((w_in, w_t), np.float32)
            for q in range(w_t):
                qr = q - c0
                if 0 <= qr <= w_raw - 1 and (qr + kw) % 2 == 1:
                    wi = (qr + kw - 1) // 2
                    if 0 <= wi < w_in:
                        sel[wi, q] = 1.0
            mats[kh] += np.kron(sel, w_eff[kh, kw])
    return jnp.asarray(mats, dtype=jnp.bfloat16)


def _bias_flat(b, w_out):
    return jnp.asarray(np.tile(np.asarray(b, np.float32), int(w_out))[None, :], jnp.float32)


def _convt_bias_map(b, h_in, w_in, h_t, w_t, n):
    """Bias inside the raw ConvT footprint, 0 in the zero-pad border; tiled over batch."""
    b = np.asarray(b, np.float32)
    cout = b.shape[0]
    h_raw, w_raw = 2 * h_in - 1, 2 * w_in - 1
    r0, c0 = (h_t - h_raw) // 2, (w_t - w_raw) // 2
    rmask = np.zeros((h_t, 1), np.float32)
    rmask[r0:r0 + h_raw, 0] = 1.0
    cmask = np.zeros((w_t,), np.float32)
    cmask[c0:c0 + w_raw] = 1.0
    col = np.repeat(cmask, cout) * np.tile(b, w_t)
    return jnp.asarray(np.tile(rmask * col[None, :], (n, 1)), jnp.float32)


def _eca_band(w_eca, ch):
    """band[ci, co]: coefficient of pooled channel ci for the k=3 ECA conv output co."""
    # TODO(synk): band orientation / ConvT parity conventions should be validated
    #             numerically against the PyTorch reference before loading real weights.
    w_eca = np.asarray(w_eca, np.float32)
    band = np.zeros((ch, ch), np.float32)
    for ci in range(ch):
        for co in range(ch):
            d = co - ci
            if d == -1:
                band[ci, co] = w_eca[2]
            elif d == 0:
                band[ci, co] = w_eca[1]
            elif d == 1:
                band[ci, co] = w_eca[0]
    return band


def _eca_tbig(w_eca, h, w, c):
    """(w*c, w*c): per-batch colsum @ T == channel-attention logits (replicated over w)."""
    band = _eca_band(w_eca, c) / float(h * w)
    return jnp.asarray(np.kron(np.ones((w, w), np.float32), band), jnp.bfloat16)


def _eca_tgroup(w_eca, h, w, c_g, c_off, c_tot):
    """(w*c_g, c_tot): one channel group's colsum contribution to the concat logits."""
    band = _eca_band(w_eca, c_tot) / float(h * w)
    sub = band[c_off:c_off + c_g, :]
    return jnp.asarray(np.kron(np.ones((w, 1), np.float32), sub), jnp.bfloat16)


def _group_bcast(w, c_g, c_off, c_tot):
    """(c_tot, w*c_g): selects + broadcasts one group's channel scales to its flat layout."""
    e = np.zeros((c_tot, c_g), np.float32)
    for ci in range(c_g):
        e[c_off + ci, ci] = 1.0
    return jnp.asarray(np.kron(np.ones((1, w), np.float32), e), jnp.bfloat16)


def _pool_mats(n, h):
    """Per-batch-block row pooling matrix and its broadcast-back transpose (0/1, bf16)."""
    pool = np.kron(np.eye(n, dtype=np.float32), np.ones((1, h), np.float32))
    return (jnp.asarray(pool, jnp.bfloat16), jnp.asarray(pool.T.copy(), jnp.bfloat16))


def _level_sizes(h0, w0, nlevel):
    sizes = [(h0, w0)]
    for _ in range(nlevel):
        h, w = sizes[-1]
        sizes.append(((h + 1) // 2, (w + 1) // 2))
    return sizes


# ======================================================================================
# Parameters (deterministic synthetic init) and packing to kernel-ready constants
# ======================================================================================

def init_params(key, nf_in, nf_base, nf_out, nlevel):
    """Deterministic synthetic parameters in the same shapes as the PyTorch module."""
    keys = iter(jax.random.split(key, 1024))

    def conv_p(cin, cout):
        kw, kb = next(keys), next(keys)
        w = jax.random.normal(kw, (3, 3, cin, cout), jnp.float32) / math.sqrt(9 * cin)
        b = 0.01 * jax.random.normal(kb, (cout,), jnp.float32)
        return {'w': w, 'b': b}

    def eca_p():
        return 0.5 * jax.random.normal(next(keys), (3,), jnp.float32)

    params = {
        'in_conv': [conv_p(nf_in, nf_base), conv_p(nf_base, nf_base)],
        'out_conv': {'eca': eca_p(), 'conv': conv_p(nf_base, nf_out)},
    }
    for i in range(nlevel):
        params[f'down_{i}'] = {
            'eca1': eca_p(), 'conv1': conv_p(nf_base, nf_base),
            'conv_s2': conv_p(nf_base, nf_base),
            'eca2': eca_p(), 'conv2': conv_p(nf_base, nf_base),
        }
        for j in range(i + 1):
            params[f'up_{i}_{j}'] = {
                # TODO(synk): real ConvTranspose2d weights need flip/(Cin,Cout)-swap here.
                'convT': conv_p(nf_base, nf_base),
                'eca1': eca_p(), 'conv1': conv_p(nf_base * (2 + j), nf_base),
                'eca2': eca_p(), 'conv2': conv_p(nf_base, nf_base),
            }
    return params


def prepare_packed(params, n, h0, w0, nf_base, nlevel):
    """Bake conv / ECA weights into A/B/T/P/bias constants (host side, once).

    The constants depend on the batch size n, because the batch is folded into the
    matmul row dimension via block-diagonal row-selection matrices."""
    c = nf_base
    sizes = _level_sizes(h0, w0, nlevel)

    lvl = []
    for l in range(nlevel + 1):
        h, w = sizes[l]
        pool, bcast = _pool_mats(n, h)
        entry = {'A': _stack_rows_batched(_s1_row_maps(h), n), 'pool': pool, 'bcast': bcast}
        if l < nlevel:
            entry['As2'] = _stack_rows_batched(_s2_row_maps(h), n)
            entry['At'] = _stack_rows_batched(_convt_row_maps(sizes[l + 1][0], h), n)
        lvl.append(entry)

    p0, p1 = params['in_conv']
    packed = {
        'lvl': lvl,
        'in': dict(B1=_conv_col_mats(p0['w'], w0), b1=_bias_flat(p0['b'], w0),
                   B2=_conv_col_mats(p1['w'], w0), b2=_bias_flat(p1['b'], w0)),
        'down': [],
        'up': [],
    }

    for i in range(nlevel):
        h, w = sizes[i]
        h2, w2 = sizes[i + 1]
        pd = params[f'down_{i}']
        packed['down'].append(dict(
            T1=_eca_tbig(pd['eca1'], h, w, c),
            B1=_conv_col_mats(pd['conv1']['w'], w), b1=_bias_flat(pd['conv1']['b'], w),
            Bs2=_conv_col_mats(pd['conv_s2']['w'], w, stride=2),
            bs2=_bias_flat(pd['conv_s2']['b'], w2),
            T2=_eca_tbig(pd['eca2'], h2, w2, c),
            B2=_conv_col_mats(pd['conv2']['w'], w2), b2=_bias_flat(pd['conv2']['b'], w2),
        ))

        ups = []
        for j in range(i + 1):
            hs, ws = sizes[i - j + 1]
            ht, wt = sizes[i - j]
            pu = params[f'up_{i}_{j}']
            ng = j + 2
            ct = c * ng
            ups.append(dict(
                Bt=_convt_col_mats(pu['convT']['w'], ws, wt),
                biasT=_convt_bias_map(pu['convT']['b'], hs, ws, ht, wt, n),
                T1=jnp.stack([_eca_tgroup(pu['eca1'], ht, wt, c, g * c, ct)
                              for g in range(ng)]),
                P=jnp.stack([_group_bcast(wt, c, g * c, ct) for g in range(ng)]),
                B1=jnp.concatenate(
                    [_conv_col_mats(pu['conv1']['w'][:, :, g * c:(g + 1) * c, :], wt)
                     for g in range(ng)], axis=0),
                b1=_bias_flat(pu['conv1']['b'], wt),
                T2=_eca_tbig(pu['eca2'], ht, wt, c),
                B2=_conv_col_mats(pu['conv2']['w'], wt), b2=_bias_flat(pu['conv2']['b'], wt),
            ))
        packed['up'].append(ups)

    po = params['out_conv']
    packed['out'] = dict(T=_eca_tbig(po['eca'], h0, w0, c),
                         B=_conv_col_mats(po['conv']['w'], w0),
                         b=_bias_flat(po['conv']['b'], w0))
    return packed


# ======================================================================================
# The single fused Pallas kernel (whole network, whole batch, one invocation)
# ======================================================================================

def _fused_kernel(treedef, nlevel, *refs):
    x_ref = refs[0]
    o_ref = refs[-1]
    P = jax.tree_util.tree_unflatten(treedef, refs[1:-1])

    bf16 = jnp.bfloat16
    f32 = jnp.float32

    def relu(v):
        return jnp.maximum(v, 0.0)

    def sigmoid(v):
        # exp(-v) may overflow to inf for very negative v; 1/(1+inf) is still the
        # correct 0.0 in f32 and this stays on the cheap EUP path.
        return 1.0 / (1.0 + jnp.exp(-v))

    def row_taps(x, a_ref):
        """Stacked row-selection (3*Mo, Mi) applied to x (Mi, L) -> 3 bf16 taps (Mo, L)."""
        m_out = a_ref.shape[0] // 3
        r = jnp.dot(a_ref[...], x.astype(bf16), preferred_element_type=f32)
        return [r[k * m_out:(k + 1) * m_out, :].astype(bf16) for k in range(3)]

    def tap_matmul(taps, b_ref, bias):
        """sum_t taps[t] @ B[t] + bias; fused into ONE MXU matmul when lane-aligned."""
        ntaps, wcin, lout = b_ref.shape
        if wcin % 128 == 0:
            xcat = jnp.concatenate(taps, axis=1)                      # (M, ntaps*wcin)
            b2d = b_ref[...].reshape(ntaps * wcin, lout)
            acc = jnp.dot(xcat, b2d, preferred_element_type=f32)
        else:
            acc = None
            for t in range(ntaps):
                part = jnp.dot(taps[t], b_ref[t], preferred_element_type=f32)
                acc = part if acc is None else acc + part
        return acc + bias

    def conv_s1(x, lvl, b_ref, bias_ref):
        return tap_matmul(row_taps(x, lvl['A']), b_ref, bias_ref[...])

    def conv_s2(x, lvl, b_ref, bias_ref):
        return tap_matmul(row_taps(x, lvl['As2']), b_ref, bias_ref[...])

    def conv_t(x, lvl, b_ref, bias_map_ref):
        return tap_matmul(row_taps(x, lvl['At']), b_ref, bias_map_ref[...])

    def eca(x, lvl, t_ref):
        """ECA on an already-ReLU'd (N*H, W*C) tile; pooling is per batch block."""
        cs = jnp.dot(lvl['pool'][...], x.astype(bf16), preferred_element_type=f32)
        logit = jnp.dot(cs.astype(bf16), t_ref[...], preferred_element_type=f32)
        rows = jnp.dot(lvl['bcast'][...], sigmoid(logit).astype(bf16),
                       preferred_element_type=f32)
        return x * rows

    x_in = x_ref[...]                                                  # (N*H0, W0*Cin) f32

    # ---- in_conv_seq: Conv -> ReLU -> Conv ------------------------------------------
    lvl0 = P['lvl'][0]
    pin = P['in']
    feat = conv_s1(x_in, lvl0, pin['B1'], pin['b1'])
    feat = conv_s1(relu(feat), lvl0, pin['B2'], pin['b2'])

    feat_level_unet = [[feat]]
    out = None

    for i in range(nlevel):
        lvl_i = P['lvl'][i]
        lvl_i1 = P['lvl'][i + 1]
        pd = P['down'][i]

        # ---- Down: ReLU, ECA, Conv, ReLU, Conv(s2), ReLU, ECA, Conv ------------------
        d = eca(relu(feat_level_unet[-1][0]), lvl_i, pd['T1'])
        d = conv_s1(d, lvl_i, pd['B1'], pd['b1'])
        d = conv_s2(relu(d), lvl_i, pd['Bs2'], pd['bs2'])
        d = eca(relu(d), lvl_i1, pd['T2'])
        d = conv_s1(d, lvl_i1, pd['B2'], pd['b2'])

        feat_up_list = [d]
        for j in range(i + 1):
            dense_inp = []
            for idx_, feat_level in enumerate(feat_level_unet[-(j + 1):]):
                dense_inp.append(feat_level[idx_])

            pu = P['up'][i][j]
            lvl_t = P['lvl'][i - j]
            pool_v = lvl_t['pool'][...]
            bcast_v = lvl_t['bcast'][...]

            # ---- Up: ReLU, ConvT(s2) + zero-pad placement ---------------------------
            fu = conv_t(relu(feat_up_list[-1]), lvl_t, pu['Bt'], pu['biasT'])

            # conv_seq's first ReLU acts on the (virtually) concatenated tensor.
            feats = [relu(fu)] + [relu(s) for s in dense_inp]

            # ECA over the concatenated channels (cross-group k=3 channel conv).
            logit = None
            for g, fg in enumerate(feats):
                cs = jnp.dot(pool_v, fg.astype(bf16), preferred_element_type=f32)
                lg = jnp.dot(cs.astype(bf16), pu['T1'][g], preferred_element_type=f32)
                logit = lg if logit is None else logit + lg
            scale = sigmoid(logit).astype(bf16)                        # (N, C_tot)

            # conv1 over the virtual concat: one matmul over all groups x taps.
            taps = []
            for g, fg in enumerate(feats):
                sg = jnp.dot(scale, pu['P'][g], preferred_element_type=f32)
                rows = jnp.dot(bcast_v, sg.astype(bf16), preferred_element_type=f32)
                taps.extend(row_taps(fg * rows, lvl_t['A']))
            f1 = tap_matmul(taps, pu['B1'], pu['b1'][...])

            f2 = eca(relu(f1), lvl_t, pu['T2'])
            f2 = conv_s1(f2, lvl_t, pu['B2'], pu['b2'])
            feat_up_list.append(f2)

        if i == nlevel - 1:
            # ---- out_conv_seq: ReLU, ECA, Conv; + residual with the network input ---
            po = P['out']
            g0 = eca(relu(feat_up_list[-1]), P['lvl'][0], po['T'])
            out = conv_s1(g0, P['lvl'][0], po['B'], po['b']) + x_in

        feat_level_unet.append(feat_up_list)

    # Single small store; lane dim is W*nf_out (<128) but it is one tiny write.
    o_ref[...] = out


# ======================================================================================
# Wrapper (single exit: down='strideconv', up='transpose2d', separable=False, eca=True)
# ======================================================================================

def _rbqe_pallas(packed, x_flat, nlevel, out_lanes):
    leaves, treedef = jax.tree_util.tree_flatten(packed)
    kernel = functools.partial(_fused_kernel, treedef, nlevel)
    out_shape = jax.ShapeDtypeStruct((x_flat.shape[0], out_lanes), jnp.float32)
    # Grid-less call: every operand is mapped whole into VMEM once (constants are
    # single-buffered), the full network runs in one kernel invocation and all
    # intermediate activations stay on-chip.
    return pl.pallas_call(kernel, out_shape=out_shape)(x_flat, *leaves)


def rbqe_apply(packed, inp_nchw, *, nlevel, nf_out):
    """NCHW in / NCHW out (matches the PyTorch module interface)."""
    n, c_in, h, w = inp_nchw.shape
    x_flat = jnp.transpose(inp_nchw, (0, 2, 3, 1)).reshape(n * h, w * c_in)
    x_flat = x_flat.astype(jnp.float32)
    out_flat = _rbqe_pallas(packed, x_flat, nlevel, w * nf_out)
    return jnp.transpose(out_flat.reshape(n, h, w, nf_out), (0, 3, 1, 2))


# ======================================================================================

if __name__ == "__main__":
    NF_IN, NF_BASE, NF_OUT, NLEVEL = 3, 8, 3, 2     # small, forward-consistent config
    N, H, W = 2, 16, 16

    key = jax.random.PRNGKey(0)
    pkey, xkey = jax.random.split(key)
    params = init_params(pkey, NF_IN, NF_BASE, NF_OUT, NLEVEL)
    x = jax.random.normal(xkey, (N, NF_IN, H, W), jnp.float32)   # NCHW like PyTorch

    # Bake conv / ECA weights into kernel-ready constant matrices once, outside jit.
    packed = prepare_packed(params, N, H, W, NF_BASE, NLEVEL)

    fwd = jax.jit(functools.partial(rbqe_apply, nlevel=NLEVEL, nf_out=NF_OUT))
    out = jax.block_until_ready(fwd(packed, x))

    assert out.shape == x.shape and out.dtype == jnp.float32
    assert bool(jnp.all(jnp.isfinite(out)))
    print("KERNEL_OK")
</pallas_src>

<mosaic_0001>
module attributes {stable_mosaic.version = 11 : i64} {
  func.func @_fused_kernel(%arg0: memref<32x48xf32, #tpu.memory_space<vmem>>, %arg1: memref<3x128x128xbf16, #tpu.memory_space<vmem>>, %arg2: memref<3x64x64xbf16, #tpu.memory_space<vmem>>, %arg3: memref<3x128x64xbf16, #tpu.memory_space<vmem>>, %arg4: memref<128x128xbf16, #tpu.memory_space<vmem>>, %arg5: memref<64x64xbf16, #tpu.memory_space<vmem>>, %arg6: memref<1x128xf32, #tpu.memory_space<vmem>>, %arg7: memref<1x64xf32, #tpu.memory_space<vmem>>, %arg8: memref<1x64xf32, #tpu.memory_space<vmem>>, %arg9: memref<3x64x64xbf16, #tpu.memory_space<vmem>>, %arg10: memref<3x32x32xbf16, #tpu.memory_space<vmem>>, %arg11: memref<3x64x32xbf16, #tpu.memory_space<vmem>>, %arg12: memref<64x64xbf16, #tpu.memory_space<vmem>>, %arg13: memref<32x32xbf16, #tpu.memory_space<vmem>>, %arg14: memref<1x64xf32, #tpu.memory_space<vmem>>, %arg15: memref<1x32xf32, #tpu.memory_space<vmem>>, %arg16: memref<1x32xf32, #tpu.memory_space<vmem>>, %arg17: memref<3x48x128xbf16, #tpu.memory_space<vmem>>, %arg18: memref<3x128x128xbf16, #tpu.memory_space<vmem>>, %arg19: memref<1x128xf32, #tpu.memory_space<vmem>>, %arg20: memref<1x128xf32, #tpu.memory_space<vmem>>, %arg21: memref<96x32xbf16, #tpu.memory_space<vmem>>, %arg22: memref<48x32xbf16, #tpu.memory_space<vmem>>, %arg23: memref<96x16xbf16, #tpu.memory_space<vmem>>, %arg24: memref<32x2xbf16, #tpu.memory_space<vmem>>, %arg25: memref<2x32xbf16, #tpu.memory_space<vmem>>, %arg26: memref<48x16xbf16, #tpu.memory_space<vmem>>, %arg27: memref<24x16xbf16, #tpu.memory_space<vmem>>, %arg28: memref<48x8xbf16, #tpu.memory_space<vmem>>, %arg29: memref<16x2xbf16, #tpu.memory_space<vmem>>, %arg30: memref<2x16xbf16, #tpu.memory_space<vmem>>, %arg31: memref<24x8xbf16, #tpu.memory_space<vmem>>, %arg32: memref<8x2xbf16, #tpu.memory_space<vmem>>, %arg33: memref<2x8xbf16, #tpu.memory_space<vmem>>, %arg34: memref<3x128x48xbf16, #tpu.memory_space<vmem>>, %arg35: memref<128x128xbf16, #tpu.memory_space<vmem>>, %arg36: memref<1x48xf32, #tpu.memory_space<vmem>>, %arg37: memref<6x128x128xbf16, #tpu.memory_space<vmem>>, %arg38: memref<3x128x128xbf16, #tpu.memory_space<vmem>>, %arg39: memref<3x64x128xbf16, #tpu.memory_space<vmem>>, %arg40: memref<2x16x128xbf16, #tpu.memory_space<vmem>>, %arg41: memref<2x128x16xbf16, #tpu.memory_space<vmem>>, %arg42: memref<128x128xbf16, #tpu.memory_space<vmem>>, %arg43: memref<1x128xf32, #tpu.memory_space<vmem>>, %arg44: memref<1x128xf32, #tpu.memory_space<vmem>>, %arg45: memref<32x128xf32, #tpu.memory_space<vmem>>, %arg46: memref<6x64x64xbf16, #tpu.memory_space<vmem>>, %arg47: memref<3x64x64xbf16, #tpu.memory_space<vmem>>, %arg48: memref<3x32x64xbf16, #tpu.memory_space<vmem>>, %arg49: memref<2x16x64xbf16, #tpu.memory_space<vmem>>, %arg50: memref<2x64x16xbf16, #tpu.memory_space<vmem>>, %arg51: memref<64x64xbf16, #tpu.memory_space<vmem>>, %arg52: memref<1x64xf32, #tpu.memory_space<vmem>>, %arg53: memref<1x64xf32, #tpu.memory_space<vmem>>, %arg54: memref<16x64xf32, #tpu.memory_space<vmem>>, %arg55: memref<9x128x128xbf16, #tpu.memory_space<vmem>>, %arg56: memref<3x128x128xbf16, #tpu.memory_space<vmem>>, %arg57: memref<3x64x128xbf16, #tpu.memory_space<vmem>>, %arg58: memref<3x24x128xbf16, #tpu.memory_space<vmem>>, %arg59: memref<3x128x24xbf16, #tpu.memory_space<vmem>>, %arg60: memref<128x128xbf16, #tpu.memory_space<vmem>>, %arg61: memref<1x128xf32, #tpu.memory_space<vmem>>, %arg62: memref<1x128xf32, #tpu.memory_space<vmem>>, %arg63: memref<32x128xf32, #tpu.memory_space<vmem>>, %arg64: memref<32x48xf32, #tpu.memory_space<vmem>>) attributes {dimension_semantics = [], scalar_prefetch = 0 : i64, scratch_operands = 0 : i64, tpu.core_type = #tpu.core_type<tc>} {
    %c0 = arith.constant 0 : index
    %c0_0 = arith.constant 0 : index
    %0 = vector.load %arg0[%c0, %c0_0] : memref<32x48xf32, #tpu.memory_space<vmem>>, vector<32x48xf32>
    %c0_1 = arith.constant 0 : index
    %c0_2 = arith.constant 0 : index
    %1 = vector.load %arg21[%c0_1, %c0_2] : memref<96x32xbf16, #tpu.memory_space<vmem>>, vector<96x32xbf16>
    %2 = arith.truncf %0 : vector<32x48xf32> to vector<32x48xbf16>
    %cst = arith.constant dense<0.000000e+00> : vector<96x48xf32>
    %3 = tpu.matmul %1, %2, %cst {dimension_numbers = #tpu.dot_dimension_numbers<[1], [0], [0], [1], [0, 0, 1, 1], [], []>} : vector<96x32xbf16>, vector<32x48xbf16>, vector<96x48xf32> -> vector<96x48xf32>
    %4 = vector.extract_strided_slice %3 {offsets = [0, 0], sizes = [32, 48], strides = [1, 1]} : vector<96x48xf32> to vector<32x48xf32>
    %5 = arith.truncf %4 : vector<32x48xf32> to vector<32x48xbf16>
    %6 = vector.extract_strided_slice %3 {offsets = [32, 0], sizes = [32, 48], strides = [1, 1]} : vector<96x48xf32> to vector<32x48xf32>
    %7 = arith.truncf %6 : vector<32x48xf32> to vector<32x48xbf16>
    %8 = vector.extract_strided_slice %3 {offsets = [64, 0], sizes = [32, 48], strides = [1, 1]} : vector<96x48xf32> to vector<32x48xf32>
    %9 = arith.truncf %8 : vector<32x48xf32> to vector<32x48xbf16>
    %c0_3 = arith.constant 0 : index
    %c0_4 = arith.constant 0 : index
    %10 = vector.load %arg19[%c0_3, %c0_4] : memref<1x128xf32, #tpu.memory_space<vmem>>, vector<1x128xf32>
    %c0_5 = arith.constant 0 : index
    %c0_6 = arith.constant 0 : index
    %c0_7 = arith.constant 0 : index
    %11 = vector.load %arg17[%c0_5, %c0_6, %c0_7] : memref<3x48x128xbf16, #tpu.memory_space<vmem>>, vector<1x48x128xbf16>
    %12 = vector.shape_cast %11 : vector<1x48x128xbf16> to vector<48x128xbf16>
    %cst_8 = arith.constant dense<0.000000e+00> : vector<32x128xf32>
    %13 = tpu.matmul %5, %12, %cst_8 {dimension_numbers = #tpu.dot_dimension_numbers<[1], [0], [0], [1], [0, 0, 1, 1], [], []>} : vector<32x48xbf16>, vector<48x128xbf16>, vector<32x128xf32> -> vector<32x128xf32>
    %c1 = arith.constant 1 : index
    %c0_9 = arith.constant 0 : index
    %c0_10 = arith.constant 0 : index
    %14 = vector.load %arg17[%c1, %c0_9, %c0_10] : memref<3x48x128xbf16, #tpu.memory_space<vmem>>, vector<1x48x128xbf16>
    %15 = vector.shape_cast %14 : vector<1x48x128xbf16> to vector<48x128xbf16>
    %cst_11 = arith.constant dense<0.000000e+00> : vector<32x128xf32>
    %16 = tpu.matmul %7, %15, %cst_11 {dimension_numbers = #tpu.dot_dimension_numbers<[1], [0], [0], [1], [0, 0, 1, 1], [], []>} : vector<32x48xbf16>, vector<48x128xbf16>, vector<32x128xf32> -> vector<32x128xf32>
    %17 = arith.addf %13, %16 : vector<32x128xf32>
    %c2 = arith.constant 2 : index
    %c0_12 = arith.constant 0 : index
    %c0_13 = arith.constant 0 : index
    %18 = vector.load %arg17[%c2, %c0_12, %c0_13] : memref<3x48x128xbf16, #tpu.memory_space<vmem>>, vector<1x48x128xbf16>
    %19 = vector.shape_cast %18 : vector<1x48x128xbf16> to vector<48x128xbf16>
    %cst_14 = arith.constant dense<0.000000e+00> : vector<32x128xf32>
    %20 = tpu.matmul %9, %19, %cst_14 {dimension_numbers = #tpu.dot_dimension_numbers<[1], [0], [0], [1], [0, 0, 1, 1], [], []>} : vector<32x48xbf16>, vector<48x128xbf16>, vector<32x128xf32> -> vector<32x128xf32>
    %21 = arith.addf %17, %20 : vector<32x128xf32>
    %22 = vector.broadcast %10 : vector<1x128xf32> to vector<32x128xf32>
    %23 = arith.addf %21, %22 : vector<32x128xf32>
    %cst_15 = arith.constant 0.000000e+00 : f32
    %24 = vector.broadcast %cst_15 : f32 to vector<32x128xf32>
    %25 = arith.maximumf %23, %24 : vector<32x128xf32>
    %c0_16 = arith.constant 0 : index
    %c0_17 = arith.constant 0 : index
    %26 = vector.load %arg21[%c0_16, %c0_17] : memref<96x32xbf16, #tpu.memory_space<vmem>>, vector<96x32xbf16>
    %27 = arith.truncf %25 : vector<32x128xf32> to vector<32x128xbf16>
    %cst_18 = arith.constant dense<0.000000e+00> : vector<96x128xf32>
    %28 = tpu.matmul %26, %27, %cst_18 {dimension_numbers = #tpu.dot_dimension_numbers<[1], [0], [0], [1], [0, 0, 1, 1], [], []>} : vector<96x32xbf16>, vector<32x128xbf16>, vector<96x128xf32> -> vector<96x128xf32>
    %29 = vector.extract_strided_slice %28 {offsets = [0, 0], sizes = [32, 128], strides = [1, 1]} : vector<96x128xf32> to vector<32x128xf32>
    %30 = arith.truncf %29 : vector<32x128xf32> to vector<32x128xbf16>
    %31 = vector.extract_strided_slice %28 {offsets = [32, 0], sizes = [32, 128], strides = [1, 1]} : vector<96x128xf32> to vector<32x128xf32>
    %32 = arith.truncf %31 : vector<32x128xf32> to vector<32x128xbf16>
    %33 = vector.extract_strided_slice %28 {offsets = [64, 0], sizes = [32, 128], strides = [1, 1]} : vector<96x128xf32> to vector<32x128xf32>
    %34 = arith.truncf %33 : vector<32x128xf32> to vector<32x128xbf16>
    %c0_19 = arith.constant 0 : index
    %c0_20 = arith.constant 0 : index
    %35 = vector.load %arg20[%c0_19, %c0_20] : memref<1x128xf32, #tpu.memory_space<vmem>>, vector<1x128xf32>
    %36 = tpu.concatenate %30, %32, %34 in 1 : vector<32x128xbf16>, vector<32x128xbf16>, vector<32x128xbf16> -> vector<32x384xbf16>
    %c0_21 = arith.constant 0 : index
    %c0_22 = arith.constant 0 : index
    %c0_23 = arith.constant 0 : index
    %37 = vector.load %arg18[%c0_21, %c0_22, %c0_23] : memref<3x128x128xbf16, #tpu.memory_space<vmem>>, vector<3x128x128xbf16>
    %38 = vector.shape_cast %37 : vector<3x128x128xbf16> to vector<384x128xbf16>
    %cst_24 = arith.constant dense<0.000000e+00> : vector<32x128xf32>
    %39 = tpu.matmul %36, %38, %cst_24 {dimension_numbers = #tpu.dot_dimension_numbers<[1], [0], [0], [1], [0, 0, 1, 1], [], []>} : vector<32x384xbf16>, vector<384x128xbf16>, vector<32x128xf32> -> vector<32x128xf32>
    %40 = vector.broadcast %35 : vector<1x128xf32> to vector<32x128xf32>
    %41 = arith.addf %39, %40 : vector<32x128xf32>
    %cst_25 = arith.constant 0.000000e+00 : f32
    %42 = vector.broadcast %cst_25 : f32 to vector<32x128xf32>
    %43 = arith.maximumf %41, %42 : vector<32x128xf32>
    %c0_26 = arith.constant 0 : index
    %c0_27 = arith.constant 0 : index
    %44 = vector.load %arg25[%c0_26, %c0_27] : memref<2x32xbf16, #tpu.memory_space<vmem>>, vector<2x32xbf16>
    %45 = arith.truncf %43 : vector<32x128xf32> to vector<32x128xbf16>
    %cst_28 = arith.constant dense<0.000000e+00> : vector<2x128xf32>
    %46 = tpu.matmul %44, %45, %cst_28 {dimension_numbers = #tpu.dot_dimension_numbers<[1], [0], [0], [1], [0, 0, 1, 1], [], []>} : vector<2x32xbf16>, vector<32x128xbf16>, vector<2x128xf32> -> vector<2x128xf32>
    %47 = arith.truncf %46 : vector<2x128xf32> to vector<2x128xbf16>
    %c0_29 = arith.constant 0 : index
    %c0_30 = arith.constant 0 : index
    %48 = vector.load %arg4[%c0_29, %c0_30] : memref<128x128xbf16, #tpu.memory_space<vmem>>, vector<128x128xbf16>
    %cst_31 = arith.constant dense<0.000000e+00> : vector<2x128xf32>
    %49 = tpu.matmul %47, %48, %cst_31 {dimension_numbers = #tpu.dot_dimension_numbers<[1], [0], [0], [1], [0, 0, 1, 1], [], []>} : vector<2x128xbf16>, vector<128x128xbf16>, vector<2x128xf32> -> vector<2x128xf32>
    %c0_32 = arith.constant 0 : index
    %c0_33 = arith.constant 0 : index
    %50 = vector.load %arg24[%c0_32, %c0_33] : memref<32x2xbf16, #tpu.memory_space<vmem>>, vector<32x2xbf16>
    %cst_34 = arith.constant 0.000000e+00 : f32
    %51 = vector.broadcast %cst_34 : f32 to vector<2x128xf32>
    %52 = arith.subf %51, %49 : vector<2x128xf32>
    %53 = math.exp %52 : vector<2x128xf32>
    %cst_35 = arith.constant 1.000000e+00 : f32
    %54 = vector.broadcast %cst_35 : f32 to vector<2x128xf32>
    %55 = arith.addf %54, %53 : vector<2x128xf32>
    %cst_36 = arith.constant 1.000000e+00 : f32
    %56 = vector.broadcast %cst_36 : f32 to vector<2x128xf32>
    %57 = arith.divf %56, %55 : vector<2x128xf32>
    %58 = arith.truncf %57 : vector<2x128xf32> to vector<2x128xbf16>
    %cst_37 = arith.constant dense<0.000000e+00> : vector<32x128xf32>
    %59 = tpu.matmul %50, %58, %cst_37 {dimension_numbers = #tpu.dot_dimension_numbers<[1], [0], [0], [1], [0, 0, 1, 1], [], []>} : vector<32x2xbf16>, vector<2x128xbf16>, vector<32x128xf32> -> vector<32x128xf32>
    %60 = arith.mulf %43, %59 : vector<32x128xf32>
    %c0_38 = arith.constant 0 : index
    %c0_39 = arith.constant 0 : index
    %61 = vector.load %arg21[%c0_38, %c0_39] : memref<96x32xbf16, #tpu.memory_space<vmem>>, vector<96x32xbf16>
    %62 = arith.truncf %60 : vector<32x128xf32> to vector<32x128xbf16>
    %cst_40 = arith.constant dense<0.000000e+00> : vector<96x128xf32>
    %63 = tpu.matmul %61, %62, %cst_40 {dimension_numbers = #tpu.dot_dimension_numbers<[1], [0], [0], [1], [0, 0, 1, 1], [], []>} : vector<96x32xbf16>, vector<32x128xbf16>, vector<96x128xf32> -> vector<96x128xf32>
    %64 = vector.extract_strided_slice %63 {offsets = [0, 0], sizes = [32, 128], strides = [1, 1]} : vector<96x128xf32> to vector<32x128xf32>
    %65 = arith.truncf %64 : vector<32x128xf32> to vector<32x128xbf16>
    %66 = vector.extract_strided_slice %63 {offsets = [32, 0], sizes = [32, 128], strides = [1, 1]} : vector<96x128xf32> to vector<32x128xf32>
    %67 = arith.truncf %66 : vector<32x128xf32> to vector<32x128xbf16>
    %68 = vector.extract_strided_slice %63 {offsets = [64, 0], sizes = [32, 128], strides = [1, 1]} : vector<96x128xf32> to vector<32x128xf32>
    %69 = arith.truncf %68 : vector<32x128xf32> to vector<32x128xbf16>
    %c0_41 = arith.constant 0 : index
    %c0_42 = arith.constant 0 : index
    %70 = vector.load %arg6[%c0_41, %c0_42] : memref<1x128xf32, #tpu.memory_space<vmem>>, vector<1x128xf32>
    %71 = tpu.concatenate %65, %67, %69 in 1 : vector<32x128xbf16>, vector<32x128xbf16>, vector<32x128xbf16> -> vector<32x384xbf16>
    %c0_43 = arith.constant 0 : index
    %c0_44 = arith.constant 0 : index
    %c0_45 = arith.constant 0 : index
    %72 = vector.load %arg1[%c0_43, %c0_44, %c0_45] : memref<3x128x128xbf16, #tpu.memory_space<vmem>>, vector<3x128x128xbf16>
    %73 = vector.shape_cast %72 : vector<3x128x128xbf16> to vector<384x128xbf16>
    %cst_46 = arith.constant dense<0.000000e+00> : vector<32x128xf32>
    %74 = tpu.matmul %71, %73, %cst_46 {dimension_numbers = #tpu.dot_dimension_numbers<[1], [0], [0], [1], [0, 0, 1, 1], [], []>} : vector<32x384xbf16>, vector<384x128xbf16>, vector<32x128xf32> -> vector<32x128xf32>
    %75 = vector.broadcast %70 : vector<1x128xf32> to vector<32x128xf32>
    %76 = arith.addf %74, %75 : vector<32x128xf32>
    %cst_47 = arith.constant 0.000000e+00 : f32
    %77 = vector.broadcast %cst_47 : f32 to vector<32x128xf32>
    %78 = arith.maximumf %76, %77 : vector<32x128xf32>
    %c0_48 = arith.constant 0 : index
    %c0_49 = arith.constant 0 : index
    %79 = vector.load %arg22[%c0_48, %c0_49] : memref<48x32xbf16, #tpu.memory_space<vmem>>, vector<48x32xbf16>
    %80 = arith.truncf %78 : vector<32x128xf32> to vector<32x128xbf16>
    %cst_50 = arith.constant dense<0.000000e+00> : vector<48x128xf32>
    %81 = tpu.matmul %79, %80, %cst_50 {dimension_numbers = #tpu.dot_dimension_numbers<[1], [0], [0], [1], [0, 0, 1, 1], [], []>} : vector<48x32xbf16>, vector<32x128xbf16>, vector<48x128xf32> -> vector<48x128xf32>
    %82 = vector.extract_strided_slice %81 {offsets = [0, 0], sizes = [16, 128], strides = [1, 1]} : vector<48x128xf32> to vector<16x128xf32>
    %83 = arith.truncf %82 : vector<16x128xf32> to vector<16x128xbf16>
    %84 = vector.extract_strided_slice %81 {offsets = [16, 0], sizes = [16, 128], strides = [1, 1]} : vector<48x128xf32> to vector<16x128xf32>
    %85 = arith.truncf %84 : vector<16x128xf32> to vector<16x128xbf16>
    %86 = vector.extract_strided_slice %81 {offsets = [32, 0], sizes = [16, 128], strides = [1, 1]} : vector<48x128xf32> to vector<16x128xf32>
    %87 = arith.truncf %86 : vector<16x128xf32> to vector<16x128xbf16>
    %c0_51 = arith.constant 0 : index
    %c0_52 = arith.constant 0 : index
    %88 = vector.load %arg8[%c0_51, %c0_52] : memref<1x64xf32, #tpu.memory_space<vmem>>, vector<1x64xf32>
    %89 = tpu.concatenate %83, %85, %87 in 1 : vector<16x128xbf16>, vector<16x128xbf16>, vector<16x128xbf16> -> vector<16x384xbf16>
    %c0_53 = arith.constant 0 : index
    %c0_54 = arith.constant 0 : index
    %c0_55 = arith.constant 0 : index
    %90 = vector.load %arg3[%c0_53, %c0_54, %c0_55] : memref<3x128x64xbf16, #tpu.memory_space<vmem>>, vector<3x128x64xbf16>
    %91 = vector.shape_cast %90 : vector<3x128x64xbf16> to vector<384x64xbf16>
    %cst_56 = arith.constant dense<0.000000e+00> : vector<16x64xf32>
    %92 = tpu.matmul %89, %91, %cst_56 {dimension_numbers = #tpu.dot_dimension_numbers<[1], [0], [0], [1], [0, 0, 1, 1], [], []>} : vector<16x384xbf16>, vector<384x64xbf16>, vector<16x64xf32> -> vector<16x64xf32>
    %93 = vector.broadcast %88 : vector<1x64xf32> to vector<16x64xf32>
    %94 = arith.addf %92, %93 : vector<16x64xf32>
    %cst_57 = arith.constant 0.000000e+00 : f32
    %95 = vector.broadcast %cst_57 : f32 to vector<16x64xf32>
    %96 = arith.maximumf %94, %95 : vector<16x64xf32>
    %c0_58 = arith.constant 0 : index
    %c0_59 = arith.constant 0 : index
    %97 = vector.load %arg30[%c0_58, %c0_59] : memref<2x16xbf16, #tpu.memory_space<vmem>>, vector<2x16xbf16>
    %98 = arith.truncf %96 : vector<16x64xf32> to vector<16x64xbf16>
    %cst_60 = arith.constant dense<0.000000e+00> : vector<2x64xf32>
    %99 = tpu.matmul %97, %98, %cst_60 {dimension_numbers = #tpu.dot_dimension_numbers<[1], [0], [0], [1], [0, 0, 1, 1], [], []>} : vector<2x16xbf16>, vector<16x64xbf16>, vector<2x64xf32> -> vector<2x64xf32>
    %100 = arith.truncf %99 : vector<2x64xf32> to vector<2x64xbf16>
    %c0_61 = arith.constant 0 : index
    %c0_62 = arith.constant 0 : index
    %101 = vector.load %arg5[%c0_61, %c0_62] : memref<64x64xbf16, #tpu.memory_space<vmem>>, vector<64x64xbf16>
    %cst_63 = arith.constant dense<0.000000e+00> : vector<2x64xf32>
    %102 = tpu.matmul %100, %101, %cst_63 {dimension_numbers = #tpu.dot_dimension_numbers<[1], [0], [0], [1], [0, 0, 1, 1], [], []>} : vector<2x64xbf16>, vector<64x64xbf16>, vector<2x64xf32> -> vector<2x64xf32>
    %c0_64 = arith.constant 0 : index
    %c0_65 = arith.constant 0 : index
    %103 = vector.load %arg29[%c0_64, %c0_65] : memref<16x2xbf16, #tpu.memory_space<vmem>>, vector<16x2xbf16>
    %cst_66 = arith.constant 0.000000e+00 : f32
    %104 = vector.broadcast %cst_66 : f32 to vector<2x64xf32>
    %105 = arith.subf %104, %102 : vector<2x64xf32>
    %106 = math.exp %105 : vector<2x64xf32>
    %cst_67 = arith.constant 1.000000e+00 : f32
    %107 = vector.broadcast %cst_67 : f32 to vector<2x64xf32>
    %108 = arith.addf %107, %106 : vector<2x64xf32>
    %cst_68 = arith.constant 1.000000e+00 : f32
    %109 = vector.broadcast %cst_68 : f32 to vector<2x64xf32>
    %110 = arith.divf %109, %108 : vector<2x64xf32>
    %111 = arith.truncf %110 : vector<2x64xf32> to vector<2x64xbf16>
    %cst_69 = arith.constant dense<0.000000e+00> : vector<16x64xf32>
    %112 = tpu.matmul %103, %111, %cst_69 {dimension_numbers = #tpu.dot_dimension_numbers<[1], [0], [0], [1], [0, 0, 1, 1], [], []>} : vector<16x2xbf16>, vector<2x64xbf16>, vector<16x64xf32> -> vector<16x64xf32>
    %113 = arith.mulf %96, %112 : vector<16x64xf32>
    %c0_70 = arith.constant 0 : index
    %c0_71 = arith.constant 0 : index
    %114 = vector.load %arg26[%c0_70, %c0_71] : memref<48x16xbf16, #tpu.memory_space<vmem>>, vector<48x16xbf16>
    %115 = arith.truncf %113 : vector<16x64xf32> to vector<16x64xbf16>
    %cst_72 = arith.constant dense<0.000000e+00> : vector<48x64xf32>
    %116 = tpu.matmul %114, %115, %cst_72 {dimension_numbers = #tpu.dot_dimension_numbers<[1], [0], [0], [1], [0, 0, 1, 1], [], []>} : vector<48x16xbf16>, vector<16x64xbf16>, vector<48x64xf32> -> vector<48x64xf32>
    %117 = vector.extract_strided_slice %116 {offsets = [0, 0], sizes = [16, 64], strides = [1, 1]} : vector<48x64xf32> to vector<16x64xf32>
    %118 = arith.truncf %117 : vector<16x64xf32> to vector<16x64xbf16>
    %119 = vector.extract_strided_slice %116 {offsets = [16, 0], sizes = [16, 64], strides = [1, 1]} : vector<48x64xf32> to vector<16x64xf32>
    %120 = arith.truncf %119 : vector<16x64xf32> to vector<16x64xbf16>
    %121 = vector.extract_strided_slice %116 {offsets = [32, 0], sizes = [16, 64], strides = [1, 1]} : vector<48x64xf32> to vector<16x64xf32>
    %122 = arith.truncf %121 : vector<16x64xf32> to vector<16x64xbf16>
    %c0_73 = arith.constant 0 : index
    %c0_74 = arith.constant 0 : index
    %123 = vector.load %arg7[%c0_73, %c0_74] : memref<1x64xf32, #tpu.memory_space<vmem>>, vector<1x64xf32>
    %c0_75 = arith.constant 0 : index
    %c0_76 = arith.constant 0 : index
    %c0_77 = arith.constant 0 : index
    %124 = vector.load %arg2[%c0_75, %c0_76, %c0_77] : memref<3x64x64xbf16, #tpu.memory_space<vmem>>, vector<1x64x64xbf16>
    %125 = vector.shape_cast %124 : vector<1x64x64xbf16> to vector<64x64xbf16>
    %cst_78 = arith.constant dense<0.000000e+00> : vector<16x64xf32>
    %126 = tpu.matmul %118, %125, %cst_78 {dimension_numbers = #tpu.dot_dimension_numbers<[1], [0], [0], [1], [0, 0, 1, 1], [], []>} : vector<16x64xbf16>, vector<64x64xbf16>, vector<16x64xf32> -> vector<16x64xf32>
    %c1_79 = arith.constant 1 : index
    %c0_80 = arith.constant 0 : index
    %c0_81 = arith.constant 0 : index
    %127 = vector.load %arg2[%c1_79, %c0_80, %c0_81] : memref<3x64x64xbf16, #tpu.memory_space<vmem>>, vector<1x64x64xbf16>
    %128 = vector.shape_cast %127 : vector<1x64x64xbf16> to vector<64x64xbf16>
    %cst_82 = arith.constant dense<0.000000e+00> : vector<16x64xf32>
    %129 = tpu.matmul %120, %128, %cst_82 {dimension_numbers = #tpu.dot_dimension_numbers<[1], [0], [0], [1], [0, 0, 1, 1], [], []>} : vector<16x64xbf16>, vector<64x64xbf16>, vector<16x64xf32> -> vector<16x64xf32>
    %130 = arith.addf %126, %129 : vector<16x64xf32>
    %c2_83 = arith.constant 2 : index
    %c0_84 = arith.constant 0 : index
    %c0_85 = arith.constant 0 : index
    %131 = vector.load %arg2[%c2_83, %c0_84, %c0_85] : memref<3x64x64xbf16, #tpu.memory_space<vmem>>, vector<1x64x64xbf16>
    %132 = vector.shape_cast %131 : vector<1x64x64xbf16> to vector<64x64xbf16>
    %cst_86 = arith.constant dense<0.000000e+00> : vector<16x64xf32>
    %133 = tpu.matmul %122, %132, %cst_86 {dimension_numbers = #tpu.dot_dimension_numbers<[1], [0], [0], [1], [0, 0, 1, 1], [], []>} : vector<16x64xbf16>, vector<64x64xbf16>, vector<16x64xf32> -> vector<16x64xf32>
    %134 = arith.addf %130, %133 : vector<16x64xf32>
    %135 = vector.broadcast %123 : vector<1x64xf32> to vector<16x64xf32>
    %136 = arith.addf %134, %135 : vector<16x64xf32>
    %c0_87 = arith.constant 0 : index
    %c0_88 = arith.constant 0 : index
    %137 = vector.load %arg25[%c0_87, %c0_88] : memref<2x32xbf16, #tpu.memory_space<vmem>>, vector<2x32xbf16>
    %c0_89 = arith.constant 0 : index
    %c0_90 = arith.constant 0 : index
    %138 = vector.load %arg24[%c0_89, %c0_90] : memref<32x2xbf16, #tpu.memory_space<vmem>>, vector<32x2xbf16>
    %cst_91 = arith.constant 0.000000e+00 : f32
    %139 = vector.broadcast %cst_91 : f32 to vector<16x64xf32>
    %140 = arith.maximumf %136, %139 : vector<16x64xf32>
    %c0_92 = arith.constant 0 : index
    %c0_93 = arith.constant 0 : index
    %141 = vector.load %arg23[%c0_92, %c0_93] : memref<96x16xbf16, #tpu.memory_space<vmem>>, vector<96x16xbf16>
    %142 = arith.truncf %140 : vector<16x64xf32> to vector<16x64xbf16>
    %cst_94 = arith.constant dense<0.000000e+00> : vector<96x64xf32>
    %143 = tpu.matmul %141, %142, %cst_94 {dimension_numbers = #tpu.dot_dimension_numbers<[1], [0], [0], [1], [0, 0, 1, 1], [], []>} : vector<96x16xbf16>, vector<16x64xbf16>, vector<96x64xf32> -> vector<96x64xf32>
    %144 = vector.extract_strided_slice %143 {offsets = [0, 0], sizes = [32, 64], strides = [1, 1]} : vector<96x64xf32> to vector<32x64xf32>
    %145 = arith.truncf %144 : vector<32x64xf32> to vector<32x64xbf16>
    %146 = vector.extract_strided_slice %143 {offsets = [32, 0], sizes = [32, 64], strides = [1, 1]} : vector<96x64xf32> to vector<32x64xf32>
    %147 = arith.truncf %146 : vector<32x64xf32> to vector<32x64xbf16>
    %148 = vector.extract_strided_slice %143 {offsets = [64, 0], sizes = [32, 64], strides = [1, 1]} : vector<96x64xf32> to vector<32x64xf32>
    %149 = arith.truncf %148 : vector<32x64xf32> to vector<32x64xbf16>
    %c0_95 = arith.constant 0 : index
    %c0_96 = arith.constant 0 : index
    %150 = vector.load %arg45[%c0_95, %c0_96] : memref<32x128xf32, #tpu.memory_space<vmem>>, vector<32x128xf32>
    %c0_97 = arith.constant 0 : index
    %c0_98 = arith.constant 0 : index
    %c0_99 = arith.constant 0 : index
    %151 = vector.load %arg39[%c0_97, %c0_98, %c0_99] : memref<3x64x128xbf16, #tpu.memory_space<vmem>>, vector<1x64x128xbf16>
    %152 = vector.shape_cast %151 : vector<1x64x128xbf16> to vector<64x128xbf16>
    %cst_100 = arith.constant dense<0.000000e+00> : vector<32x128xf32>
    %153 = tpu.matmul %145, %152, %cst_100 {dimension_numbers = #tpu.dot_dimension_numbers<[1], [0], [0], [1], [0, 0, 1, 1], [], []>} : vector<32x64xbf16>, vector<64x128xbf16>, vector<32x128xf32> -> vector<32x128xf32>
    %c1_101 = arith.constant 1 : index
    %c0_102 = arith.constant 0 : index
    %c0_103 = arith.constant 0 : index
    %154 = vector.load %arg39[%c1_101, %c0_102, %c0_103] : memref<3x64x128xbf16, #tpu.memory_space<vmem>>, vector<1x64x128xbf16>
    %155 = vector.shape_cast %154 : vector<1x64x128xbf16> to vector<64x128xbf16>
    %cst_104 = arith.constant dense<0.000000e+00> : vector<32x128xf32>
    %156 = tpu.matmul %147, %155, %cst_104 {dimension_numbers = #tpu.dot_dimension_numbers<[1], [0], [0], [1], [0, 0, 1, 1], [], []>} : vector<32x64xbf16>, vector<64x128xbf16>, vector<32x128xf32> -> vector<32x128xf32>
    %157 = arith.addf %153, %156 : vector<32x128xf32>
    %c2_105 = arith.constant 2 : index
    %c0_106 = arith.constant 0 : index
    %c0_107 = arith.constant 0 : index
    %158 = vector.load %arg39[%c2_105, %c0_106, %c0_107] : memref<3x64x128xbf16, #tpu.memory_space<vmem>>, vector<1x64x128xbf16>
    %159 = vector.shape_cast %158 : vector<1x64x128xbf16> to vector<64x128xbf16>
    %cst_108 = arith.constant dense<0.000000e+00> : vector<32x128xf32>
    %160 = tpu.matmul %149, %159, %cst_108 {dimension_numbers = #tpu.dot_dimension_numbers<[1], [0], [0], [1], [0, 0, 1, 1], [], []>} : vector<32x64xbf16>, vector<64x128xbf16>, vector<32x128xf32> -> vector<32x128xf32>
    %161 = arith.addf %157, %160 : vector<32x128xf32>
    %162 = arith.addf %161, %150 : vector<32x128xf32>
    %cst_109 = arith.constant 0.000000e+00 : f32
    %163 = vector.broadcast %cst_109 : f32 to vector<32x128xf32>
    %164 = arith.maximumf %162, %163 : vector<32x128xf32>
    %cst_110 = arith.constant 0.000000e+00 : f32
    %165 = vector.broadcast %cst_110 : f32 to vector<32x128xf32>
    %166 = arith.maximumf %41, %165 : vector<32x128xf32>
    %167 = arith.truncf %164 : vector<32x128xf32> to vector<32x128xbf16>
    %cst_111 = arith.constant dense<0.000000e+00> : vector<2x128xf32>
    %168 = tpu.matmul %137, %167, %cst_111 {dimension_numbers = #tpu.dot_dimension_numbers<[1], [0], [0], [1], [0, 0, 1, 1], [], []>} : vector<2x32xbf16>, vector<32x128xbf16>, vector<2x128xf32> -> vector<2x128xf32>
    %169 = arith.truncf %168 : vector<2x128xf32> to vector<2x128xbf16>
    %c0_112 = arith.constant 0 : index
    %c0_113 = arith.constant 0 : index
    %c0_114 = arith.constant 0 : index
    %170 = vector.load %arg41[%c0_112, %c0_113, %c0_114] : memref<2x128x16xbf16, #tpu.memory_space<vmem>>, vector<1x128x16xbf16>
    %171 = vector.shape_cast %170 : vector<1x128x16xbf16> to vector<128x16xbf16>
    %cst_115 = arith.constant dense<0.000000e+00> : vector<2x16xf32>
    %172 = tpu.matmul %169, %171, %cst_115 {dimension_numbers = #tpu.dot_dimension_numbers<[1], [0], [0], [1], [0, 0, 1, 1], [], []>} : vector<2x128xbf16>, vector<128x16xbf16>, vector<2x16xf32> -> vector<2x16xf32>
    %173 = arith.truncf %166 : vector<32x128xf32> to vector<32x128xbf16>
    %cst_116 = arith.constant dense<0.000000e+00> : vector<2x128xf32>
    %174 = tpu.matmul %137, %173, %cst_116 {dimension_numbers = #tpu.dot_dimension_numbers<[1], [0], [0], [1], [0, 0, 1, 1], [], []>} : vector<2x32xbf16>, vector<32x128xbf16>, vector<2x128xf32> -> vector<2x128xf32>
    %175 = arith.truncf %174 : vector<2x128xf32> to vector<2x128xbf16>
    %c1_117 = arith.constant 1 : index
    %c0_118 = arith.constant 0 : index
    %c0_119 = arith.constant 0 : index
    %176 = vector.load %arg41[%c1_117, %c0_118, %c0_119] : memref<2x128x16xbf16, #tpu.memory_space<vmem>>, vector<1x128x16xbf16>
    %177 = vector.shape_cast %176 : vector<1x128x16xbf16> to vector<128x16xbf16>
    %cst_120 = arith.constant dense<0.000000e+00> : vector<2x16xf32>
    %178 = tpu.matmul %175, %177, %cst_120 {dimension_numbers = #tpu.dot_dimension_numbers<[1], [0], [0], [1], [0, 0, 1, 1], [], []>} : vector<2x128xbf16>, vector<128x16xbf16>, vector<2x16xf32> -> vector<2x16xf32>
    %179 = arith.addf %172, %178 : vector<2x16xf32>
    %cst_121 = arith.constant 0.000000e+00 : f32
    %180 = vector.broadcast %cst_121 : f32 to vector<2x16xf32>
    %181 = arith.subf %180, %179 : vector<2x16xf32>
    %182 = math.exp %181 : vector<2x16xf32>
    %cst_122 = arith.constant 1.000000e+00 : f32
    %183 = vector.broadcast %cst_122 : f32 to vector<2x16xf32>
    %184 = arith.addf %183, %182 : vector<2x16xf32>
    %cst_123 = arith.constant 1.000000e+00 : f32
    %185 = vector.broadcast %cst_123 : f32 to vector<2x16xf32>
    %186 = arith.divf %185, %184 : vector<2x16xf32>
    %187 = arith.truncf %186 : vector<2x16xf32> to vector<2x16xbf16>
    %c0_124 = arith.constant 0 : index
    %c0_125 = arith.constant 0 : index
    %c0_126 = arith.constant 0 : index
    %188 = vector.load %arg40[%c0_124, %c0_125, %c0_126] : memref<2x16x128xbf16, #tpu.memory_space<vmem>>, vector<1x16x128xbf16>
    %189 = vector.shape_cast %188 : vector<1x16x128xbf16> to vector<16x128xbf16>
    %cst_127 = arith.constant dense<0.000000e+00> : vector<2x128xf32>
    %190 = tpu.matmul %187, %189, %cst_127 {dimension_numbers = #tpu.dot_dimension_numbers<[1], [0], [0], [1], [0, 0, 1, 1], [], []>} : vector<2x16xbf16>, vector<16x128xbf16>, vector<2x128xf32> -> vector<2x128xf32>
    %191 = arith.truncf %190 : vector<2x128xf32> to vector<2x128xbf16>
    %cst_128 = arith.constant dense<0.000000e+00> : vector<32x128xf32>
    %192 = tpu.matmul %138, %191, %cst_128 {dimension_numbers = #tpu.dot_dimension_numbers<[1], [0], [0], [1], [0, 0, 1, 1], [], []>} : vector<32x2xbf16>, vector<2x128xbf16>, vector<32x128xf32> -> vector<32x128xf32>
    %193 = arith.mulf %164, %192 : vector<32x128xf32>
    %c0_129 = arith.constant 0 : index
    %c0_130 = arith.constant 0 : index
    %194 = vector.load %arg21[%c0_129, %c0_130] : memref<96x32xbf16, #tpu.memory_space<vmem>>, vector<96x32xbf16>
    %195 = arith.truncf %193 : vector<32x128xf32> to vector<32x128xbf16>
    %cst_131 = arith.constant dense<0.000000e+00> : vector<96x128xf32>
    %196 = tpu.matmul %194, %195, %cst_131 {dimension_numbers = #tpu.dot_dimension_numbers<[1], [0], [0], [1], [0, 0, 1, 1], [], []>} : vector<96x32xbf16>, vector<32x128xbf16>, vector<96x128xf32> -> vector<96x128xf32>
    %197 = vector.extract_strided_slice %196 {offsets = [0, 0], sizes = [32, 128], strides = [1, 1]} : vector<96x128xf32> to vector<32x128xf32>
    %198 = arith.truncf %197 : vector<32x128xf32> to vector<32x128xbf16>
    %199 = vector.extract_strided_slice %196 {offsets = [32, 0], sizes = [32, 128], strides = [1, 1]} : vector<96x128xf32> to vector<32x128xf32>
    %200 = arith.truncf %199 : vector<32x128xf32> to vector<32x128xbf16>
    %201 = vector.extract_strided_slice %196 {offsets = [64, 0], sizes = [32, 128], strides = [1, 1]} : vector<96x128xf32> to vector<32x128xf32>
    %202 = arith.truncf %201 : vector<32x128xf32> to vector<32x128xbf16>
    %c1_132 = arith.constant 1 : index
    %c0_133 = arith.constant 0 : index
    %c0_134 = arith.constant 0 : index
    %203 = vector.load %arg40[%c1_132, %c0_133, %c0_134] : memref<2x16x128xbf16, #tpu.memory_space<vmem>>, vector<1x16x128xbf16>
    %204 = vector.shape_cast %203 : vector<1x16x128xbf16> to vector<16x128xbf16>
    %cst_135 = arith.constant dense<0.000000e+00> : vector<2x128xf32>
    %205 = tpu.matmul %187, %204, %cst_135 {dimension_numbers = #tpu.dot_dimension_numbers<[1], [0], [0], [1], [0, 0, 1, 1], [], []>} : vector<2x16xbf16>, vector<16x128xbf16>, vector<2x128xf32> -> vector<2x128xf32>
    %206 = arith.truncf %205 : vector<2x128xf32> to vector<2x128xbf16>
    %cst_136 = arith.constant dense<0.000000e+00> : vector<32x128xf32>
    %207 = tpu.matmul %138, %206, %cst_136 {dimension_numbers = #tpu.dot_dimension_numbers<[1], [0], [0], [1], [0, 0, 1, 1], [], []>} : vector<32x2xbf16>, vector<2x128xbf16>, vector<32x128xf32> -> vector<32x128xf32>
    %208 = arith.mulf %166, %207 : vector<32x128xf32>
    %c0_137 = arith.constant 0 : index
    %c0_138 = arith.constant 0 : index
    %209 = vector.load %arg21[%c0_137, %c0_138] : memref<96x32xbf16, #tpu.memory_space<vmem>>, vector<96x32xbf16>
    %210 = arith.truncf %208 : vector<32x128xf32> to vector<32x128xbf16>
    %cst_139 = arith.constant dense<0.000000e+00> : vector<96x128xf32>
    %211 = tpu.matmul %209, %210, %cst_139 {dimension_numbers = #tpu.dot_dimension_numbers<[1], [0], [0], [1], [0, 0, 1, 1], [], []>} : vector<96x32xbf16>, vector<32x128xbf16>, vector<96x128xf32> -> vector<96x128xf32>
    %212 = vector.extract_strided_slice %211 {offsets = [0, 0], sizes = [32, 128], strides = [1, 1]} : vector<96x128xf32> to vector<32x128xf32>
    %213 = arith.truncf %212 : vector<32x128xf32> to vector<32x128xbf16>
    %214 = vector.extract_strided_slice %211 {offsets = [32, 0], sizes = [32, 128], strides = [1, 1]} : vector<96x128xf32> to vector<32x128xf32>
    %215 = arith.truncf %214 : vector<32x128xf32> to vector<32x128xbf16>
    %216 = vector.extract_strided_slice %211 {offsets = [64, 0], sizes = [32, 128], strides = [1, 1]} : vector<96x128xf32> to vector<32x128xf32>
    %217 = arith.truncf %216 : vector<32x128xf32> to vector<32x128xbf16>
    %c0_140 = arith.constant 0 : index
    %c0_141 = arith.constant 0 : index
    %218 = vector.load %arg43[%c0_140, %c0_141] : memref<1x128xf32, #tpu.memory_space<vmem>>, vector<1x128xf32>
    %219 = tpu.concatenate %198, %200, %202, %213, %215, %217 in 1 : vector<32x128xbf16>, vector<32x128xbf16>, vector<32x128xbf16>, vector<32x128xbf16>, vector<32x128xbf16>, vector<32x128xbf16> -> vector<32x768xbf16>
    %c0_142 = arith.constant 0 : index
    %c0_143 = arith.constant 0 : index
    %c0_144 = arith.constant 0 : index
    %220 = vector.load %arg37[%c0_142, %c0_143, %c0_144] : memref<6x128x128xbf16, #tpu.memory_space<vmem>>, vector<6x128x128xbf16>
    %221 = vector.shape_cast %220 : vector<6x128x128xbf16> to vector<768x128xbf16>
    %cst_145 = arith.constant dense<0.000000e+00> : vector<32x128xf32>
    %222 = tpu.matmul %219, %221, %cst_145 {dimension_numbers = #tpu.dot_dimension_numbers<[1], [0], [0], [1], [0, 0, 1, 1], [], []>} : vector<32x768xbf16>, vector<768x128xbf16>, vector<32x128xf32> -> vector<32x128xf32>
    %223 = vector.broadcast %218 : vector<1x128xf32> to vector<32x128xf32>
    %224 = arith.addf %222, %223 : vector<32x128xf32>
    %cst_146 = arith.constant 0.000000e+00 : f32
    %225 = vector.broadcast %cst_146 : f32 to vector<32x128xf32>
    %226 = arith.maximumf %224, %225 : vector<32x128xf32>
    %c0_147 = arith.constant 0 : index
    %c0_148 = arith.constant 0 : index
    %227 = vector.load %arg25[%c0_147, %c0_148] : memref<2x32xbf16, #tpu.memory_space<vmem>>, vector<2x32xbf16>
    %228 = arith.truncf %226 : vector<32x128xf32> to vector<32x128xbf16>
    %cst_149 = arith.constant dense<0.000000e+00> : vector<2x128xf32>
    %229 = tpu.matmul %227, %228, %cst_149 {dimension_numbers = #tpu.dot_dimension_numbers<[1], [0], [0], [1], [0, 0, 1, 1], [], []>} : vector<2x32xbf16>, vector<32x128xbf16>, vector<2x128xf32> -> vector<2x128xf32>
    %230 = arith.truncf %229 : vector<2x128xf32> to vector<2x128xbf16>
    %c0_150 = arith.constant 0 : index
    %c0_151 = arith.constant 0 : index
    %231 = vector.load %arg42[%c0_150, %c0_151] : memref<128x128xbf16, #tpu.memory_space<vmem>>, vector<128x128xbf16>
    %cst_152 = arith.constant dense<0.000000e+00> : vector<2x128xf32>
    %232 = tpu.matmul %230, %231, %cst_152 {dimension_numbers = #tpu.dot_dimension_numbers<[1], [0], [0], [1], [0, 0, 1, 1], [], []>} : vector<2x128xbf16>, vector<128x128xbf16>, vector<2x128xf32> -> vector<2x128xf32>
    %c0_153 = arith.constant 0 : index
    %c0_154 = arith.constant 0 : index
    %233 = vector.load %arg24[%c0_153, %c0_154] : memref<32x2xbf16, #tpu.memory_space<vmem>>, vector<32x2xbf16>
    %cst_155 = arith.constant 0.000000e+00 : f32
    %234 = vector.broadcast %cst_155 : f32 to vector<2x128xf32>
    %235 = arith.subf %234, %232 : vector<2x128xf32>
    %236 = math.exp %235 : vector<2x128xf32>
    %cst_156 = arith.constant 1.000000e+00 : f32
    %237 = vector.broadcast %cst_156 : f32 to vector<2x128xf32>
    %238 = arith.addf %237, %236 : vector<2x128xf32>
    %cst_157 = arith.constant 1.000000e+00 : f32
    %239 = vector.broadcast %cst_157 : f32 to vector<2x128xf32>
    %240 = arith.divf %239, %238 : vector<2x128xf32>
    %241 = arith.truncf %240 : vector<2x128xf32> to vector<2x128xbf16>
    %cst_158 = arith.constant dense<0.000000e+00> : vector<32x128xf32>
    %242 = tpu.matmul %233, %241, %cst_158 {dimension_numbers = #tpu.dot_dimension_numbers<[1], [0], [0], [1], [0, 0, 1, 1], [], []>} : vector<32x2xbf16>, vector<2x128xbf16>, vector<32x128xf32> -> vector<32x128xf32>
    %243 = arith.mulf %226, %242 : vector<32x128xf32>
    %c0_159 = arith.constant 0 : index
    %c0_160 = arith.constant 0 : index
    %244 = vector.load %arg21[%c0_159, %c0_160] : memref<96x32xbf16, #tpu.memory_space<vmem>>, vector<96x32xbf16>
    %245 = arith.truncf %243 : vector<32x128xf32> to vector<32x128xbf16>
    %cst_161 = arith.constant dense<0.000000e+00> : vector<96x128xf32>
    %246 = tpu.matmul %244, %245, %cst_161 {dimension_numbers = #tpu.dot_dimension_numbers<[1], [0], [0], [1], [0, 0, 1, 1], [], []>} : vector<96x32xbf16>, vector<32x128xbf16>, vector<96x128xf32> -> vector<96x128xf32>
    %247 = vector.extract_strided_slice %246 {offsets = [0, 0], sizes = [32, 128], strides = [1, 1]} : vector<96x128xf32> to vector<32x128xf32>
    %248 = arith.truncf %247 : vector<32x128xf32> to vector<32x128xbf16>
    %249 = vector.extract_strided_slice %246 {offsets = [32, 0], sizes = [32, 128], strides = [1, 1]} : vector<96x128xf32> to vector<32x128xf32>
    %250 = arith.truncf %249 : vector<32x128xf32> to vector<32x128xbf16>
    %251 = vector.extract_strided_slice %246 {offsets = [64, 0], sizes = [32, 128], strides = [1, 1]} : vector<96x128xf32> to vector<32x128xf32>
    %252 = arith.truncf %251 : vector<32x128xf32> to vector<32x128xbf16>
    %c0_162 = arith.constant 0 : index
    %c0_163 = arith.constant 0 : index
    %253 = vector.load %arg44[%c0_162, %c0_163] : memref<1x128xf32, #tpu.memory_space<vmem>>, vector<1x128xf32>
    %254 = tpu.concatenate %248, %250, %252 in 1 : vector<32x128xbf16>, vector<32x128xbf16>, vector<32x128xbf16> -> vector<32x384xbf16>
    %c0_164 = arith.constant 0 : index
    %c0_165 = arith.constant 0 : index
    %c0_166 = arith.constant 0 : index
    %255 = vector.load %arg38[%c0_164, %c0_165, %c0_166] : memref<3x128x128xbf16, #tpu.memory_space<vmem>>, vector<3x128x128xbf16>
    %256 = vector.shape_cast %255 : vector<3x128x128xbf16> to vector<384x128xbf16>
    %cst_167 = arith.constant dense<0.000000e+00> : vector<32x128xf32>
    %257 = tpu.matmul %254, %256, %cst_167 {dimension_numbers = #tpu.dot_dimension_numbers<[1], [0], [0], [1], [0, 0, 1, 1], [], []>} : vector<32x384xbf16>, vector<384x128xbf16>, vector<32x128xf32> -> vector<32x128xf32>
    %258 = vector.broadcast %253 : vector<1x128xf32> to vector<32x128xf32>
    %259 = arith.addf %257, %258 : vector<32x128xf32>
    %cst_168 = arith.constant 0.000000e+00 : f32
    %260 = vector.broadcast %cst_168 : f32 to vector<16x64xf32>
    %261 = arith.maximumf %136, %260 : vector<16x64xf32>
    %c0_169 = arith.constant 0 : index
    %c0_170 = arith.constant 0 : index
    %262 = vector.load %arg30[%c0_169, %c0_170] : memref<2x16xbf16, #tpu.memory_space<vmem>>, vector<2x16xbf16>
    %263 = arith.truncf %261 : vector<16x64xf32> to vector<16x64xbf16>
    %cst_171 = arith.constant dense<0.000000e+00> : vector<2x64xf32>
    %264 = tpu.matmul %262, %263, %cst_171 {dimension_numbers = #tpu.dot_dimension_numbers<[1], [0], [0], [1], [0, 0, 1, 1], [], []>} : vector<2x16xbf16>, vector<16x64xbf16>, vector<2x64xf32> -> vector<2x64xf32>
    %265 = arith.truncf %264 : vector<2x64xf32> to vector<2x64xbf16>
    %c0_172 = arith.constant 0 : index
    %c0_173 = arith.constant 0 : index
    %266 = vector.load %arg12[%c0_172, %c0_173] : memref<64x64xbf16, #tpu.memory_space<vmem>>, vector<64x64xbf16>
    %cst_174 = arith.constant dense<0.000000e+00> : vector<2x64xf32>
    %267 = tpu.matmul %265, %266, %cst_174 {dimension_numbers = #tpu.dot_dimension_numbers<[1], [0], [0], [1], [0, 0, 1, 1], [], []>} : vector<2x64xbf16>, vector<64x64xbf16>, vector<2x64xf32> -> vector<2x64xf32>
    %c0_175 = arith.constant 0 : index
    %c0_176 = arith.constant 0 : index
    %268 = vector.load %arg29[%c0_175, %c0_176] : memref<16x2xbf16, #tpu.memory_space<vmem>>, vector<16x2xbf16>
    %cst_177 = arith.constant 0.000000e+00 : f32
    %269 = vector.broadcast %cst_177 : f32 to vector<2x64xf32>
    %270 = arith.subf %269, %267 : vector<2x64xf32>
    %271 = math.exp %270 : vector<2x64xf32>
    %cst_178 = arith.constant 1.000000e+00 : f32
    %272 = vector.broadcast %cst_178 : f32 to vector<2x64xf32>
    %273 = arith.addf %272, %271 : vector<2x64xf32>
    %cst_179 = arith.constant 1.000000e+00 : f32
    %274 = vector.broadcast %cst_179 : f32 to vector<2x64xf32>
    %275 = arith.divf %274, %273 : vector<2x64xf32>
    %276 = arith.truncf %275 : vector<2x64xf32> to vector<2x64xbf16>
    %cst_180 = arith.constant dense<0.000000e+00> : vector<16x64xf32>
    %277 = tpu.matmul %268, %276, %cst_180 {dimension_numbers = #tpu.dot_dimension_numbers<[1], [0], [0], [1], [0, 0, 1, 1], [], []>} : vector<16x2xbf16>, vector<2x64xbf16>, vector<16x64xf32> -> vector<16x64xf32>
    %278 = arith.mulf %261, %277 : vector<16x64xf32>
    %c0_181 = arith.constant 0 : index
    %c0_182 = arith.constant 0 : index
    %279 = vector.load %arg26[%c0_181, %c0_182] : memref<48x16xbf16, #tpu.memory_space<vmem>>, vector<48x16xbf16>
    %280 = arith.truncf %278 : vector<16x64xf32> to vector<16x64xbf16>
    %cst_183 = arith.constant dense<0.000000e+00> : vector<48x64xf32>
    %281 = tpu.matmul %279, %280, %cst_183 {dimension_numbers = #tpu.dot_dimension_numbers<[1], [0], [0], [1], [0, 0, 1, 1], [], []>} : vector<48x16xbf16>, vector<16x64xbf16>, vector<48x64xf32> -> vector<48x64xf32>
    %282 = vector.extract_strided_slice %281 {offsets = [0, 0], sizes = [16, 64], strides = [1, 1]} : vector<48x64xf32> to vector<16x64xf32>
    %283 = arith.truncf %282 : vector<16x64xf32> to vector<16x64xbf16>
    %284 = vector.extract_strided_slice %281 {offsets = [16, 0], sizes = [16, 64], strides = [1, 1]} : vector<48x64xf32> to vector<16x64xf32>
    %285 = arith.truncf %284 : vector<16x64xf32> to vector<16x64xbf16>
    %286 = vector.extract_strided_slice %281 {offsets = [32, 0], sizes = [16, 64], strides = [1, 1]} : vector<48x64xf32> to vector<16x64xf32>
    %287 = arith.truncf %286 : vector<16x64xf32> to vector<16x64xbf16>
    %c0_184 = arith.constant 0 : index
    %c0_185 = arith.constant 0 : index
    %288 = vector.load %arg14[%c0_184, %c0_185] : memref<1x64xf32, #tpu.memory_space<vmem>>, vector<1x64xf32>
    %c0_186 = arith.constant 0 : index
    %c0_187 = arith.constant 0 : index
    %c0_188 = arith.constant 0 : index
    %289 = vector.load %arg9[%c0_186, %c0_187, %c0_188] : memref<3x64x64xbf16, #tpu.memory_space<vmem>>, vector<1x64x64xbf16>
    %290 = vector.shape_cast %289 : vector<1x64x64xbf16> to vector<64x64xbf16>
    %cst_189 = arith.constant dense<0.000000e+00> : vector<16x64xf32>
    %291 = tpu.matmul %283, %290, %cst_189 {dimension_numbers = #tpu.dot_dimension_numbers<[1], [0], [0], [1], [0, 0, 1, 1], [], []>} : vector<16x64xbf16>, vector<64x64xbf16>, vector<16x64xf32> -> vector<16x64xf32>
    %c1_190 = arith.constant 1 : index
    %c0_191 = arith.constant 0 : index
    %c0_192 = arith.constant 0 : index
    %292 = vector.load %arg9[%c1_190, %c0_191, %c0_192] : memref<3x64x64xbf16, #tpu.memory_space<vmem>>, vector<1x64x64xbf16>
    %293 = vector.shape_cast %292 : vector<1x64x64xbf16> to vector<64x64xbf16>
    %cst_193 = arith.constant dense<0.000000e+00> : vector<16x64xf32>
    %294 = tpu.matmul %285, %293, %cst_193 {dimension_numbers = #tpu.dot_dimension_numbers<[1], [0], [0], [1], [0, 0, 1, 1], [], []>} : vector<16x64xbf16>, vector<64x64xbf16>, vector<16x64xf32> -> vector<16x64xf32>
    %295 = arith.addf %291, %294 : vector<16x64xf32>
    %c2_194 = arith.constant 2 : index
    %c0_195 = arith.constant 0 : index
    %c0_196 = arith.constant 0 : index
    %296 = vector.load %arg9[%c2_194, %c0_195, %c0_196] : memref<3x64x64xbf16, #tpu.memory_space<vmem>>, vector<1x64x64xbf16>
    %297 = vector.shape_cast %296 : vector<1x64x64xbf16> to vector<64x64xbf16>
    %cst_197 = arith.constant dense<0.000000e+00> : vector<16x64xf32>
    %298 = tpu.matmul %287, %297, %cst_197 {dimension_numbers = #tpu.dot_dimension_numbers<[1], [0], [0], [1], [0, 0, 1, 1], [], []>} : vector<16x64xbf16>, vector<64x64xbf16>, vector<16x64xf32> -> vector<16x64xf32>
    %299 = arith.addf %295, %298 : vector<16x64xf32>
    %300 = vector.broadcast %288 : vector<1x64xf32> to vector<16x64xf32>
    %301 = arith.addf %299, %300 : vector<16x64xf32>
    %cst_198 = arith.constant 0.000000e+00 : f32
    %302 = vector.broadcast %cst_198 : f32 to vector<16x64xf32>
    %303 = arith.maximumf %301, %302 : vector<16x64xf32>
    %c0_199 = arith.constant 0 : index
    %c0_200 = arith.constant 0 : index
    %304 = vector.load %arg27[%c0_199, %c0_200] : memref<24x16xbf16, #tpu.memory_space<vmem>>, vector<24x16xbf16>
    %305 = arith.truncf %303 : vector<16x64xf32> to vector<16x64xbf16>
    %cst_201 = arith.constant dense<0.000000e+00> : vector<24x64xf32>
    %306 = tpu.matmul %304, %305, %cst_201 {dimension_numbers = #tpu.dot_dimension_numbers<[1], [0], [0], [1], [0, 0, 1, 1], [], []>} : vector<24x16xbf16>, vector<16x64xbf16>, vector<24x64xf32> -> vector<24x64xf32>
    %307 = vector.extract_strided_slice %306 {offsets = [0, 0], sizes = [8, 64], strides = [1, 1]} : vector<24x64xf32> to vector<8x64xf32>
    %308 = arith.truncf %307 : vector<8x64xf32> to vector<8x64xbf16>
    %309 = vector.extract_strided_slice %306 {offsets = [8, 0], sizes = [8, 64], strides = [1, 1]} : vector<24x64xf32> to vector<8x64xf32>
    %310 = arith.truncf %309 : vector<8x64xf32> to vector<8x64xbf16>
    %311 = vector.extract_strided_slice %306 {offsets = [16, 0], sizes = [8, 64], strides = [1, 1]} : vector<24x64xf32> to vector<8x64xf32>
    %312 = arith.truncf %311 : vector<8x64xf32> to vector<8x64xbf16>
    %c0_202 = arith.constant 0 : index
    %c0_203 = arith.constant 0 : index
    %313 = vector.load %arg16[%c0_202, %c0_203] : memref<1x32xf32, #tpu.memory_space<vmem>>, vector<1x32xf32>
    %c0_204 = arith.constant 0 : index
    %c0_205 = arith.constant 0 : index
    %c0_206 = arith.constant 0 : index
    %314 = vector.load %arg11[%c0_204, %c0_205, %c0_206] : memref<3x64x32xbf16, #tpu.memory_space<vmem>>, vector<1x64x32xbf16>
    %315 = vector.shape_cast %314 : vector<1x64x32xbf16> to vector<64x32xbf16>
    %cst_207 = arith.constant dense<0.000000e+00> : vector<8x32xf32>
    %316 = tpu.matmul %308, %315, %cst_207 {dimension_numbers = #tpu.dot_dimension_numbers<[1], [0], [0], [1], [0, 0, 1, 1], [], []>} : vector<8x64xbf16>, vector<64x32xbf16>, vector<8x32xf32> -> vector<8x32xf32>
    %c1_208 = arith.constant 1 : index
    %c0_209 = arith.constant 0 : index
    %c0_210 = arith.constant 0 : index
    %317 = vector.load %arg11[%c1_208, %c0_209, %c0_210] : memref<3x64x32xbf16, #tpu.memory_space<vmem>>, vector<1x64x32xbf16>
    %318 = vector.shape_cast %317 : vector<1x64x32xbf16> to vector<64x32xbf16>
    %cst_211 = arith.constant dense<0.000000e+00> : vector<8x32xf32>
    %319 = tpu.matmul %310, %318, %cst_211 {dimension_numbers = #tpu.dot_dimension_numbers<[1], [0], [0], [1], [0, 0, 1, 1], [], []>} : vector<8x64xbf16>, vector<64x32xbf16>, vector<8x32xf32> -> vector<8x32xf32>
    %320 = arith.addf %316, %319 : vector<8x32xf32>
    %c2_212 = arith.constant 2 : index
    %c0_213 = arith.constant 0 : index
    %c0_214 = arith.constant 0 : index
    %321 = vector.load %arg11[%c2_212, %c0_213, %c0_214] : memref<3x64x32xbf16, #tpu.memory_space<vmem>>, vector<1x64x32xbf16>
    %322 = vector.shape_cast %321 : vector<1x64x32xbf16> to vector<64x32xbf16>
    %cst_215 = arith.constant dense<0.000000e+00> : vector<8x32xf32>
    %323 = tpu.matmul %312, %322, %cst_215 {dimension_numbers = #tpu.dot_dimension_numbers<[1], [0], [0], [1], [0, 0, 1, 1], [], []>} : vector<8x64xbf16>, vector<64x32xbf16>, vector<8x32xf32> -> vector<8x32xf32>
    %324 = arith.addf %320, %323 : vector<8x32xf32>
    %325 = vector.broadcast %313 : vector<1x32xf32> to vector<8x32xf32>
    %326 = arith.addf %324, %325 : vector<8x32xf32>
    %cst_216 = arith.constant 0.000000e+00 : f32
    %327 = vector.broadcast %cst_216 : f32 to vector<8x32xf32>
    %328 = arith.maximumf %326, %327 : vector<8x32xf32>
    %c0_217 = arith.constant 0 : index
    %c0_218 = arith.constant 0 : index
    %329 = vector.load %arg33[%c0_217, %c0_218] : memref<2x8xbf16, #tpu.memory_space<vmem>>, vector<2x8xbf16>
    %330 = arith.truncf %328 : vector<8x32xf32> to vector<8x32xbf16>
    %cst_219 = arith.constant dense<0.000000e+00> : vector<2x32xf32>
    %331 = tpu.matmul %329, %330, %cst_219 {dimension_numbers = #tpu.dot_dimension_numbers<[1], [0], [0], [1], [0, 0, 1, 1], [], []>} : vector<2x8xbf16>, vector<8x32xbf16>, vector<2x32xf32> -> vector<2x32xf32>
    %332 = arith.truncf %331 : vector<2x32xf32> to vector<2x32xbf16>
    %c0_220 = arith.constant 0 : index
    %c0_221 = arith.constant 0 : index
    %333 = vector.load %arg13[%c0_220, %c0_221] : memref<32x32xbf16, #tpu.memory_space<vmem>>, vector<32x32xbf16>
    %cst_222 = arith.constant dense<0.000000e+00> : vector<2x32xf32>
    %334 = tpu.matmul %332, %333, %cst_222 {dimension_numbers = #tpu.dot_dimension_numbers<[1], [0], [0], [1], [0, 0, 1, 1], [], []>} : vector<2x32xbf16>, vector<32x32xbf16>, vector<2x32xf32> -> vector<2x32xf32>
    %c0_223 = arith.constant 0 : index
    %c0_224 = arith.constant 0 : index
    %335 = vector.load %arg32[%c0_223, %c0_224] : memref<8x2xbf16, #tpu.memory_space<vmem>>, vector<8x2xbf16>
    %cst_225 = arith.constant 0.000000e+00 : f32
    %336 = vector.broadcast %cst_225 : f32 to vector<2x32xf32>
    %337 = arith.subf %336, %334 : vector<2x32xf32>
    %338 = math.exp %337 : vector<2x32xf32>
    %cst_226 = arith.constant 1.000000e+00 : f32
    %339 = vector.broadcast %cst_226 : f32 to vector<2x32xf32>
    %340 = arith.addf %339, %338 : vector<2x32xf32>
    %cst_227 = arith.constant 1.000000e+00 : f32
    %341 = vector.broadcast %cst_227 : f32 to vector<2x32xf32>
    %342 = arith.divf %341, %340 : vector<2x32xf32>
    %343 = arith.truncf %342 : vector<2x32xf32> to vector<2x32xbf16>
    %cst_228 = arith.constant dense<0.000000e+00> : vector<8x32xf32>
    %344 = tpu.matmul %335, %343, %cst_228 {dimension_numbers = #tpu.dot_dimension_numbers<[1], [0], [0], [1], [0, 0, 1, 1], [], []>} : vector<8x2xbf16>, vector<2x32xbf16>, vector<8x32xf32> -> vector<8x32xf32>
    %345 = arith.mulf %328, %344 : vector<8x32xf32>
    %c0_229 = arith.constant 0 : index
    %c0_230 = arith.constant 0 : index
    %346 = vector.load %arg31[%c0_229, %c0_230] : memref<24x8xbf16, #tpu.memory_space<vmem>>, vector<24x8xbf16>
    %347 = arith.truncf %345 : vector<8x32xf32> to vector<8x32xbf16>
    %cst_231 = arith.constant dense<0.000000e+00> : vector<24x32xf32>
    %348 = tpu.matmul %346, %347, %cst_231 {dimension_numbers = #tpu.dot_dimension_numbers<[1], [0], [0], [1], [0, 0, 1, 1], [], []>} : vector<24x8xbf16>, vector<8x32xbf16>, vector<24x32xf32> -> vector<24x32xf32>
    %349 = vector.extract_strided_slice %348 {offsets = [0, 0], sizes = [8, 32], strides = [1, 1]} : vector<24x32xf32> to vector<8x32xf32>
    %350 = arith.truncf %349 : vector<8x32xf32> to vector<8x32xbf16>
    %351 = vector.extract_strided_slice %348 {offsets = [8, 0], sizes = [8, 32], strides = [1, 1]} : vector<24x32xf32> to vector<8x32xf32>
    %352 = arith.truncf %351 : vector<8x32xf32> to vector<8x32xbf16>
    %353 = vector.extract_strided_slice %348 {offsets = [16, 0], sizes = [8, 32], strides = [1, 1]} : vector<24x32xf32> to vector<8x32xf32>
    %354 = arith.truncf %353 : vector<8x32xf32> to vector<8x32xbf16>
    %c0_232 = arith.constant 0 : index
    %c0_233 = arith.constant 0 : index
    %355 = vector.load %arg15[%c0_232, %c0_233] : memref<1x32xf32, #tpu.memory_space<vmem>>, vector<1x32xf32>
    %c0_234 = arith.constant 0 : index
    %c0_235 = arith.constant 0 : index
    %c0_236 = arith.constant 0 : index
    %356 = vector.load %arg10[%c0_234, %c0_235, %c0_236] : memref<3x32x32xbf16, #tpu.memory_space<vmem>>, vector<1x32x32xbf16>
    %357 = vector.shape_cast %356 : vector<1x32x32xbf16> to vector<32x32xbf16>
    %cst_237 = arith.constant dense<0.000000e+00> : vector<8x32xf32>
    %358 = tpu.matmul %350, %357, %cst_237 {dimension_numbers = #tpu.dot_dimension_numbers<[1], [0], [0], [1], [0, 0, 1, 1], [], []>} : vector<8x32xbf16>, vector<32x32xbf16>, vector<8x32xf32> -> vector<8x32xf32>
    %c1_238 = arith.constant 1 : index
    %c0_239 = arith.constant 0 : index
    %c0_240 = arith.constant 0 : index
    %359 = vector.load %arg10[%c1_238, %c0_239, %c0_240] : memref<3x32x32xbf16, #tpu.memory_space<vmem>>, vector<1x32x32xbf16>
    %360 = vector.shape_cast %359 : vector<1x32x32xbf16> to vector<32x32xbf16>
    %cst_241 = arith.constant dense<0.000000e+00> : vector<8x32xf32>
    %361 = tpu.matmul %352, %360, %cst_241 {dimension_numbers = #tpu.dot_dimension_numbers<[1], [0], [0], [1], [0, 0, 1, 1], [], []>} : vector<8x32xbf16>, vector<32x32xbf16>, vector<8x32xf32> -> vector<8x32xf32>
    %362 = arith.addf %358, %361 : vector<8x32xf32>
    %c2_242 = arith.constant 2 : index
    %c0_243 = arith.constant 0 : index
    %c0_244 = arith.constant 0 : index
    %363 = vector.load %arg10[%c2_242, %c0_243, %c0_244] : memref<3x32x32xbf16, #tpu.memory_space<vmem>>, vector<1x32x32xbf16>
    %364 = vector.shape_cast %363 : vector<1x32x32xbf16> to vector<32x32xbf16>
    %cst_245 = arith.constant dense<0.000000e+00> : vector<8x32xf32>
    %365 = tpu.matmul %354, %364, %cst_245 {dimension_numbers = #tpu.dot_dimension_numbers<[1], [0], [0], [1], [0, 0, 1, 1], [], []>} : vector<8x32xbf16>, vector<32x32xbf16>, vector<8x32xf32> -> vector<8x32xf32>
    %366 = arith.addf %362, %365 : vector<8x32xf32>
    %367 = vector.broadcast %355 : vector<1x32xf32> to vector<8x32xf32>
    %368 = arith.addf %366, %367 : vector<8x32xf32>
    %c0_246 = arith.constant 0 : index
    %c0_247 = arith.constant 0 : index
    %369 = vector.load %arg30[%c0_246, %c0_247] : memref<2x16xbf16, #tpu.memory_space<vmem>>, vector<2x16xbf16>
    %c0_248 = arith.constant 0 : index
    %c0_249 = arith.constant 0 : index
    %370 = vector.load %arg29[%c0_248, %c0_249] : memref<16x2xbf16, #tpu.memory_space<vmem>>, vector<16x2xbf16>
    %cst_250 = arith.constant 0.000000e+00 : f32
    %371 = vector.broadcast %cst_250 : f32 to vector<8x32xf32>
    %372 = arith.maximumf %368, %371 : vector<8x32xf32>
    %c0_251 = arith.constant 0 : index
    %c0_252 = arith.constant 0 : index
    %373 = vector.load %arg28[%c0_251, %c0_252] : memref<48x8xbf16, #tpu.memory_space<vmem>>, vector<48x8xbf16>
    %374 = arith.truncf %372 : vector<8x32xf32> to vector<8x32xbf16>
    %cst_253 = arith.constant dense<0.000000e+00> : vector<48x32xf32>
    %375 = tpu.matmul %373, %374, %cst_253 {dimension_numbers = #tpu.dot_dimension_numbers<[1], [0], [0], [1], [0, 0, 1, 1], [], []>} : vector<48x8xbf16>, vector<8x32xbf16>, vector<48x32xf32> -> vector<48x32xf32>
    %376 = vector.extract_strided_slice %375 {offsets = [0, 0], sizes = [16, 32], strides = [1, 1]} : vector<48x32xf32> to vector<16x32xf32>
    %377 = arith.truncf %376 : vector<16x32xf32> to vector<16x32xbf16>
    %378 = vector.extract_strided_slice %375 {offsets = [16, 0], sizes = [16, 32], strides = [1, 1]} : vector<48x32xf32> to vector<16x32xf32>
    %379 = arith.truncf %378 : vector<16x32xf32> to vector<16x32xbf16>
    %380 = vector.extract_strided_slice %375 {offsets = [32, 0], sizes = [16, 32], strides = [1, 1]} : vector<48x32xf32> to vector<16x32xf32>
    %381 = arith.truncf %380 : vector<16x32xf32> to vector<16x32xbf16>
    %c0_254 = arith.constant 0 : index
    %c0_255 = arith.constant 0 : index
    %382 = vector.load %arg54[%c0_254, %c0_255] : memref<16x64xf32, #tpu.memory_space<vmem>>, vector<16x64xf32>
    %c0_256 = arith.constant 0 : index
    %c0_257 = arith.constant 0 : index
    %c0_258 = arith.constant 0 : index
    %383 = vector.load %arg48[%c0_256, %c0_257, %c0_258] : memref<3x32x64xbf16, #tpu.memory_space<vmem>>, vector<1x32x64xbf16>
    %384 = vector.shape_cast %383 : vector<1x32x64xbf16> to vector<32x64xbf16>
    %cst_259 = arith.constant dense<0.000000e+00> : vector<16x64xf32>
    %385 = tpu.matmul %377, %384, %cst_259 {dimension_numbers = #tpu.dot_dimension_numbers<[1], [0], [0], [1], [0, 0, 1, 1], [], []>} : vector<16x32xbf16>, vector<32x64xbf16>, vector<16x64xf32> -> vector<16x64xf32>
    %c1_260 = arith.constant 1 : index
    %c0_261 = arith.constant 0 : index
    %c0_262 = arith.constant 0 : index
    %386 = vector.load %arg48[%c1_260, %c0_261, %c0_262] : memref<3x32x64xbf16, #tpu.memory_space<vmem>>, vector<1x32x64xbf16>
    %387 = vector.shape_cast %386 : vector<1x32x64xbf16> to vector<32x64xbf16>
    %cst_263 = arith.constant dense<0.000000e+00> : vector<16x64xf32>
    %388 = tpu.matmul %379, %387, %cst_263 {dimension_numbers = #tpu.dot_dimension_numbers<[1], [0], [0], [1], [0, 0, 1, 1], [], []>} : vector<16x32xbf16>, vector<32x64xbf16>, vector<16x64xf32> -> vector<16x64xf32>
    %389 = arith.addf %385, %388 : vector<16x64xf32>
    %c2_264 = arith.constant 2 : index
    %c0_265 = arith.constant 0 : index
    %c0_266 = arith.constant 0 : index
    %390 = vector.load %arg48[%c2_264, %c0_265, %c0_266] : memref<3x32x64xbf16, #tpu.memory_space<vmem>>, vector<1x32x64xbf16>
    %391 = vector.shape_cast %390 : vector<1x32x64xbf16> to vector<32x64xbf16>
    %cst_267 = arith.constant dense<0.000000e+00> : vector<16x64xf32>
    %392 = tpu.matmul %381, %391, %cst_267 {dimension_numbers = #tpu.dot_dimension_numbers<[1], [0], [0], [1], [0, 0, 1, 1], [], []>} : vector<16x32xbf16>, vector<32x64xbf16>, vector<16x64xf32> -> vector<16x64xf32>
    %393 = arith.addf %389, %392 : vector<16x64xf32>
    %394 = arith.addf %393, %382 : vector<16x64xf32>
    %cst_268 = arith.constant 0.000000e+00 : f32
    %395 = vector.broadcast %cst_268 : f32 to vector<16x64xf32>
    %396 = arith.maximumf %394, %395 : vector<16x64xf32>
    %cst_269 = arith.constant 0.000000e+00 : f32
    %397 = vector.broadcast %cst_269 : f32 to vector<16x64xf32>
    %398 = arith.maximumf %136, %397 : vector<16x64xf32>
    %399 = arith.truncf %396 : vector<16x64xf32> to vector<16x64xbf16>
    %cst_270 = arith.constant dense<0.000000e+00> : vector<2x64xf32>
    %400 = tpu.matmul %369, %399, %cst_270 {dimension_numbers = #tpu.dot_dimension_numbers<[1], [0], [0], [1], [0, 0, 1, 1], [], []>} : vector<2x16xbf16>, vector<16x64xbf16>, vector<2x64xf32> -> vector<2x64xf32>
    %401 = arith.truncf %400 : vector<2x64xf32> to vector<2x64xbf16>
    %c0_271 = arith.constant 0 : index
    %c0_272 = arith.constant 0 : index
    %c0_273 = arith.constant 0 : index
    %402 = vector.load %arg50[%c0_271, %c0_272, %c0_273] : memref<2x64x16xbf16, #tpu.memory_space<vmem>>, vector<1x64x16xbf16>
    %403 = vector.shape_cast %402 : vector<1x64x16xbf16> to vector<64x16xbf16>
    %cst_274 = arith.constant dense<0.000000e+00> : vector<2x16xf32>
    %404 = tpu.matmul %401, %403, %cst_274 {dimension_numbers = #tpu.dot_dimension_numbers<[1], [0], [0], [1], [0, 0, 1, 1], [], []>} : vector<2x64xbf16>, vector<64x16xbf16>, vector<2x16xf32> -> vector<2x16xf32>
    %405 = arith.truncf %398 : vector<16x64xf32> to vector<16x64xbf16>
    %cst_275 = arith.constant dense<0.000000e+00> : vector<2x64xf32>
    %406 = tpu.matmul %369, %405, %cst_275 {dimension_numbers = #tpu.dot_dimension_numbers<[1], [0], [0], [1], [0, 0, 1, 1], [], []>} : vector<2x16xbf16>, vector<16x64xbf16>, vector<2x64xf32> -> vector<2x64xf32>
    %407 = arith.truncf %406 : vector<2x64xf32> to vector<2x64xbf16>
    %c1_276 = arith.constant 1 : index
    %c0_277 = arith.constant 0 : index
    %c0_278 = arith.constant 0 : index
    %408 = vector.load %arg50[%c1_276, %c0_277, %c0_278] : memref<2x64x16xbf16, #tpu.memory_space<vmem>>, vector<1x64x16xbf16>
    %409 = vector.shape_cast %408 : vector<1x64x16xbf16> to vector<64x16xbf16>
    %cst_279 = arith.constant dense<0.000000e+00> : vector<2x16xf32>
    %410 = tpu.matmul %407, %409, %cst_279 {dimension_numbers = #tpu.dot_dimension_numbers<[1], [0], [0], [1], [0, 0, 1, 1], [], []>} : vector<2x64xbf16>, vector<64x16xbf16>, vector<2x16xf32> -> vector<2x16xf32>
    %411 = arith.addf %404, %410 : vector<2x16xf32>
    %cst_280 = arith.constant 0.000000e+00 : f32
    %412 = vector.broadcast %cst_280 : f32 to vector<2x16xf32>
    %413 = arith.subf %412, %411 : vector<2x16xf32>
    %414 = math.exp %413 : vector<2x16xf32>
    %cst_281 = arith.constant 1.000000e+00 : f32
    %415 = vector.broadcast %cst_281 : f32 to vector<2x16xf32>
    %416 = arith.addf %415, %414 : vector<2x16xf32>
    %cst_282 = arith.constant 1.000000e+00 : f32
    %417 = vector.broadcast %cst_282 : f32 to vector<2x16xf32>
    %418 = arith.divf %417, %416 : vector<2x16xf32>
    %419 = arith.truncf %418 : vector<2x16xf32> to vector<2x16xbf16>
    %c0_283 = arith.constant 0 : index
    %c0_284 = arith.constant 0 : index
    %c0_285 = arith.constant 0 : index
    %420 = vector.load %arg49[%c0_283, %c0_284, %c0_285] : memref<2x16x64xbf16, #tpu.memory_space<vmem>>, vector<1x16x64xbf16>
    %421 = vector.shape_cast %420 : vector<1x16x64xbf16> to vector<16x64xbf16>
    %cst_286 = arith.constant dense<0.000000e+00> : vector<2x64xf32>
    %422 = tpu.matmul %419, %421, %cst_286 {dimension_numbers = #tpu.dot_dimension_numbers<[1], [0], [0], [1], [0, 0, 1, 1], [], []>} : vector<2x16xbf16>, vector<16x64xbf16>, vector<2x64xf32> -> vector<2x64xf32>
    %423 = arith.truncf %422 : vector<2x64xf32> to vector<2x64xbf16>
    %cst_287 = arith.constant dense<0.000000e+00> : vector<16x64xf32>
    %424 = tpu.matmul %370, %423, %cst_287 {dimension_numbers = #tpu.dot_dimension_numbers<[1], [0], [0], [1], [0, 0, 1, 1], [], []>} : vector<16x2xbf16>, vector<2x64xbf16>, vector<16x64xf32> -> vector<16x64xf32>
    %425 = arith.mulf %396, %424 : vector<16x64xf32>
    %c0_288 = arith.constant 0 : index
    %c0_289 = arith.constant 0 : index
    %426 = vector.load %arg26[%c0_288, %c0_289] : memref<48x16xbf16, #tpu.memory_space<vmem>>, vector<48x16xbf16>
    %427 = arith.truncf %425 : vector<16x64xf32> to vector<16x64xbf16>
    %cst_290 = arith.constant dense<0.000000e+00> : vector<48x64xf32>
    %428 = tpu.matmul %426, %427, %cst_290 {dimension_numbers = #tpu.dot_dimension_numbers<[1], [0], [0], [1], [0, 0, 1, 1], [], []>} : vector<48x16xbf16>, vector<16x64xbf16>, vector<48x64xf32> -> vector<48x64xf32>
    %429 = vector.extract_strided_slice %428 {offsets = [0, 0], sizes = [16, 64], strides = [1, 1]} : vector<48x64xf32> to vector<16x64xf32>
    %430 = arith.truncf %429 : vector<16x64xf32> to vector<16x64xbf16>
    %431 = vector.extract_strided_slice %428 {offsets = [16, 0], sizes = [16, 64], strides = [1, 1]} : vector<48x64xf32> to vector<16x64xf32>
    %432 = arith.truncf %431 : vector<16x64xf32> to vector<16x64xbf16>
    %433 = vector.extract_strided_slice %428 {offsets = [32, 0], sizes = [16, 64], strides = [1, 1]} : vector<48x64xf32> to vector<16x64xf32>
    %434 = arith.truncf %433 : vector<16x64xf32> to vector<16x64xbf16>
    %c1_291 = arith.constant 1 : index
    %c0_292 = arith.constant 0 : index
    %c0_293 = arith.constant 0 : index
    %435 = vector.load %arg49[%c1_291, %c0_292, %c0_293] : memref<2x16x64xbf16, #tpu.memory_space<vmem>>, vector<1x16x64xbf16>
    %436 = vector.shape_cast %435 : vector<1x16x64xbf16> to vector<16x64xbf16>
    %cst_294 = arith.constant dense<0.000000e+00> : vector<2x64xf32>
    %437 = tpu.matmul %419, %436, %cst_294 {dimension_numbers = #tpu.dot_dimension_numbers<[1], [0], [0], [1], [0, 0, 1, 1], [], []>} : vector<2x16xbf16>, vector<16x64xbf16>, vector<2x64xf32> -> vector<2x64xf32>
    %438 = arith.truncf %437 : vector<2x64xf32> to vector<2x64xbf16>
    %cst_295 = arith.constant dense<0.000000e+00> : vector<16x64xf32>
    %439 = tpu.matmul %370, %438, %cst_295 {dimension_numbers = #tpu.dot_dimension_numbers<[1], [0], [0], [1], [0, 0, 1, 1], [], []>} : vector<16x2xbf16>, vector<2x64xbf16>, vector<16x64xf32> -> vector<16x64xf32>
    %440 = arith.mulf %398, %439 : vector<16x64xf32>
    %c0_296 = arith.constant 0 : index
    %c0_297 = arith.constant 0 : index
    %441 = vector.load %arg26[%c0_296, %c0_297] : memref<48x16xbf16, #tpu.memory_space<vmem>>, vector<48x16xbf16>
    %442 = arith.truncf %440 : vector<16x64xf32> to vector<16x64xbf16>
    %cst_298 = arith.constant dense<0.000000e+00> : vector<48x64xf32>
    %443 = tpu.matmul %441, %442, %cst_298 {dimension_numbers = #tpu.dot_dimension_numbers<[1], [0], [0], [1], [0, 0, 1, 1], [], []>} : vector<48x16xbf16>, vector<16x64xbf16>, vector<48x64xf32> -> vector<48x64xf32>
    %444 = vector.extract_strided_slice %443 {offsets = [0, 0], sizes = [16, 64], strides = [1, 1]} : vector<48x64xf32> to vector<16x64xf32>
    %445 = arith.truncf %444 : vector<16x64xf32> to vector<16x64xbf16>
    %446 = vector.extract_strided_slice %443 {offsets = [16, 0], sizes = [16, 64], strides = [1, 1]} : vector<48x64xf32> to vector<16x64xf32>
    %447 = arith.truncf %446 : vector<16x64xf32> to vector<16x64xbf16>
    %448 = vector.extract_strided_slice %443 {offsets = [32, 0], sizes = [16, 64], strides = [1, 1]} : vector<48x64xf32> to vector<16x64xf32>
    %449 = arith.truncf %448 : vector<16x64xf32> to vector<16x64xbf16>
    %c0_299 = arith.constant 0 : index
    %c0_300 = arith.constant 0 : index
    %450 = vector.load %arg52[%c0_299, %c0_300] : memref<1x64xf32, #tpu.memory_space<vmem>>, vector<1x64xf32>
    %c0_301 = arith.constant 0 : index
    %c0_302 = arith.constant 0 : index
    %c0_303 = arith.constant 0 : index
    %451 = vector.load %arg46[%c0_301, %c0_302, %c0_303] : memref<6x64x64xbf16, #tpu.memory_space<vmem>>, vector<1x64x64xbf16>
    %452 = vector.shape_cast %451 : vector<1x64x64xbf16> to vector<64x64xbf16>
    %cst_304 = arith.constant dense<0.000000e+00> : vector<16x64xf32>
    %453 = tpu.matmul %430, %452, %cst_304 {dimension_numbers = #tpu.dot_dimension_numbers<[1], [0], [0], [1], [0, 0, 1, 1], [], []>} : vector<16x64xbf16>, vector<64x64xbf16>, vector<16x64xf32> -> vector<16x64xf32>
    %c1_305 = arith.constant 1 : index
    %c0_306 = arith.constant 0 : index
    %c0_307 = arith.constant 0 : index
    %454 = vector.load %arg46[%c1_305, %c0_306, %c0_307] : memref<6x64x64xbf16, #tpu.memory_space<vmem>>, vector<1x64x64xbf16>
    %455 = vector.shape_cast %454 : vector<1x64x64xbf16> to vector<64x64xbf16>
    %cst_308 = arith.constant dense<0.000000e+00> : vector<16x64xf32>
    %456 = tpu.matmul %432, %455, %cst_308 {dimension_numbers = #tpu.dot_dimension_numbers<[1], [0], [0], [1], [0, 0, 1, 1], [], []>} : vector<16x64xbf16>, vector<64x64xbf16>, vector<16x64xf32> -> vector<16x64xf32>
    %457 = arith.addf %453, %456 : vector<16x64xf32>
    %c2_309 = arith.constant 2 : index
    %c0_310 = arith.constant 0 : index
    %c0_311 = arith.constant 0 : index
    %458 = vector.load %arg46[%c2_309, %c0_310, %c0_311] : memref<6x64x64xbf16, #tpu.memory_space<vmem>>, vector<1x64x64xbf16>
    %459 = vector.shape_cast %458 : vector<1x64x64xbf16> to vector<64x64xbf16>
    %cst_312 = arith.constant dense<0.000000e+00> : vector<16x64xf32>
    %460 = tpu.matmul %434, %459, %cst_312 {dimension_numbers = #tpu.dot_dimension_numbers<[1], [0], [0], [1], [0, 0, 1, 1], [], []>} : vector<16x64xbf16>, vector<64x64xbf16>, vector<16x64xf32> -> vector<16x64xf32>
    %461 = arith.addf %457, %460 : vector<16x64xf32>
    %c3 = arith.constant 3 : index
    %c0_313 = arith.constant 0 : index
    %c0_314 = arith.constant 0 : index
    %462 = vector.load %arg46[%c3, %c0_313, %c0_314] : memref<6x64x64xbf16, #tpu.memory_space<vmem>>, vector<1x64x64xbf16>
    %463 = vector.shape_cast %462 : vector<1x64x64xbf16> to vector<64x64xbf16>
    %cst_315 = arith.constant dense<0.000000e+00> : vector<16x64xf32>
    %464 = tpu.matmul %445, %463, %cst_315 {dimension_numbers = #tpu.dot_dimension_numbers<[1], [0], [0], [1], [0, 0, 1, 1], [], []>} : vector<16x64xbf16>, vector<64x64xbf16>, vector<16x64xf32> -> vector<16x64xf32>
    %465 = arith.addf %461, %464 : vector<16x64xf32>
    %c4 = arith.constant 4 : index
    %c0_316 = arith.constant 0 : index
    %c0_317 = arith.constant 0 : index
    %466 = vector.load %arg46[%c4, %c0_316, %c0_317] : memref<6x64x64xbf16, #tpu.memory_space<vmem>>, vector<1x64x64xbf16>
    %467 = vector.shape_cast %466 : vector<1x64x64xbf16> to vector<64x64xbf16>
    %cst_318 = arith.constant dense<0.000000e+00> : vector<16x64xf32>
    %468 = tpu.matmul %447, %467, %cst_318 {dimension_numbers = #tpu.dot_dimension_numbers<[1], [0], [0], [1], [0, 0, 1, 1], [], []>} : vector<16x64xbf16>, vector<64x64xbf16>, vector<16x64xf32> -> vector<16x64xf32>
    %469 = arith.addf %465, %468 : vector<16x64xf32>
    %c5 = arith.constant 5 : index
    %c0_319 = arith.constant 0 : index
    %c0_320 = arith.constant 0 : index
    %470 = vector.load %arg46[%c5, %c0_319, %c0_320] : memref<6x64x64xbf16, #tpu.memory_space<vmem>>, vector<1x64x64xbf16>
    %471 = vector.shape_cast %470 : vector<1x64x64xbf16> to vector<64x64xbf16>
    %cst_321 = arith.constant dense<0.000000e+00> : vector<16x64xf32>
    %472 = tpu.matmul %449, %471, %cst_321 {dimension_numbers = #tpu.dot_dimension_numbers<[1], [0], [0], [1], [0, 0, 1, 1], [], []>} : vector<16x64xbf16>, vector<64x64xbf16>, vector<16x64xf32> -> vector<16x64xf32>
    %473 = arith.addf %469, %472 : vector<16x64xf32>
    %474 = vector.broadcast %450 : vector<1x64xf32> to vector<16x64xf32>
    %475 = arith.addf %473, %474 : vector<16x64xf32>
    %cst_322 = arith.constant 0.000000e+00 : f32
    %476 = vector.broadcast %cst_322 : f32 to vector<16x64xf32>
    %477 = arith.maximumf %475, %476 : vector<16x64xf32>
    %c0_323 = arith.constant 0 : index
    %c0_324 = arith.constant 0 : index
    %478 = vector.load %arg30[%c0_323, %c0_324] : memref<2x16xbf16, #tpu.memory_space<vmem>>, vector<2x16xbf16>
    %479 = arith.truncf %477 : vector<16x64xf32> to vector<16x64xbf16>
    %cst_325 = arith.constant dense<0.000000e+00> : vector<2x64xf32>
    %480 = tpu.matmul %478, %479, %cst_325 {dimension_numbers = #tpu.dot_dimension_numbers<[1], [0], [0], [1], [0, 0, 1, 1], [], []>} : vector<2x16xbf16>, vector<16x64xbf16>, vector<2x64xf32> -> vector<2x64xf32>
    %481 = arith.truncf %480 : vector<2x64xf32> to vector<2x64xbf16>
    %c0_326 = arith.constant 0 : index
    %c0_327 = arith.constant 0 : index
    %482 = vector.load %arg51[%c0_326, %c0_327] : memref<64x64xbf16, #tpu.memory_space<vmem>>, vector<64x64xbf16>
    %cst_328 = arith.constant dense<0.000000e+00> : vector<2x64xf32>
    %483 = tpu.matmul %481, %482, %cst_328 {dimension_numbers = #tpu.dot_dimension_numbers<[1], [0], [0], [1], [0, 0, 1, 1], [], []>} : vector<2x64xbf16>, vector<64x64xbf16>, vector<2x64xf32> -> vector<2x64xf32>
    %c0_329 = arith.constant 0 : index
    %c0_330 = arith.constant 0 : index
    %484 = vector.load %arg29[%c0_329, %c0_330] : memref<16x2xbf16, #tpu.memory_space<vmem>>, vector<16x2xbf16>
    %cst_331 = arith.constant 0.000000e+00 : f32
    %485 = vector.broadcast %cst_331 : f32 to vector<2x64xf32>
    %486 = arith.subf %485, %483 : vector<2x64xf32>
    %487 = math.exp %486 : vector<2x64xf32>
    %cst_332 = arith.constant 1.000000e+00 : f32
    %488 = vector.broadcast %cst_332 : f32 to vector<2x64xf32>
    %489 = arith.addf %488, %487 : vector<2x64xf32>
    %cst_333 = arith.constant 1.000000e+00 : f32
    %490 = vector.broadcast %cst_333 : f32 to vector<2x64xf32>
    %491 = arith.divf %490, %489 : vector<2x64xf32>
    %492 = arith.truncf %491 : vector<2x64xf32> to vector<2x64xbf16>
    %cst_334 = arith.constant dense<0.000000e+00> : vector<16x64xf32>
    %493 = tpu.matmul %484, %492, %cst_334 {dimension_numbers = #tpu.dot_dimension_numbers<[1], [0], [0], [1], [0, 0, 1, 1], [], []>} : vector<16x2xbf16>, vector<2x64xbf16>, vector<16x64xf32> -> vector<16x64xf32>
    %494 = arith.mulf %477, %493 : vector<16x64xf32>
    %c0_335 = arith.constant 0 : index
    %c0_336 = arith.constant 0 : index
    %495 = vector.load %arg26[%c0_335, %c0_336] : memref<48x16xbf16, #tpu.memory_space<vmem>>, vector<48x16xbf16>
    %496 = arith.truncf %494 : vector<16x64xf32> to vector<16x64xbf16>
    %cst_337 = arith.constant dense<0.000000e+00> : vector<48x64xf32>
    %497 = tpu.matmul %495, %496, %cst_337 {dimension_numbers = #tpu.dot_dimension_numbers<[1], [0], [0], [1], [0, 0, 1, 1], [], []>} : vector<48x16xbf16>, vector<16x64xbf16>, vector<48x64xf32> -> vector<48x64xf32>
    %498 = vector.extract_strided_slice %497 {offsets = [0, 0], sizes = [16, 64], strides = [1, 1]} : vector<48x64xf32> to vector<16x64xf32>
    %499 = arith.truncf %498 : vector<16x64xf32> to vector<16x64xbf16>
    %500 = vector.extract_strided_slice %497 {offsets = [16, 0], sizes = [16, 64], strides = [1, 1]} : vector<48x64xf32> to vector<16x64xf32>
    %501 = arith.truncf %500 : vector<16x64xf32> to vector<16x64xbf16>
    %502 = vector.extract_strided_slice %497 {offsets = [32, 0], sizes = [16, 64], strides = [1, 1]} : vector<48x64xf32> to vector<16x64xf32>
    %503 = arith.truncf %502 : vector<16x64xf32> to vector<16x64xbf16>
    %c0_338 = arith.constant 0 : index
    %c0_339 = arith.constant 0 : index
    %504 = vector.load %arg53[%c0_338, %c0_339] : memref<1x64xf32, #tpu.memory_space<vmem>>, vector<1x64xf32>
    %c0_340 = arith.constant 0 : index
    %c0_341 = arith.constant 0 : index
    %c0_342 = arith.constant 0 : index
    %505 = vector.load %arg47[%c0_340, %c0_341, %c0_342] : memref<3x64x64xbf16, #tpu.memory_space<vmem>>, vector<1x64x64xbf16>
    %506 = vector.shape_cast %505 : vector<1x64x64xbf16> to vector<64x64xbf16>
    %cst_343 = arith.constant dense<0.000000e+00> : vector<16x64xf32>
    %507 = tpu.matmul %499, %506, %cst_343 {dimension_numbers = #tpu.dot_dimension_numbers<[1], [0], [0], [1], [0, 0, 1, 1], [], []>} : vector<16x64xbf16>, vector<64x64xbf16>, vector<16x64xf32> -> vector<16x64xf32>
    %c1_344 = arith.constant 1 : index
    %c0_345 = arith.constant 0 : index
    %c0_346 = arith.constant 0 : index
    %508 = vector.load %arg47[%c1_344, %c0_345, %c0_346] : memref<3x64x64xbf16, #tpu.memory_space<vmem>>, vector<1x64x64xbf16>
    %509 = vector.shape_cast %508 : vector<1x64x64xbf16> to vector<64x64xbf16>
    %cst_347 = arith.constant dense<0.000000e+00> : vector<16x64xf32>
    %510 = tpu.matmul %501, %509, %cst_347 {dimension_numbers = #tpu.dot_dimension_numbers<[1], [0], [0], [1], [0, 0, 1, 1], [], []>} : vector<16x64xbf16>, vector<64x64xbf16>, vector<16x64xf32> -> vector<16x64xf32>
    %511 = arith.addf %507, %510 : vector<16x64xf32>
    %c2_348 = arith.constant 2 : index
    %c0_349 = arith.constant 0 : index
    %c0_350 = arith.constant 0 : index
    %512 = vector.load %arg47[%c2_348, %c0_349, %c0_350] : memref<3x64x64xbf16, #tpu.memory_space<vmem>>, vector<1x64x64xbf16>
    %513 = vector.shape_cast %512 : vector<1x64x64xbf16> to vector<64x64xbf16>
    %cst_351 = arith.constant dense<0.000000e+00> : vector<16x64xf32>
    %514 = tpu.matmul %503, %513, %cst_351 {dimension_numbers = #tpu.dot_dimension_numbers<[1], [0], [0], [1], [0, 0, 1, 1], [], []>} : vector<16x64xbf16>, vector<64x64xbf16>, vector<16x64xf32> -> vector<16x64xf32>
    %515 = arith.addf %511, %514 : vector<16x64xf32>
    %516 = vector.broadcast %504 : vector<1x64xf32> to vector<16x64xf32>
    %517 = arith.addf %515, %516 : vector<16x64xf32>
    %c0_352 = arith.constant 0 : index
    %c0_353 = arith.constant 0 : index
    %518 = vector.load %arg25[%c0_352, %c0_353] : memref<2x32xbf16, #tpu.memory_space<vmem>>, vector<2x32xbf16>
    %c0_354 = arith.constant 0 : index
    %c0_355 = arith.constant 0 : index
    %519 = vector.load %arg24[%c0_354, %c0_355] : memref<32x2xbf16, #tpu.memory_space<vmem>>, vector<32x2xbf16>
    %cst_356 = arith.constant 0.000000e+00 : f32
    %520 = vector.broadcast %cst_356 : f32 to vector<16x64xf32>
    %521 = arith.maximumf %517, %520 : vector<16x64xf32>
    %c0_357 = arith.constant 0 : index
    %c0_358 = arith.constant 0 : index
    %522 = vector.load %arg23[%c0_357, %c0_358] : memref<96x16xbf16, #tpu.memory_space<vmem>>, vector<96x16xbf16>
    %523 = arith.truncf %521 : vector<16x64xf32> to vector<16x64xbf16>
    %cst_359 = arith.constant dense<0.000000e+00> : vector<96x64xf32>
    %524 = tpu.matmul %522, %523, %cst_359 {dimension_numbers = #tpu.dot_dimension_numbers<[1], [0], [0], [1], [0, 0, 1, 1], [], []>} : vector<96x16xbf16>, vector<16x64xbf16>, vector<96x64xf32> -> vector<96x64xf32>
    %525 = vector.extract_strided_slice %524 {offsets = [0, 0], sizes = [32, 64], strides = [1, 1]} : vector<96x64xf32> to vector<32x64xf32>
    %526 = arith.truncf %525 : vector<32x64xf32> to vector<32x64xbf16>
    %527 = vector.extract_strided_slice %524 {offsets = [32, 0], sizes = [32, 64], strides = [1, 1]} : vector<96x64xf32> to vector<32x64xf32>
    %528 = arith.truncf %527 : vector<32x64xf32> to vector<32x64xbf16>
    %529 = vector.extract_strided_slice %524 {offsets = [64, 0], sizes = [32, 64], strides = [1, 1]} : vector<96x64xf32> to vector<32x64xf32>
    %530 = arith.truncf %529 : vector<32x64xf32> to vector<32x64xbf16>
    %c0_360 = arith.constant 0 : index
    %c0_361 = arith.constant 0 : index
    %531 = vector.load %arg63[%c0_360, %c0_361] : memref<32x128xf32, #tpu.memory_space<vmem>>, vector<32x128xf32>
    %c0_362 = arith.constant 0 : index
    %c0_363 = arith.constant 0 : index
    %c0_364 = arith.constant 0 : index
    %532 = vector.load %arg57[%c0_362, %c0_363, %c0_364] : memref<3x64x128xbf16, #tpu.memory_space<vmem>>, vector<1x64x128xbf16>
    %533 = vector.shape_cast %532 : vector<1x64x128xbf16> to vector<64x128xbf16>
    %cst_365 = arith.constant dense<0.000000e+00> : vector<32x128xf32>
    %534 = tpu.matmul %526, %533, %cst_365 {dimension_numbers = #tpu.dot_dimension_numbers<[1], [0], [0], [1], [0, 0, 1, 1], [], []>} : vector<32x64xbf16>, vector<64x128xbf16>, vector<32x128xf32> -> vector<32x128xf32>
    %c1_366 = arith.constant 1 : index
    %c0_367 = arith.constant 0 : index
    %c0_368 = arith.constant 0 : index
    %535 = vector.load %arg57[%c1_366, %c0_367, %c0_368] : memref<3x64x128xbf16, #tpu.memory_space<vmem>>, vector<1x64x128xbf16>
    %536 = vector.shape_cast %535 : vector<1x64x128xbf16> to vector<64x128xbf16>
    %cst_369 = arith.constant dense<0.000000e+00> : vector<32x128xf32>
    %537 = tpu.matmul %528, %536, %cst_369 {dimension_numbers = #tpu.dot_dimension_numbers<[1], [0], [0], [1], [0, 0, 1, 1], [], []>} : vector<32x64xbf16>, vector<64x128xbf16>, vector<32x128xf32> -> vector<32x128xf32>
    %538 = arith.addf %534, %537 : vector<32x128xf32>
    %c2_370 = arith.constant 2 : index
    %c0_371 = arith.constant 0 : index
    %c0_372 = arith.constant 0 : index
    %539 = vector.load %arg57[%c2_370, %c0_371, %c0_372] : memref<3x64x128xbf16, #tpu.memory_space<vmem>>, vector<1x64x128xbf16>
    %540 = vector.shape_cast %539 : vector<1x64x128xbf16> to vector<64x128xbf16>
    %cst_373 = arith.constant dense<0.000000e+00> : vector<32x128xf32>
    %541 = tpu.matmul %530, %540, %cst_373 {dimension_numbers = #tpu.dot_dimension_numbers<[1], [0], [0], [1], [0, 0, 1, 1], [], []>} : vector<32x64xbf16>, vector<64x128xbf16>, vector<32x128xf32> -> vector<32x128xf32>
    %542 = arith.addf %538, %541 : vector<32x128xf32>
    %543 = arith.addf %542, %531 : vector<32x128xf32>
    %cst_374 = arith.constant 0.000000e+00 : f32
    %544 = vector.broadcast %cst_374 : f32 to vector<32x128xf32>
    %545 = arith.maximumf %543, %544 : vector<32x128xf32>
    %cst_375 = arith.constant 0.000000e+00 : f32
    %546 = vector.broadcast %cst_375 : f32 to vector<32x128xf32>
    %547 = arith.maximumf %41, %546 : vector<32x128xf32>
    %cst_376 = arith.constant 0.000000e+00 : f32
    %548 = vector.broadcast %cst_376 : f32 to vector<32x128xf32>
    %549 = arith.maximumf %259, %548 : vector<32x128xf32>
    %550 = arith.truncf %545 : vector<32x128xf32> to vector<32x128xbf16>
    %cst_377 = arith.constant dense<0.000000e+00> : vector<2x128xf32>
    %551 = tpu.matmul %518, %550, %cst_377 {dimension_numbers = #tpu.dot_dimension_numbers<[1], [0], [0], [1], [0, 0, 1, 1], [], []>} : vector<2x32xbf16>, vector<32x128xbf16>, vector<2x128xf32> -> vector<2x128xf32>
    %552 = arith.truncf %551 : vector<2x128xf32> to vector<2x128xbf16>
    %c0_378 = arith.constant 0 : index
    %c0_379 = arith.constant 0 : index
    %c0_380 = arith.constant 0 : index
    %553 = vector.load %arg59[%c0_378, %c0_379, %c0_380] : memref<3x128x24xbf16, #tpu.memory_space<vmem>>, vector<1x128x24xbf16>
    %554 = vector.shape_cast %553 : vector<1x128x24xbf16> to vector<128x24xbf16>
    %cst_381 = arith.constant dense<0.000000e+00> : vector<2x24xf32>
    %555 = tpu.matmul %552, %554, %cst_381 {dimension_numbers = #tpu.dot_dimension_numbers<[1], [0], [0], [1], [0, 0, 1, 1], [], []>} : vector<2x128xbf16>, vector<128x24xbf16>, vector<2x24xf32> -> vector<2x24xf32>
    %556 = arith.truncf %547 : vector<32x128xf32> to vector<32x128xbf16>
    %cst_382 = arith.constant dense<0.000000e+00> : vector<2x128xf32>
    %557 = tpu.matmul %518, %556, %cst_382 {dimension_numbers = #tpu.dot_dimension_numbers<[1], [0], [0], [1], [0, 0, 1, 1], [], []>} : vector<2x32xbf16>, vector<32x128xbf16>, vector<2x128xf32> -> vector<2x128xf32>
    %558 = arith.truncf %557 : vector<2x128xf32> to vector<2x128xbf16>
    %c1_383 = arith.constant 1 : index
    %c0_384 = arith.constant 0 : index
    %c0_385 = arith.constant 0 : index
    %559 = vector.load %arg59[%c1_383, %c0_384, %c0_385] : memref<3x128x24xbf16, #tpu.memory_space<vmem>>, vector<1x128x24xbf16>
    %560 = vector.shape_cast %559 : vector<1x128x24xbf16> to vector<128x24xbf16>
    %cst_386 = arith.constant dense<0.000000e+00> : vector<2x24xf32>
    %561 = tpu.matmul %558, %560, %cst_386 {dimension_numbers = #tpu.dot_dimension_numbers<[1], [0], [0], [1], [0, 0, 1, 1], [], []>} : vector<2x128xbf16>, vector<128x24xbf16>, vector<2x24xf32> -> vector<2x24xf32>
    %562 = arith.addf %555, %561 : vector<2x24xf32>
    %563 = arith.truncf %549 : vector<32x128xf32> to vector<32x128xbf16>
    %cst_387 = arith.constant dense<0.000000e+00> : vector<2x128xf32>
    %564 = tpu.matmul %518, %563, %cst_387 {dimension_numbers = #tpu.dot_dimension_numbers<[1], [0], [0], [1], [0, 0, 1, 1], [], []>} : vector<2x32xbf16>, vector<32x128xbf16>, vector<2x128xf32> -> vector<2x128xf32>
    %565 = arith.truncf %564 : vector<2x128xf32> to vector<2x128xbf16>
    %c2_388 = arith.constant 2 : index
    %c0_389 = arith.constant 0 : index
    %c0_390 = arith.constant 0 : index
    %566 = vector.load %arg59[%c2_388, %c0_389, %c0_390] : memref<3x128x24xbf16, #tpu.memory_space<vmem>>, vector<1x128x24xbf16>
    %567 = vector.shape_cast %566 : vector<1x128x24xbf16> to vector<128x24xbf16>
    %cst_391 = arith.constant dense<0.000000e+00> : vector<2x24xf32>
    %568 = tpu.matmul %565, %567, %cst_391 {dimension_numbers = #tpu.dot_dimension_numbers<[1], [0], [0], [1], [0, 0, 1, 1], [], []>} : vector<2x128xbf16>, vector<128x24xbf16>, vector<2x24xf32> -> vector<2x24xf32>
    %569 = arith.addf %562, %568 : vector<2x24xf32>
    %cst_392 = arith.constant 0.000000e+00 : f32
    %570 = vector.broadcast %cst_392 : f32 to vector<2x24xf32>
    %571 = arith.subf %570, %569 : vector<2x24xf32>
    %572 = math.exp %571 : vector<2x24xf32>
    %cst_393 = arith.constant 1.000000e+00 : f32
    %573 = vector.broadcast %cst_393 : f32 to vector<2x24xf32>
    %574 = arith.addf %573, %572 : vector<2x24xf32>
    %cst_394 = arith.constant 1.000000e+00 : f32
    %575 = vector.broadcast %cst_394 : f32 to vector<2x24xf32>
    %576 = arith.divf %575, %574 : vector<2x24xf32>
    %577 = arith.truncf %576 : vector<2x24xf32> to vector<2x24xbf16>
    %c0_395 = arith.constant 0 : index
    %c0_396 = arith.constant 0 : index
    %c0_397 = arith.constant 0 : index
    %578 = vector.load %arg58[%c0_395, %c0_396, %c0_397] : memref<3x24x128xbf16, #tpu.memory_space<vmem>>, vector<1x24x128xbf16>
    %579 = vector.shape_cast %578 : vector<1x24x128xbf16> to vector<24x128xbf16>
    %cst_398 = arith.constant dense<0.000000e+00> : vector<2x128xf32>
    %580 = tpu.matmul %577, %579, %cst_398 {dimension_numbers = #tpu.dot_dimension_numbers<[1], [0], [0], [1], [0, 0, 1, 1], [], []>} : vector<2x24xbf16>, vector<24x128xbf16>, vector<2x128xf32> -> vector<2x128xf32>
    %581 = arith.truncf %580 : vector<2x128xf32> to vector<2x128xbf16>
    %cst_399 = arith.constant dense<0.000000e+00> : vector<32x128xf32>
    %582 = tpu.matmul %519, %581, %cst_399 {dimension_numbers = #tpu.dot_dimension_numbers<[1], [0], [0], [1], [0, 0, 1, 1], [], []>} : vector<32x2xbf16>, vector<2x128xbf16>, vector<32x128xf32> -> vector<32x128xf32>
    %583 = arith.mulf %545, %582 : vector<32x128xf32>
    %c0_400 = arith.constant 0 : index
    %c0_401 = arith.constant 0 : index
    %584 = vector.load %arg21[%c0_400, %c0_401] : memref<96x32xbf16, #tpu.memory_space<vmem>>, vector<96x32xbf16>
    %585 = arith.truncf %583 : vector<32x128xf32> to vector<32x128xbf16>
    %cst_402 = arith.constant dense<0.000000e+00> : vector<96x128xf32>
    %586 = tpu.matmul %584, %585, %cst_402 {dimension_numbers = #tpu.dot_dimension_numbers<[1], [0], [0], [1], [0, 0, 1, 1], [], []>} : vector<96x32xbf16>, vector<32x128xbf16>, vector<96x128xf32> -> vector<96x128xf32>
    %587 = vector.extract_strided_slice %586 {offsets = [0, 0], sizes = [32, 128], strides = [1, 1]} : vector<96x128xf32> to vector<32x128xf32>
    %588 = arith.truncf %587 : vector<32x128xf32> to vector<32x128xbf16>
    %589 = vector.extract_strided_slice %586 {offsets = [32, 0], sizes = [32, 128], strides = [1, 1]} : vector<96x128xf32> to vector<32x128xf32>
    %590 = arith.truncf %589 : vector<32x128xf32> to vector<32x128xbf16>
    %591 = vector.extract_strided_slice %586 {offsets = [64, 0], sizes = [32, 128], strides = [1, 1]} : vector<96x128xf32> to vector<32x128xf32>
    %592 = arith.truncf %591 : vector<32x128xf32> to vector<32x128xbf16>
    %c1_403 = arith.constant 1 : index
    %c0_404 = arith.constant 0 : index
    %c0_405 = arith.constant 0 : index
    %593 = vector.load %arg58[%c1_403, %c0_404, %c0_405] : memref<3x24x128xbf16, #tpu.memory_space<vmem>>, vector<1x24x128xbf16>
    %594 = vector.shape_cast %593 : vector<1x24x128xbf16> to vector<24x128xbf16>
    %cst_406 = arith.constant dense<0.000000e+00> : vector<2x128xf32>
    %595 = tpu.matmul %577, %594, %cst_406 {dimension_numbers = #tpu.dot_dimension_numbers<[1], [0], [0], [1], [0, 0, 1, 1], [], []>} : vector<2x24xbf16>, vector<24x128xbf16>, vector<2x128xf32> -> vector<2x128xf32>
    %596 = arith.truncf %595 : vector<2x128xf32> to vector<2x128xbf16>
    %cst_407 = arith.constant dense<0.000000e+00> : vector<32x128xf32>
    %597 = tpu.matmul %519, %596, %cst_407 {dimension_numbers = #tpu.dot_dimension_numbers<[1], [0], [0], [1], [0, 0, 1, 1], [], []>} : vector<32x2xbf16>, vector<2x128xbf16>, vector<32x128xf32> -> vector<32x128xf32>
    %598 = arith.mulf %547, %597 : vector<32x128xf32>
    %c0_408 = arith.constant 0 : index
    %c0_409 = arith.constant 0 : index
    %599 = vector.load %arg21[%c0_408, %c0_409] : memref<96x32xbf16, #tpu.memory_space<vmem>>, vector<96x32xbf16>
    %600 = arith.truncf %598 : vector<32x128xf32> to vector<32x128xbf16>
    %cst_410 = arith.constant dense<0.000000e+00> : vector<96x128xf32>
    %601 = tpu.matmul %599, %600, %cst_410 {dimension_numbers = #tpu.dot_dimension_numbers<[1], [0], [0], [1], [0, 0, 1, 1], [], []>} : vector<96x32xbf16>, vector<32x128xbf16>, vector<96x128xf32> -> vector<96x128xf32>
    %602 = vector.extract_strided_slice %601 {offsets = [0, 0], sizes = [32, 128], strides = [1, 1]} : vector<96x128xf32> to vector<32x128xf32>
    %603 = arith.truncf %602 : vector<32x128xf32> to vector<32x128xbf16>
    %604 = vector.extract_strided_slice %601 {offsets = [32, 0], sizes = [32, 128], strides = [1, 1]} : vector<96x128xf32> to vector<32x128xf32>
    %605 = arith.truncf %604 : vector<32x128xf32> to vector<32x128xbf16>
    %606 = vector.extract_strided_slice %601 {offsets = [64, 0], sizes = [32, 128], strides = [1, 1]} : vector<96x128xf32> to vector<32x128xf32>
    %607 = arith.truncf %606 : vector<32x128xf32> to vector<32x128xbf16>
    %c2_411 = arith.constant 2 : index
    %c0_412 = arith.constant 0 : index
    %c0_413 = arith.constant 0 : index
    %608 = vector.load %arg58[%c2_411, %c0_412, %c0_413] : memref<3x24x128xbf16, #tpu.memory_space<vmem>>, vector<1x24x128xbf16>
    %609 = vector.shape_cast %608 : vector<1x24x128xbf16> to vector<24x128xbf16>
    %cst_414 = arith.constant dense<0.000000e+00> : vector<2x128xf32>
    %610 = tpu.matmul %577, %609, %cst_414 {dimension_numbers = #tpu.dot_dimension_numbers<[1], [0], [0], [1], [0, 0, 1, 1], [], []>} : vector<2x24xbf16>, vector<24x128xbf16>, vector<2x128xf32> -> vector<2x128xf32>
    %611 = arith.truncf %610 : vector<2x128xf32> to vector<2x128xbf16>
    %cst_415 = arith.constant dense<0.000000e+00> : vector<32x128xf32>
    %612 = tpu.matmul %519, %611, %cst_415 {dimension_numbers = #tpu.dot_dimension_numbers<[1], [0], [0], [1], [0, 0, 1, 1], [], []>} : vector<32x2xbf16>, vector<2x128xbf16>, vector<32x128xf32> -> vector<32x128xf32>
    %613 = arith.mulf %549, %612 : vector<32x128xf32>
    %c0_416 = arith.constant 0 : index
    %c0_417 = arith.constant 0 : index
    %614 = vector.load %arg21[%c0_416, %c0_417] : memref<96x32xbf16, #tpu.memory_space<vmem>>, vector<96x32xbf16>
    %615 = arith.truncf %613 : vector<32x128xf32> to vector<32x128xbf16>
    %cst_418 = arith.constant dense<0.000000e+00> : vector<96x128xf32>
    %616 = tpu.matmul %614, %615, %cst_418 {dimension_numbers = #tpu.dot_dimension_numbers<[1], [0], [0], [1], [0, 0, 1, 1], [], []>} : vector<96x32xbf16>, vector<32x128xbf16>, vector<96x128xf32> -> vector<96x128xf32>
    %617 = vector.extract_strided_slice %616 {offsets = [0, 0], sizes = [32, 128], strides = [1, 1]} : vector<96x128xf32> to vector<32x128xf32>
    %618 = arith.truncf %617 : vector<32x128xf32> to vector<32x128xbf16>
    %619 = vector.extract_strided_slice %616 {offsets = [32, 0], sizes = [32, 128], strides = [1, 1]} : vector<96x128xf32> to vector<32x128xf32>
    %620 = arith.truncf %619 : vector<32x128xf32> to vector<32x128xbf16>
    %621 = vector.extract_strided_slice %616 {offsets = [64, 0], sizes = [32, 128], strides = [1, 1]} : vector<96x128xf32> to vector<32x128xf32>
    %622 = arith.truncf %621 : vector<32x128xf32> to vector<32x128xbf16>
    %c0_419 = arith.constant 0 : index
    %c0_420 = arith.constant 0 : index
    %623 = vector.load %arg61[%c0_419, %c0_420] : memref<1x128xf32, #tpu.memory_space<vmem>>, vector<1x128xf32>
    %624 = tpu.concatenate %588, %590, %592, %603, %605, %607, %618, %620, %622 in 1 : vector<32x128xbf16>, vector<32x128xbf16>, vector<32x128xbf16>, vector<32x128xbf16>, vector<32x128xbf16>, vector<32x128xbf16>, vector<32x128xbf16>, vector<32x128xbf16>, vector<32x128xbf16> -> vector<32x1152xbf16>
    %c0_421 = arith.constant 0 : index
    %c0_422 = arith.constant 0 : index
    %c0_423 = arith.constant 0 : index
    %625 = vector.load %arg55[%c0_421, %c0_422, %c0_423] : memref<9x128x128xbf16, #tpu.memory_space<vmem>>, vector<9x128x128xbf16>
    %626 = vector.shape_cast %625 : vector<9x128x128xbf16> to vector<1152x128xbf16>
    %cst_424 = arith.constant dense<0.000000e+00> : vector<32x128xf32>
    %627 = tpu.matmul %624, %626, %cst_424 {dimension_numbers = #tpu.dot_dimension_numbers<[1], [0], [0], [1], [0, 0, 1, 1], [], []>} : vector<32x1152xbf16>, vector<1152x128xbf16>, vector<32x128xf32> -> vector<32x128xf32>
    %628 = vector.broadcast %623 : vector<1x128xf32> to vector<32x128xf32>
    %629 = arith.addf %627, %628 : vector<32x128xf32>
    %cst_425 = arith.constant 0.000000e+00 : f32
    %630 = vector.broadcast %cst_425 : f32 to vector<32x128xf32>
    %631 = arith.maximumf %629, %630 : vector<32x128xf32>
    %c0_426 = arith.constant 0 : index
    %c0_427 = arith.constant 0 : index
    %632 = vector.load %arg25[%c0_426, %c0_427] : memref<2x32xbf16, #tpu.memory_space<vmem>>, vector<2x32xbf16>
    %633 = arith.truncf %631 : vector<32x128xf32> to vector<32x128xbf16>
    %cst_428 = arith.constant dense<0.000000e+00> : vector<2x128xf32>
    %634 = tpu.matmul %632, %633, %cst_428 {dimension_numbers = #tpu.dot_dimension_numbers<[1], [0], [0], [1], [0, 0, 1, 1], [], []>} : vector<2x32xbf16>, vector<32x128xbf16>, vector<2x128xf32> -> vector<2x128xf32>
    %635 = arith.truncf %634 : vector<2x128xf32> to vector<2x128xbf16>
    %c0_429 = arith.constant 0 : index
    %c0_430 = arith.constant 0 : index
    %636 = vector.load %arg60[%c0_429, %c0_430] : memref<128x128xbf16, #tpu.memory_space<vmem>>, vector<128x128xbf16>
    %cst_431 = arith.constant dense<0.000000e+00> : vector<2x128xf32>
    %637 = tpu.matmul %635, %636, %cst_431 {dimension_numbers = #tpu.dot_dimension_numbers<[1], [0], [0], [1], [0, 0, 1, 1], [], []>} : vector<2x128xbf16>, vector<128x128xbf16>, vector<2x128xf32> -> vector<2x128xf32>
    %c0_432 = arith.constant 0 : index
    %c0_433 = arith.constant 0 : index
    %638 = vector.load %arg24[%c0_432, %c0_433] : memref<32x2xbf16, #tpu.memory_space<vmem>>, vector<32x2xbf16>
    %cst_434 = arith.constant 0.000000e+00 : f32
    %639 = vector.broadcast %cst_434 : f32 to vector<2x128xf32>
    %640 = arith.subf %639, %637 : vector<2x128xf32>
    %641 = math.exp %640 : vector<2x128xf32>
    %cst_435 = arith.constant 1.000000e+00 : f32
    %642 = vector.broadcast %cst_435 : f32 to vector<2x128xf32>
    %643 = arith.addf %642, %641 : vector<2x128xf32>
    %cst_436 = arith.constant 1.000000e+00 : f32
    %644 = vector.broadcast %cst_436 : f32 to vector<2x128xf32>
    %645 = arith.divf %644, %643 : vector<2x128xf32>
    %646 = arith.truncf %645 : vector<2x128xf32> to vector<2x128xbf16>
    %cst_437 = arith.constant dense<0.000000e+00> : vector<32x128xf32>
    %647 = tpu.matmul %638, %646, %cst_437 {dimension_numbers = #tpu.dot_dimension_numbers<[1], [0], [0], [1], [0, 0, 1, 1], [], []>} : vector<32x2xbf16>, vector<2x128xbf16>, vector<32x128xf32> -> vector<32x128xf32>
    %648 = arith.mulf %631, %647 : vector<32x128xf32>
    %c0_438 = arith.constant 0 : index
    %c0_439 = arith.constant 0 : index
    %649 = vector.load %arg21[%c0_438, %c0_439] : memref<96x32xbf16, #tpu.memory_space<vmem>>, vector<96x32xbf16>
    %650 = arith.truncf %648 : vector<32x128xf32> to vector<32x128xbf16>
    %cst_440 = arith.constant dense<0.000000e+00> : vector<96x128xf32>
    %651 = tpu.matmul %649, %650, %cst_440 {dimension_numbers = #tpu.dot_dimension_numbers<[1], [0], [0], [1], [0, 0, 1, 1], [], []>} : vector<96x32xbf16>, vector<32x128xbf16>, vector<96x128xf32> -> vector<96x128xf32>
    %652 = vector.extract_strided_slice %651 {offsets = [0, 0], sizes = [32, 128], strides = [1, 1]} : vector<96x128xf32> to vector<32x128xf32>
    %653 = arith.truncf %652 : vector<32x128xf32> to vector<32x128xbf16>
    %654 = vector.extract_strided_slice %651 {offsets = [32, 0], sizes = [32, 128], strides = [1, 1]} : vector<96x128xf32> to vector<32x128xf32>
    %655 = arith.truncf %654 : vector<32x128xf32> to vector<32x128xbf16>
    %656 = vector.extract_strided_slice %651 {offsets = [64, 0], sizes = [32, 128], strides = [1, 1]} : vector<96x128xf32> to vector<32x128xf32>
    %657 = arith.truncf %656 : vector<32x128xf32> to vector<32x128xbf16>
    %c0_441 = arith.constant 0 : index
    %c0_442 = arith.constant 0 : index
    %658 = vector.load %arg62[%c0_441, %c0_442] : memref<1x128xf32, #tpu.memory_space<vmem>>, vector<1x128xf32>
    %659 = tpu.concatenate %653, %655, %657 in 1 : vector<32x128xbf16>, vector<32x128xbf16>, vector<32x128xbf16> -> vector<32x384xbf16>
    %c0_443 = arith.constant 0 : index
    %c0_444 = arith.constant 0 : index
    %c0_445 = arith.constant 0 : index
    %660 = vector.load %arg56[%c0_443, %c0_444, %c0_445] : memref<3x128x128xbf16, #tpu.memory_space<vmem>>, vector<3x128x128xbf16>
    %661 = vector.shape_cast %660 : vector<3x128x128xbf16> to vector<384x128xbf16>
    %cst_446 = arith.constant dense<0.000000e+00> : vector<32x128xf32>
    %662 = tpu.matmul %659, %661, %cst_446 {dimension_numbers = #tpu.dot_dimension_numbers<[1], [0], [0], [1], [0, 0, 1, 1], [], []>} : vector<32x384xbf16>, vector<384x128xbf16>, vector<32x128xf32> -> vector<32x128xf32>
    %663 = vector.broadcast %658 : vector<1x128xf32> to vector<32x128xf32>
    %664 = arith.addf %662, %663 : vector<32x128xf32>
    %cst_447 = arith.constant 0.000000e+00 : f32
    %665 = vector.broadcast %cst_447 : f32 to vector<32x128xf32>
    %666 = arith.maximumf %664, %665 : vector<32x128xf32>
    %c0_448 = arith.constant 0 : index
    %c0_449 = arith.constant 0 : index
    %667 = vector.load %arg25[%c0_448, %c0_449] : memref<2x32xbf16, #tpu.memory_space<vmem>>, vector<2x32xbf16>
    %668 = arith.truncf %666 : vector<32x128xf32> to vector<32x128xbf16>
    %cst_450 = arith.constant dense<0.000000e+00> : vector<2x128xf32>
    %669 = tpu.matmul %667, %668, %cst_450 {dimension_numbers = #tpu.dot_dimension_numbers<[1], [0], [0], [1], [0, 0, 1, 1], [], []>} : vector<2x32xbf16>, vector<32x128xbf16>, vector<2x128xf32> -> vector<2x128xf32>
    %670 = arith.truncf %669 : vector<2x128xf32> to vector<2x128xbf16>
    %c0_451 = arith.constant 0 : index
    %c0_452 = arith.constant 0 : index
    %671 = vector.load %arg35[%c0_451, %c0_452] : memref<128x128xbf16, #tpu.memory_space<vmem>>, vector<128x128xbf16>
    %cst_453 = arith.constant dense<0.000000e+00> : vector<2x128xf32>
    %672 = tpu.matmul %670, %671, %cst_453 {dimension_numbers = #tpu.dot_dimension_numbers<[1], [0], [0], [1], [0, 0, 1, 1], [], []>} : vector<2x128xbf16>, vector<128x128xbf16>, vector<2x128xf32> -> vector<2x128xf32>
    %c0_454 = arith.constant 0 : index
    %c0_455 = arith.constant 0 : index
    %673 = vector.load %arg24[%c0_454, %c0_455] : memref<32x2xbf16, #tpu.memory_space<vmem>>, vector<32x2xbf16>
    %cst_456 = arith.constant 0.000000e+00 : f32
    %674 = vector.broadcast %cst_456 : f32 to vector<2x128xf32>
    %675 = arith.subf %674, %672 : vector<2x128xf32>
    %676 = math.exp %675 : vector<2x128xf32>
    %cst_457 = arith.constant 1.000000e+00 : f32
    %677 = vector.broadcast %cst_457 : f32 to vector<2x128xf32>
    %678 = arith.addf %677, %676 : vector<2x128xf32>
    %cst_458 = arith.constant 1.000000e+00 : f32
    %679 = vector.broadcast %cst_458 : f32 to vector<2x128xf32>
    %680 = arith.divf %679, %678 : vector<2x128xf32>
    %681 = arith.truncf %680 : vector<2x128xf32> to vector<2x128xbf16>
    %cst_459 = arith.constant dense<0.000000e+00> : vector<32x128xf32>
    %682 = tpu.matmul %673, %681, %cst_459 {dimension_numbers = #tpu.dot_dimension_numbers<[1], [0], [0], [1], [0, 0, 1, 1], [], []>} : vector<32x2xbf16>, vector<2x128xbf16>, vector<32x128xf32> -> vector<32x128xf32>
    %683 = arith.mulf %666, %682 : vector<32x128xf32>
    %c0_460 = arith.constant 0 : index
    %c0_461 = arith.constant 0 : index
    %684 = vector.load %arg21[%c0_460, %c0_461] : memref<96x32xbf16, #tpu.memory_space<vmem>>, vector<96x32xbf16>
    %685 = arith.truncf %683 : vector<32x128xf32> to vector<32x128xbf16>
    %cst_462 = arith.constant dense<0.000000e+00> : vector<96x128xf32>
    %686 = tpu.matmul %684, %685, %cst_462 {dimension_numbers = #tpu.dot_dimension_numbers<[1], [0], [0], [1], [0, 0, 1, 1], [], []>} : vector<96x32xbf16>, vector<32x128xbf16>, vector<96x128xf32> -> vector<96x128xf32>
    %687 = vector.extract_strided_slice %686 {offsets = [0, 0], sizes = [32, 128], strides = [1, 1]} : vector<96x128xf32> to vector<32x128xf32>
    %688 = arith.truncf %687 : vector<32x128xf32> to vector<32x128xbf16>
    %689 = vector.extract_strided_slice %686 {offsets = [32, 0], sizes = [32, 128], strides = [1, 1]} : vector<96x128xf32> to vector<32x128xf32>
    %690 = arith.truncf %689 : vector<32x128xf32> to vector<32x128xbf16>
    %691 = vector.extract_strided_slice %686 {offsets = [64, 0], sizes = [32, 128], strides = [1, 1]} : vector<96x128xf32> to vector<32x128xf32>
    %692 = arith.truncf %691 : vector<32x128xf32> to vector<32x128xbf16>
    %c0_463 = arith.constant 0 : index
    %c0_464 = arith.constant 0 : index
    %693 = vector.load %arg36[%c0_463, %c0_464] : memref<1x48xf32, #tpu.memory_space<vmem>>, vector<1x48xf32>
    %694 = tpu.concatenate %688, %690, %692 in 1 : vector<32x128xbf16>, vector<32x128xbf16>, vector<32x128xbf16> -> vector<32x384xbf16>
    %c0_465 = arith.constant 0 : index
    %c0_466 = arith.constant 0 : index
    %c0_467 = arith.constant 0 : index
    %695 = vector.load %arg34[%c0_465, %c0_466, %c0_467] : memref<3x128x48xbf16, #tpu.memory_space<vmem>>, vector<3x128x48xbf16>
    %696 = vector.shape_cast %695 : vector<3x128x48xbf16> to vector<384x48xbf16>
    %cst_468 = arith.constant dense<0.000000e+00> : vector<32x48xf32>
    %697 = tpu.matmul %694, %696, %cst_468 {dimension_numbers = #tpu.dot_dimension_numbers<[1], [0], [0], [1], [0, 0, 1, 1], [], []>} : vector<32x384xbf16>, vector<384x48xbf16>, vector<32x48xf32> -> vector<32x48xf32>
    %698 = vector.broadcast %693 : vector<1x48xf32> to vector<32x48xf32>
    %699 = arith.addf %697, %698 : vector<32x48xf32>
    %700 = arith.addf %699, %0 : vector<32x48xf32>
    %c0_469 = arith.constant 0 : index
    %c0_470 = arith.constant 0 : index
    %701 = vector.load %arg64[%c0_469, %c0_470] : memref<32x48xf32, #tpu.memory_space<vmem>>, vector<32x48xf32>
    tpu.vector_store %arg64[%c0_469, %c0_470], %700 {strides = array<i32>} : memref<32x48xf32, #tpu.memory_space<vmem>>, vector<32x48xf32>,
    return
  }
}

</mosaic_0001>

<bundles_post_ra>
// kernel: rbqe_apply.1
= control target key start
LH: loop header
LB: loop body
LE: loop exit
PB: predicated region body
PF: predicated region fallthrough
CT: control target
= control target key end

     0   :  { %s16372_s6 = smov 1   ;;  %s16373_s10 = smov 2   ;;  %s18539_s0 = inlined_call_operand.smem [shape: u32[65], index: -1, kind: input, shape index: {}] }
   0x1   :  { %s16486_s5 = sld [smem:[%s18539_s0]]   ;;  %s16374_s14 = smov 3  }
   0x2   :  { %s16491_s9 = sld [smem:[%s18539_s0 + %s16372_s6]]   ;;  %s16375_s18 = smov 4  }
   0x3   :  { %s16496_s13 = sld [smem:[%s18539_s0 + %s16373_s10]]   ;;  %s16376_s22 = smov 5  }
   0x4   :  { %s16501_s17 = sld [smem:[%s18539_s0 + %s16374_s14]]   ;;  %s16377_s26 = smov 6  }
   0x5   :  { %s16506_s21 = sld [smem:[%s18539_s0 + %s16375_s18]]   ;;  %s16378_s30 = smov 7  }
   0x6   :  { %s16511_s25 = sld [smem:[%s18539_s0 + %s16376_s22]]   ;;  %s16379_s4 = smov 8  }
   0x7   :  { %18584 = sst [smem:[#allocation76_spill]] %s16486_s5  ;;  %s16380_s10 = smov 9  }
   0x8   :  { %18585 = sst [smem:[#allocation77_spill]] %s16491_s9  ;;  %s16381_s15 = smov 10  }
   0x9   :  { %18586 = sst [smem:[#allocation78_spill]] %s16496_s13  ;;  %s16382_s20 = smov 11  }
   0xa   :  { %18587 = sst [smem:[#allocation79_spill]] %s16501_s17  ;;  %s16384_s1 = smov 13  }
   0xb   :  { %s16516_s29 = sld [smem:[%s18539_s0 + %s16377_s26]]   ;;  %s16383_s26 = smov 12  }
   0xc   :  { %18588 = sst [smem:[#allocation80_spill]] %s16511_s25  ;;  %s16385_s7 = smov 14  }
   0xd   :  { %s16521_s3 = sld [smem:[%s18539_s0 + %s16378_s30]]   ;;  %s16387_s22 = smov 16  }
   0xe   :  { %s16526_s8 = sld [smem:[%s18539_s0 + %s16379_s4]]   ;;  %s16388_s28 = smov 17  }
   0xf   :  { %s16531_s14 = sld [smem:[%s18539_s0 + %s16380_s10]]  }
  0x10   :  { %s16536_s19 = sld [smem:[%s18539_s0 + %s16381_s15]]   ;;  %s16386_s15 = smov 15  }
  0x11   :  { %s16541_s24 = sld [smem:[%s18539_s0 + %s16382_s20]]  }
  0x12   :  { %s16546_s30 = sld [smem:[%s18539_s0 + %s16383_s26]]  }
  0x13   :  { %18589 = sst [smem:[#allocation81_spill]] %s16521_s3 }
  0x14   :  { %s16551_s6 = sld [smem:[%s18539_s0 + %s16384_s1]]  }
  0x15   :  { %18590 = sst [smem:[#allocation82_spill]] %s16531_s14 }
  0x16   :  { %s16556_s12 = sld [smem:[%s18539_s0 + %s16385_s7]]   ;;  %s16389_s7 = smov 18  }
  0x17   :  { %18591 = sst [smem:[#allocation83_spill]] %s16541_s24 }
  0x18   :  { %18592 = sst [smem:[#allocation84_spill]] %s16546_s30 }
  0x19   :  { %s16561_s20 = sld [smem:[%s18539_s0 + %s16386_s15]]   ;;  %s16390_s15 = smov 19  }
  0x1a   :  { %s16566_s27 = sld [smem:[%s18539_s0 + %s16387_s22]]   ;;  %s16391_s22 = smov 20  }
  0x1b   :  { %s16571_s4 = sld [smem:[%s18539_s0 + %s16388_s28]]   ;;  %s16392_s28 = smov 21  }
  0x1c   :  { %18593 = sst [smem:[#allocation85_spill]] %s16556_s12 }
  0x1d   :  { %s16576_s24 = sld [smem:[%s18539_s0 + %s16389_s7]]   ;;  %s16393_s7 = smov 22  }
  0x1e   :  { %s16581_s17 = sld [smem:[%s18539_s0 + %s16390_s15]]   ;;  %s16394_s15 = smov 23  }
  0x1f   :  { %s16586_s9 = sld [smem:[%s18539_s0 + %s16391_s22]]   ;;  %s16395_s22 = smov 24  }
  0x20   :  { %18594 = sst [smem:[#allocation86_spill]] %s16566_s27 }
  0x21   :  { %s16591_s5 = sld [smem:[%s18539_s0 + %s16392_s28]]   ;;  %s16396_s28 = smov 25  }
  0x22   :  { %s16606_s27 = sld [smem:[%s18539_s0 + %s16395_s22]]   ;;  %s16399_s22 = smov 28  }
  0x23   :  { %18595 = sst [smem:[#allocation87_spill]] %s16576_s24 }
  0x24   :  { %18596 = sst [smem:[#allocation88_spill]] %s16581_s17 }
  0x25   :  { %s16596_s24 = sld [smem:[%s18539_s0 + %s16393_s7]]   ;;  %s16397_s7 = smov 26  }
  0x26   :  { %s16601_s17 = sld [smem:[%s18539_s0 + %s16394_s15]]   ;;  %s16398_s15 = smov 27  }
  0x27   :  { %18597 = sst [smem:[#allocation89_spill]] %s16591_s5 }
  0x28   :  { %18600 = sst [smem:[#allocation92_spill]] %s16606_s27 }
  0x29   :  { %s16611_s5 = sld [smem:[%s18539_s0 + %s16396_s28]]   ;;  %s16400_s28 = smov 29  }
  0x2a   :  { %s16626_s27 = sld [smem:[%s18539_s0 + %s16399_s22]]   ;;  %s16403_s22 = smov 32  }
  0x2b   :  { %18598 = sst [smem:[#allocation90_spill]] %s16596_s24 }
  0x2c   :  { %18599 = sst [smem:[#allocation91_spill]] %s16601_s17 }
  0x2d   :  { %s16616_s24 = sld [smem:[%s18539_s0 + %s16397_s7]]   ;;  %s16401_s7 = smov 30  }
  0x2e   :  { %s16621_s17 = sld [smem:[%s18539_s0 + %s16398_s15]]   ;;  %s16402_s15 = smov 31  }
  0x2f   :  { %18601 = sst [smem:[#allocation93_spill]] %s16611_s5 }
  0x30   :  { %18604 = sst [smem:[#allocation96_spill]] %s16626_s27 }
  0x31   :  { %s16631_s5 = sld [smem:[%s18539_s0 + %s16400_s28]]   ;;  %s16404_s28 = smov 33  }
  0x32   :  { %s16646_s27 = sld [smem:[%s18539_s0 + %s16403_s22]]   ;;  %s16407_s22 = smov 36  }
  0x33   :  { %18602 = sst [smem:[#allocation94_spill]] %s16616_s24 }
  0x34   :  { %18603 = sst [smem:[#allocation95_spill]] %s16621_s17 }
  0x35   :  { %s16636_s24 = sld [smem:[%s18539_s0 + %s16401_s7]]   ;;  %s16405_s7 = smov 34  }
  0x36   :  { %s16641_s17 = sld [smem:[%s18539_s0 + %s16402_s15]]   ;;  %s16406_s15 = smov 35  }
  0x37   :  { %18605 = sst [smem:[#allocation97_spill]] %s16631_s5 }
  0x38   :  { %18607 = sst [smem:[#allocation99_spill]] %s16646_s27 }
  0x39   :  { %s16651_s5 = sld [smem:[%s18539_s0 + %s16404_s28]]   ;;  %s16408_s28 = smov 37  }
  0x3a   :  { %s16656_s12 = sld [smem:[%s18539_s0 + %s16405_s7]]   ;;  %s16409_s7 = smov 38  }
  0x3b   :  { %s16666_s27 = sld [smem:[%s18539_s0 + %s16407_s22]]   ;;  %s16411_s22 = smov 40  }
  0x3c   :  { %18606 = sst [smem:[#allocation98_spill]] %s16641_s17 }
  0x3d   :  { %s16661_s17 = sld [smem:[%s18539_s0 + %s16406_s15]]   ;;  %s16410_s15 = smov 39  }
  0x3e   :  { %s16681_s30 = sld [smem:[%s18539_s0 + %s16410_s15]]   ;;  %s16414_s15 = smov 43  }
  0x3f   :  { %18608 = sst [smem:[#allocation100_spill]] %s16651_s5 }
  0x40   :  { %18609 = sst [smem:[#allocation101_spill]] %s16656_s12 }
  0x41   :  { %18610 = sst [smem:[#allocation102_spill]] %s16666_s27 }
  0x42   :  { %s16671_s5 = sld [smem:[%s18539_s0 + %s16408_s28]]   ;;  %s16412_s28 = smov 41  }
  0x43   :  { %s16676_s12 = sld [smem:[%s18539_s0 + %s16409_s7]]   ;;  %s16413_s7 = smov 42  }
  0x44   :  { %s16686_s27 = sld [smem:[%s18539_s0 + %s16411_s22]]   ;;  %s16415_s22 = smov 44  }
  0x45   :  { %s16701_s14 = sld [smem:[%s18539_s0 + %s16414_s15]]   ;;  %s16418_s15 = smov 47  }
  0x48   :  { %18611 = sst [smem:[#allocation103_spill]] %s16671_s5 }
  0x49   :  { %18612 = sst [smem:[#allocation104_spill]] %s16676_s12 }
  0x4a   :  { %18613 = sst [smem:[#allocation105_spill]] %s16686_s27 }
  0x4b   :  { %s16691_s5 = sld [smem:[%s18539_s0 + %s16412_s28]]   ;;  %s16416_s28 = smov 45  }
  0x4c   :  { %s16696_s12 = sld [smem:[%s18539_s0 + %s16413_s7]]   ;;  %s16417_s7 = smov 46  }
  0x4d   :  { %18615 = sst [smem:[#allocation107_spill]] %s16701_s14 }
  0x4e   :  { %s16706_s27 = sld [smem:[%s18539_s0 + %s16415_s22]]   ;;  %s16419_s22 = smov 48  }
  0x4f   :  { %s16716_s3 = sld [smem:[%s18539_s0 + %s16417_s7]]   ;;  %s16421_s7 = smov 50  }
  0x50   :  { %s16721_s14 = sld [smem:[%s18539_s0 + %s16418_s15]]   ;;  %s16422_s15 = smov 51  }
  0x51   :  { %18614 = sst [smem:[#allocation106_spill]] %s16691_s5 }
  0x52   :  { %s16711_s5 = sld [smem:[%s18539_s0 + %s16416_s28]]   ;;  %s16420_s28 = smov 49  }
  0x53   :  { %s16726_s25 = sld [smem:[%s18539_s0 + %s16419_s22]]   ;;  %s16423_s22 = smov 52  }
  0x54   :  { %s16741_s13 = sld [smem:[%s18539_s0 + %s16422_s15]]   ;;  %s16426_s15 = smov 55  }
  0x55   :  { %18617 = sst [smem:[#allocation109_spill]] %s16716_s3 }
  0x56   :  { %s16736_s3 = sld [smem:[%s18539_s0 + %s16421_s7]]   ;;  %s16425_s7 = smov 54  }
  0x58   :  { %18616 = sst [smem:[#allocation108_spill]] %s16711_s5 }
  0x59   :  { %18618 = sst [smem:[#allocation110_spill]] %s16726_s25 }
  0x5a   :  { %s16731_s5 = sld [smem:[%s18539_s0 + %s16420_s28]]   ;;  %s16424_s28 = smov 53  }
  0x5b   :  { %18621 = sst [smem:[#allocation113_spill]] %s16741_s13 }
  0x5c   :  { %18620 = sst [smem:[#allocation112_spill]] %s16736_s3 }
  0x5d   :  { %s16746_s25 = sld [smem:[%s18539_s0 + %s16423_s22]]   ;;  %s16427_s22 = smov 56  }
  0x5e   :  { %s16756_s3 = sld [smem:[%s18539_s0 + %s16425_s7]]   ;;  %s16429_s7 = smov 58  }
  0x5f   :  { %s16761_s13 = sld [smem:[%s18539_s0 + %s16426_s15]]   ;;  %s16430_s15 = smov 59  }
  0x60   :  { %18619 = sst [smem:[#allocation111_spill]] %s16731_s5 }
  0x61   :  { %s16751_s5 = sld [smem:[%s18539_s0 + %s16424_s28]]   ;;  %s16428_s28 = smov 57  }
  0x63   :  { %18622 = sst [smem:[#allocation114_spill]] %s16746_s25 }
  0x64   :  { %18624 = sst [smem:[#allocation116_spill]] %s16756_s3 }
  0x65   :  { %18625 = sst [smem:[#allocation117_spill]] %s16761_s13 }
  0x66   :  { %s16766_s25 = sld [smem:[%s18539_s0 + %s16427_s22]]   ;;  %s16431_s22 = smov 60  }
  0x67   :  { %18623 = sst [smem:[#allocation115_spill]] %s16751_s5 }
  0x68   :  { %s16771_s5 = sld [smem:[%s18539_s0 + %s16428_s28]]   ;;  %s16432_s28 = smov 61  }
  0x69   :  { %s16776_s3 = sld [smem:[%s18539_s0 + %s16429_s7]]   ;;  %s16433_s7 = smov 62  }
  0x6a   :  { %s16781_s13 = sld [smem:[%s18539_s0 + %s16430_s15]]   ;;  %s16434_s15 = smov 63  }
  0x6c   :  { %18626 = sst [smem:[#allocation118_spill]] %s16766_s25 }
  0x6d   :  { %s16786_s25 = sld [smem:[%s18539_s0 + %s16431_s22]]   ;;  %s16435_s22 = smov 64  }
  0x6e   :  { %18627 = sst [smem:[#allocation119_spill]] %s16771_s5 }
  0x6f   :  { %18628 = sst [smem:[#allocation120_spill]] %s16776_s3 }
  0x70   :  { %18629 = sst [smem:[#allocation121_spill]] %s16781_s13 }
  0x71   :  { %s16791_s5 = sld [smem:[%s18539_s0 + %s16432_s28]]  }
  0x72   :  { %s16796_s3 = sld [smem:[%s18539_s0 + %s16433_s7]]  }
  0x73   :  { %18630 = sst [smem:[#allocation122_spill]] %s16786_s25 }
  0x74   :  { %s16801_s13 = sld [smem:[%s18539_s0 + %s16434_s15]]  }
  0x75   :  { %s16806_s25 = sld [smem:[%s18539_s0 + %s16435_s22]]  }
  0x76   :  { %134 = vsyncpa [#allocation3], 0 }
  0x77   :  { %135 = vsyncpa [#allocation5], 0 }
  0x78   :  { %136 = vsyncpa [#allocation8], 0 }
  0x79   :  { %137 = vsyncpa [#allocation11], 0 }
  0x7a   :  { %138 = vsyncpa [#allocation14], 0 }
  0x7b   :  { %139 = vsyncpa [#allocation17], 0 }
  0x7c   :  { %140 = vsyncpa [#allocation20], 0 }
  0x7d   :  { %141 = vsyncpa [#allocation23], 0 }
  0x7e   :  { %142 = vsyncpa [#allocation26], 0 }
  0x7f   :  { %143 = vsyncpa [#allocation29], 0 }
  0x80   :  { %144 = vsyncpa [#allocation32], 0 }
  0x81   :  { %145 = vsyncpa [#allocation35], 0 }
  0x82   :  { %146 = vsyncpa [#allocation38], 0 }
  0x83   :  { %147 = vsyncpa [#allocation41], 0 }
  0x84   :  { %148 = vsyncpa [#allocation44], 0 }
  0x85   :  { %149 = vsyncpa [#allocation47], 0 }
  0x86   :  { %150 = vsyncpa [#allocation50], 0 }
  0x87   :  { %151 = vsyncpa [#allocation53], 0 }
  0x88   :  { %152 = vsyncpa [#allocation56], 0  ;;  %s16436_s0 = smov [#allocation4]   ;;  %s16437_s1 = smov [#allocation7]  }
  0x89   :  { %s176_s28 = sshll.u32 %s16436_s0, 4  ;;  %s201_s2 = sshll.u32 %s16437_s1, 4  ;;  %s177_s28 = int_to_ptr.vmem [resolvable:$true] %s176_s28  ;;  %s16808_s2 = int_to_ptr.vmem [resolvable:$true] %s201_s2 }
  0x8a   :  { %s15542_s7 = scalar_lea.hbm %s16506_s21, 1024 }
  0x8b   :  { %p15543_p0 = scmp.ne.s32.totalorder %s16506_s21, %s15542_s7  ;;  %p15546_p1 = scmp.lt.u32.totalorder %s15542_s7, %s16506_s21 }
  0x8d   :  { %p15548_p2 = pnand %p15546_p1, %p15543_p0 }
  0x8f   :  { %15551 = shalt.err (!%p15548_p2)
}
  0x90   :  { %s15552_s10 = scalar_lea.vmem %s177_s28, 1024  ;;  %p15557_p4 = scmp.lt.s32.totalorder %s177_s28, %s177_s28 }
  0x91   :  { %p15553_p3 = scmp.ne.s32.totalorder %s177_s28, %s15552_s10  ;;  %p15558_p5 = scmp.lt.s32.totalorder %s15552_s10, %s15552_s10 }
  0x93   :  { %p15559_p6 = por %p15558_p5, %p15557_p4 }
  0x95   :  { %p15560_p7 = pnand %p15559_p6, %p15553_p3 }
  0x97   :  { %15563 = shalt.err (!%p15560_p7)
}
  0x98   :  { %s16438_s11 = smov 64   ;;  %s16439_s15 = smov 4  }
  0x99   :  { %182 = dma.hbm_to_vmem [thread:$0]  %s16506_s21, 1024, %s177_s28, [#allocation5], %s16438_s11, %s16438_s11, %s16439_s15  }
  0x9a   :  { %s15564_s16 = scalar_lea.hbm %s16516_s29, 16 }
  0x9b   :  { %p15565_p8 = scmp.ne.s32.totalorder %s16516_s29, %s15564_s16  ;;  %p15568_p9 = scmp.lt.u32.totalorder %s15564_s16, %s16516_s29 }
  0x9d   :  { %p15570_p10 = pnand %p15568_p9, %p15565_p8 }
  0x9f   :  { %15573 = shalt.err (!%p15570_p10)
}
  0xa0   :  { %s15574_s18 = scalar_lea.vmem %s16808_s2, 16  ;;  %s15578_s22 = scalar_lea.vmem %s16808_s2, 32 }
  0xa1   :  { %p15575_p11 = scmp.ne.s32.totalorder %s16808_s2, %s15574_s18  ;;  %p15579_p12 = scmp.lt.s32.totalorder %s16808_s2, %s16808_s2 }
  0xa2   :  { %p15580_p13 = scmp.lt.s32.totalorder %s15578_s22, %s15574_s18 }
  0xa4   :  { %p15581_p0 = por %p15580_p13, %p15579_p12 }
  0xa6   :  { %p15582_p1 = pnand %p15581_p0, %p15575_p11 }
  0xa8   :  { %15585 = shalt.err (!%p15582_p1)
}
  0xa9   :  { %204 = dma.hbm_to_vmem [thread:$0]  %s16516_s29, 16, %s16808_s2, [#allocation8]  }
  0xaa   :  { %s16440_s21 = smov [#allocation10]   ;;  %s16441_s26 = smov [#allocation13]  }
  0xab   :  { %s221_s23 = sshll.u32 %s16440_s21, 4  ;;  %s242_s0 = sshll.u32 %s16441_s26, 4  ;;  %s222_s23 = int_to_ptr.vmem [resolvable:$true] %s221_s23  ;;  %s16827_s0 = int_to_ptr.vmem [resolvable:$true] %s242_s0 }
  0xac   :  { %s15586_s28 = scalar_lea.hbm %s16526_s8, 16 }
  0xad   :  { %p15587_p2 = scmp.ne.s32.totalorder %s16526_s8, %s15586_s28  ;;  %p15590_p3 = scmp.lt.u32.totalorder %s15586_s28, %s16526_s8 }
  0xaf   :  { %p15592_p4 = pnand %p15590_p3, %p15587_p2 }
  0xb1   :  { %15595 = shalt.err (!%p15592_p4)
}
  0xb2   :  { %s15596_s1 = scalar_lea.vmem %s222_s23, 16  ;;  %s15600_s7 = scalar_lea.vmem %s222_s23, 32 }
  0xb3   :  { %p15597_p5 = scmp.ne.s32.totalorder %s222_s23, %s15596_s1  ;;  %p15601_p6 = scmp.lt.s32.totalorder %s222_s23, %s222_s23 }
  0xb4   :  { %p15602_p7 = scmp.lt.s32.totalorder %s15600_s7, %s15596_s1 }
  0xb6   :  { %p15603_p8 = por %p15602_p7, %p15601_p6 }
  0xb8   :  { %p15604_p9 = pnand %p15603_p8, %p15597_p5 }
  0xba   :  { %15607 = shalt.err (!%p15604_p9)
}
  0xbb   :  { %224 = dma.hbm_to_vmem [thread:$0]  %s16526_s8, 16, %s222_s23, [#allocation11]  }
  0xbc   :  { %s15608_s29 = scalar_lea.hbm %s16536_s19, 768 }
  0xbd   :  { %p15609_p10 = scmp.ne.s32.totalorder %s16536_s19, %s15608_s29  ;;  %p15612_p11 = scmp.lt.u32.totalorder %s15608_s29, %s16536_s19 }
  0xbf   :  { %p15614_p12 = pnand %p15612_p11, %p15609_p10 }
  0xc1   :  { %15617 = shalt.err (!%p15614_p12)
}
  0xc2   :  { %s15618_s2 = scalar_lea.vmem %s16827_s0, 768  ;;  %p15623_p0 = scmp.lt.s32.totalorder %s16827_s0, %s16827_s0 }
  0xc3   :  { %p15619_p13 = scmp.ne.s32.totalorder %s16827_s0, %s15618_s2  ;;  %p15624_p1 = scmp.lt.s32.totalorder %s15618_s2, %s15618_s2 }
  0xc5   :  { %p15625_p2 = por %p15624_p1, %p15623_p0 }
  0xc7   :  { %p15626_p3 = pnand %p15625_p2, %p15619_p13 }
  0xc9   :  { %15629 = shalt.err (!%p15626_p3)
}
  0xca   :  { %248 = dma.hbm_to_vmem [thread:$0]  %s16536_s19, 768, %s16827_s0, [#allocation14], %s16438_s11, %s16438_s11, %s16439_s15  }
  0xcb   :  { %s16442_s8 = smov [#allocation16]   ;;  %s16443_s16 = smov [#allocation19]  }
  0xcc   :  { %s268_s10 = sshll.u32 %s16442_s8, 4  ;;  %s291_s18 = sshll.u32 %s16443_s16, 4  ;;  %s269_s10 = int_to_ptr.vmem [resolvable:$true] %s268_s10  ;;  %s292_s18 = int_to_ptr.vmem [resolvable:$true] %s291_s18 }
  0xcd   :  { %s15630_s22 = scalar_lea.hbm %s16551_s6, 256 }
  0xce   :  { %p15631_p4 = scmp.ne.s32.totalorder %s16551_s6, %s15630_s22  ;;  %p15634_p5 = scmp.lt.u32.totalorder %s15630_s22, %s16551_s6 }
  0xd0   :  { %p15636_p6 = pnand %p15634_p5, %p15631_p4 }
  0xd2   :  { %15639 = shalt.err (!%p15636_p6)
}
  0xd3   :  { %s15640_s21 = scalar_lea.vmem %s269_s10, 256  ;;  %p15645_p8 = scmp.lt.s32.totalorder %s269_s10, %s269_s10 }
  0xd4   :  { %p15641_p7 = scmp.ne.s32.totalorder %s269_s10, %s15640_s21  ;;  %p15646_p9 = scmp.lt.s32.totalorder %s15640_s21, %s15640_s21 }
  0xd6   :  { %p15647_p10 = por %p15646_p9, %p15645_p8 }
  0xd8   :  { %p15648_p11 = pnand %p15647_p10, %p15641_p7 }
  0xda   :  { %15651 = shalt.err (!%p15648_p11)
}
  0xdb   :  { %274 = dma.hbm_to_vmem [thread:$0]  %s16551_s6, 256, %s269_s10, [#allocation17], %s16438_s11, %s16438_s11, %s16439_s15  }
  0xdc   :  { %s15652_s19 = scalar_lea.hbm %s16561_s20, 16 }
  0xdd   :  { %p15653_p12 = scmp.ne.s32.totalorder %s16561_s20, %s15652_s19  ;;  %p15656_p13 = scmp.lt.u32.totalorder %s15652_s19, %s16561_s20 }
  0xdf   :  { %p15658_p0 = pnand %p15656_p13, %p15653_p12 }
  0xe1   :  { %15661 = shalt.err (!%p15658_p0)
}
  0xe2   :  { %s15662_s23 = scalar_lea.vmem %s292_s18, 16  ;;  %s15666_s26 = scalar_lea.vmem %s292_s18, 32 }
  0xe3   :  { %p15663_p1 = scmp.ne.s32.totalorder %s292_s18, %s15662_s23  ;;  %p15667_p2 = scmp.lt.s32.totalorder %s292_s18, %s292_s18 }
  0xe4   :  { %p15668_p3 = scmp.lt.s32.totalorder %s15666_s26, %s15662_s23 }
  0xe6   :  { %p15669_p4 = por %p15668_p3, %p15667_p2 }
  0xe8   :  { %p15670_p5 = pnand %p15669_p4, %p15663_p1 }
  0xea   :  { %15673 = shalt.err (!%p15670_p5)
}
  0xeb   :  { %294 = dma.hbm_to_vmem [thread:$0]  %s16561_s20, 16, %s292_s18, [#allocation20]  }
  0xec   :  { %s16444_s0 = smov [#allocation22]   ;;  %s16445_s28 = smov [#allocation25]  }
  0xed   :  { %s310_s6 = sshll.u32 %s16444_s0, 4  ;;  %s335_s1 = sshll.u32 %s16445_s28, 4  ;;  %s311_s6 = int_to_ptr.vmem [resolvable:$true] %s310_s6  ;;  %s336_s1 = int_to_ptr.vmem [resolvable:$true] %s335_s1 }
  0xee   :  { %s15674_s7 = scalar_lea.hbm %s16571_s4, 1152 }
  0xef   :  { %p15675_p6 = scmp.ne.s32.totalorder %s16571_s4, %s15674_s7  ;;  %p15678_p7 = scmp.lt.u32.totalorder %s15674_s7, %s16571_s4 }
  0xf1   :  { %p15680_p8 = pnand %p15678_p7, %p15675_p6 }
  0xf3   :  { %15683 = shalt.err (!%p15680_p8)
}
  0xf4   :  { %s15684_s29 = scalar_lea.vmem %s311_s6, 1152  ;;  %p15689_p10 = scmp.lt.s32.totalorder %s311_s6, %s311_s6 }
  0xf5   :  { %p15685_p9 = scmp.ne.s32.totalorder %s311_s6, %s15684_s29  ;;  %p15690_p11 = scmp.lt.s32.totalorder %s15684_s29, %s15684_s29 }
  0xf7   :  { %p15691_p12 = por %p15690_p11, %p15689_p10 }
  0xf9   :  { %p15692_p13 = pnand %p15691_p12, %p15685_p9 }
  0xfb   :  { %15695 = shalt.err (!%p15692_p13)
}
  0xfc   :  { %316 = dma.hbm_to_vmem [thread:$0]  %s16571_s4, 1152, %s311_s6, [#allocation23], %s16438_s11, %s16438_s11, %s16439_s15  }
  0xfd   :  { %s15696_s20 = scalar_lea.hbm %s16586_s9, 16 }
  0xfe   :  { %p15697_p0 = scmp.ne.s32.totalorder %s16586_s9, %s15696_s20  ;;  %p15700_p1 = scmp.lt.u32.totalorder %s15696_s20, %s16586_s9 }
 0x100   :  { %p15702_p2 = pnand %p15700_p1, %p15697_p0 }
 0x102   :  { %15705 = shalt.err (!%p15702_p2)
}
 0x103   :  { %s15706_s2 = scalar_lea.vmem %s336_s1, 16  ;;  %s15710_s8 = scalar_lea.vmem %s336_s1, 32 }
 0x104   :  { %p15707_p3 = scmp.ne.s32.totalorder %s336_s1, %s15706_s2  ;;  %p15711_p4 = scmp.lt.s32.totalorder %s336_s1, %s336_s1 }
 0x105   :  { %p15712_p5 = scmp.lt.s32.totalorder %s15710_s8, %s15706_s2 }
 0x107   :  { %p15713_p6 = por %p15712_p5, %p15711_p4 }
 0x109   :  { %p15714_p7 = pnand %p15713_p6, %p15707_p3 }
 0x10b   :  { %15717 = shalt.err (!%p15714_p7)
}
 0x10c   :  { %338 = dma.hbm_to_vmem [thread:$0]  %s16586_s9, 16, %s336_s1, [#allocation26]  }
 0x10d   :  { %s16446_s10 = smov [#allocation28]   ;;  %s16447_s16 = smov [#allocation31]  }
 0x10e   :  { %s371_s4 = sshll.u32 %s16446_s10, 4  ;;  %s396_s18 = sshll.u32 %s16447_s16, 4  ;;  %s372_s4 = int_to_ptr.vmem [resolvable:$true] %s371_s4  ;;  %s16867_s18 = int_to_ptr.vmem [resolvable:$true] %s396_s18 }
 0x10f   :  { %s15718_s22 = scalar_lea.hbm %s16636_s24, 16 }
 0x110   :  { %p15719_p8 = scmp.ne.s32.totalorder %s16636_s24, %s15718_s22  ;;  %p15722_p9 = scmp.lt.u32.totalorder %s15718_s22, %s16636_s24 }
 0x112   :  { %p15724_p10 = pnand %p15722_p9, %p15719_p8 }
 0x114   :  { %15727 = shalt.err (!%p15724_p10)
}
 0x115   :  { %s15728_s21 = scalar_lea.vmem %s372_s4, 16  ;;  %s15732_s19 = scalar_lea.vmem %s372_s4, 32 }
 0x116   :  { %p15729_p11 = scmp.ne.s32.totalorder %s372_s4, %s15728_s21  ;;  %p15733_p12 = scmp.lt.s32.totalorder %s372_s4, %s372_s4 }
 0x117   :  { %p15734_p13 = scmp.lt.s32.totalorder %s15732_s19, %s15728_s21 }
 0x119   :  { %p15735_p0 = por %p15734_p13, %p15733_p12 }
 0x11b   :  { %p15736_p1 = pnand %p15735_p0, %p15729_p11 }
 0x11d   :  { %15739 = shalt.err (!%p15736_p1)
}
 0x11e   :  { %374 = dma.hbm_to_vmem [thread:$0]  %s16636_s24, 16, %s372_s4, [#allocation29]  }
 0x11f   :  { %s15740_s9 = scalar_lea.hbm %s16661_s17, 1024 }
 0x120   :  { %p15741_p2 = scmp.ne.s32.totalorder %s16661_s17, %s15740_s9  ;;  %p15744_p3 = scmp.lt.u32.totalorder %s15740_s9, %s16661_s17 }
 0x122   :  { %p15746_p4 = pnand %p15744_p3, %p15741_p2 }
 0x124   :  { %15749 = shalt.err (!%p15746_p4)
}
 0x125   :  { %s15750_s23 = scalar_lea.vmem %s16867_s18, 1024  ;;  %p15755_p6 = scmp.lt.s32.totalorder %s16867_s18, %s16867_s18 }
 0x126   :  { %p15751_p5 = scmp.ne.s32.totalorder %s16867_s18, %s15750_s23  ;;  %p15756_p7 = scmp.lt.s32.totalorder %s15750_s23, %s15750_s23 }
 0x128   :  { %p15757_p8 = por %p15756_p7, %p15755_p6 }
 0x12a   :  { %p15758_p9 = pnand %p15757_p8, %p15751_p5 }
 0x12c   :  { %15761 = shalt.err (!%p15758_p9)
}
 0x12d   :  { %402 = dma.hbm_to_vmem [thread:$0]  %s16661_s17, 1024, %s16867_s18, [#allocation32], %s16438_s11, %s16438_s11, %s16439_s15  }
 0x12e   :  { %s16448_s24 = smov [#allocation34]   ;;  %s16449_s0 = smov [#allocation37]  }
 0x12f   :  { %s422_s26 = sshll.u32 %s16448_s24, 4  ;;  %s448_s6 = sshll.u32 %s16449_s0, 4  ;;  %s423_s26 = int_to_ptr.vmem [resolvable:$true] %s422_s26  ;;  %s16885_s6 = int_to_ptr.vmem [resolvable:$true] %s448_s6 }
 0x130   :  { %s15762_s28 = scalar_lea.hbm %s16681_s30, 1536 }
 0x131   :  { %p15763_p10 = scmp.ne.s32.totalorder %s16681_s30, %s15762_s28  ;;  %p15766_p11 = scmp.lt.u32.totalorder %s15762_s28, %s16681_s30 }
 0x133   :  { %p15768_p12 = pnand %p15766_p11, %p15763_p10 }
 0x135   :  { %15771 = shalt.err (!%p15768_p12)
}
 0x136   :  { %s15772_s1 = scalar_lea.vmem %s423_s26, 1536  ;;  %p15777_p0 = scmp.lt.s32.totalorder %s423_s26, %s423_s26 }
 0x137   :  { %p15773_p13 = scmp.ne.s32.totalorder %s423_s26, %s15772_s1  ;;  %p15778_p1 = scmp.lt.s32.totalorder %s15772_s1, %s15772_s1 }
 0x139   :  { %p15779_p2 = por %p15778_p1, %p15777_p0 }
 0x13b   :  { %p15780_p3 = pnand %p15779_p2, %p15773_p13 }
 0x13d   :  { %15783 = shalt.err (!%p15780_p3)
}
 0x13e   :  { %428 = dma.hbm_to_vmem [thread:$0]  %s16681_s30, 1536, %s423_s26, [#allocation35], %s16438_s11, %s16438_s11, %s16439_s15  }
 0x13f   :  { %s15784_s17 = scalar_lea.hbm %s16696_s12, 1024 }
 0x140   :  { %p15785_p4 = scmp.ne.s32.totalorder %s16696_s12, %s15784_s17  ;;  %p15788_p5 = scmp.lt.u32.totalorder %s15784_s17, %s16696_s12 }
 0x142   :  { %p15790_p6 = pnand %p15788_p5, %p15785_p4 }
 0x144   :  { %15793 = shalt.err (!%p15790_p6)
}
 0x145   :  { %s15794_s7 = scalar_lea.vmem %s16885_s6, 1024  ;;  %p15799_p8 = scmp.lt.s32.totalorder %s16885_s6, %s16885_s6 }
 0x146   :  { %p15795_p7 = scmp.ne.s32.totalorder %s16885_s6, %s15794_s7  ;;  %p15800_p9 = scmp.lt.s32.totalorder %s15794_s7, %s15794_s7 }
 0x148   :  { %p15801_p10 = por %p15800_p9, %p15799_p8 }
 0x14a   :  { %p15802_p11 = pnand %p15801_p10, %p15795_p7 }
 0x14c   :  { %15805 = shalt.err (!%p15802_p11)
}
 0x14d   :  { %454 = dma.hbm_to_vmem [thread:$0]  %s16696_s12, 1024, %s16885_s6, [#allocation38], %s16438_s11, %s16438_s11, %s16439_s15  }
 0x14e   :  { %s16450_s30 = smov [#allocation40]   ;;  %s16451_s20 = smov [#allocation43]  }
 0x14f   :  { %s471_s29 = sshll.u32 %s16450_s30, 4  ;;  %s494_s2 = sshll.u32 %s16451_s20, 4  ;;  %s472_s29 = int_to_ptr.vmem [resolvable:$true] %s471_s29  ;;  %s16906_s2 = int_to_ptr.vmem [resolvable:$true] %s494_s2 }
 0x150   :  { %s15806_s8 = scalar_lea.hbm %s16706_s27, 16 }
 0x151   :  { %p15807_p12 = scmp.ne.s32.totalorder %s16706_s27, %s15806_s8  ;;  %p15810_p13 = scmp.lt.u32.totalorder %s15806_s8, %s16706_s27 }
 0x153   :  { %p15812_p0 = pnand %p15810_p13, %p15807_p12 }
 0x155   :  { %15815 = shalt.err (!%p15812_p0)
}
 0x156   :  { %s15816_s10 = scalar_lea.vmem %s472_s29, 16  ;;  %s15820_s4 = scalar_lea.vmem %s472_s29, 32 }
 0x157   :  { %p15817_p1 = scmp.ne.s32.totalorder %s472_s29, %s15816_s10  ;;  %p15821_p2 = scmp.lt.s32.totalorder %s472_s29, %s472_s29 }
 0x158   :  { %p15822_p3 = scmp.lt.s32.totalorder %s15820_s4, %s15816_s10 }
 0x15a   :  { %p15823_p4 = por %p15822_p3, %p15821_p2 }
 0x15c   :  { %p15824_p5 = pnand %p15823_p4, %p15817_p1 }
 0x15e   :  { %15827 = shalt.err (!%p15824_p5)
}
 0x15f   :  { %474 = dma.hbm_to_vmem [thread:$0]  %s16706_s27, 16, %s472_s29, [#allocation41]  }
 0x160   :  { %s15828_s12 = scalar_lea.hbm %s16721_s14, 1536 }
 0x161   :  { %p15829_p6 = scmp.ne.s32.totalorder %s16721_s14, %s15828_s12  ;;  %p15832_p7 = scmp.lt.u32.totalorder %s15828_s12, %s16721_s14 }
 0x163   :  { %p15834_p8 = pnand %p15832_p7, %p15829_p6 }
 0x165   :  { %15837 = shalt.err (!%p15834_p8)
}
 0x166   :  { %s15838_s16 = scalar_lea.vmem %s16906_s2, 1536  ;;  %p15843_p10 = scmp.lt.s32.totalorder %s16906_s2, %s16906_s2 }
 0x167   :  { %p15839_p9 = scmp.ne.s32.totalorder %s16906_s2, %s15838_s16  ;;  %p15844_p11 = scmp.lt.s32.totalorder %s15838_s16, %s15838_s16 }
 0x169   :  { %p15845_p12 = por %p15844_p11, %p15843_p10 }
 0x16b   :  { %p15846_p13 = pnand %p15845_p12, %p15839_p9 }
 0x16d   :  { %15849 = shalt.err (!%p15846_p13)
}
 0x16e   :  { %s18631_s27 = sld [smem:[#allocation111_spill]]  ;;  %s16452_s18 = smov [#allocation46]  }
 0x16f   :  { %500 = dma.hbm_to_vmem [thread:$0]  %s16721_s14, 1536, %s16906_s2, [#allocation44], %s16438_s11, %s16438_s11, %s16439_s15  }
 0x170   :  { %s518_s22 = sshll.u32 %s16452_s18, 4  ;;  %s519_s22 = int_to_ptr.vmem [resolvable:$true] %s518_s22 }
 0x174   :  { %s15850_s21 = scalar_lea.hbm %s18631_s27, 256 }
 0x175   :  { %p15851_p0 = scmp.ne.s32.totalorder %s18631_s27, %s15850_s21  ;;  %p15854_p1 = scmp.lt.u32.totalorder %s15850_s21, %s18631_s27 }
 0x177   :  { %p15856_p2 = pnand %p15854_p1, %p15851_p0 }
 0x179   :  { %15859 = shalt.err (!%p15856_p2)
}
 0x17a   :  { %s15860_s19 = scalar_lea.vmem %s519_s22, 256  ;;  %p15865_p4 = scmp.lt.s32.totalorder %s519_s22, %s519_s22 }
 0x17b   :  { %p15861_p3 = scmp.ne.s32.totalorder %s519_s22, %s15860_s19  ;;  %p15866_p5 = scmp.lt.s32.totalorder %s15860_s19, %s15860_s19 }
 0x17d   :  { %p15867_p6 = por %p15866_p5, %p15865_p4 }
 0x17f   :  { %p15868_p7 = pnand %p15867_p6, %p15861_p3 }
 0x181   :  { %15871 = shalt.err (!%p15868_p7)
}
 0x182   :  { %s18632_s14 = sld [smem:[#allocation116_spill]]  ;;  %s16453_s9 = smov [#allocation49]  }
 0x183   :  { %524 = dma.hbm_to_vmem [thread:$0]  %s18631_s27, 256, %s519_s22, [#allocation47], %s16438_s11, %s16438_s11, %s16439_s15  }
 0x184   :  { %s548_s23 = sshll.u32 %s16453_s9, 4  ;;  %s16454_s24 = smov [#allocation52]   ;;  %s549_s23 = int_to_ptr.vmem [resolvable:$true] %s548_s23 }
 0x185   :  { %s576_s26 = sshll.u32 %s16454_s24, 4  ;;  %s577_s26 = int_to_ptr.vmem [resolvable:$true] %s576_s26 }
 0x188   :  { %s15872_s0 = scalar_lea.hbm %s18632_s14, 256 }
 0x189   :  { %p15873_p8 = scmp.ne.s32.totalorder %s18632_s14, %s15872_s0  ;;  %p15876_p9 = scmp.lt.u32.totalorder %s15872_s0, %s18632_s14 }
 0x18b   :  { %p15878_p10 = pnand %p15876_p9, %p15873_p8 }
 0x18d   :  { %15881 = shalt.err (!%p15878_p10)
}
 0x18e   :  { %s15882_s6 = scalar_lea.vmem %s549_s23, 256  ;;  %p15887_p12 = scmp.lt.s32.totalorder %s549_s23, %s549_s23 }
 0x18f   :  { %p15883_p11 = scmp.ne.s32.totalorder %s549_s23, %s15882_s6  ;;  %p15888_p13 = scmp.lt.s32.totalorder %s15882_s6, %s15882_s6 }
 0x191   :  { %p15889_p0 = por %p15888_p13, %p15887_p12 }
 0x193   :  { %p15890_p1 = pnand %p15889_p0, %p15883_p11 }
 0x195   :  { %15893 = shalt.err (!%p15890_p1)
}
 0x196   :  { %s16455_s28 = smov 128   ;;  %s18633_s1 = sld [smem:[#allocation120_spill]] }
 0x197   :  { %s16456_s17 = smov 8  }
 0x198   :  { %554 = dma.hbm_to_vmem [thread:$0]  %s18632_s14, 256, %s549_s23, [#allocation50], %s16455_s28, %s16455_s28, %s16456_s17  }
 0x19c   :  { %s15894_s7 = scalar_lea.hbm %s18633_s1, 576 }
 0x19d   :  { %p15895_p2 = scmp.ne.s32.totalorder %s18633_s1, %s15894_s7  ;;  %p15898_p3 = scmp.lt.u32.totalorder %s15894_s7, %s18633_s1 }
 0x19f   :  { %p15900_p4 = pnand %p15898_p3, %p15895_p2 }
 0x1a1   :  { %15903 = shalt.err (!%p15900_p4)
}
 0x1a2   :  { %s15904_s30 = scalar_lea.vmem %s577_s26, 576  ;;  %p15909_p6 = scmp.lt.s32.totalorder %s577_s26, %s577_s26 }
 0x1a3   :  { %p15905_p5 = scmp.ne.s32.totalorder %s577_s26, %s15904_s30  ;;  %p15910_p7 = scmp.lt.s32.totalorder %s15904_s30, %s15904_s30 }
 0x1a5   :  { %p15911_p8 = por %p15910_p7, %p15909_p6 }
 0x1a7   :  { %p15912_p9 = pnand %p15911_p8, %p15905_p5 }
 0x1a9   :  { %15915 = shalt.err (!%p15912_p9)
}
 0x1aa   :  { %s18634_s29 = sld [smem:[#allocation78_spill]]  ;;  %s16457_s20 = smov [#allocation2]  }
 0x1ab   :  { %582 = dma.hbm_to_vmem [thread:$0]  %s18633_s1, 576, %s577_s26, [#allocation53], %s16438_s11, %s16438_s11, %s16439_s15  }
 0x1ac   :  { %s162_s2 = sshll.u32 %s16457_s20, 4  ;;  %s16458_s8 = smov [#allocation6]   ;;  %s163_s2 = int_to_ptr.vmem [resolvable:$true] %s162_s2 }
 0x1ad   :  { %s188_s10 = sshll.u32 %s16458_s8, 4  ;;  %s189_s10 = int_to_ptr.vmem [resolvable:$true] %s188_s10 }
 0x1b0   :  { %s15916_s4 = scalar_lea.hbm %s18634_s29, 1536 }
 0x1b1   :  { %p15917_p10 = scmp.ne.s32.totalorder %s18634_s29, %s15916_s4  ;;  %p15920_p11 = scmp.lt.u32.totalorder %s15916_s4, %s18634_s29 }
 0x1b3   :  { %p15922_p12 = pnand %p15920_p11, %p15917_p10 }
 0x1b5   :  { %15925 = shalt.err (!%p15922_p12)
}
 0x1b6   :  { %s15926_s12 = scalar_lea.vmem %s163_s2, 1536  ;;  %p15931_p0 = scmp.lt.s32.totalorder %s163_s2, %s163_s2 }
 0x1b7   :  { %p15927_p13 = scmp.ne.s32.totalorder %s163_s2, %s15926_s12  ;;  %p15932_p1 = scmp.lt.s32.totalorder %s15926_s12, %s15926_s12 }
 0x1b9   :  { %p15933_p2 = por %p15932_p1, %p15931_p0 }
 0x1bb   :  { %p15934_p3 = pnand %p15933_p2, %p15927_p13 }
 0x1bd   :  { %15937 = shalt.err (!%p15934_p3)
}
 0x1be   :  { %s18635_s16 = sld [smem:[#allocation80_spill]] }
 0x1bf   :  { %168 = dma.hbm_to_vmem [thread:$0]  %s18634_s29, 1536, %s163_s2, [#allocation3], %s16438_s11, %s16438_s11, %s16439_s15  }
 0x1c4   :  { %s15938_s27 = scalar_lea.hbm %s18635_s16, 512 }
 0x1c5   :  { %p15939_p4 = scmp.ne.s32.totalorder %s18635_s16, %s15938_s27  ;;  %p15942_p5 = scmp.lt.u32.totalorder %s15938_s27, %s18635_s16 }
 0x1c7   :  { %p15944_p6 = pnand %p15942_p5, %p15939_p4 }
 0x1c9   :  { %15947 = shalt.err (!%p15944_p6)
}
 0x1ca   :  { %s15948_s18 = scalar_lea.vmem %s189_s10, 512  ;;  %p15953_p8 = scmp.lt.s32.totalorder %s189_s10, %s189_s10 }
 0x1cb   :  { %p15949_p7 = scmp.ne.s32.totalorder %s189_s10, %s15948_s18  ;;  %p15954_p9 = scmp.lt.s32.totalorder %s15948_s18, %s15948_s18 }
 0x1cd   :  { %p15955_p10 = por %p15954_p9, %p15953_p8 }
 0x1cf   :  { %p15956_p11 = pnand %p15955_p10, %p15949_p7 }
 0x1d1   :  { %15959 = shalt.err (!%p15956_p11)
}
 0x1d2   :  { %s18636_s22 = sld [smem:[#allocation81_spill]]  ;;  %s16459_s21 = smov [#allocation9]  }
 0x1d3   :  { %194 = dma.hbm_to_vmem [thread:$0]  %s18635_s16, 512, %s189_s10, [#allocation5], %s16438_s11, %s16438_s11, %s16439_s15  }
 0x1d4   :  { %s211_s19 = sshll.u32 %s16459_s21, 4  ;;  %s16460_s14 = smov [#allocation12]   ;;  %s212_s19 = int_to_ptr.vmem [resolvable:$true] %s211_s19 }
 0x1d5   :  { %s230_s9 = sshll.u32 %s16460_s14, 4  ;;  %s231_s9 = int_to_ptr.vmem [resolvable:$true] %s230_s9 }
 0x1d8   :  { %s15960_s23 = scalar_lea.hbm %s18636_s22, 16 }
 0x1d9   :  { %p15961_p12 = scmp.ne.s32.totalorder %s18636_s22, %s15960_s23  ;;  %p15964_p13 = scmp.lt.u32.totalorder %s15960_s23, %s18636_s22 }
 0x1db   :  { %p15966_p0 = pnand %p15964_p13, %p15961_p12 }
 0x1dd   :  { %15969 = shalt.err (!%p15966_p0)
}
 0x1de   :  { %s15970_s24 = scalar_lea.vmem %s212_s19, 16  ;;  %s15974_s26 = scalar_lea.vmem %s212_s19, 32 }
 0x1df   :  { %p15971_p1 = scmp.ne.s32.totalorder %s212_s19, %s15970_s24  ;;  %p15975_p2 = scmp.lt.s32.totalorder %s212_s19, %s212_s19 }
 0x1e0   :  { %p15976_p3 = scmp.lt.s32.totalorder %s15974_s26, %s15970_s24 }
 0x1e2   :  { %p15977_p4 = por %p15976_p3, %p15975_p2 }
 0x1e4   :  { %p15978_p5 = pnand %p15977_p4, %p15971_p1 }
 0x1e6   :  { %15981 = shalt.err (!%p15978_p5)
}
 0x1e7   :  { %s18637_s0 = sld [smem:[#allocation82_spill]] }
 0x1e8   :  { %214 = dma.hbm_to_vmem [thread:$0]  %s18636_s22, 16, %s212_s19, [#allocation8]  }
 0x1ed   :  { %s15982_s6 = scalar_lea.hbm %s18637_s0, 1536 }
 0x1ee   :  { %p15983_p6 = scmp.ne.s32.totalorder %s18637_s0, %s15982_s6  ;;  %p15986_p7 = scmp.lt.u32.totalorder %s15982_s6, %s18637_s0 }
 0x1f0   :  { %p15988_p8 = pnand %p15986_p7, %p15983_p6 }
 0x1f2   :  { %15991 = shalt.err (!%p15988_p8)
}
 0x1f3   :  { %s15992_s1 = scalar_lea.vmem %s231_s9, 1536  ;;  %p15997_p10 = scmp.lt.s32.totalorder %s231_s9, %s231_s9 }
 0x1f4   :  { %p15993_p9 = scmp.ne.s32.totalorder %s231_s9, %s15992_s1  ;;  %p15998_p11 = scmp.lt.s32.totalorder %s15992_s1, %s15992_s1 }
 0x1f6   :  { %p15999_p12 = por %p15998_p11, %p15997_p10 }
 0x1f8   :  { %p16000_p13 = pnand %p15999_p12, %p15993_p9 }
 0x1fa   :  { %16003 = shalt.err (!%p16000_p13)
}
 0x1fb   :  { %s18638_s7 = sld [smem:[#allocation84_spill]]  ;;  %s16461_s30 = smov [#allocation15]  }
 0x1fc   :  { %236 = dma.hbm_to_vmem [thread:$0]  %s18637_s0, 1536, %s231_s9, [#allocation11], %s16438_s11, %s16438_s11, %s16439_s15  }
 0x1fd   :  { %s256_s29 = sshll.u32 %s16461_s30, 4  ;;  %s16462_s20 = smov [#allocation18]   ;;  %s257_s29 = int_to_ptr.vmem [resolvable:$true] %s256_s29 }
 0x1fe   :  { %s281_s2 = sshll.u32 %s16462_s20, 4  ;;  %s282_s2 = int_to_ptr.vmem [resolvable:$true] %s281_s2 }
 0x201   :  { %s16004_s8 = scalar_lea.hbm %s18638_s7, 512 }
 0x202   :  { %p16005_p0 = scmp.ne.s32.totalorder %s18638_s7, %s16004_s8  ;;  %p16008_p1 = scmp.lt.u32.totalorder %s16004_s8, %s18638_s7 }
 0x204   :  { %p16010_p2 = pnand %p16008_p1, %p16005_p0 }
 0x206   :  { %16013 = shalt.err (!%p16010_p2)
}
 0x207   :  { %s16014_s10 = scalar_lea.vmem %s257_s29, 512  ;;  %p16019_p4 = scmp.lt.s32.totalorder %s257_s29, %s257_s29 }
 0x208   :  { %p16015_p3 = scmp.ne.s32.totalorder %s257_s29, %s16014_s10  ;;  %p16020_p5 = scmp.lt.s32.totalorder %s16014_s10, %s16014_s10 }
 0x20a   :  { %p16021_p6 = por %p16020_p5, %p16019_p4 }
 0x20c   :  { %p16022_p7 = pnand %p16021_p6, %p16015_p3 }
 0x20e   :  { %16025 = shalt.err (!%p16022_p7)
}
 0x20f   :  { %s18639_s4 = sld [smem:[#allocation85_spill]] }
 0x210   :  { %262 = dma.hbm_to_vmem [thread:$0]  %s18638_s7, 512, %s257_s29, [#allocation14], %s16438_s11, %s16438_s11, %s16439_s15  }
 0x215   :  { %s16026_s12 = scalar_lea.hbm %s18639_s4, 16 }
 0x216   :  { %p16027_p8 = scmp.ne.s32.totalorder %s18639_s4, %s16026_s12  ;;  %p16030_p9 = scmp.lt.u32.totalorder %s16026_s12, %s18639_s4 }
 0x218   :  { %p16032_p10 = pnand %p16030_p9, %p16027_p8 }
 0x21a   :  { %16035 = shalt.err (!%p16032_p10)
}
 0x21b   :  { %s16036_s16 = scalar_lea.vmem %s282_s2, 16  ;;  %s16040_s27 = scalar_lea.vmem %s282_s2, 32 }
 0x21c   :  { %p16037_p11 = scmp.ne.s32.totalorder %s282_s2, %s16036_s16  ;;  %p16041_p12 = scmp.lt.s32.totalorder %s282_s2, %s282_s2 }
 0x21d   :  { %p16042_p13 = scmp.lt.s32.totalorder %s16040_s27, %s16036_s16 }
 0x21f   :  { %p16043_p0 = por %p16042_p13, %p16041_p12 }
 0x221   :  { %p16044_p1 = pnand %p16043_p0, %p16037_p11 }
 0x223   :  { %16047 = shalt.err (!%p16044_p1)
}
 0x224   :  { %s18640_s18 = sld [smem:[#allocation86_spill]]  ;;  %s16463_s22 = smov [#allocation21]  }
 0x225   :  { %284 = dma.hbm_to_vmem [thread:$0]  %s18639_s4, 16, %s282_s2, [#allocation17]  }
 0x226   :  { %s301_s21 = sshll.u32 %s16463_s22, 4  ;;  %s16464_s19 = smov [#allocation24]   ;;  %s302_s21 = int_to_ptr.vmem [resolvable:$true] %s301_s21 }
 0x227   :  { %s325_s14 = sshll.u32 %s16464_s19, 4  ;;  %s326_s14 = int_to_ptr.vmem [resolvable:$true] %s325_s14 }
 0x22a   :  { %s16048_s9 = scalar_lea.hbm %s18640_s18, 16 }
 0x22b   :  { %p16049_p2 = scmp.ne.s32.totalorder %s18640_s18, %s16048_s9  ;;  %p16052_p3 = scmp.lt.u32.totalorder %s16048_s9, %s18640_s18 }
 0x22d   :  { %p16054_p4 = pnand %p16052_p3, %p16049_p2 }
 0x22f   :  { %16057 = shalt.err (!%p16054_p4)
}
 0x230   :  { %s16058_s23 = scalar_lea.vmem %s302_s21, 16  ;;  %s16062_s24 = scalar_lea.vmem %s302_s21, 32 }
 0x231   :  { %p16059_p5 = scmp.ne.s32.totalorder %s302_s21, %s16058_s23  ;;  %p16063_p6 = scmp.lt.s32.totalorder %s302_s21, %s302_s21 }
 0x232   :  { %p16064_p7 = scmp.lt.s32.totalorder %s16062_s24, %s16058_s23 }
 0x234   :  { %p16065_p8 = por %p16064_p7, %p16063_p6 }
 0x236   :  { %p16066_p9 = pnand %p16065_p8, %p16059_p5 }
 0x238   :  { %16069 = shalt.err (!%p16066_p9)
}
 0x239   :  { %s18641_s26 = sld [smem:[#allocation88_spill]] }
 0x23a   :  { %304 = dma.hbm_to_vmem [thread:$0]  %s18640_s18, 16, %s302_s21, [#allocation20]  }
 0x23f   :  { %s16070_s0 = scalar_lea.hbm %s18641_s26, 16 }
 0x240   :  { %p16071_p10 = scmp.ne.s32.totalorder %s18641_s26, %s16070_s0  ;;  %p16074_p11 = scmp.lt.u32.totalorder %s16070_s0, %s18641_s26 }
 0x242   :  { %p16076_p12 = pnand %p16074_p11, %p16071_p10 }
 0x244   :  { %16079 = shalt.err (!%p16076_p12)
}
 0x245   :  { %s16080_s6 = scalar_lea.vmem %s326_s14, 16  ;;  %s16084_s1 = scalar_lea.vmem %s326_s14, 32 }
 0x246   :  { %p16081_p13 = scmp.ne.s32.totalorder %s326_s14, %s16080_s6  ;;  %p16085_p0 = scmp.lt.s32.totalorder %s326_s14, %s326_s14 }
 0x247   :  { %p16086_p1 = scmp.lt.s32.totalorder %s16084_s1, %s16080_s6 }
 0x249   :  { %p16087_p2 = por %p16086_p1, %p16085_p0 }
 0x24b   :  { %p16088_p3 = pnand %p16087_p2, %p16081_p13 }
 0x24d   :  { %16091 = shalt.err (!%p16088_p3)
}
 0x24e   :  { %s18642_s7 = sld [smem:[#allocation93_spill]]  ;;  %s16465_s30 = smov [#allocation27]  }
 0x24f   :  { %328 = dma.hbm_to_vmem [thread:$0]  %s18641_s26, 16, %s326_s14, [#allocation23]  }
 0x250   :  { %s353_s29 = sshll.u32 %s16465_s30, 4  ;;  %s16466_s20 = smov [#allocation30]   ;;  %s354_s29 = int_to_ptr.vmem [resolvable:$true] %s353_s29 }
 0x251   :  { %s385_s2 = sshll.u32 %s16466_s20, 4  ;;  %s386_s2 = int_to_ptr.vmem [resolvable:$true] %s385_s2 }
 0x254   :  { %s16092_s8 = scalar_lea.hbm %s18642_s7, 16 }
 0x255   :  { %p16093_p4 = scmp.ne.s32.totalorder %s18642_s7, %s16092_s8  ;;  %p16096_p5 = scmp.lt.u32.totalorder %s16092_s8, %s18642_s7 }
 0x257   :  { %p16098_p6 = pnand %p16096_p5, %p16093_p4 }
 0x259   :  { %16101 = shalt.err (!%p16098_p6)
}
 0x25a   :  { %s16102_s10 = scalar_lea.vmem %s354_s29, 16  ;;  %s16106_s4 = scalar_lea.vmem %s354_s29, 32 }
 0x25b   :  { %p16103_p7 = scmp.ne.s32.totalorder %s354_s29, %s16102_s10  ;;  %p16107_p8 = scmp.lt.s32.totalorder %s354_s29, %s354_s29 }
 0x25c   :  { %p16108_p9 = scmp.lt.s32.totalorder %s16106_s4, %s16102_s10 }
 0x25e   :  { %p16109_p10 = por %p16108_p9, %p16107_p8 }
 0x260   :  { %p16110_p11 = pnand %p16109_p10, %p16103_p7 }
 0x262   :  { %16113 = shalt.err (!%p16110_p11)
}
 0x263   :  { %s18643_s12 = sld [smem:[#allocation100_spill]] }
 0x264   :  { %356 = dma.hbm_to_vmem [thread:$0]  %s18642_s7, 16, %s354_s29, [#allocation26]  }
 0x269   :  { %s16114_s16 = scalar_lea.hbm %s18643_s12, 16 }
 0x26a   :  { %p16115_p12 = scmp.ne.s32.totalorder %s18643_s12, %s16114_s16  ;;  %p16118_p13 = scmp.lt.u32.totalorder %s16114_s16, %s18643_s12 }
 0x26c   :  { %p16120_p0 = pnand %p16118_p13, %p16115_p12 }
 0x26e   :  { %16123 = shalt.err (!%p16120_p0)
}
 0x26f   :  { %s16124_s27 = scalar_lea.vmem %s386_s2, 16  ;;  %s16128_s18 = scalar_lea.vmem %s386_s2, 32 }
 0x270   :  { %p16125_p1 = scmp.ne.s32.totalorder %s386_s2, %s16124_s27  ;;  %p16129_p2 = scmp.lt.s32.totalorder %s386_s2, %s386_s2 }
 0x271   :  { %p16130_p3 = scmp.lt.s32.totalorder %s16128_s18, %s16124_s27 }
 0x273   :  { %p16131_p4 = por %p16130_p3, %p16129_p2 }
 0x275   :  { %p16132_p5 = pnand %p16131_p4, %p16125_p1 }
 0x277   :  { %16135 = shalt.err (!%p16132_p5)
}
 0x278   :  { %s18644_s22 = sld [smem:[#allocation102_spill]]  ;;  %s16467_s21 = smov [#allocation33]  }
 0x279   :  { %388 = dma.hbm_to_vmem [thread:$0]  %s18643_s12, 16, %s386_s2, [#allocation29]  }
 0x27a   :  { %s409_s19 = sshll.u32 %s16467_s21, 4  ;;  %s16468_s14 = smov [#allocation36]   ;;  %s410_s19 = int_to_ptr.vmem [resolvable:$true] %s409_s19 }
 0x27b   :  { %s434_s9 = sshll.u32 %s16468_s14, 4  ;;  %s435_s9 = int_to_ptr.vmem [resolvable:$true] %s434_s9 }
 0x27e   :  { %s16136_s23 = scalar_lea.hbm %s18644_s22, 16 }
 0x27f   :  { %p16137_p6 = scmp.ne.s32.totalorder %s18644_s22, %s16136_s23  ;;  %p16140_p7 = scmp.lt.u32.totalorder %s16136_s23, %s18644_s22 }
 0x281   :  { %p16142_p8 = pnand %p16140_p7, %p16137_p6 }
 0x283   :  { %16145 = shalt.err (!%p16142_p8)
}
 0x284   :  { %s16146_s24 = scalar_lea.vmem %s410_s19, 16  ;;  %s16150_s26 = scalar_lea.vmem %s410_s19, 32 }
 0x285   :  { %p16147_p9 = scmp.ne.s32.totalorder %s410_s19, %s16146_s24  ;;  %p16151_p10 = scmp.lt.s32.totalorder %s410_s19, %s410_s19 }
 0x286   :  { %p16152_p11 = scmp.lt.s32.totalorder %s16150_s26, %s16146_s24 }
 0x288   :  { %p16153_p12 = por %p16152_p11, %p16151_p10 }
 0x28a   :  { %p16154_p13 = pnand %p16153_p12, %p16147_p9 }
 0x28c   :  { %16157 = shalt.err (!%p16154_p13)
}
 0x28d   :  { %s18645_s0 = sld [smem:[#allocation105_spill]] }
 0x28e   :  { %412 = dma.hbm_to_vmem [thread:$0]  %s18644_s22, 16, %s410_s19, [#allocation32]  }
 0x293   :  { %s16158_s6 = scalar_lea.hbm %s18645_s0, 256 }
 0x294   :  { %p16159_p0 = scmp.ne.s32.totalorder %s18645_s0, %s16158_s6  ;;  %p16162_p1 = scmp.lt.u32.totalorder %s16158_s6, %s18645_s0 }
 0x296   :  { %p16164_p2 = pnand %p16162_p1, %p16159_p0 }
 0x298   :  { %16167 = shalt.err (!%p16164_p2)
}
 0x299   :  { %s16168_s1 = scalar_lea.vmem %s435_s9, 256  ;;  %p16173_p4 = scmp.lt.s32.totalorder %s435_s9, %s435_s9 }
 0x29a   :  { %p16169_p3 = scmp.ne.s32.totalorder %s435_s9, %s16168_s1  ;;  %p16174_p5 = scmp.lt.s32.totalorder %s16168_s1, %s16168_s1 }
 0x29c   :  { %p16175_p6 = por %p16174_p5, %p16173_p4 }
 0x29e   :  { %p16176_p7 = pnand %p16175_p6, %p16169_p3 }
 0x2a0   :  { %16179 = shalt.err (!%p16176_p7)
}
 0x2a1   :  { %s18646_s7 = sld [smem:[#allocation107_spill]]  ;;  %s16469_s30 = smov [#allocation39]  }
 0x2a2   :  { %440 = dma.hbm_to_vmem [thread:$0]  %s18645_s0, 256, %s435_s9, [#allocation35], %s16438_s11, %s16438_s11, %s16439_s15  }
 0x2a3   :  { %s461_s29 = sshll.u32 %s16469_s30, 4  ;;  %s16470_s20 = smov [#allocation42]   ;;  %s462_s29 = int_to_ptr.vmem [resolvable:$true] %s461_s29 }
 0x2a4   :  { %s480_s2 = sshll.u32 %s16470_s20, 4  ;;  %s481_s2 = int_to_ptr.vmem [resolvable:$true] %s480_s2 }
 0x2a7   :  { %s16180_s8 = scalar_lea.hbm %s18646_s7, 16 }
 0x2a8   :  { %p16181_p8 = scmp.ne.s32.totalorder %s18646_s7, %s16180_s8  ;;  %p16184_p9 = scmp.lt.u32.totalorder %s16180_s8, %s18646_s7 }
 0x2aa   :  { %p16186_p10 = pnand %p16184_p9, %p16181_p8 }
 0x2ac   :  { %16189 = shalt.err (!%p16186_p10)
}
 0x2ad   :  { %s16190_s10 = scalar_lea.vmem %s462_s29, 16  ;;  %s16194_s4 = scalar_lea.vmem %s462_s29, 32 }
 0x2ae   :  { %p16191_p11 = scmp.ne.s32.totalorder %s462_s29, %s16190_s10  ;;  %p16195_p12 = scmp.lt.s32.totalorder %s462_s29, %s462_s29 }
 0x2af   :  { %p16196_p13 = scmp.lt.s32.totalorder %s16194_s4, %s16190_s10 }
 0x2b1   :  { %p16197_p0 = por %p16196_p13, %p16195_p12 }
 0x2b3   :  { %p16198_p1 = pnand %p16197_p0, %p16191_p11 }
 0x2b5   :  { %16201 = shalt.err (!%p16198_p1)
}
 0x2b6   :  { %s18647_s12 = sld [smem:[#allocation108_spill]] }
 0x2b7   :  { %464 = dma.hbm_to_vmem [thread:$0]  %s18646_s7, 16, %s462_s29, [#allocation38]  }
 0x2bc   :  { %s16202_s16 = scalar_lea.hbm %s18647_s12, 512 }
 0x2bd   :  { %p16203_p2 = scmp.ne.s32.totalorder %s18647_s12, %s16202_s16  ;;  %p16206_p3 = scmp.lt.u32.totalorder %s16202_s16, %s18647_s12 }
 0x2bf   :  { %p16208_p4 = pnand %p16206_p3, %p16203_p2 }
 0x2c1   :  { %16211 = shalt.err (!%p16208_p4)
}
 0x2c2   :  { %s16212_s27 = scalar_lea.vmem %s481_s2, 512  ;;  %p16217_p6 = scmp.lt.s32.totalorder %s481_s2, %s481_s2 }
 0x2c3   :  { %p16213_p5 = scmp.ne.s32.totalorder %s481_s2, %s16212_s27  ;;  %p16218_p7 = scmp.lt.s32.totalorder %s16212_s27, %s16212_s27 }
 0x2c5   :  { %p16219_p8 = por %p16218_p7, %p16217_p6 }
 0x2c7   :  { %p16220_p9 = pnand %p16219_p8, %p16213_p5 }
 0x2c9   :  { %16223 = shalt.err (!%p16220_p9)
}
 0x2ca   :  { %s18648_s18 = sld [smem:[#allocation110_spill]]  ;;  %s16471_s22 = smov [#allocation45]  }
 0x2cb   :  { %486 = dma.hbm_to_vmem [thread:$0]  %s18647_s12, 512, %s481_s2, [#allocation41], %s16455_s28, %s16455_s28, %s16456_s17  }
 0x2cc   :  { %s506_s21 = sshll.u32 %s16471_s22, 4  ;;  %s16472_s19 = smov [#allocation48]   ;;  %s507_s21 = int_to_ptr.vmem [resolvable:$true] %s506_s21 }
 0x2cd   :  { %s532_s14 = sshll.u32 %s16472_s19, 4  ;;  %s533_s14 = int_to_ptr.vmem [resolvable:$true] %s532_s14 }
 0x2d0   :  { %s16224_s9 = scalar_lea.hbm %s18648_s18, 768 }
 0x2d1   :  { %p16225_p10 = scmp.ne.s32.totalorder %s18648_s18, %s16224_s9  ;;  %p16228_p11 = scmp.lt.u32.totalorder %s16224_s9, %s18648_s18 }
 0x2d3   :  { %p16230_p12 = pnand %p16228_p11, %p16225_p10 }
 0x2d5   :  { %16233 = shalt.err (!%p16230_p12)
}
 0x2d6   :  { %s16234_s23 = scalar_lea.vmem %s507_s21, 768  ;;  %p16239_p0 = scmp.lt.s32.totalorder %s507_s21, %s507_s21 }
 0x2d7   :  { %p16235_p13 = scmp.ne.s32.totalorder %s507_s21, %s16234_s23  ;;  %p16240_p1 = scmp.lt.s32.totalorder %s16234_s23, %s16234_s23 }
 0x2d9   :  { %p16241_p2 = por %p16240_p1, %p16239_p0 }
 0x2db   :  { %p16242_p3 = pnand %p16241_p2, %p16235_p13 }
 0x2dd   :  { %16245 = shalt.err (!%p16242_p3)
}
 0x2de   :  { %s18649_s24 = sld [smem:[#allocation113_spill]] }
 0x2df   :  { %512 = dma.hbm_to_vmem [thread:$0]  %s18648_s18, 768, %s507_s21, [#allocation44], %s16438_s11, %s16438_s11, %s16439_s15  }
 0x2e4   :  { %s16246_s26 = scalar_lea.hbm %s18649_s24, 512 }
 0x2e5   :  { %p16247_p4 = scmp.ne.s32.totalorder %s18649_s24, %s16246_s26  ;;  %p16250_p5 = scmp.lt.u32.totalorder %s16246_s26, %s18649_s24 }
 0x2e7   :  { %p16252_p6 = pnand %p16250_p5, %p16247_p4 }
 0x2e9   :  { %16255 = shalt.err (!%p16252_p6)
}
 0x2ea   :  { %s16256_s0 = scalar_lea.vmem %s533_s14, 512  ;;  %p16261_p8 = scmp.lt.s32.totalorder %s533_s14, %s533_s14 }
 0x2eb   :  { %p16257_p7 = scmp.ne.s32.totalorder %s533_s14, %s16256_s0  ;;  %p16262_p9 = scmp.lt.s32.totalorder %s16256_s0, %s16256_s0 }
 0x2ed   :  { %p16263_p10 = por %p16262_p9, %p16261_p8 }
 0x2ef   :  { %p16264_p11 = pnand %p16263_p10, %p16257_p7 }
 0x2f1   :  { %16267 = shalt.err (!%p16264_p11)
}
 0x2f2   :  { %s18650_s6 = sld [smem:[#allocation119_spill]]  ;;  %s16473_s1 = smov [#allocation51]  }
 0x2f3   :  { %538 = dma.hbm_to_vmem [thread:$0]  %s18649_s24, 512, %s533_s14, [#allocation47], %s16438_s11, %s16438_s11, %s16439_s15  }
 0x2f4   :  { %s564_s7 = sshll.u32 %s16473_s1, 4  ;;  %s16474_s30 = smov [#allocation54]   ;;  %s565_s7 = int_to_ptr.vmem [resolvable:$true] %s564_s7 }
 0x2f5   :  { %s590_s29 = sshll.u32 %s16474_s30, 4  ;;  %s591_s29 = int_to_ptr.vmem [resolvable:$true] %s590_s29 }
 0x2f8   :  { %s16268_s20 = scalar_lea.hbm %s18650_s6, 1536 }
 0x2f9   :  { %p16269_p12 = scmp.ne.s32.totalorder %s18650_s6, %s16268_s20  ;;  %p16272_p13 = scmp.lt.u32.totalorder %s16268_s20, %s18650_s6 }
 0x2fb   :  { %p16274_p0 = pnand %p16272_p13, %p16269_p12 }
 0x2fd   :  { %16277 = shalt.err (!%p16274_p0)
}
 0x2fe   :  { %s16278_s2 = scalar_lea.vmem %s565_s7, 1536  ;;  %p16283_p2 = scmp.lt.s32.totalorder %s565_s7, %s565_s7 }
 0x2ff   :  { %p16279_p1 = scmp.ne.s32.totalorder %s565_s7, %s16278_s2  ;;  %p16284_p3 = scmp.lt.s32.totalorder %s16278_s2, %s16278_s2 }
 0x301   :  { %p16285_p4 = por %p16284_p3, %p16283_p2 }
 0x303   :  { %p16286_p5 = pnand %p16285_p4, %p16279_p1 }
 0x305   :  { %16289 = shalt.err (!%p16286_p5)
}
 0x306   :  { %s18651_s8 = sld [smem:[#allocation122_spill]] }
 0x307   :  { %570 = dma.hbm_to_vmem [thread:$0]  %s18650_s6, 1536, %s565_s7, [#allocation50], %s16438_s11, %s16438_s11, %s16439_s15  }
 0x30c   :  { %s16290_s10 = scalar_lea.hbm %s18651_s8, 1024 }
 0x30d   :  { %p16291_p6 = scmp.ne.s32.totalorder %s18651_s8, %s16290_s10  ;;  %p16294_p7 = scmp.lt.u32.totalorder %s16290_s10, %s18651_s8 }
 0x30f   :  { %p16296_p8 = pnand %p16294_p7, %p16291_p6 }
 0x311   :  { %16299 = shalt.err (!%p16296_p8)
}
 0x312   :  { %s16300_s4 = scalar_lea.vmem %s591_s29, 1024  ;;  %p16305_p10 = scmp.lt.s32.totalorder %s591_s29, %s591_s29 }
 0x313   :  { %p16301_p9 = scmp.ne.s32.totalorder %s591_s29, %s16300_s4  ;;  %p16306_p11 = scmp.lt.s32.totalorder %s16300_s4, %s16300_s4 }
 0x315   :  { %p16307_p12 = por %p16306_p11, %p16305_p10 }
 0x317   :  { %p16308_p13 = pnand %p16307_p12, %p16301_p9 }
 0x319   :  { %16311 = shalt.err (!%p16308_p13)
}
 0x31a   :  { %596 = dma.hbm_to_vmem [thread:$0]  %s18651_s8, 1024, %s591_s29, [#allocation53], %s16438_s11, %s16438_s11, %s16439_s15  }
 0x31b   :  { %s16475_s12 = smov [#allocation55]   ;;  %s16312_s27 = scalar_lea.hbm %s16801_s13, 512 }
 0x31c   :  { %s606_s16 = sshll.u32 %s16475_s12, 4  ;;  %p16313_p0 = scmp.ne.s32.totalorder %s16801_s13, %s16312_s27  ;;  %s607_s16 = int_to_ptr.vmem [resolvable:$true] %s606_s16 }
 0x31d   :  { %p16316_p1 = scmp.lt.u32.totalorder %s16312_s27, %s16801_s13 }
 0x31f   :  { %p16318_p2 = pnand %p16316_p1, %p16313_p0 }
 0x321   :  { %16321 = shalt.err (!%p16318_p2)
}
 0x322   :  { %s16322_s18 = scalar_lea.vmem %s607_s16, 512  ;;  %p16327_p4 = scmp.lt.s32.totalorder %s607_s16, %s607_s16 }
 0x323   :  { %p16323_p3 = scmp.ne.s32.totalorder %s607_s16, %s16322_s18  ;;  %p16328_p5 = scmp.lt.s32.totalorder %s16322_s18, %s16322_s18 }
 0x325   :  { %p16329_p6 = por %p16328_p5, %p16327_p4 }
 0x327   :  { %p16330_p7 = pnand %p16329_p6, %p16323_p3 }
 0x329   :  { %16333 = shalt.err (!%p16330_p7)
}
 0x32a   :  { %612 = dma.hbm_to_vmem [thread:$0]  %s16801_s13, 512, %s607_s16, [#allocation56], %s16455_s28, %s16455_s28, %s16456_s17  }
 0x32b   :  { %16334 = dma.done.wait [#allocation3], 1536  }
 0x32c   :  { %16335 = vsyncadd [#allocation3], 4294965760 }
 0x32d   :  { %16336 = dma.done.wait [#allocation5], 1536  }
 0x32e   :  { %16337 = vsyncadd [#allocation5], 4294965760 }
 0x32f   :  { %16338 = dma.done.wait [#allocation8], 32  }
 0x330   :  { %16339 = vsyncadd [#allocation8], 4294967264 }
 0x331   :  { %16340 = dma.done.wait [#allocation11], 1552  }
 0x332   :  { %16341 = vsyncadd [#allocation11], 4294965744 }
 0x333   :  { %16342 = dma.done.wait [#allocation14], 1280  }
 0x334   :  { %16343 = vsyncadd [#allocation14], 4294966016 }
 0x335   :  { %16344 = dma.done.wait [#allocation17], 272  }
 0x336   :  { %16345 = vsyncadd [#allocation17], 4294967024 }
 0x337   :  { %16346 = dma.done.wait [#allocation20], 32  }
 0x338   :  { %16347 = vsyncadd [#allocation20], 4294967264 }
 0x339   :  { %16348 = dma.done.wait [#allocation23], 1168  }
 0x33a   :  { %16349 = vsyncadd [#allocation23], 4294966128 }
 0x33b   :  { %16350 = dma.done.wait [#allocation26], 32  }
 0x33c   :  { %16351 = vsyncadd [#allocation26], 4294967264 }
 0x33d   :  { %16352 = dma.done.wait [#allocation29], 32  }
 0x33e   :  { %16353 = vsyncadd [#allocation29], 4294967264 }
 0x33f   :  { %16354 = dma.done.wait [#allocation32], 1040  }
 0x340   :  { %16355 = vsyncadd [#allocation32], 4294966256 }
 0x341   :  { %16356 = dma.done.wait [#allocation35], 1792  }
 0x342   :  { %16357 = vsyncadd [#allocation35], 4294965504 }
 0x343   :  { %16358 = dma.done.wait [#allocation38], 1040  }
 0x344   :  { %16359 = vsyncadd [#allocation38], 4294966256 }
 0x345   :  { %16360 = dma.done.wait [#allocation41], 528  }
 0x346   :  { %16361 = vsyncadd [#allocation41], 4294966768 }
 0x347   :  { %16362 = dma.done.wait [#allocation44], 2304  }
 0x348   :  { %16363 = vsyncadd [#allocation44], 4294964992 }
 0x349   :  { %16364 = dma.done.wait [#allocation47], 768  }
 0x34a   :  { %16365 = vsyncadd [#allocation47], 4294966528 }
 0x34b   :  { %16366 = dma.done.wait [#allocation50], 1792  }
 0x34c   :  { %16367 = vsyncadd [#allocation50], 4294965504 }
 0x34d   :  { %16368 = dma.done.wait [#allocation53], 1600  }
 0x34e   :  { %16369 = vsyncadd [#allocation53], 4294965696 }
 0x34f   :  { %16370 = dma.done.wait [#allocation56], 512  }
 0x350   :  { %16371 = vsyncadd [#allocation56], 4294966784  ;;  %s18652_s13 = sld [smem:[#allocation76_spill]]  ;;  %s18653_s11 = sld [smem:[#allocation89_spill]]  ;;  %vm770_vm0 = vcmask 261120   ;;  %v14938_v12 = vld [vmem:[#allocation22 + $0x18] sm:$0xff]  }
 0x351   :  { %13498 = vmatprep.subr.bf16.mxu1 %v14938_v12  ;;  %v14939_v13 = vld [vmem:[#allocation22 + $0x20] sm:$0xff]   ;;  %v14940_v14 = vld [vmem:[#allocation22 + $0x28] sm:$0xff]   ;;  %vm908_vm1 = vcmask 392192   ;;  %v14943_v30 = vld [vmem:[#allocation22 + $0x10] sm:$0xff]   ;;  %s18654_s15 = sld [smem:[#allocation87_spill]]  ;;  %vm16477_vm2 = vmmov 0  }
 0x352   :  { %13499 = vmatpush3.bf16.msra.mxu1 %v14938_v12  ;;  %v14941_v15 = vld [vmem:[#allocation22] sm:$0xff]   ;;  %v14942_v27 = vld [vmem:[#allocation22 + $0x8] sm:$0xff]   ;;  %v14944_v33 = vld [vmem:[#allocation22 + $0x30] sm:$0xff]   ;;  %s18655_s28 = sld [smem:[#allocation92_spill]]  ;;  %vm1697_vm3 = vcmask 15360   ;;  %s18656_s17 = sld [smem:[#allocation77_spill]] }
 0x353   :  { %13500 = vmatprep.subr.bf16.mxu1 %v14939_v13  ;;  %v14945_v37 = vld [vmem:[#allocation22 + $0x38] sm:$0xff]   ;;  %v14946_v38 = vld [vmem:[#allocation22 + $0x40] sm:$0xff]   ;;  %v11756_v42 = vld [vmem:[#allocation24] ss:$0 sm:$0xff]  ;;  %vm1704_vm4 = vcmask 1040384   ;;  %s18657_s22 = sld [smem:[#allocation79_spill]] }
 0x354   :  { %s18658_s21 = sld [smem:[#allocation90_spill]]  ;;  %vm2528_vm5 = vcmask 130048   ;;  %vm2605_vm6 = vcmask 523264   ;;  %s18659_s19 = sld [smem:[#allocation97_spill]]  ;;  %vm6047_vm7 = vcmask 1043456   ;;  %vm6043_vm8 = vcmask 64512  }
 0x355   :  { %s18660_s14 = sld [smem:[#allocation94_spill]]  ;;  %s18661_s9 = sld [smem:[#allocation91_spill]]  ;;  %vm9009_vm9 = vcmask 195584  }
 0x356   :  { %v722_v0 = vld [vmem:[%s18652_s13] sm:$0xff]  ;;  %v723_v1 = vld [vmem:[%s18652_s13 + $0x8] sm:$0xff]  ;;  %v724_v2 = vld [vmem:[%s18652_s13 + $0x10] sm:$0xff]  ;;  %13501 = vmatpush3.bf16.msra.mxu1 %v14939_v13  ;;  %s18662_s23 = sld [smem:[#allocation106_spill]]  ;;  %s18663_s24 = sld [smem:[#allocation103_spill]] }
 0x357   :  { %v738_v3 = vpack.c.bf16 %v723_v1, %v722_v0  ;;  %v725_v4 = vld [vmem:[%s18652_s13 + $0x18] sm:$0xff]  ;;  %v14932_v6 = vld [vmem:[%s18653_s11] sm:$0xff]   ;;  %v14933_v7 = vld [vmem:[%s18653_s11 + $0x8] sm:$0xff]   ;;  %13502 = vmatprep.subr.bf16.mxu1 %v14940_v14  ;;  %s18664_s26 = sld [smem:[#allocation104_spill]]  ;;  %s18665_s0 = sld [smem:[#allocation95_spill]] }
 0x358   :  { %v739_v5 = vpack.c.bf16 %v725_v4, %v724_v2  ;;  %13486 = vmatprep.mubr.msk.bf16.mxu0 %vm770_vm0, %v14932_v6  ;;  %v14934_v8 = vld [vmem:[%s18653_s11 + $0x10] sm:$0xff]   ;;  %v14935_v9 = vld [vmem:[%s18653_s11 + $0x18] sm:$0xff]   ;;  %v14936_v10 = vld [vmem:[%s18653_s11 + $0x20] sm:$0xff]   ;;  %s18666_s6 = sld [smem:[#allocation83_spill]]  ;;  %s18668_s7 = sld [smem:[#allocation98_spill]] }
 0x359   :  { %13482 = vmatprep.subr.bf16.mxu0 %v738_v3  ;;  %v14937_v11 = vld [vmem:[%s18653_s11 + $0x28] sm:$0xff]   ;;  %v14952_v39 = vld [vmem:[%s18654_s15 + $0x80] sm:$0xff]   ;;  %v14958_v41 = vld [vmem:[%s18654_s15 + $0x90] sm:$0xff]   ;;  %s18667_s1 = sld [smem:[#allocation99_spill]]  ;;  %s18669_s30 = sld [smem:[#allocation96_spill]] }
 0x35a   :  { %13483 = vmatpush3.bf16.msra.mxu0 %v738_v3  ;;  %13503 = vmatpush3.bf16.msra.mxu1 %v14940_v14  ;;  %v14955_v40 = vld [vmem:[%s18654_s15 + $0x88] sm:$0xff]   ;;  %v14947_v57 = vld [vmem:[%s18654_s15 + $0x40] sm:$0xff]   ;;  %v17089_v61 = vld [vmem:[%s18653_s11 + $0x10] sm:$0xff]   ;;  %s18670_s29 = sld [smem:[#allocation112_spill]]  ;;  %s18671_s20 = sld [smem:[#allocation109_spill]] }
 0x35b   :  { %13484 = vmatprep.subr.bf16.mxu0 %v739_v5  ;;  %13508 = vmatprep.subr.bf16.mxu1 %v14941_v15  ;;  %v14948_v58 = vld [vmem:[%s18654_s15] sm:$0xff]   ;;  %v14949_v59 = vld [vmem:[%s18654_s15 + $0x48] sm:$0xff]   ;;  %v14951_v63 = vld [vmem:[%s18654_s15 + $0x50] sm:$0xff]   ;;  %s18672_s2 = sld [smem:[#allocation114_spill]]  ;;  %s18673_s8 = sld [smem:[#allocation115_spill]] }
 0x35c   :  { %v17084_v60 = vld [vmem:[%s18653_s11 + $0x8] sm:$0xff]   ;;  %v14953_v0 = vld [vmem:[%s18654_s15 + $0x10] sm:$0xff]   ;;  %v14954_v1 = vld [vmem:[%s18654_s15 + $0x58] sm:$0xff]   ;;  %s18674_s10 = sld [smem:[#allocation121_spill]]  ;;  %s18675_s4 = sld [smem:[#allocation117_spill]] }
 0x35d   :  { %v14950_v62 = vld [vmem:[%s18654_s15 + $0x8] sm:$0xff]   ;;  %v17098_v2 = vld [vmem:[%s18653_s11 + $0x18] sm:$0xff]   ;;  %v17103_v3 = vld [vmem:[%s18653_s11 + $0x20] sm:$0xff]  }
 0x35e   :  { %13485 = vmatpush3.bf16.msra.mxu0 %v739_v5  ;;  %v14956_v4 = vld [vmem:[%s18654_s15 + $0x18] sm:$0xff]   ;;  %v14957_v5 = vld [vmem:[%s18654_s15 + $0x60] sm:$0xff]   ;;  %v14965_v13 = vld [vmem:[%s18654_s15 + $0x30] sm:$0xff]  }
 0x35f   :  { %v14964_v12 = vld [vmem:[%s18654_s15 + $0xa0] sm:$0xff]   ;;  %v14966_v14 = vld [vmem:[%s18654_s15 + $0x78] sm:$0xff]  }
 0x361   :  { %13487 = vmatmul.mubr.msk.bf16.vlgmr.msra.gmra.mrb[0].mxu0 %vm770_vm0, %v14933_v7  ;;  %v14959_v7 = vld [vmem:[%s18654_s15 + $0x20] sm:$0xff]  }
 0x362   :  { %13490 = vmatprep.mubr.msk.bf16.mxu0 %vm770_vm0, %v14934_v8  ;;  %v14960_v8 = vld [vmem:[%s18654_s15 + $0x68] sm:$0xff]  }
 0x369   :  { %13491 = vmatmul.mubr.msk.bf16.gmra.mrb[4].mxu0 %vm770_vm0, %v14935_v9  ;;  %v14961_v9 = vld [vmem:[%s18654_s15 + $0x98] sm:$0xff]  }
 0x36a   :  { %13494 = vmatprep.mubr.msk.bf16.mxu0 %vm770_vm0, %v14936_v10  ;;  %v14962_v10 = vld [vmem:[%s18654_s15 + $0x28] sm:$0xff]  }
 0x371   :  { %13495 = vmatmul.mubr.msk.bf16.gmra.mrb[8].mxu0 %vm770_vm0, %v14937_v11  ;;  %v14963_v11 = vld [vmem:[%s18654_s15 + $0x70] sm:$0xff]  }
 0x372   :  { %13532 = vmatprep.mubr.msk.bf16.mxu0 %vm770_vm0, %v14932_v6  ;;  %v17110_v6 = vld [vmem:[%s18653_s11 + $0x28] sm:$0xff]  }
 0x434   :  { %v13488_v16 = vpop.f32.mrb[0].mxu0 }
 0x435   :  { %v823_v17 = vpop.f32.mrb[1].mxu0 }
 0x436   :  { %v13489_v18 = vpop.f32.mrb[2].mxu0 }
 0x437   :  { %v871_v19 = vpack.c.bf16 %v13489_v18, %v13488_v16  ;;  %v826_v20 = vpop.f32.mrb[3].mxu0  ;;  %v14968_v16 = vld [vmem:[%s18654_s15 + $0x38] sm:$0xff]  }
 0x438   :  { %v870_v21 = vpack.c.bf16 %v826_v20, %v823_v17  ;;  %v14969_v17 = vld [vmem:[%s18654_s15 + $0xb0] sm:$0xff]   ;;  %v14970_v18 = vld [vmem:[%s18654_s15 + $0xb8] sm:$0xff]  }
 0x43c   :  { %v13492_v22 = vpop.f32.mrb[4].mxu0 }
 0x43d   :  { %v839_v23 = vpop.f32.mrb[5].mxu0 }
 0x43e   :  { %v13493_v24 = vpop.f32.mrb[6].mxu0 }
 0x43f   :  { %v873_v25 = vpack.c.bf16 %v13493_v24, %v13492_v22  ;;  %v842_v26 = vpop.f32.mrb[7].mxu0 }
 0x440   :  { %v872_v28 = vpack.c.bf16 %v842_v26, %v839_v23 }
 0x442   :  { %13504 = vmatprep.mubr.msk.bf16.mxu1 %vm908_vm1, %v872_v28 }
 0x443   :  { %13505 = vmatmul.mubr.msk.bf16.vlgmr.msra.gmra.mrb[0].mxu1 %vm908_vm1, %v873_v25 }
 0x444   :  { %13509 = vmatpush3.bf16.msra.mxu1 %v14941_v15  ;;  %13514 = vmatprep.mubr.msk.bf16.mxu1 %vm908_vm1, %v870_v21  ;;  %v13496_v29 = vpop.f32.mrb[8].mxu0  ;;  %v14967_v15 = vld [vmem:[%s18654_s15 + $0xa8] sm:$0xff]  }
 0x445   :  { %13510 = vmatprep.subr.bf16.mxu1 %v14942_v27  ;;  %v855_v31 = vpop.f32.mrb[9].mxu0 }
 0x446   :  { %v13497_v32 = vpop.f32.mrb[10].mxu0 }
 0x447   :  { %v875_v34 = vpack.c.bf16 %v13497_v32, %v13496_v29  ;;  %v858_v35 = vpop.f32.mrb[11].mxu0 }
 0x448   :  { %13511 = vmatpush3.bf16.msra.mxu1 %v14942_v27  ;;  %v874_v36 = vpack.c.bf16 %v858_v35, %v855_v31 }
 0x449   :  { %13512 = vmatprep.subr.bf16.mxu1 %v14943_v30 }
 0x44c   :  { %13513 = vmatpush3.bf16.msra.mxu1 %v14943_v30 }
 0x44d   :  { %13518 = vmatprep.subr.bf16.mxu1 %v14944_v33 }
 0x44f   :  { %13515 = vmatmul.mubr.msk.bf16.vlgmr.msra.gmra.mrb[0].mxu1 %vm908_vm1, %v871_v19 }
 0x450   :  { %13519 = vmatpush3.bf16.msra.mxu1 %v14944_v33  ;;  %13524 = vmatprep.mubr.msk.bf16.mxu1 %vm908_vm1, %v874_v36 }
 0x451   :  { %13520 = vmatprep.subr.bf16.mxu1 %v14945_v37 }
 0x454   :  { %13521 = vmatpush3.bf16.msra.mxu1 %v14945_v37  ;;  %v16476_v37 = vmov 0.0  }
 0x455   :  { %13522 = vmatprep.subr.bf16.mxu1 %v14946_v38 }
 0x458   :  { %13523 = vmatpush3.bf16.msra.mxu1 %v14946_v38  ;;  %v14971_v38 = vld [vmem:[#allocation4] sm:$0xff]  }
 0x459   :  { %13544 = vmatprep.subr.bf16.mxu1 %v14952_v39 }
 0x45b   :  { %13525 = vmatmul.mubr.msk.bf16.vlgmr.msra.gmra.mrb[0].mxu1 %vm908_vm1, %v875_v34 }
 0x45c   :  { %13545 = vmatpush3.bf16.msra.mxu1 %v14952_v39  ;;  %v14972_v39 = vld [vmem:[#allocation4 + $0x8] sm:$0xff]  }
 0x45d   :  { %13546 = vmatprep.subr.bf16.mxu1 %v14955_v40 }
 0x460   :  { %13547 = vmatpush3.bf16.msra.mxu1 %v14955_v40  ;;  %v14973_v40 = vld [vmem:[#allocation4 + $0x10] sm:$0xff]  }
 0x461   :  { %13548 = vmatprep.subr.bf16.mxu1 %v14958_v41 }
 0x464   :  { %13549 = vmatpush3.bf16.msra.mxu1 %v14958_v41  ;;  %v14974_v41 = vld [vmem:[#allocation4 + $0x18] sm:$0xff]  }
 0x465   :  { %13550 = vmatprep.subr.bf16.mxu1 %v14961_v9 }
 0x468   :  { %13551 = vmatpush3.bf16.msra.mxu1 %v14961_v9 }
 0x469   :  { %13552 = vmatprep.subr.bf16.mxu1 %v14964_v12 }
 0x46c   :  { %13553 = vmatpush3.bf16.msra.mxu1 %v14964_v12 }
 0x46d   :  { %13554 = vmatprep.subr.bf16.mxu1 %v14967_v15 }
 0x470   :  { %13555 = vmatpush3.bf16.msra.mxu1 %v14967_v15 }
 0x471   :  { %13556 = vmatprep.subr.bf16.mxu1 %v14969_v17 }
 0x474   :  { %13557 = vmatpush3.bf16.msra.mxu1 %v14969_v17  ;;  %v17152_v17 = vld [vmem:[#allocation27] sm:$0x1] }
 0x475   :  { %13558 = vmatprep.subr.bf16.mxu1 %v14970_v18 }
 0x478   :  { %13559 = vmatpush3.bf16.msra.mxu1 %v14970_v18  ;;  %v14978_v18 = vld [vmem:[#allocation4 + $0x38] sm:$0xff]  }
 0x479   :  { %13564 = vmatprep.subr.bf16.mxu1 %v16476_v37 }
 0x52e   :  { %v13526_v43 = vpop.f32.mrb[0].mxu1 }
 0x52f   :  { %v1129_v44 = vadd.f32 %v13526_v43, %v11756_v42  ;;  %v1102_v45 = vpop.f32.mrb[1].mxu1  ;;  %v14976_v43 = vld [vmem:[#allocation4 + $0x28] sm:$0xff]  }
 0x530   :  { %v1127_v46 = vadd.f32 %v11756_v42, %v1102_v45  ;;  %v13527_v47 = vpop.f32.mrb[2].mxu1 }
 0x531   :  { %v1130_v48 = vadd.f32 %v13527_v47, %v11756_v42  ;;  %v1105_v49 = vpop.f32.mrb[3].mxu1  ;;  %v1133_v51 = vmax.f32 %v1129_v44, 0.0  ;;  %v14977_v44 = vld [vmem:[#allocation4 + $0x30] sm:$0xff]  }
 0x532   :  { %v1128_v50 = vadd.f32 %v11756_v42, %v1105_v49  ;;  %v1131_v53 = vmax.f32 %v1127_v46, 0.0  ;;  %v14975_v42 = vld [vmem:[#allocation4 + $0x20] sm:$0xff]  }
 0x533   :  { %v1134_v52 = vmax.f32 %v1130_v48, 0.0 }
 0x534   :  { %v1132_v54 = vmax.f32 %v1128_v50, 0.0 }
 0x535   :  { %v1136_v55 = vpack.c.bf16 %v1134_v52, %v1133_v51  ;;  %v11763_v51 = vld [vmem:[#allocation25] ss:$0 sm:$0xff] }
 0x536   :  { %v1135_v56 = vpack.c.bf16 %v1132_v54, %v1131_v53 }
 0x538   :  { %13528 = vmatprep.subr.bf16.mxu0 %v1135_v56 }
 0x539   :  { %13529 = vmatpush3.bf16.msra.mxu0 %v1135_v56 }
 0x53a   :  { %13530 = vmatprep.subr.bf16.mxu0 %v1136_v55 }
 0x53d   :  { %13531 = vmatpush3.bf16.msra.mxu0 %v1136_v55 }
 0x53e   :  { %12594 = vmatprep.subr.bf16.mxu0 %v14947_v57 }
 0x540   :  { %13533 = vmatmul.mubr.msk.bf16.vlgmr.msra.gmra.mrb[12].mxu0 %vm770_vm0, %v17084_v60 }
 0x541   :  { %13536 = vmatprep.mubr.msk.bf16.mxu0 %vm770_vm0, %v17089_v61  ;;  %12595 = vmatpush3.bf16.msra.mxu0 %v14948_v58 }
 0x542   :  { %12596 = vmatprep.subr.bf16.mxu0 %v14949_v59 }
 0x545   :  { %12597 = vmatpush3.bf16.msra.mxu0 %v14950_v62 }
 0x546   :  { %12598 = vmatprep.subr.bf16.mxu0 %v14951_v63 }
 0x548   :  { %13537 = vmatmul.mubr.msk.bf16.gmra.mrb[16].mxu0 %vm770_vm0, %v17098_v2 }
 0x549   :  { %13540 = vmatprep.mubr.msk.bf16.mxu0 %vm770_vm0, %v17103_v3  ;;  %12599 = vmatpush3.bf16.msra.mxu0 %v14953_v0 }
 0x54a   :  { %12600 = vmatprep.subr.bf16.mxu0 %v14954_v1 }
 0x54d   :  { %12601 = vmatpush3.bf16.msra.mxu0 %v14956_v4 }
 0x54e   :  { %12602 = vmatprep.subr.bf16.mxu0 %v14957_v5 }
 0x550   :  { %13541 = vmatmul.mubr.msk.bf16.gmra.mrb[20].mxu0 %vm770_vm0, %v17110_v6 }
 0x551   :  { %12603 = vmatpush3.bf16.msra.mxu0 %v14959_v7 }
 0x552   :  { %12604 = vmatprep.subr.bf16.mxu0 %v14960_v8 }
 0x555   :  { %12605 = vmatpush3.bf16.msra.mxu0 %v14962_v10 }
 0x556   :  { %12606 = vmatprep.subr.bf16.mxu0 %v14963_v11 }
 0x559   :  { %12607 = vmatpush3.bf16.msra.mxu0 %v14965_v13 }
 0x55a   :  { %12608 = vmatprep.subr.bf16.mxu0 %v14966_v14 }
 0x55d   :  { %12609 = vmatpush3.bf16.msra.mxu0 %v14968_v16 }
 0x55e   :  { %13572 = vmatprep.subr.bf16.mxu0 %v16476_v37 }
 0x613   :  { %v13534_v19 = vpop.f32.mrb[12].mxu0 }
 0x614   :  { %v1171_v20 = vpop.f32.mrb[13].mxu0 }
 0x615   :  { %v13535_v21 = vpop.f32.mrb[14].mxu0 }
 0x616   :  { %v1219_v22 = vpack.c.bf16 %v13535_v21, %v13534_v19  ;;  %v1174_v23 = vpop.f32.mrb[15].mxu0 }
 0x617   :  { %v1218_v24 = vpack.c.bf16 %v1174_v23, %v1171_v20 }
 0x61b   :  { %v13538_v25 = vpop.f32.mrb[16].mxu0 }
 0x61c   :  { %v1187_v26 = vpop.f32.mrb[17].mxu0 }
 0x61d   :  { %v13539_v27 = vpop.f32.mrb[18].mxu0 }
 0x61e   :  { %v1221_v28 = vpack.c.bf16 %v13539_v27, %v13538_v25  ;;  %v1190_v29 = vpop.f32.mrb[19].mxu0 }
 0x61f   :  { %v1220_v30 = vpack.c.bf16 %v1190_v29, %v1187_v26 }
 0x621   :  { %1455 = vmatprep.mubr.bf16.mxu0 %v1220_v30 }
 0x622   :  { %1456 = vmatmul.mubr.bf16.vlgmr.msra.gmra.mrb[24].mxu0 %v1218_v24  ;;  %v14979_v24 = vld [vmem:[%s18655_s28] sm:$0xff]  }
 0x623   :  { %v13542_v31 = vpop.f32.mrb[20].mxu0  ;;  %1463 = vmatprep.mubr.bf16.mxu0 %v1221_v28  ;;  %13573 = vmatpush3.bf16.msra.mxu0 %v14971_v38  ;;  %v15494_v38 = vld [vmem:[%s18653_s11] sm:$0xff]  }
 0x624   :  { %v1203_v32 = vpop.f32.mrb[21].mxu0  ;;  %13574 = vmatprep.subr.bf16.mxu0 %v16476_v37 }
 0x625   :  { %v13543_v33 = vpop.f32.mrb[22].mxu0 }
 0x626   :  { %v1223_v34 = vpack.c.bf16 %v13543_v33, %v13542_v31  ;;  %v1206_v35 = vpop.f32.mrb[23].mxu0 }
 0x627   :  { %v1222_v36 = vpack.c.bf16 %v1206_v35, %v1203_v32  ;;  %13575 = vmatpush3.bf16.msra.mxu0 %v14972_v39  ;;  %v14986_v39 = vld [vmem:[%s18656_s17 + $0x80] sm:$0xff]  }
 0x628   :  { %13576 = vmatprep.subr.bf16.mxu0 %v16476_v37 }
 0x629   :  { %13560 = vmatprep.mubr.bf16.mxu1 %v1222_v36  ;;  %v14980_v36 = vld [vmem:[%s18655_s28 + $0x8] sm:$0xff]  }
 0x62a   :  { %1464 = vmatmul.mubr.bf16.gmra.mrb[28].mxu0 %v1219_v22  ;;  %13561 = vmatmul.mubr.bf16.vlgmr.msra.gmra.mrb[4].mxu1 %v1223_v34 }
 0x62b   :  { %13568 = vmatprep.mubr.msk.bf16.mxu1 %vm16477_vm2, %v16476_v37  ;;  %13588 = vmatprep.mubr.msk.bf16.mxu0 %vm16477_vm2, %v16476_v37 }
 0x62c   :  { %13577 = vmatpush3.bf16.msra.mxu0 %v14973_v40  ;;  %v14989_v40 = vld [vmem:[%s18656_s17 + $0x88] sm:$0xff]  }
 0x62d   :  { %13578 = vmatprep.subr.bf16.mxu0 %v16476_v37 }
 0x630   :  { %13579 = vmatpush3.bf16.msra.mxu0 %v14974_v41  ;;  %v14992_v41 = vld [vmem:[%s18656_s17 + $0x90] sm:$0xff]  }
 0x631   :  { %13580 = vmatprep.subr.bf16.mxu0 %v16476_v37 }
 0x634   :  { %13581 = vmatpush3.bf16.msra.mxu0 %v14975_v42 }
 0x635   :  { %13582 = vmatprep.subr.bf16.mxu0 %v16476_v37 }
 0x638   :  { %13583 = vmatpush3.bf16.msra.mxu0 %v14976_v43 }
 0x639   :  { %13584 = vmatprep.subr.bf16.mxu0 %v16476_v37 }
 0x63c   :  { %13585 = vmatpush3.bf16.msra.mxu0 %v14977_v44 }
 0x63d   :  { %13586 = vmatprep.subr.bf16.mxu0 %v16476_v37 }
 0x640   :  { %13587 = vmatpush3.bf16.msra.mxu0 %v14978_v18 }
 0x641   :  { %13614 = vmatprep.subr.bf16.mxu0 %v14986_v39 }
 0x6f5   :  { %v12610_v45 = vpop.f32.mrb[24].mxu0 }
 0x6f6   :  { %v12611_v46 = vpop.f32.mrb[25].mxu0 }
 0x6f7   :  { %v12612_v47 = vadd.f32 %v12611_v46, %v12610_v45  ;;  %v12613_v48 = vpop.f32.mrb[26].mxu0 }
 0x6f8   :  { %v12614_v49 = vpop.f32.mrb[27].mxu0 }
 0x6f9   :  { %v12615_v50 = vadd.f32 %v12614_v49, %v12613_v48  ;;  %v1458_v52 = vadd.f32 %v12612_v47, %v11763_v51 }
 0x6fb   :  { %v1461_v57 = vadd.f32 %v12615_v50, %v11763_v51 }
 0x6fd   :  { %v12616_v53 = vpop.f32.mrb[28].mxu0  ;;  %v13562_v54 = vpop.f32.mrb[4].mxu1 }
 0x6fe   :  { %v12617_v55 = vpop.f32.mrb[29].mxu0  ;;  %v1506_v56 = vpop.f32.mrb[5].mxu1 }
 0x6ff   :  { %v12618_v58 = vadd.f32 %v12617_v55, %v12616_v53  ;;  %v1507_v59 = vadd.f32 %v1506_v56, %v1458_v52  ;;  %v12619_v62 = vpop.f32.mrb[30].mxu0  ;;  %v13563_v63 = vpop.f32.mrb[6].mxu1  ;;  %v14981_v52 = vld [vmem:[%s18656_s17 + $0x40] sm:$0xff]   ;;  %v14984_v55 = vld [vmem:[%s18656_s17 + $0x8] sm:$0xff]   ;;  %v14985_v56 = vld [vmem:[%s18656_s17 + $0x50] sm:$0xff]  }
 0x700   :  { %v12620_v0 = vpop.f32.mrb[31].mxu0  ;;  %v1509_v1 = vpop.f32.mrb[7].mxu1  ;;  %v14982_v53 = vld [vmem:[%s18656_s17] sm:$0xff]  }
 0x701   :  { %v1466_v4 = vadd.f32 %v12618_v58, %v11763_v51  ;;  %v12621_v5 = vadd.f32 %v12620_v0, %v12619_v62  ;;  %v1510_v7 = vadd.f32 %v1509_v1, %v1461_v57  ;;  %v17139_v9 = vmax.f32 %v1507_v59, 0.0  ;;  %v14987_v57 = vld [vmem:[%s18656_s17 + $0x10] sm:$0xff]   ;;  %v14988_v58 = vld [vmem:[%s18656_s17 + $0x58] sm:$0xff]   ;;  %v14993_v59 = vld [vmem:[%s18656_s17 + $0x20] sm:$0xff]  }
 0x702   :  { %v14995_v62 = vld [vmem:[%s18656_s17 + $0x98] sm:$0xff]   ;;  %v14998_v0 = vld [vmem:[%s18656_s17 + $0xa0] sm:$0xff]   ;;  %v14999_v1 = vld [vmem:[%s18656_s17 + $0x30] sm:$0xff]  }
 0x703   :  { %v1515_v8 = vadd.f32 %v13562_v54, %v1466_v4  ;;  %v1469_v10 = vadd.f32 %v12621_v5, %v11763_v51  ;;  %v17141_v11 = vmax.f32 %v1510_v7, 0.0  ;;  %v14983_v54 = vld [vmem:[%s18656_s17 + $0x48] sm:$0xff]   ;;  %v15002_v5 = vld [vmem:[%s18656_s17 + $0x38] sm:$0xff]   ;;  %v15003_v7 = vld [vmem:[%s18656_s17 + $0xb0] sm:$0xff]  }
 0x704   :  { %v15001_v4 = vld [vmem:[%s18656_s17 + $0xa8] sm:$0xff]  }
 0x705   :  { %v1518_v12 = vadd.f32 %v13563_v63, %v1469_v10  ;;  %v1526_v13 = vpack.c.bf16 %v17141_v11, %v17139_v9  ;;  %v17145_v14 = vmax.f32 %v1515_v8, 0.0  ;;  %v14997_v63 = vld [vmem:[%s18656_s17 + $0x70] sm:$0xff]   ;;  %v15004_v8 = vld [vmem:[%s18656_s17 + $0xb8] sm:$0xff]  }
 0x707   :  { %v17147_v15 = vmax.f32 %v1518_v12, 0.0  ;;  %13565 = vmatpush3.bf16.msra.mxu1 %v1526_v13 }
 0x708   :  { %13566 = vmatprep.subr.bf16.mxu1 %v16476_v37 }
 0x709   :  { %v1527_v16 = vpack.c.bf16 %v17147_v15, %v17145_v14 }
 0x70b   :  { %13567 = vmatpush3.bf16.msra.mxu1 %v1527_v16 }
 0x70e   :  { %13569 = vmatmul.mubr.msk.bf16.vlgmr.msra.gmra.mrb[8].mxu1 %vm770_vm0, %v17152_v17 }
 0x70f   :  { %13594 = vmatprep.mubr.msk.bf16.mxu1 %vm1697_vm3, %v14979_v24 }
 0x7e1   :  { %v1565_v19 = vpop.f32.mrb[8].mxu1 }
 0x7e2   :  { %v17156_v20 = vpack.c.bf16 %v1565_v19, %v1565_v19  ;;  %v13570_v21 = vpop.f32.mrb[9].mxu1 }
 0x7e3   :  { %v1568_v22 = vpop.f32.mrb[10].mxu1 }
 0x7e4   :  { %v13571_v23 = vpop.f32.mrb[11].mxu1  ;;  %13589 = vmatmul.mubr.bf16.vlgmr.msra.gmra.mrb[32].mxu0 %v17156_v20 }
 0x7e5   :  { %13615 = vmatpush3.bf16.msra.mxu0 %v14986_v39  ;;  %v15014_v39 = vld [vmem:[%s18657_s22 + $0x10] sm:$0xff]  }
 0x7e6   :  { %13616 = vmatprep.subr.bf16.mxu0 %v14989_v40 }
 0x7e9   :  { %13617 = vmatpush3.bf16.msra.mxu0 %v14989_v40  ;;  %v15015_v40 = vld [vmem:[%s18657_s22 + $0x58] sm:$0xff]  }
 0x7ea   :  { %13618 = vmatprep.subr.bf16.mxu0 %v14992_v41 }
 0x7ed   :  { %13619 = vmatpush3.bf16.msra.mxu0 %v14992_v41  ;;  %v15017_v41 = vld [vmem:[%s18657_s22 + $0x18] sm:$0xff]  }
 0x7ee   :  { %13620 = vmatprep.subr.bf16.mxu0 %v14995_v62 }
 0x7f1   :  { %13621 = vmatpush3.bf16.msra.mxu0 %v14995_v62 }
 0x7f2   :  { %13622 = vmatprep.subr.bf16.mxu0 %v14998_v0 }
 0x7f5   :  { %13623 = vmatpush3.bf16.msra.mxu0 %v14998_v0 }
 0x7f6   :  { %13624 = vmatprep.subr.bf16.mxu0 %v15001_v4 }
 0x7f9   :  { %13625 = vmatpush3.bf16.msra.mxu0 %v15001_v4 }
 0x7fa   :  { %13626 = vmatprep.subr.bf16.mxu0 %v15003_v7 }
 0x7fd   :  { %13627 = vmatpush3.bf16.msra.mxu0 %v15003_v7 }
 0x7fe   :  { %13628 = vmatprep.subr.bf16.mxu0 %v15004_v8 }
 0x801   :  { %13629 = vmatpush3.bf16.msra.mxu0 %v15004_v8 }
 0x802   :  { %13634 = vmatprep.subr.bf16.mxu0 %v16476_v37 }
 0x8b7   :  { %v1670_v25 = vpop.f32.mrb[32].mxu0 }
 0x8b8   :  { %v1680_v26 = vsub.f32 0.0, %v1670_v25  ;;  %v13590_v27 = vpop.f32.mrb[33].mxu0 }
 0x8b9   :  { %v1673_v28 = vpop.f32.mrb[34].mxu0 }
 0x8ba   :  { %v1681_v29 = vmul.f32 1.442695, %v1680_v26  ;;  %v13591_v30 = vpop.f32.mrb[35].mxu0 }
 0x8bc   :  { %15445 = vpow2.f32 %v1681_v29 }
 0x8c6   :  { %v15446_v31 = vpop.eup %15445 }
 0x8c7   :  { %v1683_v32 = vadd.f32 1.0, %v15446_v31 }
 0x8c9   :  { %15447 = vrcp.f32 %v1683_v32 }
 0x8d3   :  { %v15448_v33 = vpop.eup %15447 }
 0x8d4   :  { %v1686_v34 = vpack.c.bf16 %v15448_v33, %v15448_v33  ;;  %v15008_v33 = vld [vmem:[%s18657_s22 + $0x40] sm:$0xff]  }
 0x8d6   :  { %14816 = vmatprep.subr.msk.bf16.mxu1 %vm1704_vm4, %v1686_v34  ;;  %v1706_v35 = vsel %vm1704_vm4, %v1686_v34, 0  ;;  %v15009_v34 = vld [vmem:[%s18657_s22] sm:$0xff]  }
 0x8d7   :  { %13593 = vmatpush3.bf16.msra.mxu1 %v1706_v35  ;;  %v15010_v35 = vld [vmem:[%s18657_s22 + $0x48] sm:$0xff]  }
 0x8da   :  { %13595 = vmatmul.mubr.msk.bf16.vlgmr.msra.gmra.mrb[12].mxu1 %vm1697_vm3, %v14980_v36  ;;  %v15011_v36 = vld [vmem:[%s18657_s22 + $0x8] sm:$0xff]  }
 0x8db   :  { %13602 = vmatprep.mubr.msk.bf16.mxu1 %vm770_vm0, %v15494_v38  ;;  %v15012_v38 = vld [vmem:[%s18657_s22 + $0x50] sm:$0xff]  }
 0x9ad   :  { %v13596_v42 = vpop.f32.mrb[12].mxu1 }
 0x9ae   :  { %v1742_v43 = vpop.f32.mrb[13].mxu1  ;;  %v1759_v45 = vmul.f32 %v13596_v42, %v17145_v14  ;;  %v15018_v42 = vld [vmem:[%s18657_s22 + $0x60] sm:$0xff]  }
 0x9af   :  { %v13597_v44 = vpop.f32.mrb[14].mxu1  ;;  %v1757_v48 = vmul.f32 %v1742_v43, %v17139_v9  ;;  %v15020_v43 = vld [vmem:[%s18657_s22 + $0x20] sm:$0xff]  }
 0x9b0   :  { %v1760_v46 = vmul.f32 %v13597_v44, %v17147_v15  ;;  %v1745_v47 = vpop.f32.mrb[15].mxu1 }
 0x9b1   :  { %v1758_v49 = vmul.f32 %v1745_v47, %v17141_v11 }
 0x9b2   :  { %v1762_v50 = vpack.c.bf16 %v1760_v46, %v1759_v45 }
 0x9b3   :  { %v1761_v51 = vpack.c.bf16 %v1758_v49, %v1757_v48 }
 0x9b5   :  { %13598 = vmatprep.subr.bf16.mxu1 %v1761_v51 }
 0x9b6   :  { %13599 = vmatpush3.bf16.msra.mxu1 %v1761_v51 }
 0x9b7   :  { %13600 = vmatprep.subr.bf16.mxu1 %v1762_v50 }
 0x9ba   :  { %13601 = vmatpush3.bf16.msra.mxu1 %v1762_v50  ;;  %v11807_v50 = vld [vmem:[#allocation7] ss:$0 sm:$0xff] }
 0x9bb   :  { %12655 = vmatprep.subr.bf16.mxu1 %v14981_v52 }
 0x9bd   :  { %13603 = vmatmul.mubr.msk.bf16.vlgmr.msra.gmra.mrb[16].mxu1 %vm770_vm0, %v17084_v60  ;;  %v14990_v60 = vld [vmem:[%s18656_s17 + $0x18] sm:$0xff]  }
 0x9be   :  { %13606 = vmatprep.mubr.msk.bf16.mxu1 %vm770_vm0, %v17089_v61  ;;  %12656 = vmatpush3.bf16.msra.mxu1 %v14982_v53  ;;  %v14991_v61 = vld [vmem:[%s18656_s17 + $0x60] sm:$0xff]  }
 0x9bf   :  { %12657 = vmatprep.subr.bf16.mxu1 %v14983_v54 }
 0x9c2   :  { %12658 = vmatpush3.bf16.msra.mxu1 %v14984_v55 }
 0x9c3   :  { %12659 = vmatprep.subr.bf16.mxu1 %v14985_v56 }
 0x9c5   :  { %13607 = vmatmul.mubr.msk.bf16.gmra.mrb[20].mxu1 %vm770_vm0, %v17098_v2  ;;  %v14994_v2 = vld [vmem:[%s18656_s17 + $0x68] sm:$0xff]  }
 0x9c6   :  { %13610 = vmatprep.mubr.msk.bf16.mxu1 %vm770_vm0, %v17103_v3  ;;  %12660 = vmatpush3.bf16.msra.mxu1 %v14987_v57  ;;  %v14996_v3 = vld [vmem:[%s18656_s17 + $0x28] sm:$0xff]  }
 0x9c7   :  { %12661 = vmatprep.subr.bf16.mxu1 %v14988_v58 }
 0x9ca   :  { %12662 = vmatpush3.bf16.msra.mxu1 %v14990_v60 }
 0x9cb   :  { %12663 = vmatprep.subr.bf16.mxu1 %v14991_v61 }
 0x9cd   :  { %13611 = vmatmul.mubr.msk.bf16.gmra.mrb[24].mxu1 %vm770_vm0, %v17110_v6  ;;  %v15000_v6 = vld [vmem:[%s18656_s17 + $0x78] sm:$0xff]  }
 0x9ce   :  { %12664 = vmatpush3.bf16.msra.mxu1 %v14993_v59 }
 0x9cf   :  { %12665 = vmatprep.subr.bf16.mxu1 %v14994_v2 }
 0x9d2   :  { %12666 = vmatpush3.bf16.msra.mxu1 %v14996_v3 }
 0x9d3   :  { %12667 = vmatprep.subr.bf16.mxu1 %v14997_v63 }
 0x9d6   :  { %12668 = vmatpush3.bf16.msra.mxu1 %v14999_v1 }
 0x9d7   :  { %12669 = vmatprep.subr.bf16.mxu1 %v15000_v6 }
 0x9da   :  { %12670 = vmatpush3.bf16.msra.mxu1 %v15002_v5 }
 0x9db   :  { %12698 = vmatprep.subr.bf16.mxu1 %v15008_v33  ;;  %v15031_v33 = vld [vmem:[%s18657_s22 + $0xb8] sm:$0xff]  }
 0xa90   :  { %v13604_v10 = vpop.f32.mrb[16].mxu1 }
 0xa91   :  { %v1797_v12 = vpop.f32.mrb[17].mxu1 }
 0xa92   :  { %v13605_v13 = vpop.f32.mrb[18].mxu1 }
 0xa93   :  { %v1845_v16 = vpack.c.bf16 %v13605_v13, %v13604_v10  ;;  %v1800_v18 = vpop.f32.mrb[19].mxu1  ;;  %v15005_v13 = vld [vmem:[%s18658_s21] sm:$0xff]  }
 0xa94   :  { %v1844_v19 = vpack.c.bf16 %v1800_v18, %v1797_v12  ;;  %v15016_v18 = vld [vmem:[%s18657_s22 + $0x88] sm:$0xff]  }
 0xa98   :  { %v13608_v21 = vpop.f32.mrb[20].mxu1 }
 0xa99   :  { %v1813_v22 = vpop.f32.mrb[21].mxu1 }
 0xa9a   :  { %v13609_v23 = vpop.f32.mrb[22].mxu1 }
 0xa9b   :  { %v1847_v24 = vpack.c.bf16 %v13609_v23, %v13608_v21  ;;  %v1816_v25 = vpop.f32.mrb[23].mxu1  ;;  %v15019_v21 = vld [vmem:[%s18657_s22 + $0x90] sm:$0xff]   ;;  %v15021_v23 = vld [vmem:[%s18657_s22 + $0x68] sm:$0xff]  }
 0xa9c   :  { %v1846_v26 = vpack.c.bf16 %v1816_v25, %v1813_v22  ;;  %v15007_v22 = vld [vmem:[%s18658_s21 + $0x10] sm:$0xff]   ;;  %v15023_v25 = vld [vmem:[%s18657_s22 + $0x28] sm:$0xff]  }
 0xa9e   :  { %2081 = vmatprep.mubr.bf16.mxu1 %v1846_v26  ;;  %v15024_v26 = vld [vmem:[%s18657_s22 + $0x70] sm:$0xff]  }
 0xa9f   :  { %2082 = vmatmul.mubr.bf16.vlgmr.msra.gmra.mrb[28].mxu1 %v1844_v19  ;;  %v15006_v19 = vld [vmem:[%s18658_s21 + $0x8] sm:$0xff]  }
 0xaa0   :  { %v13612_v27 = vpop.f32.mrb[24].mxu1  ;;  %2089 = vmatprep.mubr.bf16.mxu1 %v1847_v24  ;;  %12699 = vmatpush3.bf16.msra.mxu1 %v15009_v34  ;;  %v15022_v24 = vld [vmem:[%s18657_s22 + $0x98] sm:$0xff]  }
 0xaa1   :  { %v1829_v28 = vpop.f32.mrb[25].mxu1  ;;  %12700 = vmatprep.subr.bf16.mxu1 %v15010_v35 }
 0xaa2   :  { %v13613_v29 = vpop.f32.mrb[26].mxu1 }
 0xaa3   :  { %v1849_v30 = vpack.c.bf16 %v13613_v29, %v13612_v27  ;;  %v1832_v31 = vpop.f32.mrb[27].mxu1  ;;  %v15025_v27 = vld [vmem:[%s18657_s22 + $0xa0] sm:$0xff]   ;;  %v15027_v29 = vld [vmem:[%s18657_s22 + $0x78] sm:$0xff]  }
 0xaa4   :  { %v1848_v32 = vpack.c.bf16 %v1832_v31, %v1829_v28  ;;  %12701 = vmatpush3.bf16.msra.mxu1 %v15011_v36  ;;  %v15026_v28 = vld [vmem:[%s18657_s22 + $0x30] sm:$0xff]   ;;  %v15029_v31 = vld [vmem:[%s18657_s22 + $0x38] sm:$0xff]  }
 0xaa5   :  { %12702 = vmatprep.subr.bf16.mxu1 %v15012_v38 }
 0xaa6   :  { %13630 = vmatprep.mubr.bf16.mxu0 %v1848_v32  ;;  %v15030_v32 = vld [vmem:[%s18657_s22 + $0xb0] sm:$0xff]  }
 0xaa7   :  { %2090 = vmatmul.mubr.bf16.gmra.mrb[32].mxu1 %v1845_v16  ;;  %13631 = vmatmul.mubr.bf16.vlgmr.msra.gmra.mrb[36].mxu0 %v1849_v30  ;;  %v15013_v16 = vld [vmem:[%s18657_s22 + $0x80] sm:$0xff]   ;;  %v15028_v30 = vld [vmem:[%s18657_s22 + $0xa8] sm:$0xff]  }
 0xaa8   :  { %13638 = vmatprep.mubr.msk.bf16.mxu0 %vm16477_vm2, %v16476_v37  ;;  %12703 = vmatpush3.bf16.msra.mxu1 %v15014_v39 }
 0xaa9   :  { %12704 = vmatprep.subr.bf16.mxu1 %v15015_v40 }
 0xaac   :  { %12705 = vmatpush3.bf16.msra.mxu1 %v15017_v41 }
 0xaad   :  { %12706 = vmatprep.subr.bf16.mxu1 %v15018_v42 }
 0xab0   :  { %12707 = vmatpush3.bf16.msra.mxu1 %v15020_v43 }
 0xab1   :  { %12708 = vmatprep.subr.bf16.mxu1 %v15021_v23 }
 0xab4   :  { %12709 = vmatpush3.bf16.msra.mxu1 %v15023_v25 }
 0xab5   :  { %12710 = vmatprep.subr.bf16.mxu1 %v15024_v26 }
 0xab8   :  { %12711 = vmatpush3.bf16.msra.mxu1 %v15026_v28 }
 0xab9   :  { %12712 = vmatprep.subr.bf16.mxu1 %v15027_v29 }
 0xabc   :  { %12713 = vmatpush3.bf16.msra.mxu1 %v15029_v31  ;;  %v15036_v31 = vld [vmem:[%s18659_s19] sm:$0xff]  }
 0xabd   :  { %13670 = vmatprep.subr.bf16.mxu1 %v16476_v37 }
 0xb72   :  { %v12671_v44 = vpop.f32.mrb[28].mxu1 }
 0xb73   :  { %v12672_v45 = vpop.f32.mrb[29].mxu1 }
 0xb74   :  { %v12673_v46 = vadd.f32 %v12672_v45, %v12671_v44  ;;  %v12674_v47 = vpop.f32.mrb[30].mxu1 }
 0xb75   :  { %v12675_v48 = vpop.f32.mrb[31].mxu1 }
 0xb76   :  { %v12676_v49 = vadd.f32 %v12675_v48, %v12674_v47  ;;  %v2084_v53 = vadd.f32 %v12673_v46, %v11807_v50 }
 0xb78   :  { %v2087_v61 = vadd.f32 %v12676_v49, %v11807_v50 }
 0xb7a   :  { %v12677_v51 = vpop.f32.mrb[32].mxu1  ;;  %v13632_v52 = vpop.f32.mrb[36].mxu0 }
 0xb7b   :  { %v12678_v54 = vpop.f32.mrb[33].mxu1  ;;  %v2132_v55 = vpop.f32.mrb[37].mxu0 }
 0xb7c   :  { %v12679_v56 = vadd.f32 %v12678_v54, %v12677_v51  ;;  %v2133_v57 = vadd.f32 %v2132_v55, %v2084_v53  ;;  %v12680_v58 = vpop.f32.mrb[34].mxu1  ;;  %v13633_v60 = vpop.f32.mrb[38].mxu0  ;;  %v11838_v55 = vld [vmem:[#allocation10] ss:$0 sm:$0xff] }
 0xb7d   :  { %v12681_v59 = vpop.f32.mrb[35].mxu1  ;;  %v2135_v2 = vpop.f32.mrb[39].mxu0 }
 0xb7e   :  { %v2092_v62 = vadd.f32 %v12679_v56, %v11807_v50  ;;  %v12682_v3 = vadd.f32 %v12681_v59, %v12680_v58  ;;  %v2136_v63 = vadd.f32 %v2135_v2, %v2087_v61  ;;  %v2147_v1 = vmax.f32 %v2133_v57, 0.0 }
 0xb80   :  { %v2141_v0 = vadd.f32 %v13632_v52, %v2092_v62  ;;  %v2095_v6 = vadd.f32 %v12682_v3, %v11807_v50  ;;  %v2148_v4 = vmax.f32 %v2136_v63, 0.0 }
 0xb82   :  { %v2144_v5 = vadd.f32 %v13633_v60, %v2095_v6  ;;  %v2157_v7 = vpack.c.bf16 %v2148_v4, %v2147_v1  ;;  %v2149_v8 = vmax.f32 %v2141_v0, 0.0  ;;  %v2526_v6 = vld [vmem:[#allocation28] sm:$0x1]  ;;  %v15032_v4 = vld [vmem:[#allocation6] sm:$0xff]  }
 0xb84   :  { %v2150_v10 = vmax.f32 %v2144_v5, 0.0  ;;  %13635 = vmatpush3.bf16.msra.mxu0 %v2157_v7  ;;  %v15033_v5 = vld [vmem:[#allocation6 + $0x8] sm:$0xff]   ;;  %v15034_v7 = vld [vmem:[#allocation6 + $0x10] sm:$0xff]  }
 0xb85   :  { %13636 = vmatprep.subr.bf16.mxu0 %v16476_v37 }
 0xb86   :  { %v2158_v12 = vpack.c.bf16 %v2150_v10, %v2149_v8  ;;  %v15035_v8 = vld [vmem:[#allocation6 + $0x18] sm:$0xff]  }
 0xb88   :  { %13637 = vmatpush3.bf16.msra.mxu0 %v2158_v12 }
 0xb89   :  { %13650 = vmatprep.subr.bf16.mxu0 %v16476_v37 }
 0xb8b   :  { %13639 = vmatmul.mubr.msk.bf16.vlgmr.msra.gmra.mrb[40].mxu0 %vm770_vm0, %v15005_v13 }
 0xb8c   :  { %13642 = vmatprep.mubr.msk.bf16.mxu0 %vm16477_vm2, %v16476_v37  ;;  %13651 = vmatpush3.bf16.msra.mxu0 %v15013_v16 }
 0xb8d   :  { %13652 = vmatprep.subr.bf16.mxu0 %v16476_v37 }
 0xb90   :  { %13653 = vmatpush3.bf16.msra.mxu0 %v15016_v18 }
 0xb91   :  { %13654 = vmatprep.subr.bf16.mxu0 %v16476_v37 }
 0xb93   :  { %13643 = vmatmul.mubr.msk.bf16.gmra.mrb[44].mxu0 %vm770_vm0, %v15006_v19 }
 0xb94   :  { %13646 = vmatprep.mubr.msk.bf16.mxu0 %vm16477_vm2, %v16476_v37  ;;  %13655 = vmatpush3.bf16.msra.mxu0 %v15019_v21 }
 0xb95   :  { %13656 = vmatprep.subr.bf16.mxu0 %v16476_v37 }
 0xb98   :  { %13657 = vmatpush3.bf16.msra.mxu0 %v15022_v24 }
 0xb99   :  { %13658 = vmatprep.subr.bf16.mxu0 %v16476_v37 }
 0xb9b   :  { %13647 = vmatmul.mubr.msk.bf16.gmra.mrb[48].mxu0 %vm770_vm0, %v15007_v22 }
 0xb9c   :  { %13666 = vmatprep.mubr.msk.bf16.mxu0 %vm16477_vm2, %v16476_v37  ;;  %13659 = vmatpush3.bf16.msra.mxu0 %v15025_v27 }
 0xb9d   :  { %13660 = vmatprep.subr.bf16.mxu0 %v16476_v37 }
 0xba0   :  { %13661 = vmatpush3.bf16.msra.mxu0 %v15028_v30 }
 0xba1   :  { %13662 = vmatprep.subr.bf16.mxu0 %v16476_v37 }
 0xba4   :  { %13663 = vmatpush3.bf16.msra.mxu0 %v15030_v32  ;;  %v15042_v32 = vld [vmem:[#allocation2 + $0x20] sm:$0xff]  }
 0xba5   :  { %13664 = vmatprep.subr.bf16.mxu0 %v16476_v37 }
 0xba8   :  { %13665 = vmatpush3.bf16.msra.mxu0 %v15031_v33 }
 0xba9   :  { %13688 = vmatprep.subr.bf16.mxu0 %v16476_v37 }
 0xc5e   :  { %v2217_v34 = vpop.f32.mrb[40].mxu0 }
 0xc5f   :  { %v13640_v35 = vpop.f32.mrb[41].mxu0 }
 0xc60   :  { %v2220_v36 = vpop.f32.mrb[42].mxu0 }
 0xc61   :  { %v2240_v38 = vpack.c.bf16 %v2220_v36, %v2217_v34  ;;  %v13641_v39 = vpop.f32.mrb[43].mxu0 }
 0xc66   :  { %v2225_v40 = vpop.f32.mrb[44].mxu0 }
 0xc67   :  { %v13644_v41 = vpop.f32.mrb[45].mxu0 }
 0xc68   :  { %v2228_v42 = vpop.f32.mrb[46].mxu0  ;;  %v15037_v41 = vld [vmem:[%s18660_s14] sm:$0xff]  }
 0xc69   :  { %v2241_v43 = vpack.c.bf16 %v2228_v42, %v2225_v40  ;;  %v13645_v44 = vpop.f32.mrb[47].mxu0  ;;  %v15040_v42 = vld [vmem:[#allocation2] sm:$0xff]  }
 0xc6a   :  { %v15038_v44 = vld [vmem:[%s18660_s14 + $0x8] sm:$0xff]  }
 0xc6b   :  { %2474 = vmatprep.mubr.bf16.mxu1 %v2241_v43  ;;  %v15041_v43 = vld [vmem:[#allocation2 + $0x8] sm:$0xff]  }
 0xc6c   :  { %2475 = vmatmul.mubr.bf16.vlgmr.msra.gmra.mrb[36].mxu1 %v2240_v38 }
 0xc6d   :  { %13672 = vmatprep.mubr.msk.bf16.mxu1 %vm16477_vm2, %v16476_v37 }
 0xc6e   :  { %v2233_v45 = vpop.f32.mrb[48].mxu0 }
 0xc6f   :  { %v13648_v46 = vpop.f32.mrb[49].mxu0 }
 0xc70   :  { %v2236_v47 = vpop.f32.mrb[50].mxu0  ;;  %v15039_v46 = vld [vmem:[%s18660_s14 + $0x10] sm:$0xff]  }
 0xc71   :  { %v2242_v48 = vpack.c.bf16 %v2236_v47, %v2233_v45  ;;  %v13649_v49 = vpop.f32.mrb[51].mxu0  ;;  %v15043_v45 = vld [vmem:[#allocation2 + $0x10] sm:$0xff]   ;;  %v15044_v47 = vld [vmem:[#allocation2 + $0x28] sm:$0xff]  }
 0xc72   :  { %v15046_v49 = vld [vmem:[#allocation2 + $0x30] sm:$0xff]  }
 0xc73   :  { %13667 = vmatmul.mubr.bf16.vlgmr.msra.gmra.mrb[52].mxu0 %v2242_v48  ;;  %v15045_v48 = vld [vmem:[#allocation2 + $0x18] sm:$0xff]  }
 0xc74   :  { %13690 = vmatprep.mubr.msk.bf16.mxu0 %vm16477_vm2, %v16476_v37 }
 0xd3f   :  { %v12714_v50 = vpop.f32.mrb[36].mxu1 }
 0xd40   :  { %v12715_v51 = vpop.f32.mrb[37].mxu1 }
 0xd41   :  { %v12716_v52 = vadd.f32 %v12715_v51, %v12714_v50  ;;  %v12717_v53 = vpop.f32.mrb[38].mxu1  ;;  %v15047_v50 = vld [vmem:[#allocation2 + $0x38] sm:$0xff]  }
 0xd42   :  { %v12718_v54 = vpop.f32.mrb[39].mxu1 }
 0xd43   :  { %v12719_v56 = vadd.f32 %v12718_v54, %v12717_v53  ;;  %v2477_v57 = vadd.f32 %v12716_v52, %v11838_v55 }
 0xd45   :  { %v2480_v59 = vadd.f32 %v12719_v56, %v11838_v55 }
 0xd46   :  { %v2517_v58 = vpop.f32.mrb[52].mxu0 }
 0xd47   :  { %v2518_v60 = vadd.f32 %v2517_v58, %v2477_v57  ;;  %v13668_v61 = vpop.f32.mrb[53].mxu0 }
 0xd48   :  { %v2520_v2 = vpop.f32.mrb[54].mxu0 }
 0xd49   :  { %v2521_v62 = vadd.f32 %v2520_v2, %v2480_v59  ;;  %v13669_v3 = vpop.f32.mrb[55].mxu0  ;;  %v2524_v63 = vmax.f32 %v2518_v60, 0.0  ;;  %v15048_v60 = vld [vmem:[#allocation2 + $0x40] sm:$0xff]   ;;  %v15049_v2 = vld [vmem:[#allocation2 + $0x48] sm:$0xff]  }
 0xd4b   :  { %v2525_v0 = vmax.f32 %v2521_v62, 0.0 }
 0xd4d   :  { %v2527_v1 = vpack.c.bf16 %v2525_v0, %v2524_v63 }
 0xd4f   :  { %13671 = vmatpush3.bf16.msra.mxu1 %v2527_v1 }
 0xd50   :  { %13676 = vmatprep.subr.bf16.mxu1 %v16476_v37 }
 0xd52   :  { %13673 = vmatmul.mubr.msk.bf16.vlgmr.msra.gmra.mrb[40].mxu1 %vm2528_vm5, %v2526_v6 }
 0xd53   :  { %13677 = vmatpush3.bf16.msra.mxu1 %v15032_v4  ;;  %13684 = vmatprep.mubr.msk.bf16.mxu1 %vm16477_vm2, %v16476_v37  ;;  %v15051_v4 = vld [vmem:[#allocation2 + $0x58] sm:$0xff]  }
 0xd54   :  { %13678 = vmatprep.subr.bf16.mxu1 %v16476_v37 }
 0xd57   :  { %13679 = vmatpush3.bf16.msra.mxu1 %v15033_v5  ;;  %v15052_v5 = vld [vmem:[%s18661_s9] sm:$0xff]  }
 0xd58   :  { %13680 = vmatprep.subr.bf16.mxu1 %v16476_v37 }
 0xd5b   :  { %13681 = vmatpush3.bf16.msra.mxu1 %v15034_v7  ;;  %v15058_v7 = vld [vmem:[#allocation34 + $0x20] sm:$0xff]  }
 0xd5c   :  { %13682 = vmatprep.subr.bf16.mxu1 %v16476_v37 }
 0xd5f   :  { %13683 = vmatpush3.bf16.msra.mxu1 %v15035_v8 }
 0xd60   :  { %13708 = vmatprep.subr.bf16.mxu1 %v16476_v37 }
 0xe25   :  { %v2566_v10 = vpop.f32.mrb[40].mxu1 }
 0xe26   :  { %v2572_v12 = vpack.c.bf16 %v2566_v10, %v2566_v10  ;;  %v13674_v13 = vpop.f32.mrb[41].mxu1 }
 0xe27   :  { %v2569_v16 = vpop.f32.mrb[42].mxu1 }
 0xe28   :  { %v13675_v18 = vpop.f32.mrb[43].mxu1  ;;  %13685 = vmatmul.mubr.msk.bf16.vlgmr.msra.gmra.mrb[44].mxu1 %vm2605_vm6, %v2572_v12 }
 0xe29   :  { %13716 = vmatprep.mubr.msk.bf16.mxu1 %vm16477_vm2, %v16476_v37  ;;  %13709 = vmatpush3.bf16.msra.mxu1 %v15042_v32 }
 0xe2a   :  { %13710 = vmatprep.subr.bf16.mxu1 %v16476_v37 }
 0xe2d   :  { %13711 = vmatpush3.bf16.msra.mxu1 %v15044_v47 }
 0xe2e   :  { %13712 = vmatprep.subr.bf16.mxu1 %v16476_v37 }
 0xe31   :  { %13713 = vmatpush3.bf16.msra.mxu1 %v15046_v49 }
 0xe32   :  { %13714 = vmatprep.subr.bf16.mxu1 %v16476_v37 }
 0xe35   :  { %13715 = vmatpush3.bf16.msra.mxu1 %v15047_v50 }
 0xe36   :  { %13732 = vmatprep.subr.bf16.mxu1 %v16476_v37 }
 0xefb   :  { %v2643_v19 = vpop.f32.mrb[44].mxu1 }
 0xefc   :  { %v2651_v21 = vsub.f32 0.0, %v2643_v19  ;;  %v13686_v22 = vpop.f32.mrb[45].mxu1 }
 0xefd   :  { %v2646_v23 = vpop.f32.mrb[46].mxu1 }
 0xefe   :  { %v2652_v24 = vmul.f32 1.442695, %v2651_v21  ;;  %v13687_v25 = vpop.f32.mrb[47].mxu1 }
 0xf00   :  { %15449 = vpow2.f32 %v2652_v24  ;;  %v11892_v24 = vld [vmem:[#allocation9] ss:$0 sm:$0xff] }
 0xf0a   :  { %v15450_v26 = vpop.eup %15449 }
 0xf0b   :  { %v2654_v27 = vadd.f32 1.0, %v15450_v26 }
 0xf0d   :  { %15451 = vrcp.f32 %v2654_v27 }
 0xf17   :  { %v15452_v28 = vpop.eup %15451 }
 0xf18   :  { %v2657_v29 = vpack.c.bf16 %v15452_v28, %v15452_v28 }
 0xf1a   :  { %v2667_v30 = vsel %vm1704_vm4, %v2657_v29, 0 }
 0xf1b   :  { %13689 = vmatpush3.bf16.msra.mxu0 %v2667_v30 }
 0xf1c   :  { %13694 = vmatprep.subr.bf16.mxu0 %v16476_v37 }
 0xf1e   :  { %13691 = vmatmul.mubr.msk.bf16.vlgmr.msra.gmra.mrb[56].mxu0 %vm1697_vm3, %v15036_v31 }
 0xf1f   :  { %13696 = vmatprep.mubr.msk.bf16.mxu0 %vm16477_vm2, %v16476_v37 }
 0xff1   :  { %v2703_v33 = vpop.f32.mrb[56].mxu0 }
 0xff2   :  { %v13692_v34 = vpop.f32.mrb[57].mxu0  ;;  %v2710_v36 = vmul.f32 %v2703_v33, %v2524_v63  ;;  %v15050_v63 = vld [vmem:[#allocation2 + $0x50] sm:$0xff]  }
 0xff3   :  { %v2706_v35 = vpop.f32.mrb[58].mxu0 }
 0xff4   :  { %v2711_v38 = vmul.f32 %v2706_v35, %v2525_v0  ;;  %v13693_v39 = vpop.f32.mrb[59].mxu0 }
 0xff5   :  { %v15055_v39 = vld [vmem:[%s18661_s9 + $0x18] sm:$0xff]  }
 0xff6   :  { %v2718_v40 = vpack.c.bf16 %v2711_v38, %v2710_v36  ;;  %v15053_v36 = vld [vmem:[%s18661_s9 + $0x8] sm:$0xff]   ;;  %v15054_v38 = vld [vmem:[%s18661_s9 + $0x10] sm:$0xff]  }
 0xff8   :  { %13695 = vmatpush3.bf16.msra.mxu0 %v2718_v40  ;;  %v15056_v40 = vld [vmem:[%s18661_s9 + $0x20] sm:$0xff]  }
 0xff9   :  { %13720 = vmatprep.subr.bf16.mxu0 %v16476_v37 }
 0xffb   :  { %13697 = vmatmul.mubr.msk.bf16.vlgmr.msra.gmra.mrb[60].mxu0 %vm2528_vm5, %v15037_v41  ;;  %v15057_v41 = vld [vmem:[%s18661_s9 + $0x28] sm:$0xff]  }
 0xffc   :  { %13700 = vmatprep.mubr.msk.bf16.mxu0 %vm16477_vm2, %v16476_v37  ;;  %13721 = vmatpush3.bf16.msra.mxu0 %v15040_v42  ;;  %v15059_v42 = vld [vmem:[#allocation34 + $0x28] sm:$0xff]  }
 0xffd   :  { %13722 = vmatprep.subr.bf16.mxu0 %v16476_v37 }
0x1000   :  { %13723 = vmatpush3.bf16.msra.mxu0 %v15041_v43  ;;  %v15060_v43 = vld [vmem:[#allocation34 + $0x30] sm:$0xff]  }
0x1001   :  { %13724 = vmatprep.subr.bf16.mxu0 %v16476_v37 }
0x1003   :  { %13701 = vmatmul.mubr.msk.bf16.gmra.mrb[64].mxu0 %vm2528_vm5, %v15038_v44  ;;  %v15061_v44 = vld [vmem:[#allocation34 + $0x38] sm:$0xff]  }
0x1004   :  { %13704 = vmatprep.mubr.msk.bf16.mxu0 %vm16477_vm2, %v16476_v37  ;;  %13725 = vmatpush3.bf16.msra.mxu0 %v15043_v45  ;;  %v15062_v45 = vld [vmem:[#allocation34] sm:$0xff]  }
0x1005   :  { %13726 = vmatprep.subr.bf16.mxu0 %v16476_v37 }
0x1008   :  { %13727 = vmatpush3.bf16.msra.mxu0 %v15045_v48 }
0x100b   :  { %13705 = vmatmul.mubr.msk.bf16.gmra.mrb[68].mxu0 %vm2528_vm5, %v15039_v46 }
0x100c   :  { %13728 = vmatprep.mubr.msk.bf16.mxu0 %vm16477_vm2, %v16476_v37 }
0x10ce   :  { %v2777_v51 = vpop.f32.mrb[60].mxu0 }
0x10cf   :  { %v13698_v52 = vpop.f32.mrb[61].mxu0 }
0x10d0   :  { %v2780_v53 = vpop.f32.mrb[62].mxu0 }
0x10d1   :  { %v2800_v54 = vpack.c.bf16 %v2780_v53, %v2777_v51  ;;  %v13699_v55 = vpop.f32.mrb[63].mxu0 }
0x10d3   :  { %13729 = vmatmul.mubr.msk.bf16.vlgmr.msra.gmra.mrb[72].mxu0 %vm2605_vm6, %v2800_v54 }
0x10d4   :  { %13746 = vmatprep.mubr.msk.bf16.mxu0 %vm2528_vm5, %v15052_v5  ;;  %v15069_v5 = vld [vmem:[#allocation34 + $0x58] sm:$0xff]  }
0x10d6   :  { %v2785_v56 = vpop.f32.mrb[64].mxu0 }
0x10d7   :  { %v13702_v57 = vpop.f32.mrb[65].mxu0 }
0x10d8   :  { %v2788_v58 = vpop.f32.mrb[66].mxu0 }
0x10d9   :  { %v2801_v61 = vpack.c.bf16 %v2788_v58, %v2785_v56  ;;  %v13703_v59 = vpop.f32.mrb[67].mxu0  ;;  %v15063_v58 = vld [vmem:[#allocation34 + $0x8] sm:$0xff]  }
0x10db   :  { %13717 = vmatmul.mubr.msk.bf16.vlgmr.msra.gmra.mrb[48].mxu1 %vm2605_vm6, %v2801_v61  ;;  %v15064_v61 = vld [vmem:[#allocation34 + $0x10] sm:$0xff]  }
0x10dc   :  { %13733 = vmatpush3.bf16.msra.mxu1 %v15048_v60  ;;  %13740 = vmatprep.mubr.msk.bf16.mxu1 %vm16477_vm2, %v16476_v37 }
0x10dd   :  { %13734 = vmatprep.subr.bf16.mxu1 %v16476_v37 }
0x10de   :  { %v2793_v62 = vpop.f32.mrb[68].mxu0 }
0x10df   :  { %v13706_v3 = vpop.f32.mrb[69].mxu0 }
0x10e0   :  { %13735 = vmatpush3.bf16.msra.mxu1 %v15049_v2  ;;  %v2796_v0 = vpop.f32.mrb[70].mxu0 }
0x10e1   :  { %13736 = vmatprep.subr.bf16.mxu1 %v16476_v37  ;;  %v2802_v1 = vpack.c.bf16 %v2796_v0, %v2793_v62  ;;  %v13707_v6 = vpop.f32.mrb[71].mxu0  ;;  %v15065_v0 = vld [vmem:[#allocation34 + $0x18] sm:$0xff]  }
0x10e2   :  { %v15067_v6 = vld [vmem:[#allocation34 + $0x48] sm:$0xff]  }
0x10e4   :  { %13737 = vmatpush3.bf16.msra.mxu1 %v15050_v63 }
0x10e5   :  { %13738 = vmatprep.subr.bf16.mxu1 %v16476_v37 }
0x10e8   :  { %13739 = vmatpush3.bf16.msra.mxu1 %v15051_v4  ;;  %v15068_v4 = vld [vmem:[#allocation34 + $0x50] sm:$0xff]  }
0x10e9   :  { %13758 = vmatprep.subr.bf16.mxu1 %v15058_v7 }
0x10eb   :  { %13741 = vmatmul.mubr.msk.bf16.vlgmr.msra.gmra.mrb[52].mxu1 %vm2605_vm6, %v2802_v1  ;;  %v15066_v1 = vld [vmem:[#allocation34 + $0x40] sm:$0xff]  }
0x10ec   :  { %13759 = vmatpush3.bf16.msra.mxu1 %v15058_v7  ;;  %v3194_v7 = vld [vmem:[#allocation42] sm:$0xff] }
0x10ed   :  { %13760 = vmatprep.subr.bf16.mxu1 %v15059_v42 }
0x10f0   :  { %13761 = vmatpush3.bf16.msra.mxu1 %v15059_v42  ;;  %v15078_v42 = vld [vmem:[%s18662_s23] sm:$0xff]  }
0x10f1   :  { %13762 = vmatprep.subr.bf16.mxu1 %v15060_v43 }
0x10f4   :  { %13763 = vmatpush3.bf16.msra.mxu1 %v15060_v43  ;;  %v15079_v43 = vld [vmem:[%s18662_s23 + $0x8] sm:$0xff]  }
0x10f5   :  { %13764 = vmatprep.subr.bf16.mxu1 %v15061_v44 }
0x10f8   :  { %13765 = vmatpush3.bf16.msra.mxu1 %v15061_v44  ;;  %v15080_v44 = vld [vmem:[%s18662_s23 + $0x10] sm:$0xff]  }
0x10f9   :  { %13770 = vmatprep.subr.bf16.mxu1 %v15062_v45 }
0x11a6   :  { %v2950_v8 = vpop.f32.mrb[72].mxu0 }
0x11a7   :  { %v13730_v10 = vpop.f32.mrb[73].mxu0 }
0x11a8   :  { %v2953_v12 = vpop.f32.mrb[74].mxu0 }
0x11a9   :  { %v13731_v13 = vpop.f32.mrb[75].mxu0 }
0x11aa   :  { %v3195_v13 = vld [vmem:[#allocation42 + $0x8] sm:$0xff] }
0x11ae   :  { %v2882_v16 = vpop.f32.mrb[48].mxu1 }
0x11af   :  { %v2951_v18 = vadd.f32 %v2950_v8, %v2882_v16  ;;  %v13718_v19 = vpop.f32.mrb[49].mxu1 }
0x11b0   :  { %v2885_v21 = vpop.f32.mrb[50].mxu1  ;;  %v3196_v19 = vld [vmem:[#allocation42 + $0x10] sm:$0xff] }
0x11b1   :  { %v2954_v22 = vadd.f32 %v2953_v12, %v2885_v21  ;;  %v13719_v23 = vpop.f32.mrb[51].mxu1  ;;  %v3197_v12 = vld [vmem:[#allocation42 + $0x18] sm:$0xff] }
0x11be   :  { %v3027_v25 = vpop.f32.mrb[52].mxu1 }
0x11bf   :  { %v3034_v26 = vadd.f32 %v3027_v25, %v2951_v18  ;;  %v13742_v27 = vpop.f32.mrb[53].mxu1 }
0x11c0   :  { %v3030_v28 = vpop.f32.mrb[54].mxu1 }
0x11c1   :  { %v3042_v29 = vadd.f32 %v11892_v24, %v3034_v26  ;;  %v3035_v30 = vadd.f32 %v3030_v28, %v2954_v22  ;;  %v13743_v31 = vpop.f32.mrb[55].mxu1 }
0x11c2   :  { %v15070_v31 = vld [vmem:[%s18662_s23 + $0x40] sm:$0xff]  }
0x11c3   :  { %v3043_v32 = vadd.f32 %v11892_v24, %v3035_v30  ;;  %v17306_v33 = vmax.f32 %v3042_v29, 0.0 }
0x11c5   :  { %v17308_v34 = vmax.f32 %v3043_v32, 0.0  ;;  %v15071_v32 = vld [vmem:[%s18662_s23 + $0x48] sm:$0xff]  }
0x11c7   :  { %v17312_v35 = vpack.c.bf16 %v17308_v34, %v17306_v33 }
0x11c9   :  { %13744 = vmatprep.subr.bf16.mxu0 %v17312_v35 }
0x11ca   :  { %13745 = vmatpush3.bf16.msra.mxu0 %v17312_v35 }
0x11cb   :  { %13794 = vmatprep.subr.bf16.mxu0 %v16476_v37 }
0x11cd   :  { %13747 = vmatmul.mubr.msk.bf16.vlgmr.msra.gmra.mrb[76].mxu0 %vm2528_vm5, %v15053_v36  ;;  %v15072_v36 = vld [vmem:[%s18662_s23 + $0x50] sm:$0xff]  }
0x11ce   :  { %13750 = vmatprep.mubr.msk.bf16.mxu0 %vm2528_vm5, %v15054_v38  ;;  %v15073_v38 = vld [vmem:[%s18662_s23 + $0x58] sm:$0xff]  }
0x11d5   :  { %13751 = vmatmul.mubr.msk.bf16.gmra.mrb[80].mxu0 %vm2528_vm5, %v15055_v39  ;;  %v15075_v39 = vld [vmem:[%s18662_s23 + $0x68] sm:$0xff]  }
0x11d6   :  { %13754 = vmatprep.mubr.msk.bf16.mxu0 %vm2528_vm5, %v15056_v40  ;;  %v15076_v40 = vld [vmem:[%s18662_s23 + $0x70] sm:$0xff]  }
0x11dd   :  { %13755 = vmatmul.mubr.msk.bf16.gmra.mrb[84].mxu0 %vm2528_vm5, %v15057_v41  ;;  %v15077_v41 = vld [vmem:[%s18662_s23 + $0x78] sm:$0xff]  }
0x11de   :  { %13798 = vmatprep.mubr.msk.bf16.mxu0 %vm16477_vm2, %v16476_v37 }
0x12a0   :  { %v13748_v46 = vpop.f32.mrb[76].mxu0 }
0x12a1   :  { %v3141_v47 = vpop.f32.mrb[77].mxu0 }
0x12a2   :  { %v13749_v48 = vpop.f32.mrb[78].mxu0 }
0x12a3   :  { %v3189_v49 = vpack.c.bf16 %v13749_v48, %v13748_v46  ;;  %v3144_v50 = vpop.f32.mrb[79].mxu0  ;;  %v15082_v46 = vld [vmem:[%s18662_s23 + $0x20] sm:$0xff]   ;;  %v15084_v48 = vld [vmem:[%s18662_s23 + $0x30] sm:$0xff]  }
0x12a4   :  { %v3188_v51 = vpack.c.bf16 %v3144_v50, %v3141_v47  ;;  %v15083_v47 = vld [vmem:[%s18662_s23 + $0x28] sm:$0xff]  }
0x12a8   :  { %v13752_v52 = vpop.f32.mrb[80].mxu0 }
0x12a9   :  { %v3157_v53 = vpop.f32.mrb[81].mxu0 }
0x12aa   :  { %v13753_v54 = vpop.f32.mrb[82].mxu0 }
0x12ab   :  { %v3191_v55 = vpack.c.bf16 %v13753_v54, %v13752_v52  ;;  %v3160_v56 = vpop.f32.mrb[83].mxu0 }
0x12ac   :  { %v3190_v57 = vpack.c.bf16 %v3160_v56, %v3157_v53  ;;  %v15086_v56 = vld [vmem:[#allocation36] sm:$0xff]  }
0x12ae   :  { %13766 = vmatprep.mubr.msk.bf16.mxu1 %vm2605_vm6, %v3190_v57 }
0x12af   :  { %13767 = vmatmul.mubr.msk.bf16.vlgmr.msra.gmra.mrb[56].mxu1 %vm2605_vm6, %v3191_v55  ;;  %v17399_v55 = vld [vmem:[%s18655_s28] sm:$0xff]  }
0x12b0   :  { %13771 = vmatpush3.bf16.msra.mxu1 %v15062_v45  ;;  %13778 = vmatprep.mubr.msk.bf16.mxu1 %vm2605_vm6, %v3188_v51  ;;  %v13756_v60 = vpop.f32.mrb[84].mxu0  ;;  %v15081_v45 = vld [vmem:[%s18662_s23 + $0x18] sm:$0xff]  }
0x12b1   :  { %13772 = vmatprep.subr.bf16.mxu1 %v15063_v58  ;;  %v3173_v59 = vpop.f32.mrb[85].mxu0 }
0x12b2   :  { %v13757_v2 = vpop.f32.mrb[86].mxu0 }
0x12b3   :  { %v3193_v62 = vpack.c.bf16 %v13757_v2, %v13756_v60  ;;  %v3176_v3 = vpop.f32.mrb[87].mxu0 }
0x12b4   :  { %13773 = vmatpush3.bf16.msra.mxu1 %v15063_v58  ;;  %v3192_v63 = vpack.c.bf16 %v3176_v3, %v3173_v59 }
0x12b5   :  { %13774 = vmatprep.subr.bf16.mxu1 %v15064_v61 }
0x12b8   :  { %13775 = vmatpush3.bf16.msra.mxu1 %v15064_v61 }
0x12b9   :  { %13776 = vmatprep.subr.bf16.mxu1 %v15065_v0 }
0x12bc   :  { %13777 = vmatpush3.bf16.msra.mxu1 %v15065_v0 }
0x12bd   :  { %13782 = vmatprep.subr.bf16.mxu1 %v15066_v1 }
0x12bf   :  { %13779 = vmatmul.mubr.msk.bf16.vlgmr.msra.gmra.mrb[56].mxu1 %vm2605_vm6, %v3189_v49  ;;  %v15085_v49 = vld [vmem:[%s18662_s23 + $0x38] sm:$0xff]  }
0x12c0   :  { %13783 = vmatpush3.bf16.msra.mxu1 %v15066_v1  ;;  %13790 = vmatprep.mubr.msk.bf16.mxu1 %vm2605_vm6, %v3192_v63 }
0x12c1   :  { %13784 = vmatprep.subr.bf16.mxu1 %v15067_v6 }
0x12c4   :  { %13785 = vmatpush3.bf16.msra.mxu1 %v15067_v6 }
0x12c5   :  { %13786 = vmatprep.subr.bf16.mxu1 %v15068_v4 }
0x12c8   :  { %13787 = vmatpush3.bf16.msra.mxu1 %v15068_v4 }
0x12c9   :  { %13788 = vmatprep.subr.bf16.mxu1 %v15069_v5 }
0x12cc   :  { %13789 = vmatpush3.bf16.msra.mxu1 %v15069_v5 }
0x12cd   :  { %13842 = vmatprep.subr.bf16.mxu1 %v16476_v37 }
0x12cf   :  { %13791 = vmatmul.mubr.msk.bf16.vlgmr.msra.gmra.mrb[56].mxu1 %vm2605_vm6, %v3193_v62 }
0x12d0   :  { %13844 = vmatprep.mubr.msk.bf16.mxu1 %vm16477_vm2, %v16476_v37  ;;  %13843 = vmatpush3.bf16.msra.mxu1 %v15086_v56 }
0x13a2   :  { %v13792_v8 = vpop.f32.mrb[56].mxu1 }
0x13a3   :  { %v3446_v10 = vpop.f32.mrb[57].mxu1  ;;  %v17344_v24 = vadd.f32 %v13792_v8, %v3196_v19 }
0x13a4   :  { %v17338_v16 = vadd.f32 %v3446_v10, %v3194_v7  ;;  %v13793_v18 = vpop.f32.mrb[58].mxu1  ;;  %v17409_v10 = vld [vmem:[%s18655_s28 + $0x8] sm:$0xff]  }
0x13a5   :  { %v3449_v21 = vpop.f32.mrb[59].mxu1  ;;  %v17340_v22 = vadd.f32 %v13793_v18, %v3197_v12  ;;  %v3471_v29 = vmax.f32 %v17344_v24, 0.0  ;;  %v17414_v12 = vld [vmem:[%s18653_s11] sm:$0xff]   ;;  %v15087_v24 = vld [vmem:[#allocation36 + $0x8] sm:$0xff]  }
0x13a6   :  { %v17342_v23 = vadd.f32 %v3449_v21, %v3195_v13  ;;  %v3469_v25 = vmax.f32 %v17338_v16, 0.0  ;;  %v17433_v16 = vld [vmem:[%s18653_s11 + $0x10] sm:$0xff]  }
0x13a7   :  { %v3472_v27 = vmax.f32 %v17340_v22, 0.0  ;;  %v17428_v22 = vld [vmem:[%s18653_s11 + $0x8] sm:$0xff]  }
0x13a8   :  { %v3470_v26 = vmax.f32 %v17342_v23, 0.0  ;;  %v17438_v23 = vld [vmem:[%s18653_s11 + $0x18] sm:$0xff]  }
0x13a9   :  { %v3474_v30 = vpack.c.bf16 %v3472_v27, %v3471_v29 }
0x13aa   :  { %v3473_v28 = vpack.c.bf16 %v3470_v26, %v3469_v25 }
0x13ac   :  { %13795 = vmatpush3.bf16.msra.mxu0 %v3473_v28 }
0x13ad   :  { %13796 = vmatprep.subr.bf16.mxu0 %v16476_v37 }
0x13b0   :  { %13797 = vmatpush3.bf16.msra.mxu0 %v3474_v30 }
0x13b1   :  { %13802 = vmatprep.subr.bf16.mxu0 %v16476_v37 }
0x13b3   :  { %13799 = vmatmul.mubr.msk.bf16.vlgmr.msra.gmra.mrb[88].mxu0 %vm770_vm0, %v17152_v17  ;;  %v15074_v17 = vld [vmem:[%s18662_s23 + $0x60] sm:$0xff]  }
0x13b4   :  { %13803 = vmatpush3.bf16.msra.mxu0 %v15070_v31  ;;  %13818 = vmatprep.mubr.msk.bf16.mxu0 %vm16477_vm2, %v16476_v37 }
0x13b5   :  { %13804 = vmatprep.subr.bf16.mxu0 %v16476_v37 }
0x13b8   :  { %13805 = vmatpush3.bf16.msra.mxu0 %v15071_v32 }
0x13b9   :  { %13806 = vmatprep.subr.bf16.mxu0 %v16476_v37 }
0x13bc   :  { %13807 = vmatpush3.bf16.msra.mxu0 %v15072_v36 }
0x13bd   :  { %13808 = vmatprep.subr.bf16.mxu0 %v16476_v37 }
0x13c0   :  { %13809 = vmatpush3.bf16.msra.mxu0 %v15073_v38 }
0x13c1   :  { %13810 = vmatprep.subr.bf16.mxu0 %v16476_v37 }
0x13c4   :  { %13811 = vmatpush3.bf16.msra.mxu0 %v15074_v17 }
0x13c5   :  { %13812 = vmatprep.subr.bf16.mxu0 %v16476_v37 }
0x13c8   :  { %13813 = vmatpush3.bf16.msra.mxu0 %v15075_v39 }
0x13c9   :  { %13814 = vmatprep.subr.bf16.mxu0 %v16476_v37 }
0x13cc   :  { %13815 = vmatpush3.bf16.msra.mxu0 %v15076_v40 }
0x13cd   :  { %13816 = vmatprep.subr.bf16.mxu0 %v16476_v37 }
0x13d0   :  { %13817 = vmatpush3.bf16.msra.mxu0 %v15077_v41 }
0x13d1   :  { %13822 = vmatprep.subr.bf16.mxu0 %v16476_v37 }
0x13d3   :  { %13819 = vmatmul.mubr.bf16.vlgmr.msra.gmra.mrb[92].mxu0 %v17156_v20 }
0x13d4   :  { %13823 = vmatpush3.bf16.msra.mxu0 %v15078_v42  ;;  %13838 = vmatprep.mubr.msk.bf16.mxu0 %vm16477_vm2, %v16476_v37 }
0x13d5   :  { %13824 = vmatprep.subr.bf16.mxu0 %v16476_v37 }
0x13d8   :  { %13825 = vmatpush3.bf16.msra.mxu0 %v15079_v43 }
0x13d9   :  { %13826 = vmatprep.subr.bf16.mxu0 %v16476_v37 }
0x13dc   :  { %13827 = vmatpush3.bf16.msra.mxu0 %v15080_v44 }
0x13dd   :  { %13828 = vmatprep.subr.bf16.mxu0 %v16476_v37 }
0x13e0   :  { %13829 = vmatpush3.bf16.msra.mxu0 %v15081_v45 }
0x13e1   :  { %13830 = vmatprep.subr.bf16.mxu0 %v16476_v37 }
0x13e4   :  { %13831 = vmatpush3.bf16.msra.mxu0 %v15082_v46 }
0x13e5   :  { %13832 = vmatprep.subr.bf16.mxu0 %v16476_v37 }
0x13e8   :  { %13833 = vmatpush3.bf16.msra.mxu0 %v15083_v47 }
0x13e9   :  { %13834 = vmatprep.subr.bf16.mxu0 %v16476_v37 }
0x13ec   :  { %13835 = vmatpush3.bf16.msra.mxu0 %v15084_v48 }
0x13ed   :  { %13836 = vmatprep.subr.bf16.mxu0 %v16476_v37 }
0x13f0   :  { %13837 = vmatpush3.bf16.msra.mxu0 %v15085_v49 }
0x1486   :  { %v3509_v50 = vpop.f32.mrb[88].mxu0 }
0x1487   :  { %v3515_v51 = vpack.c.bf16 %v3509_v50, %v3509_v50  ;;  %v13800_v52 = vpop.f32.mrb[89].mxu0 }
0x1488   :  { %v3512_v53 = vpop.f32.mrb[90].mxu0 }
0x1489   :  { %v13801_v54 = vpop.f32.mrb[91].mxu0  ;;  %13839 = vmatmul.mubr.bf16.vlgmr.msra.gmra.mrb[92].mxu0 %v3515_v51 }
0x148a   :  { %13878 = vmatprep.mubr.msk.bf16.mxu0 %vm1697_vm3, %v17399_v55 }
0x155c   :  { %v3719_v57 = vpop.f32.mrb[92].mxu0 }
0x155d   :  { %v3725_v58 = vsub.f32 0.0, %v3719_v57  ;;  %v13840_v60 = vpop.f32.mrb[93].mxu0 }
0x155e   :  { %v3722_v61 = vpop.f32.mrb[94].mxu0 }
0x155f   :  { %v3726_v59 = vmul.f32 1.442695, %v3725_v58  ;;  %v13841_v2 = vpop.f32.mrb[95].mxu0  ;;  %v15088_v58 = vld [vmem:[%s18663_s24 + $0x40] sm:$0xff]  }
0x1560   :  { %v15089_v2 = vld [vmem:[%s18663_s24] sm:$0xff]  }
0x1561   :  { %15453 = vpow2.f32 %v3726_v59 }
0x156b   :  { %v15454_v62 = vpop.eup %15453 }
0x156c   :  { %v3728_v3 = vadd.f32 1.0, %v15454_v62  ;;  %v15090_v62 = vld [vmem:[%s18663_s24 + $0x48] sm:$0xff]  }
0x156e   :  { %15455 = vrcp.f32 %v3728_v3  ;;  %v15091_v3 = vld [vmem:[%s18663_s24 + $0x8] sm:$0xff]  }
0x1578   :  { %v15456_v63 = vpop.eup %15455 }
0x1579   :  { %v3731_v0 = vpack.c.bf16 %v15456_v63, %v15456_v63  ;;  %v15092_v63 = vld [vmem:[%s18663_s24 + $0x50] sm:$0xff]  }
0x157b   :  { %13845 = vmatmul.mubr.msk.bf16.vlgmr.msra.gmra.mrb[60].mxu1 %vm2528_vm5, %v3731_v0 }
0x157c   :  { %13850 = vmatprep.mubr.msk.bf16.mxu1 %vm1697_vm3, %v17399_v55 }
0x164e   :  { %v3777_v1 = vpop.f32.mrb[60].mxu1 }
0x164f   :  { %v3783_v6 = vpack.c.bf16 %v3777_v1, %v3777_v1  ;;  %v13846_v4 = vpop.f32.mrb[61].mxu1  ;;  %v15094_v1 = vld [vmem:[%s18663_s24 + $0x58] sm:$0xff]  }
0x1650   :  { %v3780_v5 = vpop.f32.mrb[62].mxu1  ;;  %v15096_v4 = vld [vmem:[%s18663_s24 + $0x60] sm:$0xff]  }
0x1651   :  { %v13847_v7 = vpop.f32.mrb[63].mxu1  ;;  %14817 = vmatprep.subr.msk.bf16.mxu1 %vm1704_vm4, %v3783_v6  ;;  %v3785_v8 = vsel %vm1704_vm4, %v3783_v6, 0  ;;  %v15095_v6 = vld [vmem:[%s18663_s24 + $0x18] sm:$0xff]   ;;  %v15097_v5 = vld [vmem:[%s18663_s24 + $0x20] sm:$0xff]  }
0x1652   :  { %13849 = vmatpush3.bf16.msra.mxu1 %v3785_v8  ;;  %v15098_v7 = vld [vmem:[%s18663_s24 + $0x68] sm:$0xff]  }
0x1653   :  { %v15099_v8 = vld [vmem:[%s18663_s24 + $0x28] sm:$0xff]  }
0x1655   :  { %13851 = vmatmul.mubr.msk.bf16.vlgmr.msra.gmra.mrb[64].mxu1 %vm1697_vm3, %v17409_v10 }
0x1656   :  { %13858 = vmatprep.mubr.msk.bf16.mxu1 %vm770_vm0, %v17414_v12 }
0x1728   :  { %v13852_v13 = vpop.f32.mrb[64].mxu1 }
0x1729   :  { %v3821_v18 = vpop.f32.mrb[65].mxu1  ;;  %v3838_v21 = vmul.f32 %v13852_v13, %v3471_v29  ;;  %v15100_v13 = vld [vmem:[%s18663_s24 + $0x70] sm:$0xff]  }
0x172a   :  { %v13853_v19 = vpop.f32.mrb[66].mxu1  ;;  %v3836_v31 = vmul.f32 %v3821_v18, %v3469_v25  ;;  %v17443_v25 = vld [vmem:[%s18653_s11 + $0x20] sm:$0xff]   ;;  %v15101_v18 = vld [vmem:[%s18663_s24 + $0x30] sm:$0xff]  }
0x172b   :  { %v3839_v28 = vmul.f32 %v13853_v19, %v3472_v27  ;;  %v3824_v30 = vpop.f32.mrb[67].mxu1  ;;  %v15102_v19 = vld [vmem:[%s18663_s24 + $0x78] sm:$0xff]  }
0x172c   :  { %v3837_v32 = vmul.f32 %v3824_v30, %v3470_v26  ;;  %v17448_v26 = vld [vmem:[%s18653_s11 + $0x28] sm:$0xff]   ;;  %v15115_v30 = vld [vmem:[%s18663_s24 + $0x100] sm:$0xff]  }
0x172d   :  { %v3841_v36 = vpack.c.bf16 %v3839_v28, %v3838_v21  ;;  %v15103_v21 = vld [vmem:[%s18663_s24 + $0x38] sm:$0xff]   ;;  %v15113_v28 = vld [vmem:[%s18663_s24 + $0x140] sm:$0xff]  }
0x172e   :  { %v3840_v38 = vpack.c.bf16 %v3837_v32, %v3836_v31  ;;  %v15117_v31 = vld [vmem:[%s18663_s24 + $0x148] sm:$0xff]  }
0x172f   :  { %v15119_v32 = vld [vmem:[%s18663_s24 + $0x108] sm:$0xff]  }
0x1730   :  { %13854 = vmatprep.subr.bf16.mxu1 %v3840_v38 }
0x1731   :  { %13855 = vmatpush3.bf16.msra.mxu1 %v3840_v38 }
0x1732   :  { %13856 = vmatprep.subr.bf16.mxu1 %v3841_v36 }
0x1735   :  { %13857 = vmatpush3.bf16.msra.mxu1 %v3841_v36  ;;  %v15121_v36 = vld [vmem:[%s18663_s24 + $0x150] sm:$0xff]  }
0x1736   :  { %13870 = vmatprep.subr.bf16.mxu1 %v16476_v37 }
0x1738   :  { %13859 = vmatmul.mubr.msk.bf16.vlgmr.msra.gmra.mrb[68].mxu1 %vm770_vm0, %v17428_v22 }
0x1739   :  { %13862 = vmatprep.mubr.msk.bf16.mxu1 %vm770_vm0, %v17433_v16  ;;  %13871 = vmatpush3.bf16.msra.mxu1 %v15087_v24 }
0x1740   :  { %13863 = vmatmul.mubr.msk.bf16.gmra.mrb[72].mxu1 %vm770_vm0, %v17438_v23 }
0x1741   :  { %13866 = vmatprep.mubr.msk.bf16.mxu1 %vm770_vm0, %v17443_v25 }
0x1748   :  { %13867 = vmatmul.mubr.msk.bf16.gmra.mrb[76].mxu1 %vm770_vm0, %v17448_v26 }
0x1749   :  { %13872 = vmatprep.mubr.msk.bf16.mxu1 %vm16477_vm2, %v16476_v37 }
0x1750   :  { %13873 = vmatmul.mubr.msk.bf16.vlgmr.msra.gmra.mrb[80].mxu1 %vm2528_vm5, %v3731_v0  ;;  %v15093_v0 = vld [vmem:[%s18663_s24 + $0x10] sm:$0xff]  }
0x1751   :  { %13886 = vmatprep.mubr.msk.bf16.mxu1 %vm770_vm0, %v17414_v12 }
0x180b   :  { %v13860_v27 = vpop.f32.mrb[68].mxu1 }
0x180c   :  { %v3876_v29 = vpop.f32.mrb[69].mxu1 }
0x180d   :  { %v13861_v17 = vpop.f32.mrb[70].mxu1 }
0x180e   :  { %v3924_v39 = vpack.c.bf16 %v13861_v17, %v13860_v27  ;;  %v3879_v40 = vpop.f32.mrb[71].mxu1 }
0x180f   :  { %v3923_v41 = vpack.c.bf16 %v3879_v40, %v3876_v29 }
0x1813   :  { %v13864_v42 = vpop.f32.mrb[72].mxu1 }
0x1814   :  { %v3892_v43 = vpop.f32.mrb[73].mxu1 }
0x1815   :  { %v13865_v44 = vpop.f32.mrb[74].mxu1 }
0x1816   :  { %v3926_v45 = vpack.c.bf16 %v13865_v44, %v13864_v42  ;;  %v3895_v46 = vpop.f32.mrb[75].mxu1  ;;  %v15104_v44 = vld [vmem:[%s18663_s24 + $0xc0] sm:$0xff]  }
0x1817   :  { %v3925_v47 = vpack.c.bf16 %v3895_v46, %v3892_v43  ;;  %v15106_v46 = vld [vmem:[%s18663_s24 + $0xc8] sm:$0xff]  }
0x181b   :  { %v17457_v48 = vpop.f32.mrb[76].mxu1 }
0x181c   :  { %v17459_v49 = vpop.f32.mrb[77].mxu1 }
0x181d   :  { %v17461_v50 = vpop.f32.mrb[78].mxu1 }
0x181e   :  { %v3928_v51 = vpack.c.bf16 %v17461_v50, %v17457_v48  ;;  %v17465_v52 = vpop.f32.mrb[79].mxu1 }
0x181f   :  { %v3927_v53 = vpack.c.bf16 %v17465_v52, %v17459_v49 }
0x1823   :  { %v3972_v54 = vpop.f32.mrb[80].mxu1 }
0x1824   :  { %v3978_v56 = vpack.c.bf16 %v3972_v54, %v3972_v54  ;;  %v13874_v57 = vpop.f32.mrb[81].mxu1  ;;  %v15108_v54 = vld [vmem:[%s18663_s24 + $0xd0] sm:$0xff]  }
0x1825   :  { %v3975_v60 = vpop.f32.mrb[82].mxu1  ;;  %v15110_v57 = vld [vmem:[%s18663_s24 + $0xd8] sm:$0xff]  }
0x1826   :  { %v3980_v61 = vsel %vm1704_vm4, %v3978_v56, 0  ;;  %v13875_v59 = vpop.f32.mrb[83].mxu1  ;;  %14818 = vmatprep.subr.msk.bf16.mxu0 %vm1704_vm4, %v3978_v56  ;;  %v15109_v56 = vld [vmem:[%s18663_s24 + $0x90] sm:$0xff]   ;;  %v15112_v60 = vld [vmem:[%s18663_s24 + $0xe0] sm:$0xff]  }
0x1827   :  { %13877 = vmatpush3.bf16.msra.mxu0 %v3980_v61  ;;  %v15114_v61 = vld [vmem:[%s18663_s24 + $0xa0] sm:$0xff]   ;;  %v15116_v59 = vld [vmem:[%s18663_s24 + $0xe8] sm:$0xff]  }
0x1828   :  { %12829 = vmatprep.subr.bf16.mxu0 %v15088_v58  ;;  %v15111_v58 = vld [vmem:[%s18663_s24 + $0x98] sm:$0xff]  }
0x182a   :  { %13879 = vmatmul.mubr.msk.bf16.vlgmr.msra.gmra.mrb[96].mxu0 %vm1697_vm3, %v17409_v10 }
0x182b   :  { %12830 = vmatpush3.bf16.msra.mxu0 %v15089_v2  ;;  %4547 = vmatprep.mubr.bf16.mxu0 %v3925_v47  ;;  %v15107_v47 = vld [vmem:[%s18663_s24 + $0x88] sm:$0xff]  }
0x182c   :  { %12831 = vmatprep.subr.bf16.mxu0 %v15090_v62 }
0x182f   :  { %12832 = vmatpush3.bf16.msra.mxu0 %v15091_v3  ;;  %v15118_v3 = vld [vmem:[%s18663_s24 + $0xa8] sm:$0xff]  }
0x1830   :  { %12833 = vmatprep.subr.bf16.mxu0 %v15092_v63 }
0x1833   :  { %12834 = vmatpush3.bf16.msra.mxu0 %v15093_v0 }
0x1834   :  { %12835 = vmatprep.subr.bf16.mxu0 %v15094_v1  ;;  %v15120_v1 = vld [vmem:[%s18663_s24 + $0xf0] sm:$0xff]  }
0x1837   :  { %12836 = vmatpush3.bf16.msra.mxu0 %v15095_v6 }
0x1838   :  { %12837 = vmatprep.subr.bf16.mxu0 %v15096_v4 }
0x183b   :  { %12838 = vmatpush3.bf16.msra.mxu0 %v15097_v5 }
0x183c   :  { %12839 = vmatprep.subr.bf16.mxu0 %v15098_v7 }
0x183f   :  { %12840 = vmatpush3.bf16.msra.mxu0 %v15099_v8 }
0x1840   :  { %12841 = vmatprep.subr.bf16.mxu0 %v15100_v13 }
0x1843   :  { %12842 = vmatpush3.bf16.msra.mxu0 %v15101_v18 }
0x1844   :  { %12843 = vmatprep.subr.bf16.mxu0 %v15102_v19 }
0x1847   :  { %12844 = vmatpush3.bf16.msra.mxu0 %v15103_v21  ;;  %v15122_v21 = vld [vmem:[%s18663_s24 + $0xb0] sm:$0xff]  }
0x1848   :  { %12885 = vmatprep.subr.bf16.mxu0 %v15113_v28  ;;  %v15123_v28 = vld [vmem:[%s18663_s24 + $0x110] sm:$0xff]  }
0x184a   :  { %4548 = vmatmul.mubr.bf16.vlgmr.msra.gmra.mrb[100].mxu0 %v3923_v41 }
0x184b   :  { %4555 = vmatprep.mubr.bf16.mxu0 %v3926_v45  ;;  %12886 = vmatpush3.bf16.msra.mxu0 %v15115_v30  ;;  %v15105_v45 = vld [vmem:[%s18663_s24 + $0x80] sm:$0xff]   ;;  %v15124_v30 = vld [vmem:[%s18663_s24 + $0xf8] sm:$0xff]  }
0x184c   :  { %12887 = vmatprep.subr.bf16.mxu0 %v15117_v31  ;;  %v15125_v31 = vld [vmem:[%s18663_s24 + $0x158] sm:$0xff]  }
0x184f   :  { %12888 = vmatpush3.bf16.msra.mxu0 %v15119_v32  ;;  %v15126_v32 = vld [vmem:[%s18663_s24 + $0xb8] sm:$0xff]  }
0x1850   :  { %12889 = vmatprep.subr.bf16.mxu0 %v15121_v36  ;;  %v15127_v36 = vld [vmem:[%s18663_s24 + $0x118] sm:$0xff]  }
0x1852   :  { %4556 = vmatmul.mubr.bf16.gmra.mrb[104].mxu0 %v3924_v39 }
0x1853   :  { %12890 = vmatpush3.bf16.msra.mxu0 %v15123_v28 }
0x1854   :  { %12891 = vmatprep.subr.bf16.mxu0 %v15125_v31 }
0x1857   :  { %12892 = vmatpush3.bf16.msra.mxu0 %v15127_v36 }
0x18fd   :  { %v13880_v38 = vpop.f32.mrb[96].mxu0 }
0x18fe   :  { %v4016_v24 = vpop.f32.mrb[97].mxu0  ;;  %v4033_v29 = vmul.f32 %v13880_v38, %v17145_v14  ;;  %v15128_v38 = vld [vmem:[%s18663_s24 + $0x160] sm:$0xff]  }
0x18ff   :  { %v13881_v27 = vpop.f32.mrb[98].mxu0  ;;  %v4031_v40 = vmul.f32 %v4016_v24, %v17139_v9  ;;  %v15129_v24 = vld [vmem:[%s18663_s24 + $0x120] sm:$0xff]   ;;  %12893 = vmatprep.subr.bf16.mxu0 %v15128_v38 }
0x1900   :  { %v4034_v17 = vmul.f32 %v13881_v27, %v17147_v15  ;;  %v4019_v39 = vpop.f32.mrb[99].mxu0  ;;  %12894 = vmatpush3.bf16.msra.mxu0 %v15129_v24  ;;  %v15130_v27 = vld [vmem:[%s18663_s24 + $0x168] sm:$0xff]  }
0x1901   :  { %v4032_v41 = vmul.f32 %v4019_v39, %v17141_v11  ;;  %12895 = vmatprep.subr.bf16.mxu0 %v15130_v27  ;;  %v15133_v39 = vld [vmem:[%s18663_s24 + $0x130] sm:$0xff]  }
0x1902   :  { %v4036_v42 = vpack.c.bf16 %v4034_v17, %v4033_v29  ;;  %v15131_v29 = vld [vmem:[%s18663_s24 + $0x128] sm:$0xff]   ;;  %v15132_v17 = vld [vmem:[%s18663_s24 + $0x170] sm:$0xff]  }
0x1903   :  { %v4035_v43 = vpack.c.bf16 %v4032_v41, %v4031_v40  ;;  %v15134_v40 = vld [vmem:[%s18663_s24 + $0x178] sm:$0xff]  }
0x1904   :  { %12896 = vmatpush3.bf16.msra.mxu0 %v15131_v29  ;;  %v15135_v41 = vld [vmem:[%s18663_s24 + $0x138] sm:$0xff]  }
0x1905   :  { %13882 = vmatprep.subr.bf16.mxu1 %v4035_v43  ;;  %12897 = vmatprep.subr.bf16.mxu0 %v15132_v17 }
0x1906   :  { %13883 = vmatpush3.bf16.msra.mxu1 %v4035_v43 }
0x1907   :  { %13884 = vmatprep.subr.bf16.mxu1 %v4036_v42 }
0x1908   :  { %12898 = vmatpush3.bf16.msra.mxu0 %v15133_v39 }
0x1909   :  { %12899 = vmatprep.subr.bf16.mxu0 %v15134_v40 }
0x190a   :  { %13885 = vmatpush3.bf16.msra.mxu1 %v4036_v42 }
0x190b   :  { %12857 = vmatprep.subr.bf16.mxu1 %v15104_v44 }
0x190c   :  { %12900 = vmatpush3.bf16.msra.mxu0 %v15135_v41 }
0x190d   :  { %13887 = vmatmul.mubr.msk.bf16.vlgmr.msra.gmra.mrb[84].mxu1 %vm770_vm0, %v17428_v22 }
0x190e   :  { %13890 = vmatprep.mubr.msk.bf16.mxu1 %vm770_vm0, %v17433_v16  ;;  %12858 = vmatpush3.bf16.msra.mxu1 %v15105_v45 }
0x190f   :  { %12859 = vmatprep.subr.bf16.mxu1 %v15106_v46 }
0x1912   :  { %12860 = vmatpush3.bf16.msra.mxu1 %v15107_v47 }
0x1913   :  { %12861 = vmatprep.subr.bf16.mxu1 %v15108_v54 }
0x1915   :  { %13891 = vmatmul.mubr.msk.bf16.gmra.mrb[88].mxu1 %vm770_vm0, %v17438_v23 }
0x1916   :  { %13894 = vmatprep.mubr.msk.bf16.mxu1 %vm770_vm0, %v17443_v25  ;;  %12862 = vmatpush3.bf16.msra.mxu1 %v15109_v56 }
0x1917   :  { %12863 = vmatprep.subr.bf16.mxu1 %v15110_v57 }
0x191a   :  { %12864 = vmatpush3.bf16.msra.mxu1 %v15111_v58 }
0x191b   :  { %12865 = vmatprep.subr.bf16.mxu1 %v15112_v60 }
0x191d   :  { %13895 = vmatmul.mubr.msk.bf16.gmra.mrb[92].mxu1 %vm770_vm0, %v17448_v26  ;;  %v12845_v2 = vpop.f32.mrb[100].mxu0 }
0x191e   :  { %v12846_v62 = vpop.f32.mrb[101].mxu0  ;;  %12866 = vmatpush3.bf16.msra.mxu1 %v15114_v61 }
0x191f   :  { %v17520_v63 = vadd.f32 %v12846_v62, %v12845_v2  ;;  %v12848_v0 = vpop.f32.mrb[102].mxu0  ;;  %12867 = vmatprep.subr.bf16.mxu1 %v15116_v59 }
0x1920   :  { %v12849_v6 = vpop.f32.mrb[103].mxu0 }
0x1921   :  { %v17523_v4 = vadd.f32 %v12849_v6, %v12848_v0 }
0x1922   :  { %12868 = vmatpush3.bf16.msra.mxu1 %v15118_v3 }
0x1923   :  { %12869 = vmatprep.subr.bf16.mxu1 %v15120_v1 }
0x1925   :  { %v12851_v5 = vpop.f32.mrb[104].mxu0 }
0x1926   :  { %v12852_v7 = vpop.f32.mrb[105].mxu0  ;;  %12870 = vmatpush3.bf16.msra.mxu1 %v15122_v21 }
0x1927   :  { %v17525_v8 = vadd.f32 %v12852_v7, %v12851_v5  ;;  %v12854_v13 = vpop.f32.mrb[106].mxu0  ;;  %12871 = vmatprep.subr.bf16.mxu1 %v15124_v30 }
0x1928   :  { %v12855_v18 = vpop.f32.mrb[107].mxu0 }
0x1929   :  { %v17527_v19 = vadd.f32 %v12855_v18, %v12854_v13 }
0x192a   :  { %12872 = vmatpush3.bf16.msra.mxu1 %v15126_v32 }
0x192b   :  { %13898 = vmatprep.subr.bf16.mxu1 %v16476_v37 }
0x19e0   :  { %v13888_v42 = vpop.f32.mrb[84].mxu1 }
0x19e1   :  { %v4071_v43 = vpop.f32.mrb[85].mxu1 }
0x19e2   :  { %v13889_v44 = vpop.f32.mrb[86].mxu1 }
0x19e3   :  { %v4119_v45 = vpack.c.bf16 %v13889_v44, %v13888_v42  ;;  %v4074_v46 = vpop.f32.mrb[87].mxu1 }
0x19e4   :  { %v4118_v47 = vpack.c.bf16 %v4074_v46, %v4071_v43 }
0x19e6   :  { %4596 = vmatprep.mubr.bf16.mxu1 %v4118_v47 }
0x19e7   :  { %4597 = vmatmul.mubr.bf16.vlgmr.msra.gmra.mrb[96].mxu1 %v3927_v53  ;;  %v11976_v53 = vld [vmem:[#allocation39] ss:$0 sm:$0xff] }
0x19e8   :  { %v13892_v54 = vpop.f32.mrb[88].mxu1  ;;  %4604 = vmatprep.mubr.bf16.mxu1 %v4119_v45  ;;  %v4550_v50 = vadd.f32 %v17520_v63, %v11976_v53  ;;  %v4553_v5 = vadd.f32 %v17523_v4, %v11976_v53  ;;  %v4558_v30 = vadd.f32 %v17525_v8, %v11976_v53  ;;  %v4561_v36 = vadd.f32 %v17527_v19, %v11976_v53  ;;  %v15140_v53 = vld [vmem:[#allocation37 + $0x20] sm:$0xff]  }
0x19e9   :  { %v4087_v56 = vpop.f32.mrb[89].mxu1 }
0x19ea   :  { %v13893_v57 = vpop.f32.mrb[90].mxu1 }
0x19eb   :  { %v4121_v58 = vpack.c.bf16 %v13893_v57, %v13892_v54  ;;  %v4090_v60 = vpop.f32.mrb[91].mxu1 }
0x19ec   :  { %v4120_v61 = vpack.c.bf16 %v4090_v60, %v4087_v56 }
0x19ef   :  { %4605 = vmatmul.mubr.bf16.gmra.mrb[100].mxu1 %v3928_v51 }
0x19f0   :  { %v13896_v59 = vpop.f32.mrb[92].mxu1  ;;  %13902 = vmatprep.mubr.msk.bf16.mxu1 %vm16477_vm2, %v16476_v37 }
0x19f1   :  { %v4103_v2 = vpop.f32.mrb[93].mxu1 }
0x19f2   :  { %v13897_v62 = vpop.f32.mrb[94].mxu1 }
0x19f3   :  { %v4123_v3 = vpack.c.bf16 %v13897_v62, %v13896_v59  ;;  %v4106_v49 = vpop.f32.mrb[95].mxu1  ;;  %v15503_v62 = vld [vmem:[#allocation27] sm:$0x1] }
0x19f4   :  { %v4122_v52 = vpack.c.bf16 %v4106_v49, %v4103_v2  ;;  %v15136_v2 = vld [vmem:[#allocation37] sm:$0xff]   ;;  %v15138_v49 = vld [vmem:[#allocation37 + $0x10] sm:$0xff]  }
0x19f6   :  { %4645 = vmatprep.mubr.bf16.mxu0 %v4122_v52  ;;  %v15139_v52 = vld [vmem:[#allocation37 + $0x18] sm:$0xff]  }
0x19f7   :  { %4646 = vmatmul.mubr.bf16.vlgmr.msra.gmra.mrb[108].mxu0 %v4120_v61 }
0x19f8   :  { %4653 = vmatprep.mubr.bf16.mxu0 %v4123_v3  ;;  %v15137_v3 = vld [vmem:[#allocation37 + $0x8] sm:$0xff]  }
0x19ff   :  { %4654 = vmatmul.mubr.bf16.gmra.mrb[112].mxu0 %v4121_v58 }
0x1a00   :  { %13928 = vmatprep.mubr.msk.bf16.mxu0 %vm1697_vm3, %v17399_v55 }
0x1aba   :  { %v12873_v0 = vpop.f32.mrb[96].mxu1 }
0x1abb   :  { %v12874_v48 = vpop.f32.mrb[97].mxu1 }
0x1abc   :  { %v12875_v51 = vadd.f32 %v12874_v48, %v12873_v0  ;;  %v12876_v1 = vpop.f32.mrb[98].mxu1  ;;  %v15141_v0 = vld [vmem:[#allocation37 + $0x28] sm:$0xff]   ;;  %v15142_v48 = vld [vmem:[#allocation37 + $0x30] sm:$0xff]  }
0x1abd   :  { %v12877_v6 = vpop.f32.mrb[99].mxu1 }
0x1abe   :  { %v4599_v7 = vadd.f32 %v12875_v51, %v4550_v50  ;;  %v12878_v13 = vadd.f32 %v12877_v6, %v12876_v1  ;;  %v15143_v50 = vld [vmem:[#allocation37 + $0x38] sm:$0xff]  }
0x1ac0   :  { %v4602_v18 = vadd.f32 %v12878_v13, %v4553_v5 }
0x1ac2   :  { %v12879_v21 = vpop.f32.mrb[100].mxu1 }
0x1ac3   :  { %v12880_v28 = vpop.f32.mrb[101].mxu1 }
0x1ac4   :  { %v12881_v31 = vadd.f32 %v12880_v28, %v12879_v21  ;;  %v12882_v32 = vpop.f32.mrb[102].mxu1 }
0x1ac5   :  { %v12883_v55 = vpop.f32.mrb[103].mxu1 }
0x1ac6   :  { %v4607_v38 = vadd.f32 %v12881_v31, %v4558_v30  ;;  %v12884_v24 = vadd.f32 %v12883_v55, %v12882_v32 }
0x1ac8   :  { %v4610_v63 = vadd.f32 %v12884_v24, %v4561_v36 }
0x1aca   :  { %v12901_v27 = vpop.f32.mrb[108].mxu0 }
0x1acb   :  { %v12902_v29 = vpop.f32.mrb[109].mxu0 }
0x1acc   :  { %v12903_v17 = vadd.f32 %v12902_v29, %v12901_v27  ;;  %v12904_v39 = vpop.f32.mrb[110].mxu0  ;;  %v15145_v27 = vld [vmem:[%s18664_s26] sm:$0xff]   ;;  %v15146_v29 = vld [vmem:[%s18664_s26 + $0x48] sm:$0xff]  }
0x1acd   :  { %v12905_v4 = vpop.f32.mrb[111].mxu0 }
0x1ace   :  { %v17558_v40 = vadd.f32 %v12903_v17, %v4599_v7  ;;  %v12906_v41 = vadd.f32 %v12905_v4, %v12904_v39  ;;  %v15147_v17 = vld [vmem:[%s18664_s26 + $0x8] sm:$0xff]   ;;  %v15149_v39 = vld [vmem:[%s18664_s26 + $0x50] sm:$0xff]  }
0x1acf   :  { %v15150_v4 = vld [vmem:[%s18664_s26 + $0x10] sm:$0xff]  }
0x1ad0   :  { %v17560_v42 = vadd.f32 %v12906_v41, %v4602_v18  ;;  %v4662_v8 = vmax.f32 %v17558_v40, 0.0  ;;  %v15152_v41 = vld [vmem:[%s18664_s26 + $0x58] sm:$0xff]   ;;  %v15154_v40 = vld [vmem:[%s18664_s26 + $0x90] sm:$0xff]  }
0x1ad2   :  { %v4663_v43 = vmax.f32 %v17560_v42, 0.0  ;;  %v12907_v44 = vpop.f32.mrb[112].mxu0  ;;  %v15158_v42 = vld [vmem:[%s18664_s26 + $0x68] sm:$0xff]  }
0x1ad3   :  { %v12908_v45 = vpop.f32.mrb[113].mxu0 }
0x1ad4   :  { %v4666_v19 = vpack.c.bf16 %v4663_v43, %v4662_v8  ;;  %v12909_v46 = vadd.f32 %v12908_v45, %v12907_v44  ;;  %v12910_v47 = vpop.f32.mrb[114].mxu0  ;;  %v15153_v44 = vld [vmem:[%s18664_s26 + $0x18] sm:$0xff]  }
0x1ad5   :  { %v12911_v54 = vpop.f32.mrb[115].mxu0 }
0x1ad6   :  { %v17568_v56 = vadd.f32 %v12909_v46, %v4607_v38  ;;  %v12912_v57 = vadd.f32 %v12911_v54, %v12910_v47  ;;  %13899 = vmatpush3.bf16.msra.mxu1 %v4666_v19 }
0x1ad7   :  { %13900 = vmatprep.subr.bf16.mxu1 %v16476_v37 }
0x1ad8   :  { %v17571_v58 = vadd.f32 %v12912_v57, %v4610_v63  ;;  %v4664_v60 = vmax.f32 %v17568_v56, 0.0  ;;  %v15144_v63 = vld [vmem:[%s18664_s26 + $0x40] sm:$0xff]   ;;  %v15151_v56 = vld [vmem:[%s18664_s26 + $0x88] sm:$0xff]  }
0x1ada   :  { %v4665_v61 = vmax.f32 %v17571_v58, 0.0  ;;  %v15164_v58 = vld [vmem:[%s18664_s26 + $0x78] sm:$0xff]  }
0x1adc   :  { %v4667_v59 = vpack.c.bf16 %v4665_v61, %v4664_v60 }
0x1ade   :  { %13901 = vmatpush3.bf16.msra.mxu1 %v4667_v59 }
0x1adf   :  { %13906 = vmatprep.subr.bf16.mxu1 %v16476_v37 }
0x1ae1   :  { %13903 = vmatmul.mubr.msk.bf16.vlgmr.msra.gmra.mrb[104].mxu1 %vm770_vm0, %v15503_v62 }
0x1ae2   :  { %13907 = vmatpush3.bf16.msra.mxu1 %v15136_v2  ;;  %13922 = vmatprep.mubr.msk.bf16.mxu1 %vm16477_vm2, %v16476_v37 }
0x1ae3   :  { %13908 = vmatprep.subr.bf16.mxu1 %v16476_v37 }
0x1ae6   :  { %13909 = vmatpush3.bf16.msra.mxu1 %v15137_v3  ;;  %v15148_v3 = vld [vmem:[%s18664_s26 + $0x80] sm:$0xff]  }
0x1ae7   :  { %13910 = vmatprep.subr.bf16.mxu1 %v16476_v37 }
0x1aea   :  { %13911 = vmatpush3.bf16.msra.mxu1 %v15138_v49  ;;  %v15167_v49 = vld [vmem:[%s18664_s26 + $0xb8] sm:$0xff]  }
0x1aeb   :  { %13912 = vmatprep.subr.bf16.mxu1 %v16476_v37 }
0x1aee   :  { %13913 = vmatpush3.bf16.msra.mxu1 %v15139_v52 }
0x1aef   :  { %13914 = vmatprep.subr.bf16.mxu1 %v16476_v37 }
0x1af2   :  { %13915 = vmatpush3.bf16.msra.mxu1 %v15140_v53 }
0x1af3   :  { %13916 = vmatprep.subr.bf16.mxu1 %v16476_v37 }
0x1af6   :  { %13917 = vmatpush3.bf16.msra.mxu1 %v15141_v0 }
0x1af7   :  { %13918 = vmatprep.subr.bf16.mxu1 %v16476_v37 }
0x1afa   :  { %13919 = vmatpush3.bf16.msra.mxu1 %v15142_v48 }
0x1afb   :  { %13920 = vmatprep.subr.bf16.mxu1 %v16476_v37 }
0x1afe   :  { %13921 = vmatpush3.bf16.msra.mxu1 %v15143_v50 }
0x1aff   :  { %12936 = vmatprep.subr.bf16.mxu1 %v15144_v63  ;;  %v15171_v63 = vld [vmem:[#allocation15 + $0x18] sm:$0xff]  }
0x1bb4   :  { %v4702_v51 = vpop.f32.mrb[104].mxu1 }
0x1bb5   :  { %v4708_v1 = vpack.c.bf16 %v4702_v51, %v4702_v51  ;;  %v13904_v6 = vpop.f32.mrb[105].mxu1 }
0x1bb6   :  { %v4705_v5 = vpop.f32.mrb[106].mxu1 }
0x1bb7   :  { %v13905_v7 = vpop.f32.mrb[107].mxu1  ;;  %13923 = vmatmul.mubr.bf16.vlgmr.msra.gmra.mrb[108].mxu1 %v4708_v1 }
0x1bb8   :  { %12937 = vmatpush3.bf16.msra.mxu1 %v15145_v27 }
0x1bb9   :  { %12938 = vmatprep.subr.bf16.mxu1 %v15146_v29 }
0x1bbc   :  { %12939 = vmatpush3.bf16.msra.mxu1 %v15147_v17 }
0x1bbd   :  { %12940 = vmatprep.subr.bf16.mxu1 %v15149_v39 }
0x1bc0   :  { %12941 = vmatpush3.bf16.msra.mxu1 %v15150_v4 }
0x1bc1   :  { %12942 = vmatprep.subr.bf16.mxu1 %v15152_v41 }
0x1bc4   :  { %12943 = vmatpush3.bf16.msra.mxu1 %v15153_v44  ;;  %v12042_v44 = vld [vmem:[#allocation40] ss:$0 sm:$0xff] }
0x1c8a   :  { %v4807_v13 = vpop.f32.mrb[108].mxu1 }
0x1c8b   :  { %v4813_v18 = vsub.f32 0.0, %v4807_v13  ;;  %v13924_v21 = vpop.f32.mrb[109].mxu1 }
0x1c8c   :  { %v4810_v28 = vpop.f32.mrb[110].mxu1 }
0x1c8d   :  { %v4814_v30 = vmul.f32 1.442695, %v4813_v18  ;;  %v13925_v31 = vpop.f32.mrb[111].mxu1 }
0x1c8f   :  { %15457 = vpow2.f32 %v4814_v30 }
0x1c99   :  { %v15458_v32 = vpop.eup %15457 }
0x1c9a   :  { %v4816_v55 = vadd.f32 1.0, %v15458_v32 }
0x1c9c   :  { %15459 = vrcp.f32 %v4816_v55 }
0x1ca6   :  { %v15460_v36 = vpop.eup %15459 }
0x1ca7   :  { %v4819_v38 = vpack.c.bf16 %v15460_v36, %v15460_v36  ;;  %v17646_v36 = vld [vmem:[#allocation28] sm:$0x1] }
0x1ca9   :  { %14819 = vmatprep.subr.msk.bf16.mxu0 %vm1704_vm4, %v4819_v38  ;;  %v4821_v24 = vsel %vm1704_vm4, %v4819_v38, 0  ;;  %v15168_v38 = vld [vmem:[#allocation15] sm:$0xff]  }
0x1caa   :  { %13927 = vmatpush3.bf16.msra.mxu0 %v4821_v24  ;;  %v15170_v24 = vld [vmem:[#allocation15 + $0x10] sm:$0xff]  }
0x1cad   :  { %13929 = vmatmul.mubr.msk.bf16.vlgmr.msra.gmra.mrb[116].mxu0 %vm1697_vm3, %v17409_v10  ;;  %v15155_v10 = vld [vmem:[%s18664_s26 + $0x60] sm:$0xff]  }
0x1cae   :  { %13936 = vmatprep.mubr.msk.bf16.mxu0 %vm770_vm0, %v17414_v12  ;;  %12944 = vmatprep.subr.bf16.mxu1 %v15155_v10 }
0x1d80   :  { %v13930_v12 = vpop.f32.mrb[116].mxu0 }
0x1d81   :  { %v4857_v45 = vpop.f32.mrb[117].mxu0  ;;  %v4874_v46 = vmul.f32 %v13930_v12, %v4664_v60  ;;  %v15165_v60 = vld [vmem:[%s18664_s26 + $0x38] sm:$0xff]  }
0x1d82   :  { %v13931_v19 = vpop.f32.mrb[118].mxu0  ;;  %v4872_v57 = vmul.f32 %v4857_v45, %v4662_v8  ;;  %v15159_v8 = vld [vmem:[%s18664_s26 + $0x28] sm:$0xff]  }
0x1d83   :  { %v4875_v47 = vmul.f32 %v13931_v19, %v4665_v61  ;;  %v4860_v54 = vpop.f32.mrb[119].mxu0  ;;  %v15166_v61 = vld [vmem:[%s18664_s26 + $0xb0] sm:$0xff]  }
0x1d84   :  { %v4873_v59 = vmul.f32 %v4860_v54, %v4663_v43  ;;  %v15162_v43 = vld [vmem:[%s18664_s26 + $0x30] sm:$0xff]  }
0x1d85   :  { %v4877_v2 = vpack.c.bf16 %v4875_v47, %v4874_v46 }
0x1d86   :  { %v4876_v62 = vpack.c.bf16 %v4873_v59, %v4872_v57 }
0x1d88   :  { %13932 = vmatprep.subr.bf16.mxu0 %v4876_v62 }
0x1d89   :  { %13933 = vmatpush3.bf16.msra.mxu0 %v4876_v62 }
0x1d8a   :  { %13934 = vmatprep.subr.bf16.mxu0 %v4877_v2 }
0x1d8d   :  { %13935 = vmatpush3.bf16.msra.mxu0 %v4877_v2 }
0x1d8e   :  { %13948 = vmatprep.subr.bf16.mxu0 %v15148_v3 }
0x1d90   :  { %13937 = vmatmul.mubr.msk.bf16.vlgmr.msra.gmra.mrb[120].mxu0 %vm770_vm0, %v17428_v22  ;;  %v15156_v22 = vld [vmem:[%s18664_s26 + $0x20] sm:$0xff]  }
0x1d91   :  { %13940 = vmatprep.mubr.msk.bf16.mxu0 %vm770_vm0, %v17433_v16  ;;  %13949 = vmatpush3.bf16.msra.mxu0 %v15148_v3  ;;  %v15157_v16 = vld [vmem:[%s18664_s26 + $0x98] sm:$0xff]  }
0x1d92   :  { %13950 = vmatprep.subr.bf16.mxu0 %v15151_v56  ;;  %12945 = vmatpush3.bf16.msra.mxu1 %v15156_v22 }
0x1d93   :  { %12946 = vmatprep.subr.bf16.mxu1 %v15158_v42 }
0x1d95   :  { %13951 = vmatpush3.bf16.msra.mxu0 %v15151_v56 }
0x1d96   :  { %13952 = vmatprep.subr.bf16.mxu0 %v15154_v40  ;;  %12947 = vmatpush3.bf16.msra.mxu1 %v15159_v8 }
0x1d98   :  { %13941 = vmatmul.mubr.msk.bf16.gmra.mrb[124].mxu0 %vm770_vm0, %v17438_v23  ;;  %v15160_v23 = vld [vmem:[%s18664_s26 + $0xa0] sm:$0xff]  }
0x1d99   :  { %13944 = vmatprep.mubr.msk.bf16.mxu0 %vm770_vm0, %v17443_v25  ;;  %13953 = vmatpush3.bf16.msra.mxu0 %v15154_v40  ;;  %v15161_v25 = vld [vmem:[%s18664_s26 + $0x70] sm:$0xff]  }
0x1d9a   :  { %13954 = vmatprep.subr.bf16.mxu0 %v15157_v16  ;;  %12948 = vmatprep.subr.bf16.mxu1 %v15161_v25 }
0x1d9b   :  { %12949 = vmatpush3.bf16.msra.mxu1 %v15162_v43 }
0x1d9c   :  { %12950 = vmatprep.subr.bf16.mxu1 %v15164_v58 }
0x1d9d   :  { %13955 = vmatpush3.bf16.msra.mxu0 %v15157_v16 }
0x1d9e   :  { %13956 = vmatprep.subr.bf16.mxu0 %v15160_v23 }
0x1d9f   :  { %12951 = vmatpush3.bf16.msra.mxu1 %v15165_v60 }
0x1da0   :  { %13945 = vmatmul.mubr.msk.bf16.gmra.mrb[128].mxu0 %vm770_vm0, %v17448_v26  ;;  %v15163_v26 = vld [vmem:[%s18664_s26 + $0xa8] sm:$0xff]   ;;  %13974 = vmatprep.subr.bf16.mxu1 %v16476_v37 }
0x1da1   :  { %13957 = vmatpush3.bf16.msra.mxu0 %v15160_v23 }
0x1da2   :  { %13958 = vmatprep.subr.bf16.mxu0 %v15163_v26 }
0x1da5   :  { %13959 = vmatpush3.bf16.msra.mxu0 %v15163_v26 }
0x1da6   :  { %13960 = vmatprep.subr.bf16.mxu0 %v15166_v61 }
0x1da9   :  { %13961 = vmatpush3.bf16.msra.mxu0 %v15166_v61 }
0x1daa   :  { %13962 = vmatprep.subr.bf16.mxu0 %v15167_v49 }
0x1dad   :  { %13963 = vmatpush3.bf16.msra.mxu0 %v15167_v49 }
0x1dae   :  { %13968 = vmatprep.subr.bf16.mxu0 %v16476_v37 }
0x1e63   :  { %v13938_v52 = vpop.f32.mrb[120].mxu0 }
0x1e64   :  { %v4912_v53 = vpop.f32.mrb[121].mxu0 }
0x1e65   :  { %v13939_v0 = vpop.f32.mrb[122].mxu0 }
0x1e66   :  { %v4960_v48 = vpack.c.bf16 %v13939_v0, %v13938_v52  ;;  %v4915_v50 = vpop.f32.mrb[123].mxu0 }
0x1e67   :  { %v4959_v51 = vpack.c.bf16 %v4915_v50, %v4912_v53 }
0x1e6b   :  { %v13942_v1 = vpop.f32.mrb[124].mxu0 }
0x1e6c   :  { %v4928_v6 = vpop.f32.mrb[125].mxu0 }
0x1e6d   :  { %v13943_v5 = vpop.f32.mrb[126].mxu0 }
0x1e6e   :  { %v4962_v7 = vpack.c.bf16 %v13943_v5, %v13942_v1  ;;  %v4931_v13 = vpop.f32.mrb[127].mxu0  ;;  %v17673_v5 = vld [vmem:[%s18659_s19] sm:$0xff]  }
0x1e6f   :  { %v4961_v18 = vpack.c.bf16 %v4931_v13, %v4928_v6 }
0x1e71   :  { %5196 = vmatprep.mubr.bf16.mxu1 %v4961_v18 }
0x1e72   :  { %5197 = vmatmul.mubr.bf16.vlgmr.msra.gmra.mrb[112].mxu1 %v4959_v51 }
0x1e73   :  { %v13946_v21 = vpop.f32.mrb[128].mxu0  ;;  %5204 = vmatprep.mubr.bf16.mxu1 %v4962_v7  ;;  %13975 = vmatpush3.bf16.msra.mxu1 %v15168_v38  ;;  %v15174_v7 = vld [vmem:[#allocation12 + $0x20] sm:$0xff]  }
0x1e74   :  { %v4944_v28 = vpop.f32.mrb[129].mxu0  ;;  %13976 = vmatprep.subr.bf16.mxu1 %v16476_v37  ;;  %v17684_v38 = vld [vmem:[%s18660_s14] sm:$0xff]  }
0x1e75   :  { %v13947_v30 = vpop.f32.mrb[130].mxu0 }
0x1e76   :  { %v4964_v31 = vpack.c.bf16 %v13947_v30, %v13946_v21  ;;  %v4947_v32 = vpop.f32.mrb[131].mxu0 }
0x1e77   :  { %v4963_v55 = vpack.c.bf16 %v4947_v32, %v4944_v28 }
0x1e79   :  { %13964 = vmatprep.mubr.bf16.mxu0 %v4963_v55  ;;  %v15172_v55 = vld [vmem:[#allocation12] sm:$0xff]  }
0x1e7a   :  { %5205 = vmatmul.mubr.bf16.gmra.mrb[116].mxu1 %v4960_v48  ;;  %13965 = vmatmul.mubr.bf16.vlgmr.msra.gmra.mrb[132].mxu0 %v4964_v31 }
0x1e7b   :  { %13969 = vmatpush3.bf16.msra.mxu0 %v17312_v35  ;;  %13970 = vmatprep.mubr.msk.bf16.mxu0 %vm16477_vm2, %v16476_v37  ;;  %v15169_v35 = vld [vmem:[#allocation15 + $0x8] sm:$0xff]  }
0x1e7c   :  { %13982 = vmatprep.mubr.msk.bf16.mxu1 %vm16477_vm2, %v16476_v37  ;;  %13986 = vmatprep.subr.bf16.mxu0 %v16476_v37 }
0x1e7d   :  { %13977 = vmatpush3.bf16.msra.mxu1 %v15169_v35  ;;  %v15173_v35 = vld [vmem:[#allocation12 + $0x8] sm:$0xff]  }
0x1e7e   :  { %13978 = vmatprep.subr.bf16.mxu1 %v16476_v37 }
0x1e81   :  { %13979 = vmatpush3.bf16.msra.mxu1 %v15170_v24  ;;  %v15175_v24 = vld [vmem:[#allocation12 + $0x10] sm:$0xff]  }
0x1e82   :  { %13971 = vmatmul.mubr.msk.bf16.vlgmr.msra.gmra.mrb[136].mxu0 %vm2528_vm5, %v17646_v36  ;;  %13980 = vmatprep.subr.bf16.mxu1 %v16476_v37 }
0x1e83   :  { %13988 = vmatprep.mubr.msk.bf16.mxu0 %vm16477_vm2, %v16476_v37 }
0x1e85   :  { %13981 = vmatpush3.bf16.msra.mxu1 %v15171_v63  ;;  %v17693_v63 = vld [vmem:[%s18660_s14 + $0x8] sm:$0xff]  }
0x1e86   :  { %13992 = vmatprep.subr.bf16.mxu1 %v16476_v37 }
0x1f45   :  { %v12952_v27 = vpop.f32.mrb[112].mxu1 }
0x1f46   :  { %v12953_v29 = vpop.f32.mrb[113].mxu1 }
0x1f47   :  { %v12954_v17 = vadd.f32 %v12953_v29, %v12952_v27  ;;  %v12955_v39 = vpop.f32.mrb[114].mxu1  ;;  %v17701_v27 = vld [vmem:[%s18660_s14 + $0x10] sm:$0xff]  }
0x1f48   :  { %v12956_v4 = vpop.f32.mrb[115].mxu1  ;;  %v15176_v29 = vld [vmem:[#allocation12 + $0x28] sm:$0xff]  }
0x1f49   :  { %v12957_v41 = vadd.f32 %v12956_v4, %v12955_v39  ;;  %v5199_v45 = vadd.f32 %v12954_v17, %v12042_v44  ;;  %v15177_v17 = vld [vmem:[#allocation12 + $0x18] sm:$0xff]   ;;  %v15178_v39 = vld [vmem:[#allocation12 + $0x30] sm:$0xff]  }
0x1f4a   :  { %v15179_v4 = vld [vmem:[#allocation12 + $0x38] sm:$0xff]  }
0x1f4b   :  { %v5202_v2 = vadd.f32 %v12957_v41, %v12042_v44 }
0x1f4d   :  { %v12958_v10 = vpop.f32.mrb[116].mxu1  ;;  %v13966_v12 = vpop.f32.mrb[132].mxu0 }
0x1f4e   :  { %v12959_v19 = vpop.f32.mrb[117].mxu1  ;;  %v5247_v46 = vpop.f32.mrb[133].mxu0 }
0x1f4f   :  { %v12960_v47 = vadd.f32 %v12959_v19, %v12958_v10  ;;  %v17656_v54 = vadd.f32 %v5247_v46, %v5199_v45  ;;  %v12961_v57 = vpop.f32.mrb[118].mxu1  ;;  %v13967_v59 = vpop.f32.mrb[134].mxu0 }
0x1f50   :  { %v12962_v62 = vpop.f32.mrb[119].mxu1  ;;  %v5250_v3 = vpop.f32.mrb[135].mxu0 }
0x1f51   :  { %v5207_v56 = vadd.f32 %v12960_v47, %v12042_v44  ;;  %v12963_v40 = vadd.f32 %v12962_v62, %v12961_v57  ;;  %v17658_v22 = vadd.f32 %v5250_v3, %v5202_v2  ;;  %v15180_v57 = vld [vmem:[#allocation12 + $0x40] sm:$0xff]   ;;  %v15181_v62 = vld [vmem:[#allocation12 + $0x48] sm:$0xff]  }
0x1f53   :  { %v17660_v16 = vadd.f32 %v13966_v12, %v5207_v56  ;;  %v5210_v42 = vadd.f32 %v12963_v40, %v12042_v44  ;;  %v15182_v40 = vld [vmem:[#allocation12 + $0x50] sm:$0xff]  }
0x1f55   :  { %v17662_v8 = vadd.f32 %v13967_v59, %v5210_v42  ;;  %v5296_v23 = vpop.f32.mrb[136].mxu0 }
0x1f56   :  { %v17664_v25 = vpack.c.bf16 %v5296_v23, %v5296_v23  ;;  %v13972_v43 = vpop.f32.mrb[137].mxu0 }
0x1f57   :  { %v5299_v26 = vpop.f32.mrb[138].mxu0 }
0x1f58   :  { %v13973_v58 = vpop.f32.mrb[139].mxu0  ;;  %13983 = vmatmul.mubr.msk.bf16.vlgmr.msra.gmra.mrb[120].mxu1 %vm2605_vm6, %v17664_v25  ;;  %v15183_v26 = vld [vmem:[#allocation12 + $0x58] sm:$0xff]  }
0x1f59   :  { %13994 = vmatprep.mubr.msk.bf16.mxu1 %vm16477_vm2, %v16476_v37  ;;  %v15184_v58 = vld [vmem:[%s18665_s0] sm:$0xff]  }
0x202b   :  { %v5372_v60 = vpop.f32.mrb[120].mxu1 }
0x202c   :  { %v5378_v61 = vsub.f32 0.0, %v5372_v60  ;;  %v13984_v49 = vpop.f32.mrb[121].mxu1  ;;  %v15187_v60 = vld [vmem:[%s18666_s6 + $0x20] sm:$0xff]  }
0x202d   :  { %v5375_v52 = vpop.f32.mrb[122].mxu1  ;;  %v15191_v49 = vld [vmem:[%s18666_s6 + $0x30] sm:$0xff]  }
0x202e   :  { %v5379_v53 = vmul.f32 1.442695, %v5378_v61  ;;  %v13985_v0 = vpop.f32.mrb[123].mxu1  ;;  %v15189_v61 = vld [vmem:[%s18666_s6 + $0x28] sm:$0xff]  }
0x2030   :  { %15461 = vpow2.f32 %v5379_v53 }
0x203a   :  { %v15462_v48 = vpop.eup %15461 }
0x203b   :  { %v5381_v50 = vadd.f32 1.0, %v15462_v48 }
0x203d   :  { %15463 = vrcp.f32 %v5381_v50 }
0x2047   :  { %v15464_v51 = vpop.eup %15463 }
0x2048   :  { %v5384_v1 = vpack.c.bf16 %v15464_v51, %v15464_v51 }
0x204a   :  { %v5386_v6 = vsel %vm1704_vm4, %v5384_v1, 0 }
0x204b   :  { %13987 = vmatpush3.bf16.msra.mxu0 %v5386_v6 }
0x204c   :  { %14006 = vmatprep.subr.bf16.mxu0 %v16476_v37 }
0x204e   :  { %13989 = vmatmul.mubr.msk.bf16.vlgmr.msra.gmra.mrb[140].mxu0 %vm1697_vm3, %v17673_v5 }
0x204f   :  { %14014 = vmatprep.mubr.msk.bf16.mxu0 %vm16477_vm2, %v16476_v37  ;;  %14007 = vmatpush3.bf16.msra.mxu0 %v15174_v7 }
0x2050   :  { %14008 = vmatprep.subr.bf16.mxu0 %v16476_v37 }
0x2053   :  { %14009 = vmatpush3.bf16.msra.mxu0 %v15176_v29 }
0x2054   :  { %14010 = vmatprep.subr.bf16.mxu0 %v16476_v37 }
0x2057   :  { %14011 = vmatpush3.bf16.msra.mxu0 %v15178_v39 }
0x2058   :  { %14012 = vmatprep.subr.bf16.mxu0 %v16476_v37 }
0x205b   :  { %14013 = vmatpush3.bf16.msra.mxu0 %v15179_v4  ;;  %v15185_v4 = vld [vmem:[%s18665_s0 + $0x8] ss:$0 sps:$4 sm:$0xff]  }
0x205c   :  { %14030 = vmatprep.subr.bf16.mxu0 %v16476_v37 }
0x2121   :  { %v5422_v13 = vpop.f32.mrb[140].mxu0 }
0x2122   :  { %v13990_v18 = vpop.f32.mrb[141].mxu0  ;;  %v5429_v28 = vmul.f32 %v5422_v13, %v17306_v33 }
0x2123   :  { %v5425_v21 = vpop.f32.mrb[142].mxu0  ;;  %v12092_v18 = vld [vmem:[#allocation18] ss:$0 sm:$0xff] }
0x2124   :  { %v5430_v30 = vmul.f32 %v5425_v21, %v17308_v34  ;;  %v13991_v31 = vpop.f32.mrb[143].mxu0 }
0x2126   :  { %v5431_v32 = vpack.c.bf16 %v5430_v30, %v5429_v28 }
0x2128   :  { %13993 = vmatpush3.bf16.msra.mxu1 %v5431_v32 }
0x2129   :  { %14018 = vmatprep.subr.bf16.mxu1 %v16476_v37 }
0x212b   :  { %13995 = vmatmul.mubr.msk.bf16.vlgmr.msra.gmra.mrb[124].mxu1 %vm2528_vm5, %v17684_v38 }
0x212c   :  { %13998 = vmatprep.mubr.msk.bf16.mxu1 %vm16477_vm2, %v16476_v37  ;;  %14019 = vmatpush3.bf16.msra.mxu1 %v15172_v55 }
0x212d   :  { %14020 = vmatprep.subr.bf16.mxu1 %v16476_v37 }
0x2130   :  { %14021 = vmatpush3.bf16.msra.mxu1 %v15173_v35 }
0x2131   :  { %14022 = vmatprep.subr.bf16.mxu1 %v16476_v37 }
0x2133   :  { %13999 = vmatmul.mubr.msk.bf16.gmra.mrb[128].mxu1 %vm2528_vm5, %v17693_v63 }
0x2134   :  { %14002 = vmatprep.mubr.msk.bf16.mxu1 %vm16477_vm2, %v16476_v37  ;;  %14023 = vmatpush3.bf16.msra.mxu1 %v15175_v24 }
0x2135   :  { %14024 = vmatprep.subr.bf16.mxu1 %v16476_v37 }
0x2138   :  { %14025 = vmatpush3.bf16.msra.mxu1 %v15177_v17 }
0x213b   :  { %14003 = vmatmul.mubr.msk.bf16.gmra.mrb[132].mxu1 %vm2528_vm5, %v17701_v27 }
0x213c   :  { %14026 = vmatprep.mubr.msk.bf16.mxu1 %vm16477_vm2, %v16476_v37 }
0x21fe   :  { %v5466_v41 = vpop.f32.mrb[124].mxu1 }
0x21ff   :  { %v13996_v44 = vpop.f32.mrb[125].mxu1 }
0x2200   :  { %v5469_v10 = vpop.f32.mrb[126].mxu1  ;;  %v15188_v44 = vld [vmem:[%s18666_s6 + $0x8] sm:$0xff]  }
0x2201   :  { %v5489_v12 = vpack.c.bf16 %v5469_v10, %v5466_v41  ;;  %v13997_v45 = vpop.f32.mrb[127].mxu1  ;;  %v15186_v41 = vld [vmem:[%s18666_s6] sm:$0xff]   ;;  %v15190_v10 = vld [vmem:[%s18666_s6 + $0x10] sm:$0xff]  }
0x2202   :  { %v15193_v45 = vld [vmem:[%s18666_s6 + $0x38] sm:$0xff]  }
0x2203   :  { %14027 = vmatmul.mubr.msk.bf16.vlgmr.msra.gmra.mrb[136].mxu1 %vm2605_vm6, %v5489_v12  ;;  %v15192_v12 = vld [vmem:[%s18666_s6 + $0x18] sm:$0xff]  }
0x2204   :  { %14044 = vmatprep.mubr.msk.bf16.mxu1 %vm2528_vm5, %v15184_v58 }
0x2206   :  { %v5474_v19 = vpop.f32.mrb[128].mxu1 }
0x2207   :  { %v14000_v46 = vpop.f32.mrb[129].mxu1 }
0x2208   :  { %v5477_v47 = vpop.f32.mrb[130].mxu1 }
0x2209   :  { %v5490_v59 = vpack.c.bf16 %v5477_v47, %v5474_v19  ;;  %v14001_v2 = vpop.f32.mrb[131].mxu1 }
0x220a   :  { %v15194_v2 = vld [vmem:[%s18666_s6 + $0x40] sm:$0xff]  }
0x220b   :  { %14015 = vmatmul.mubr.msk.bf16.vlgmr.msra.gmra.mrb[144].mxu0 %vm2605_vm6, %v5490_v59 }
0x220c   :  { %14031 = vmatpush3.bf16.msra.mxu0 %v15180_v57  ;;  %14038 = vmatprep.mubr.msk.bf16.mxu0 %vm16477_vm2, %v16476_v37 }
0x220d   :  { %14032 = vmatprep.subr.bf16.mxu0 %v16476_v37 }
0x220e   :  { %v5482_v3 = vpop.f32.mrb[132].mxu1 }
0x220f   :  { %v14004_v56 = vpop.f32.mrb[133].mxu1 }
0x2210   :  { %14033 = vmatpush3.bf16.msra.mxu0 %v15181_v62  ;;  %v5485_v42 = vpop.f32.mrb[134].mxu1  ;;  %v15196_v56 = vld [vmem:[%s18666_s6 + $0x50] sm:$0xff]  }
0x2211   :  { %14034 = vmatprep.subr.bf16.mxu0 %v16476_v37  ;;  %v5491_v23 = vpack.c.bf16 %v5485_v42, %v5482_v3  ;;  %v14005_v43 = vpop.f32.mrb[135].mxu1  ;;  %v15195_v3 = vld [vmem:[%s18666_s6 + $0x48] sm:$0xff]  }
0x2214   :  { %14035 = vmatpush3.bf16.msra.mxu0 %v15182_v40  ;;  %v15197_v40 = vld [vmem:[%s18666_s6 + $0x58] sm:$0xff]  }
0x2215   :  { %14036 = vmatprep.subr.bf16.mxu0 %v16476_v37 }
0x2218   :  { %14037 = vmatpush3.bf16.msra.mxu0 %v15183_v26 }
0x2219   :  { %14048 = vmatprep.subr.bf16.mxu0 %v16476_v37 }
0x221b   :  { %14039 = vmatmul.mubr.msk.bf16.vlgmr.msra.gmra.mrb[148].mxu0 %vm2605_vm6, %v5491_v23 }
0x221c   :  { %14056 = vmatprep.mubr.msk.bf16.mxu0 %vm16477_vm2, %v16476_v37  ;;  %14049 = vmatpush3.bf16.msra.mxu0 %v15187_v60 }
0x221d   :  { %14050 = vmatprep.subr.bf16.mxu0 %v16476_v37 }
0x2220   :  { %14051 = vmatpush3.bf16.msra.mxu0 %v15189_v61 }
0x2221   :  { %14052 = vmatprep.subr.bf16.mxu0 %v16476_v37 }
0x2224   :  { %14053 = vmatpush3.bf16.msra.mxu0 %v15191_v49 }
0x2225   :  { %14054 = vmatprep.subr.bf16.mxu0 %v16476_v37 }
0x2228   :  { %14055 = vmatpush3.bf16.msra.mxu0 %v15193_v45 }
0x2229   :  { %14072 = vmatprep.subr.bf16.mxu0 %v16476_v37 }
0x22d6   :  { %v5639_v52 = vpop.f32.mrb[136].mxu1 }
0x22d7   :  { %v14028_v53 = vpop.f32.mrb[137].mxu1 }
0x22d8   :  { %v5642_v0 = vpop.f32.mrb[138].mxu1 }
0x22d9   :  { %v14029_v48 = vpop.f32.mrb[139].mxu1 }
0x22de   :  { %v5571_v50 = vpop.f32.mrb[144].mxu0 }
0x22df   :  { %v5640_v51 = vadd.f32 %v5639_v52, %v5571_v50  ;;  %v14016_v1 = vpop.f32.mrb[145].mxu0 }
0x22e0   :  { %v5574_v6 = vpop.f32.mrb[146].mxu0 }
0x22e1   :  { %v5643_v7 = vadd.f32 %v5642_v0, %v5574_v6  ;;  %v14017_v13 = vpop.f32.mrb[147].mxu0  ;;  %v12128_v0 = vld [vmem:[#allocation21] ss:$0 sm:$0xff] }
0x22ee   :  { %v5716_v21 = vpop.f32.mrb[148].mxu0 }
0x22ef   :  { %v5723_v28 = vadd.f32 %v5716_v21, %v5640_v51  ;;  %v14040_v30 = vpop.f32.mrb[149].mxu0 }
0x22f0   :  { %v5719_v31 = vpop.f32.mrb[150].mxu0  ;;  %v15198_v30 = vld [vmem:[#allocation16] sm:$0xff]  }
0x22f1   :  { %v5731_v32 = vadd.f32 %v12092_v18, %v5723_v28  ;;  %v5724_v55 = vadd.f32 %v5719_v31, %v5643_v7  ;;  %v14041_v35 = vpop.f32.mrb[151].mxu0  ;;  %v6041_v28 = vld [vmem:[#allocation30] sm:$0x1]  ;;  %v15199_v31 = vld [vmem:[#allocation16 + $0x8] sm:$0xff]  }
0x22f3   :  { %v5732_v24 = vadd.f32 %v12092_v18, %v5724_v55  ;;  %v5733_v29 = vmax.f32 %v5731_v32, 0.0 }
0x22f5   :  { %v5734_v17 = vmax.f32 %v5732_v24, 0.0 }
0x22f7   :  { %v5738_v39 = vpack.c.bf16 %v5734_v17, %v5733_v29 }
0x22f9   :  { %14042 = vmatprep.subr.bf16.mxu1 %v5738_v39 }
0x22fa   :  { %14043 = vmatpush3.bf16.msra.mxu1 %v5738_v39 }
0x22fb   :  { %14060 = vmatprep.subr.bf16.mxu1 %v16476_v37 }
0x22fd   :  { %14045 = vmatmul.mubr.msk.bf16.vlgmr.msra.gmra.mrb[140].mxu1 %vm2528_vm5, %v15185_v4 }
0x22fe   :  { %14061 = vmatpush3.bf16.msra.mxu1 %v15186_v41  ;;  %14068 = vmatprep.mubr.msk.bf16.mxu1 %vm16477_vm2, %v16476_v37 }
0x22ff   :  { %14062 = vmatprep.subr.bf16.mxu1 %v16476_v37 }
0x2302   :  { %14063 = vmatpush3.bf16.msra.mxu1 %v15188_v44 }
0x2303   :  { %14064 = vmatprep.subr.bf16.mxu1 %v16476_v37 }
0x2306   :  { %14065 = vmatpush3.bf16.msra.mxu1 %v15190_v10 }
0x2307   :  { %14066 = vmatprep.subr.bf16.mxu1 %v16476_v37 }
0x230a   :  { %14067 = vmatpush3.bf16.msra.mxu1 %v15192_v12 }
0x230b   :  { %14084 = vmatprep.subr.bf16.mxu1 %v16476_v37 }
0x23d0   :  { %v14046_v19 = vpop.f32.mrb[140].mxu1 }
0x23d1   :  { %v5787_v46 = vpop.f32.mrb[141].mxu1  ;;  %v5803_v42 = vpack.c.bf16 %v14046_v19, %v14046_v19 }
0x23d2   :  { %v5801_v47 = vpack.c.bf16 %v5787_v46, %v5787_v46  ;;  %v14047_v57 = vpop.f32.mrb[142].mxu1 }
0x23d3   :  { %v5790_v59 = vpop.f32.mrb[143].mxu1  ;;  %v6151_v57 = vld [vmem:[%s18667_s1] sm:$0xf] }
0x23d4   :  { %v5802_v62 = vpack.c.bf16 %v5790_v59, %v5790_v59  ;;  %14069 = vmatmul.mubr.msk.bf16.vlgmr.msra.gmra.mrb[144].mxu1 %vm2605_vm6, %v5801_v47  ;;  %v15200_v59 = vld [vmem:[%s18668_s7] sm:$0xff]  }
0x23d5   :  { %14086 = vmatprep.mubr.msk.bf16.mxu1 %vm16477_vm2, %v16476_v37 }
0x23d6   :  { %14057 = vmatmul.mubr.msk.bf16.vlgmr.msra.gmra.mrb[152].mxu0 %vm2605_vm6, %v5802_v62 }
0x23d7   :  { %14073 = vmatpush3.bf16.msra.mxu0 %v15194_v2  ;;  %14080 = vmatprep.mubr.msk.bf16.mxu0 %vm16477_vm2, %v16476_v37  ;;  %v15203_v2 = vld [vmem:[#allocation13 + $0x10] sm:$0xff]  }
0x23d8   :  { %14074 = vmatprep.subr.bf16.mxu0 %v16476_v37 }
0x23db   :  { %14075 = vmatpush3.bf16.msra.mxu0 %v15195_v3 }
0x23dc   :  { %14076 = vmatprep.subr.bf16.mxu0 %v16476_v37 }
0x23df   :  { %14077 = vmatpush3.bf16.msra.mxu0 %v15196_v56 }
0x23e0   :  { %14078 = vmatprep.subr.bf16.mxu0 %v16476_v37 }
0x23e3   :  { %14079 = vmatpush3.bf16.msra.mxu0 %v15197_v40 }
0x23e4   :  { %14098 = vmatprep.subr.bf16.mxu0 %v16476_v37 }
0x23e6   :  { %14081 = vmatmul.mubr.msk.bf16.vlgmr.msra.gmra.mrb[156].mxu0 %vm2605_vm6, %v5803_v42 }
0x23e7   :  { %14100 = vmatprep.mubr.msk.bf16.mxu0 %vm16477_vm2, %v16476_v37 }
0x24a7   :  { %v5950_v23 = vpop.f32.mrb[144].mxu1 }
0x24a8   :  { %v14070_v43 = vpop.f32.mrb[145].mxu1 }
0x24a9   :  { %v5883_v26 = vpop.f32.mrb[152].mxu0  ;;  %v5953_v58 = vpop.f32.mrb[146].mxu1 }
0x24aa   :  { %v5951_v60 = vadd.f32 %v5950_v23, %v5883_v26  ;;  %v14058_v61 = vpop.f32.mrb[153].mxu0  ;;  %v14071_v49 = vpop.f32.mrb[147].mxu1  ;;  %v15201_v26 = vld [vmem:[%s18668_s7 + $0x8] ss:$0 sps:$4 sm:$0xff]  }
0x24ab   :  { %v5886_v52 = vpop.f32.mrb[154].mxu0  ;;  %v15202_v58 = vld [vmem:[#allocation13] sm:$0xff]   ;;  %v15205_v61 = vld [vmem:[#allocation13 + $0x18] sm:$0xff]  }
0x24ac   :  { %v14059_v53 = vpop.f32.mrb[155].mxu0 }
0x24b9   :  { %v6026_v48 = vpop.f32.mrb[156].mxu0 }
0x24ba   :  { %v6032_v50 = vadd.f32 %v6026_v48, %v5951_v60  ;;  %v14082_v51 = vpop.f32.mrb[157].mxu0  ;;  %v15204_v60 = vld [vmem:[#allocation13 + $0x8] sm:$0xff]  }
0x24bb   :  { %v6029_v1 = vpop.f32.mrb[158].mxu0 }
0x24bc   :  { %v6039_v6 = vadd.f32 %v12128_v0, %v6032_v50  ;;  %v14083_v7 = vpop.f32.mrb[159].mxu0  ;;  %v15206_v50 = vld [vmem:[#allocation13 + $0x20] sm:$0xff]   ;;  %v15207_v1 = vld [vmem:[#allocation13 + $0x28] sm:$0xff]  }
0x24be   :  { %v6040_v13 = vmax.f32 %v6039_v6, 0.0 }
0x24c0   :  { %v6042_v18 = vpack.c.bf16 %v6040_v13, %v6040_v13 }
0x24c2   :  { %v6049_v21 = vsel %vm6047_vm7, %v6042_v18, 0 }
0x24c3   :  { %14085 = vmatpush3.bf16.msra.mxu1 %v6049_v21 }
0x24c4   :  { %14090 = vmatprep.subr.bf16.mxu1 %v16476_v37 }
0x24c6   :  { %14087 = vmatmul.mubr.msk.bf16.vlgmr.msra.gmra.mrb[148].mxu1 %vm6043_vm8, %v6041_v28 }
0x24c7   :  { %14091 = vmatpush3.bf16.msra.mxu1 %v15198_v30  ;;  %14094 = vmatprep.mubr.msk.bf16.mxu1 %vm16477_vm2, %v16476_v37 }
0x24c8   :  { %14092 = vmatprep.subr.bf16.mxu1 %v16476_v37 }
0x24cb   :  { %14093 = vmatpush3.bf16.msra.mxu1 %v15199_v31 }
0x2599   :  { %v6085_v32 = vpop.f32.mrb[148].mxu1 }
0x259a   :  { %v6091_v55 = vpack.c.bf16 %v6085_v32, %v6085_v32  ;;  %v14088_v35 = vpop.f32.mrb[149].mxu1 }
0x259b   :  { %v6088_v24 = vpop.f32.mrb[150].mxu1  ;;  %v12147_v35 = vld [vmem:[#allocation19] ss:$0 sm:$0xff] }
0x259c   :  { %v14089_v29 = vpop.f32.mrb[151].mxu1  ;;  %14095 = vmatmul.mubr.msk.bf16.vlgmr.msra.gmra.mrb[152].mxu1 %vm770_vm0, %v6091_v55 }
0x259d   :  { %14106 = vmatprep.mubr.msk.bf16.mxu1 %vm6043_vm8, %v15200_v59 }
0x266f   :  { %v6145_v17 = vpop.f32.mrb[152].mxu1 }
0x2670   :  { %v6152_v39 = vsub.f32 0.0, %v6145_v17  ;;  %v14096_v4 = vpop.f32.mrb[153].mxu1 }
0x2671   :  { %v6148_v41 = vpop.f32.mrb[154].mxu1 }
0x2672   :  { %v6153_v44 = vmul.f32 1.442695, %v6152_v39  ;;  %v14097_v10 = vpop.f32.mrb[155].mxu1 }
0x2674   :  { %15465 = vpow2.f32 %v6153_v44 }
0x267e   :  { %v15466_v12 = vpop.eup %15465 }
0x267f   :  { %v6155_v45 = vadd.f32 1.0, %v15466_v12 }
0x2681   :  { %15467 = vrcp.f32 %v6155_v45  ;;  %v15208_v45 = vld [vmem:[%s18669_s30] sm:$0xff]  }
0x268b   :  { %v15468_v19 = vpop.eup %15467 }
0x268c   :  { %v6158_v46 = vpack.c.bf16 %v15468_v19, %v15468_v19  ;;  %v15209_v19 = vld [vmem:[%s18669_s30 + $0x8] sm:$0xff]  }
0x268e   :  { %v6163_v47 = vsel %vm1704_vm4, %v6158_v46, 0  ;;  %v15210_v46 = vld [vmem:[%s18669_s30 + $0x10] sm:$0xff]  }
0x268f   :  { %14099 = vmatpush3.bf16.msra.mxu0 %v6163_v47  ;;  %v15211_v47 = vld [vmem:[#allocation45 + $0x10] sm:$0xff]  }
0x2690   :  { %14110 = vmatprep.subr.bf16.mxu0 %v16476_v37 }
0x2692   :  { %14101 = vmatmul.mubr.msk.bf16.vlgmr.msra.gmra.mrb[160].mxu0 %vm1697_vm3, %v6151_v57  ;;  %v15212_v57 = vld [vmem:[#allocation45 + $0x18] sm:$0xff]  }
0x2693   :  { %14114 = vmatprep.mubr.msk.bf16.mxu0 %vm16477_vm2, %v16476_v37  ;;  %14111 = vmatpush3.bf16.msra.mxu0 %v15203_v2 }
0x2694   :  { %14112 = vmatprep.subr.bf16.mxu0 %v16476_v37 }
0x2697   :  { %14113 = vmatpush3.bf16.msra.mxu0 %v15205_v61 }
0x2698   :  { %14126 = vmatprep.subr.bf16.mxu0 %v16476_v37 }
0x2765   :  { %v6199_v62 = vpop.f32.mrb[160].mxu0 }
0x2766   :  { %v6205_v3 = vmul.f32 %v6199_v62, %v6040_v13  ;;  %v14102_v56 = vpop.f32.mrb[161].mxu0 }
0x2767   :  { %v6202_v40 = vpop.f32.mrb[162].mxu0 }
0x2768   :  { %v6209_v42 = vpack.c.bf16 %v6205_v3, %v6205_v3  ;;  %v14103_v23 = vpop.f32.mrb[163].mxu0 }
0x276a   :  { %v6225_v43 = vsel %vm6047_vm7, %v6209_v42, 0  ;;  %14820 = vmatprep.subr.msk.bf16.mxu1 %vm6047_vm7, %v6209_v42 }
0x276b   :  { %14105 = vmatpush3.bf16.msra.mxu1 %v6225_v43  ;;  %v15213_v43 = vld [vmem:[#allocation45] sm:$0xff]  }
0x276c   :  { %14118 = vmatprep.subr.bf16.mxu1 %v16476_v37 }
0x276e   :  { %14107 = vmatmul.mubr.msk.bf16.vlgmr.msra.gmra.mrb[156].mxu1 %vm6043_vm8, %v15201_v26 }
0x276f   :  { %14119 = vmatpush3.bf16.msra.mxu1 %v15202_v58  ;;  %14122 = vmatprep.mubr.msk.bf16.mxu1 %vm16477_vm2, %v16476_v37 }
0x2770   :  { %14120 = vmatprep.subr.bf16.mxu1 %v16476_v37 }
0x2773   :  { %14121 = vmatpush3.bf16.msra.mxu1 %v15204_v60  ;;  %v15214_v60 = vld [vmem:[#allocation45 + $0x8] sm:$0xff]  }
0x2774   :  { %14134 = vmatprep.subr.bf16.mxu1 %v16476_v37 }
0x2841   :  { %v14108_v49 = vpop.f32.mrb[156].mxu1 }
0x2842   :  { %v6261_v52 = vpop.f32.mrb[157].mxu1  ;;  %v6277_v6 = vpack.c.bf16 %v14108_v49, %v14108_v49 }
0x2843   :  { %v6275_v53 = vpack.c.bf16 %v6261_v52, %v6261_v52  ;;  %v14109_v0 = vpop.f32.mrb[158].mxu1  ;;  %v15215_v52 = vld [vmem:[#allocation45 + $0x20] sm:$0xff]  }
0x2844   :  { %v6264_v48 = vpop.f32.mrb[159].mxu1 }
0x2845   :  { %v6276_v51 = vpack.c.bf16 %v6264_v48, %v6264_v48  ;;  %14123 = vmatmul.mubr.msk.bf16.vlgmr.msra.gmra.mrb[160].mxu1 %vm770_vm0, %v6275_v53 }
0x2846   :  { %14136 = vmatprep.mubr.msk.bf16.mxu1 %vm16477_vm2, %v16476_v37 }
0x2847   :  { %14115 = vmatmul.mubr.msk.bf16.vlgmr.msra.gmra.mrb[164].mxu0 %vm770_vm0, %v6276_v51  ;;  %v15217_v51 = vld [vmem:[%s18670_s29 + $0x20] sm:$0xff]  }
0x2848   :  { %14127 = vmatpush3.bf16.msra.mxu0 %v15206_v50  ;;  %14130 = vmatprep.mubr.msk.bf16.mxu0 %vm16477_vm2, %v16476_v37  ;;  %v15216_v50 = vld [vmem:[#allocation45 + $0x28] sm:$0xff]  }
0x2849   :  { %14128 = vmatprep.subr.bf16.mxu0 %v16476_v37 }
0x284c   :  { %14129 = vmatpush3.bf16.msra.mxu0 %v15207_v1  ;;  %v15218_v1 = vld [vmem:[%s18670_s29 + $0x28] sm:$0xff]  }
0x284d   :  { %14148 = vmatprep.subr.bf16.mxu0 %v16476_v37 }
0x284f   :  { %14131 = vmatmul.mubr.msk.bf16.vlgmr.msra.gmra.mrb[168].mxu0 %vm770_vm0, %v6277_v6  ;;  %v15219_v6 = vld [vmem:[%s18670_s29 + $0x30] sm:$0xff]  }
0x2850   :  { %14152 = vmatprep.mubr.msk.bf16.mxu0 %vm16477_vm2, %v16476_v37  ;;  %14149 = vmatpush3.bf16.msra.mxu0 %v15211_v47 }
0x2851   :  { %14150 = vmatprep.subr.bf16.mxu0 %v16476_v37 }
0x2854   :  { %14151 = vmatpush3.bf16.msra.mxu0 %v15212_v57 }
0x2855   :  { %14156 = vmatprep.subr.bf16.mxu0 %v16476_v37 }
0x2918   :  { %v6392_v7 = vpop.f32.mrb[160].mxu1 }
0x2919   :  { %v14124_v13 = vpop.f32.mrb[161].mxu1 }
0x291a   :  { %v6337_v18 = vpop.f32.mrb[164].mxu0  ;;  %v6395_v21 = vpop.f32.mrb[162].mxu1  ;;  %v15221_v13 = vld [vmem:[%s18670_s29] sm:$0xff]  }
0x291b   :  { %v6393_v28 = vadd.f32 %v6392_v7, %v6337_v18  ;;  %v14116_v30 = vpop.f32.mrb[165].mxu0  ;;  %v14125_v31 = vpop.f32.mrb[163].mxu1  ;;  %v15220_v7 = vld [vmem:[%s18670_s29 + $0x38] sm:$0xff]   ;;  %v15222_v18 = vld [vmem:[%s18670_s29 + $0x8] sm:$0xff]   ;;  %v15223_v21 = vld [vmem:[%s18670_s29 + $0x10] sm:$0xff]  }
0x291c   :  { %v6340_v32 = vpop.f32.mrb[166].mxu0 }
0x291d   :  { %v14117_v55 = vpop.f32.mrb[167].mxu0 }
0x2922   :  { %v6452_v24 = vpop.f32.mrb[168].mxu0 }
0x2923   :  { %v6458_v29 = vadd.f32 %v6452_v24, %v6393_v28  ;;  %v14132_v17 = vpop.f32.mrb[169].mxu0 }
0x2924   :  { %v6455_v39 = vpop.f32.mrb[170].mxu0 }
0x2925   :  { %v6465_v4 = vadd.f32 %v12147_v35, %v6458_v29  ;;  %v14133_v41 = vpop.f32.mrb[171].mxu0  ;;  %v6561_v39 = vld [vmem:[#allocation49] sm:$0xff] }
0x2927   :  { %v6466_v44 = vmax.f32 %v6465_v4, 0.0 }
0x2929   :  { %v6473_v10 = vpack.c.bf16 %v6466_v44, %v6466_v44 }
0x292b   :  { %v6499_v12 = vsel %vm6047_vm7, %v6473_v10, 0  ;;  %v6562_v10 = vld [vmem:[#allocation49 + $0x8] sm:$0xff] }
0x292c   :  { %14135 = vmatpush3.bf16.msra.mxu1 %v6499_v12 }
0x292d   :  { %14172 = vmatprep.subr.bf16.mxu1 %v16476_v37 }
0x292f   :  { %14137 = vmatmul.mubr.msk.bf16.vlgmr.msra.gmra.mrb[164].mxu1 %vm6043_vm8, %v15208_v45 }
0x2930   :  { %14140 = vmatprep.mubr.msk.bf16.mxu1 %vm16477_vm2, %v16476_v37 }
0x2937   :  { %14141 = vmatmul.mubr.msk.bf16.gmra.mrb[168].mxu1 %vm6043_vm8, %v15209_v19 }
0x2938   :  { %14144 = vmatprep.mubr.msk.bf16.mxu1 %vm16477_vm2, %v16476_v37 }
0x293f   :  { %14145 = vmatmul.mubr.msk.bf16.gmra.mrb[172].mxu1 %vm6043_vm8, %v15210_v46 }
0x2940   :  { %14174 = vmatprep.mubr.msk.bf16.mxu1 %vm16477_vm2, %v16476_v37 }
0x2a02   :  { %v6535_v59 = vpop.f32.mrb[164].mxu1 }
0x2a03   :  { %v14138_v2 = vpop.f32.mrb[165].mxu1 }
0x2a04   :  { %v6538_v62 = vpop.f32.mrb[166].mxu1 }
0x2a05   :  { %v6558_v3 = vpack.c.bf16 %v6538_v62, %v6535_v59  ;;  %v14139_v56 = vpop.f32.mrb[167].mxu1  ;;  %v15224_v62 = vld [vmem:[%s18670_s29 + $0x18] sm:$0xff]  }
0x2a0a   :  { %v6543_v40 = vpop.f32.mrb[168].mxu1 }
0x2a0b   :  { %v14142_v42 = vpop.f32.mrb[169].mxu1 }
0x2a0c   :  { %v6546_v23 = vpop.f32.mrb[170].mxu1 }
0x2a0d   :  { %v6559_v26 = vpack.c.bf16 %v6546_v23, %v6543_v40  ;;  %v14143_v58 = vpop.f32.mrb[171].mxu1 }
0x2a0f   :  { %14153 = vmatmul.mubr.msk.bf16.vlgmr.msra.gmra.mrb[172].mxu0 %vm770_vm0, %v6559_v26  ;;  %v15226_v26 = vld [vmem:[#allocation46 + $0x8] sm:$0xff]  }
0x2a10   :  { %14157 = vmatpush3.bf16.msra.mxu0 %v15213_v43  ;;  %14160 = vmatprep.mubr.msk.bf16.mxu0 %vm16477_vm2, %v16476_v37  ;;  %v15225_v43 = vld [vmem:[#allocation46] sm:$0xff]  }
0x2a11   :  { %14158 = vmatprep.subr.bf16.mxu0 %v16476_v37 }
0x2a12   :  { %v6551_v61 = vpop.f32.mrb[172].mxu1 }
0x2a13   :  { %v14146_v49 = vpop.f32.mrb[173].mxu1 }
0x2a14   :  { %14159 = vmatpush3.bf16.msra.mxu0 %v15214_v60  ;;  %v6554_v53 = vpop.f32.mrb[174].mxu1 }
0x2a15   :  { %14164 = vmatprep.subr.bf16.mxu0 %v16476_v37  ;;  %v6560_v0 = vpack.c.bf16 %v6554_v53, %v6551_v61  ;;  %v14147_v48 = vpop.f32.mrb[175].mxu1 }
0x2a17   :  { %14161 = vmatmul.mubr.msk.bf16.vlgmr.msra.gmra.mrb[176].mxu0 %vm770_vm0, %v6558_v3 }
0x2a18   :  { %14165 = vmatpush3.bf16.msra.mxu0 %v15215_v52  ;;  %14168 = vmatprep.mubr.msk.bf16.mxu0 %vm16477_vm2, %v16476_v37 }
0x2a19   :  { %14166 = vmatprep.subr.bf16.mxu0 %v16476_v37 }
0x2a1c   :  { %14167 = vmatpush3.bf16.msra.mxu0 %v15216_v50 }
0x2a1d   :  { %14178 = vmatprep.subr.bf16.mxu0 %v16476_v37 }
0x2a1f   :  { %14169 = vmatmul.mubr.msk.bf16.vlgmr.msra.gmra.mrb[180].mxu0 %vm770_vm0, %v6560_v0 }
0x2a20   :  { %14179 = vmatpush3.bf16.msra.mxu0 %v15217_v51  ;;  %14186 = vmatprep.mubr.msk.bf16.mxu0 %vm16477_vm2, %v16476_v37 }
0x2a21   :  { %14180 = vmatprep.subr.bf16.mxu0 %v16476_v37 }
0x2a24   :  { %14181 = vmatpush3.bf16.msra.mxu0 %v15218_v1 }
0x2a25   :  { %14182 = vmatprep.subr.bf16.mxu0 %v16476_v37 }
0x2a28   :  { %14183 = vmatpush3.bf16.msra.mxu0 %v15219_v6 }
0x2a29   :  { %14184 = vmatprep.subr.bf16.mxu0 %v16476_v37 }
0x2a2c   :  { %14185 = vmatpush3.bf16.msra.mxu0 %v15220_v7 }
0x2a2d   :  { %14190 = vmatprep.subr.bf16.mxu0 %v16476_v37 }
0x2a2f   :  { %14187 = vmatmul.mubr.msk.bf16.vlgmr.msra.gmra.mrb[184].mxu0 %vm2605_vm6, %v17664_v25 }
0x2a30   :  { %14198 = vmatprep.mubr.msk.bf16.mxu0 %vm16477_vm2, %v16476_v37  ;;  %14191 = vmatpush3.bf16.msra.mxu0 %v15221_v13 }
0x2a31   :  { %14192 = vmatprep.subr.bf16.mxu0 %v16476_v37 }
0x2a34   :  { %14193 = vmatpush3.bf16.msra.mxu0 %v15222_v18 }
0x2a35   :  { %14194 = vmatprep.subr.bf16.mxu0 %v16476_v37 }
0x2a38   :  { %14195 = vmatpush3.bf16.msra.mxu0 %v15223_v21 }
0x2a39   :  { %14196 = vmatprep.subr.bf16.mxu0 %v16476_v37 }
0x2a3c   :  { %14197 = vmatpush3.bf16.msra.mxu0 %v15224_v62 }
0x2a3d   :  { %14228 = vmatprep.subr.bf16.mxu0 %v16476_v37 }
0x2ae2   :  { %v6621_v28 = vpop.f32.mrb[172].mxu0 }
0x2ae3   :  { %v14154_v30 = vpop.f32.mrb[173].mxu0 }
0x2ae4   :  { %v6624_v31 = vpop.f32.mrb[174].mxu0 }
0x2ae5   :  { %v14155_v32 = vpop.f32.mrb[175].mxu0 }
0x2aea   :  { %v6677_v25 = vpop.f32.mrb[176].mxu0 }
0x2aeb   :  { %v6678_v55 = vadd.f32 %v6677_v25, %v6621_v28  ;;  %v14162_v35 = vpop.f32.mrb[177].mxu0 }
0x2aec   :  { %v6680_v24 = vpop.f32.mrb[178].mxu0 }
0x2aed   :  { %v6681_v29 = vadd.f32 %v6680_v24, %v6624_v31  ;;  %v14163_v17 = vpop.f32.mrb[179].mxu0 }
0x2af2   :  { %v6738_v4 = vpop.f32.mrb[180].mxu0 }
0x2af3   :  { %v6745_v41 = vadd.f32 %v6738_v4, %v6678_v55  ;;  %v14170_v44 = vpop.f32.mrb[181].mxu0  ;;  %v15229_v55 = vld [vmem:[%s18671_s20 + $0x20] sm:$0xff]  }
0x2af4   :  { %v6741_v12 = vpop.f32.mrb[182].mxu0 }
0x2af5   :  { %v17845_v45 = vadd.f32 %v6745_v41, %v6561_v39  ;;  %v6746_v19 = vadd.f32 %v6741_v12, %v6681_v29  ;;  %v14171_v46 = vpop.f32.mrb[183].mxu0 }
0x2af7   :  { %v17847_v47 = vadd.f32 %v6746_v19, %v6562_v10  ;;  %v6749_v57 = vmax.f32 %v17845_v45, 0.0  ;;  %v15230_v45 = vld [vmem:[%s18671_s20 + $0x10] sm:$0xff]  }
0x2af9   :  { %v6750_v59 = vmax.f32 %v17847_v47, 0.0  ;;  %v15232_v47 = vld [vmem:[%s18671_s20 + $0x18] sm:$0xff]  }
0x2afb   :  { %v6751_v2 = vpack.c.bf16 %v6750_v59, %v6749_v57 }
0x2afd   :  { %14173 = vmatpush3.bf16.msra.mxu1 %v6751_v2 }
0x2afe   :  { %14202 = vmatprep.subr.bf16.mxu1 %v16476_v37 }
0x2b00   :  { %14175 = vmatmul.mubr.msk.bf16.vlgmr.msra.gmra.mrb[176].mxu1 %vm2528_vm5, %v17646_v36 }
0x2b01   :  { %14204 = vmatprep.mubr.msk.bf16.mxu1 %vm16477_vm2, %v16476_v37  ;;  %14203 = vmatpush3.bf16.msra.mxu1 %v15225_v43 }
0x2b02   :  { %14208 = vmatprep.subr.bf16.mxu1 %v16476_v37 }
0x2bd3   :  { %v6786_v3 = vpop.f32.mrb[176].mxu1 }
0x2bd4   :  { %v6792_v56 = vpack.c.bf16 %v6786_v3, %v6786_v3  ;;  %v14176_v40 = vpop.f32.mrb[177].mxu1  ;;  %v15236_v3 = vld [vmem:[%s18671_s20 + $0x60] sm:$0xff]  }
0x2bd5   :  { %v6789_v42 = vpop.f32.mrb[178].mxu1 }
0x2bd6   :  { %14199 = vmatmul.mubr.msk.bf16.vlgmr.msra.gmra.mrb[184].mxu0 %vm2605_vm6, %v6792_v56  ;;  %v14177_v23 = vpop.f32.mrb[179].mxu1  ;;  %v15238_v42 = vld [vmem:[%s18671_s20 + $0x68] sm:$0xff]  }
0x2bd7   :  { %14230 = vmatprep.mubr.msk.bf16.mxu0 %vm16477_vm2, %v16476_v37  ;;  %14229 = vmatpush3.bf16.msra.mxu0 %v15226_v26 }
0x2bd8   :  { %14234 = vmatprep.subr.bf16.mxu0 %v16476_v37 }
0x2ca9   :  { %v6935_v36 = vpop.f32.mrb[184].mxu0 }
0x2caa   :  { %v6941_v58 = vsub.f32 0.0, %v6935_v36  ;;  %v14200_v60 = vpop.f32.mrb[185].mxu0  ;;  %v15235_v36 = vld [vmem:[%s18671_s20 + $0x40] sm:$0xff]  }
0x2cab   :  { %v6938_v61 = vpop.f32.mrb[186].mxu0 }
0x2cac   :  { %v6942_v49 = vmul.f32 1.442695, %v6941_v58  ;;  %v14201_v52 = vpop.f32.mrb[187].mxu0  ;;  %v15240_v58 = vld [vmem:[%s18671_s20 + $0x70] sm:$0xff]  }
0x2cad   :  { %v15242_v52 = vld [vmem:[%s18671_s20 + $0x78] sm:$0xff]  }
0x2cae   :  { %15469 = vpow2.f32 %v6942_v49  ;;  %v15237_v49 = vld [vmem:[%s18671_s20 + $0x48] sm:$0xff]  }
0x2cb8   :  { %v15470_v53 = vpop.eup %15469 }
0x2cb9   :  { %v6944_v0 = vadd.f32 1.0, %v15470_v53 }
0x2cbb   :  { %15471 = vrcp.f32 %v6944_v0 }
0x2cc5   :  { %v15472_v48 = vpop.eup %15471 }
0x2cc6   :  { %v6947_v50 = vpack.c.bf16 %v15472_v48, %v15472_v48 }
0x2cc8   :  { %14205 = vmatmul.mubr.msk.bf16.vlgmr.msra.gmra.mrb[180].mxu1 %vm2528_vm5, %v6947_v50  ;;  %14231 = vmatmul.mubr.msk.bf16.vlgmr.msra.gmra.mrb[188].mxu0 %vm2528_vm5, %v6947_v50  ;;  %v15239_v50 = vld [vmem:[%s18671_s20 + $0x50] sm:$0xff]  }
0x2cc9   :  { %14210 = vmatprep.mubr.msk.bf16.mxu1 %vm16477_vm2, %v16476_v37  ;;  %14236 = vmatprep.mubr.msk.bf16.mxu0 %vm16477_vm2, %v16476_v37 }
0x2d9b   :  { %v6993_v51 = vpop.f32.mrb[180].mxu1  ;;  %v7150_v1 = vpop.f32.mrb[188].mxu0 }
0x2d9c   :  { %v6999_v6 = vpack.c.bf16 %v6993_v51, %v6993_v51  ;;  %v7156_v7 = vpack.c.bf16 %v7150_v1, %v7150_v1  ;;  %v14206_v13 = vpop.f32.mrb[181].mxu1  ;;  %v14232_v18 = vpop.f32.mrb[189].mxu0 }
0x2d9d   :  { %v6996_v21 = vpop.f32.mrb[182].mxu1  ;;  %v7153_v28 = vpop.f32.mrb[190].mxu0 }
0x2d9e   :  { %v7001_v30 = vsel %vm1704_vm4, %v6999_v6, 0  ;;  %v7158_v31 = vsel %vm1704_vm4, %v7156_v7, 0  ;;  %v14207_v32 = vpop.f32.mrb[183].mxu1  ;;  %v14233_v25 = vpop.f32.mrb[191].mxu0  ;;  %v15241_v6 = vld [vmem:[%s18671_s20 + $0x58] sm:$0xff]   ;;  %v15243_v21 = vld [vmem:[%s18671_s20 + $0x80] sm:$0xff]  }
0x2d9f   :  { %14209 = vmatpush3.bf16.msra.mxu1 %v7001_v30  ;;  %14235 = vmatpush3.bf16.msra.mxu0 %v7158_v31  ;;  %v15244_v28 = vld [vmem:[%s18671_s20 + $0xa0] sm:$0xff]   ;;  %v15245_v32 = vld [vmem:[%s18671_s20 + $0x88] sm:$0xff]  }
0x2da0   :  { %14214 = vmatprep.subr.bf16.mxu1 %v16476_v37  ;;  %14254 = vmatprep.subr.bf16.mxu0 %v16476_v37  ;;  %v15246_v25 = vld [vmem:[%s18671_s20 + $0xa8] sm:$0xff]  }
0x2da2   :  { %14211 = vmatmul.mubr.msk.bf16.vlgmr.msra.gmra.mrb[184].mxu1 %vm1697_vm3, %v17673_v5  ;;  %14237 = vmatmul.mubr.msk.bf16.vlgmr.msra.gmra.mrb[192].mxu0 %vm1697_vm3, %v17673_v5 }
0x2da3   :  { %14216 = vmatprep.mubr.msk.bf16.mxu1 %vm16477_vm2, %v16476_v37  ;;  %14262 = vmatprep.mubr.msk.bf16.mxu0 %vm16477_vm2, %v16476_v37 }
0x2da4   :  { %14255 = vmatpush3.bf16.msra.mxu0 %v15229_v55 }
0x2da5   :  { %14256 = vmatprep.subr.bf16.mxu0 %v16476_v37 }
0x2e75   :  { %v7037_v35 = vpop.f32.mrb[184].mxu1  ;;  %v7194_v24 = vpop.f32.mrb[192].mxu0 }
0x2e76   :  { %v14212_v29 = vpop.f32.mrb[185].mxu1  ;;  %v14238_v17 = vpop.f32.mrb[193].mxu0  ;;  %v7044_v41 = vmul.f32 %v7037_v35, %v6749_v57  ;;  %v7201_v5 = vmul.f32 %v7194_v24, %v17306_v33  ;;  %v15227_v33 = vld [vmem:[%s18671_s20] sm:$0xff]   ;;  %v15234_v57 = vld [vmem:[%s18671_s20 + $0x38] sm:$0xff]  }
0x2e77   :  { %v7040_v39 = vpop.f32.mrb[186].mxu1  ;;  %v7197_v4 = vpop.f32.mrb[194].mxu0  ;;  %v15247_v29 = vld [vmem:[%s18671_s20 + $0x90] sm:$0xff]  }
0x2e78   :  { %v7045_v44 = vmul.f32 %v7040_v39, %v6750_v59  ;;  %v7202_v10 = vmul.f32 %v7197_v4, %v17308_v34  ;;  %v14213_v12 = vpop.f32.mrb[187].mxu1  ;;  %v14239_v19 = vpop.f32.mrb[195].mxu0  ;;  %v15228_v34 = vld [vmem:[%s18671_s20 + $0x8] sm:$0xff]   ;;  %v15248_v17 = vld [vmem:[%s18671_s20 + $0xb0] sm:$0xff]  }
0x2e7a   :  { %v7046_v46 = vpack.c.bf16 %v7045_v44, %v7044_v41  ;;  %v7203_v2 = vpack.c.bf16 %v7202_v10, %v7201_v5  ;;  %v15249_v41 = vld [vmem:[%s18671_s20 + $0x98] sm:$0xff]  }
0x2e7b   :  { %v15250_v5 = vld [vmem:[%s18671_s20 + $0xb8] sm:$0xff]  }
0x2e7c   :  { %14215 = vmatpush3.bf16.msra.mxu1 %v7046_v46 }
0x2e7d   :  { %14240 = vmatprep.subr.bf16.mxu1 %v16476_v37 }
0x2e7f   :  { %14217 = vmatmul.mubr.msk.bf16.vlgmr.msra.gmra.mrb[188].mxu1 %vm2528_vm5, %v17684_v38 }
0x2e80   :  { %14241 = vmatpush3.bf16.msra.mxu1 %v7203_v2  ;;  %14220 = vmatprep.mubr.msk.bf16.mxu1 %vm16477_vm2, %v16476_v37 }
0x2e81   :  { %14266 = vmatprep.subr.bf16.mxu1 %v16476_v37 }
0x2e87   :  { %14221 = vmatmul.mubr.msk.bf16.gmra.mrb[192].mxu1 %vm2528_vm5, %v17693_v63 }
0x2e88   :  { %14224 = vmatprep.mubr.msk.bf16.mxu1 %vm16477_vm2, %v16476_v37 }
0x2e8f   :  { %14225 = vmatmul.mubr.msk.bf16.gmra.mrb[196].mxu1 %vm2528_vm5, %v17701_v27 }
0x2e90   :  { %14242 = vmatprep.mubr.msk.bf16.mxu1 %vm16477_vm2, %v16476_v37 }
0x2e97   :  { %14243 = vmatmul.mubr.msk.bf16.vlgmr.msra.gmra.mrb[200].mxu1 %vm2528_vm5, %v17684_v38  ;;  %v15231_v38 = vld [vmem:[%s18671_s20 + $0x28] sm:$0xff]  }
0x2e98   :  { %14246 = vmatprep.mubr.msk.bf16.mxu1 %vm16477_vm2, %v16476_v37  ;;  %14267 = vmatpush3.bf16.msra.mxu1 %v15227_v33 }
0x2e99   :  { %14268 = vmatprep.subr.bf16.mxu1 %v16476_v37  ;;  %14257 = vmatpush3.bf16.msra.mxu0 %v15231_v38 }
0x2e9a   :  { %14258 = vmatprep.subr.bf16.mxu0 %v16476_v37 }
0x2e9c   :  { %14269 = vmatpush3.bf16.msra.mxu1 %v15228_v34 }
0x2e9d   :  { %14270 = vmatprep.subr.bf16.mxu1 %v16476_v37 }
0x2e9f   :  { %14247 = vmatmul.mubr.msk.bf16.gmra.mrb[204].mxu1 %vm2528_vm5, %v17693_v63  ;;  %v15233_v63 = vld [vmem:[%s18671_s20 + $0x30] sm:$0xff]  }
0x2ea0   :  { %14250 = vmatprep.mubr.msk.bf16.mxu1 %vm16477_vm2, %v16476_v37  ;;  %14271 = vmatpush3.bf16.msra.mxu1 %v15230_v45 }
0x2ea1   :  { %14272 = vmatprep.subr.bf16.mxu1 %v16476_v37  ;;  %14259 = vmatpush3.bf16.msra.mxu0 %v15233_v63 }
0x2ea2   :  { %14260 = vmatprep.subr.bf16.mxu0 %v16476_v37 }
0x2ea4   :  { %14273 = vmatpush3.bf16.msra.mxu1 %v15232_v47 }
0x2ea5   :  { %14290 = vmatprep.subr.bf16.mxu1 %v16476_v37  ;;  %14261 = vmatpush3.bf16.msra.mxu0 %v15234_v57 }
0x2ea6   :  { %14278 = vmatprep.subr.bf16.mxu0 %v16476_v37 }
0x2ea7   :  { %14251 = vmatmul.mubr.msk.bf16.gmra.mrb[208].mxu1 %vm2528_vm5, %v17701_v27 }
0x2ea8   :  { %14274 = vmatprep.mubr.msk.bf16.mxu1 %vm16477_vm2, %v16476_v37 }
0x2f52   :  { %v7081_v27 = vpop.f32.mrb[188].mxu1 }
0x2f53   :  { %v14218_v59 = vpop.f32.mrb[189].mxu1 }
0x2f54   :  { %v7084_v62 = vpop.f32.mrb[190].mxu1 }
0x2f55   :  { %v7104_v56 = vpack.c.bf16 %v7084_v62, %v7081_v27  ;;  %v14219_v40 = vpop.f32.mrb[191].mxu1 }
0x2f57   :  { %14275 = vmatmul.mubr.msk.bf16.vlgmr.msra.gmra.mrb[212].mxu1 %vm2605_vm6, %v7104_v56 }
0x2f58   :  { %14291 = vmatpush3.bf16.msra.mxu1 %v15236_v3  ;;  %14298 = vmatprep.mubr.msk.bf16.mxu1 %vm16477_vm2, %v16476_v37 }
0x2f59   :  { %14292 = vmatprep.subr.bf16.mxu1 %v16476_v37 }
0x2f5a   :  { %v7089_v23 = vpop.f32.mrb[192].mxu1 }
0x2f5b   :  { %v14222_v43 = vpop.f32.mrb[193].mxu1 }
0x2f5c   :  { %v7092_v26 = vpop.f32.mrb[194].mxu1  ;;  %14293 = vmatpush3.bf16.msra.mxu1 %v15238_v42 }
0x2f5d   :  { %v7105_v60 = vpack.c.bf16 %v7092_v26, %v7089_v23  ;;  %v14223_v61 = vpop.f32.mrb[195].mxu1  ;;  %14294 = vmatprep.subr.bf16.mxu1 %v16476_v37 }
0x2f5f   :  { %14263 = vmatmul.mubr.msk.bf16.vlgmr.msra.gmra.mrb[196].mxu0 %vm2605_vm6, %v7105_v60 }
0x2f60   :  { %14279 = vmatpush3.bf16.msra.mxu0 %v15235_v36  ;;  %14295 = vmatpush3.bf16.msra.mxu1 %v15240_v58 }
0x2f61   :  { %14280 = vmatprep.subr.bf16.mxu0 %v16476_v37  ;;  %14296 = vmatprep.subr.bf16.mxu1 %v16476_v37 }
0x2f62   :  { %v7097_v53 = vpop.f32.mrb[196].mxu1  ;;  %14286 = vmatprep.mubr.msk.bf16.mxu0 %vm16477_vm2, %v16476_v37 }
0x2f63   :  { %v14226_v0 = vpop.f32.mrb[197].mxu1 }
0x2f64   :  { %14281 = vmatpush3.bf16.msra.mxu0 %v15237_v49  ;;  %v7100_v48 = vpop.f32.mrb[198].mxu1  ;;  %14297 = vmatpush3.bf16.msra.mxu1 %v15242_v52 }
0x2f65   :  { %v7106_v51 = vpack.c.bf16 %v7100_v48, %v7097_v53  ;;  %14282 = vmatprep.subr.bf16.mxu0 %v16476_v37  ;;  %v14227_v1 = vpop.f32.mrb[199].mxu1  ;;  %14314 = vmatprep.subr.bf16.mxu1 %v16476_v37 }
0x2f68   :  { %14283 = vmatpush3.bf16.msra.mxu0 %v15239_v50  ;;  %v12264_v50 = vld [vmem:[%s18672_s2] ss:$0 sm:$0xff] }
0x2f69   :  { %14284 = vmatprep.subr.bf16.mxu0 %v16476_v37 }
0x2f6a   :  { %v7238_v7 = vpop.f32.mrb[200].mxu1 }
0x2f6b   :  { %v14244_v13 = vpop.f32.mrb[201].mxu1 }
0x2f6c   :  { %14285 = vmatpush3.bf16.msra.mxu0 %v15241_v6  ;;  %v7241_v18 = vpop.f32.mrb[202].mxu1 }
0x2f6d   :  { %v7261_v30 = vpack.c.bf16 %v7241_v18, %v7238_v7  ;;  %14302 = vmatprep.subr.bf16.mxu0 %v16476_v37  ;;  %v14245_v31 = vpop.f32.mrb[203].mxu1 }
0x2f6f   :  { %14287 = vmatmul.mubr.msk.bf16.vlgmr.msra.gmra.mrb[200].mxu0 %vm2605_vm6, %v7106_v51  ;;  %14299 = vmatmul.mubr.msk.bf16.vlgmr.msra.gmra.mrb[216].mxu1 %vm2605_vm6, %v7261_v30 }
0x2f70   :  { %14303 = vmatpush3.bf16.msra.mxu0 %v15243_v21  ;;  %14315 = vmatpush3.bf16.msra.mxu1 %v15244_v28 }
0x2f71   :  { %14304 = vmatprep.subr.bf16.mxu0 %v16476_v37  ;;  %14316 = vmatprep.subr.bf16.mxu1 %v16476_v37 }
0x2f72   :  { %v7246_v55 = vpop.f32.mrb[204].mxu1  ;;  %14310 = vmatprep.mubr.msk.bf16.mxu0 %vm16477_vm2, %v16476_v37  ;;  %14322 = vmatprep.mubr.msk.bf16.mxu1 %vm16477_vm2, %v16476_v37 }
0x2f73   :  { %v14248_v35 = vpop.f32.mrb[205].mxu1 }
0x2f74   :  { %14305 = vmatpush3.bf16.msra.mxu0 %v15245_v32  ;;  %14317 = vmatpush3.bf16.msra.mxu1 %v15246_v25  ;;  %v7249_v24 = vpop.f32.mrb[206].mxu1  ;;  %v15509_v35 = vld [vmem:[#allocation28] sm:$0x1] }
0x2f75   :  { %v7262_v39 = vpack.c.bf16 %v7249_v24, %v7246_v55  ;;  %14306 = vmatprep.subr.bf16.mxu0 %v16476_v37  ;;  %v14249_v4 = vpop.f32.mrb[207].mxu1  ;;  %14318 = vmatprep.subr.bf16.mxu1 %v16476_v37  ;;  %v15251_v55 = vld [vmem:[#allocation48] sm:$0xff]   ;;  %v15252_v24 = vld [vmem:[#allocation48 + $0x8] sm:$0xff]  }
0x2f78   :  { %14307 = vmatpush3.bf16.msra.mxu0 %v15247_v29  ;;  %14319 = vmatpush3.bf16.msra.mxu1 %v15248_v17  ;;  %v15253_v29 = vld [vmem:[#allocation48 + $0x10] sm:$0xff]   ;;  %v15254_v17 = vld [vmem:[#allocation48 + $0x18] sm:$0xff]  }
0x2f79   :  { %14308 = vmatprep.subr.bf16.mxu0 %v16476_v37  ;;  %14320 = vmatprep.subr.bf16.mxu1 %v16476_v37 }
0x2f7a   :  { %v7254_v44 = vpop.f32.mrb[208].mxu1 }
0x2f7b   :  { %v14252_v10 = vpop.f32.mrb[209].mxu1 }
0x2f7c   :  { %14309 = vmatpush3.bf16.msra.mxu0 %v15249_v41  ;;  %v7257_v12 = vpop.f32.mrb[210].mxu1  ;;  %14321 = vmatpush3.bf16.msra.mxu1 %v15250_v5 }
0x2f7d   :  { %v7263_v19 = vpack.c.bf16 %v7257_v12, %v7254_v44  ;;  %v14253_v46 = vpop.f32.mrb[211].mxu1  ;;  %14326 = vmatprep.subr.bf16.mxu0 %v16476_v37  ;;  %14344 = vmatprep.subr.bf16.mxu1 %v16476_v37 }
0x2f7f   :  { %14311 = vmatmul.mubr.msk.bf16.vlgmr.msra.gmra.mrb[204].mxu0 %vm2605_vm6, %v7262_v39  ;;  %14323 = vmatmul.mubr.msk.bf16.vlgmr.msra.gmra.mrb[220].mxu1 %vm2605_vm6, %v7263_v19 }
0x2f80   :  { %14328 = vmatprep.mubr.msk.bf16.mxu0 %vm16477_vm2, %v16476_v37  ;;  %14346 = vmatprep.mubr.msk.bf16.mxu1 %vm16477_vm2, %v16476_v37 }
0x302a   :  { %v7411_v2 = vpop.f32.mrb[212].mxu1 }
0x302b   :  { %v14276_v33 = vpop.f32.mrb[213].mxu1 }
0x302c   :  { %v7414_v34 = vpop.f32.mrb[214].mxu1 }
0x302d   :  { %v14277_v45 = vpop.f32.mrb[215].mxu1 }
0x3032   :  { %v7343_v38 = vpop.f32.mrb[196].mxu0 }
0x3033   :  { %v7412_v47 = vadd.f32 %v7411_v2, %v7343_v38  ;;  %v14264_v63 = vpop.f32.mrb[197].mxu0 }
0x3034   :  { %v7346_v57 = vpop.f32.mrb[198].mxu0 }
0x3035   :  { %v7415_v27 = vadd.f32 %v7414_v34, %v7346_v57  ;;  %v14265_v59 = vpop.f32.mrb[199].mxu0  ;;  %v15510_v57 = vld [vmem:[%s18659_s19] sm:$0xff]  }
0x3042   :  { %v7488_v62 = vpop.f32.mrb[200].mxu0  ;;  %v7567_v3 = vpop.f32.mrb[216].mxu1 }
0x3043   :  { %v7495_v56 = vadd.f32 %v7488_v62, %v7412_v47  ;;  %v14288_v40 = vpop.f32.mrb[201].mxu0  ;;  %v14300_v42 = vpop.f32.mrb[217].mxu1 }
0x3044   :  { %v7491_v23 = vpop.f32.mrb[202].mxu0  ;;  %v7570_v43 = vpop.f32.mrb[218].mxu1 }
0x3045   :  { %v7574_v26 = vadd.f32 %v7567_v3, %v7495_v56  ;;  %v7496_v36 = vadd.f32 %v7491_v23, %v7415_v27  ;;  %v14289_v58 = vpop.f32.mrb[203].mxu0  ;;  %v14301_v60 = vpop.f32.mrb[219].mxu1  ;;  %v15257_v27 = vld [vmem:[#allocation43 + $0x20] sm:$0xff]  }
0x3046   :  { %v15258_v58 = vld [vmem:[#allocation43 + $0x10] sm:$0xff]  }
0x3047   :  { %v7575_v61 = vadd.f32 %v7570_v43, %v7496_v36  ;;  %v15255_v43 = vld [vmem:[#allocation43] sm:$0xff]   ;;  %v15256_v36 = vld [vmem:[#allocation43 + $0x8] sm:$0xff]   ;;  %v15512_v60 = vld [vmem:[%s18660_s14 + $0x8] sm:$0xff]  }
0x3052   :  { %v7646_v49 = vpop.f32.mrb[204].mxu0  ;;  %v7725_v52 = vpop.f32.mrb[220].mxu1 }
0x3053   :  { %v7653_v53 = vadd.f32 %v7646_v49, %v7574_v26  ;;  %v14312_v0 = vpop.f32.mrb[205].mxu0  ;;  %v14324_v48 = vpop.f32.mrb[221].mxu1  ;;  %v15511_v26 = vld [vmem:[%s18660_s14] sm:$0xff]  }
0x3054   :  { %v7649_v51 = vpop.f32.mrb[206].mxu0  ;;  %v7728_v1 = vpop.f32.mrb[222].mxu1  ;;  %v15259_v49 = vld [vmem:[#allocation43 + $0x28] sm:$0xff]   ;;  %v15262_v0 = vld [vmem:[#allocation43 + $0x38] sm:$0xff]  }
0x3055   :  { %v7732_v6 = vadd.f32 %v7725_v52, %v7653_v53  ;;  %v7654_v7 = vadd.f32 %v7649_v51, %v7575_v61  ;;  %v14313_v13 = vpop.f32.mrb[207].mxu0  ;;  %v14325_v18 = vpop.f32.mrb[223].mxu1  ;;  %v15513_v61 = vld [vmem:[%s18660_s14 + $0x10] sm:$0xff]   ;;  %v15261_v53 = vld [vmem:[#allocation43 + $0x30] sm:$0xff]  }
0x3056   :  { %v15260_v52 = vld [vmem:[#allocation43 + $0x18] sm:$0xff]  }
0x3057   :  { %v7740_v21 = vadd.f32 %v12264_v50, %v7732_v6  ;;  %v7733_v28 = vadd.f32 %v7728_v1, %v7654_v7  ;;  %v15514_v7 = vld [vmem:[%s18661_s9] sm:$0xff]  }
0x3059   :  { %v7741_v30 = vadd.f32 %v12264_v50, %v7733_v28  ;;  %v7742_v31 = vmax.f32 %v7740_v21, 0.0  ;;  %v15263_v28 = vld [vmem:[#allocation43 + $0x40] sm:$0xff]  }
0x305b   :  { %v7743_v32 = vmax.f32 %v7741_v30, 0.0 }
0x305d   :  { %v7744_v25 = vpack.c.bf16 %v7743_v32, %v7742_v31 }
0x305f   :  { %14327 = vmatpush3.bf16.msra.mxu0 %v7744_v25 }
0x3060   :  { %14332 = vmatprep.subr.bf16.mxu0 %v16476_v37 }
0x3062   :  { %14329 = vmatmul.mubr.msk.bf16.vlgmr.msra.gmra.mrb[208].mxu0 %vm2528_vm5, %v15509_v35  ;;  %v15265_v35 = vld [vmem:[#allocation43 + $0x50] sm:$0xff]  }
0x3063   :  { %14333 = vmatpush3.bf16.msra.mxu0 %v15251_v55  ;;  %14340 = vmatprep.mubr.msk.bf16.mxu0 %vm16477_vm2, %v16476_v37 }
0x3064   :  { %14334 = vmatprep.subr.bf16.mxu0 %v16476_v37 }
0x3067   :  { %14335 = vmatpush3.bf16.msra.mxu0 %v15252_v24 }
0x3068   :  { %14336 = vmatprep.subr.bf16.mxu0 %v16476_v37 }
0x306b   :  { %14337 = vmatpush3.bf16.msra.mxu0 %v15253_v29 }
0x306c   :  { %14338 = vmatprep.subr.bf16.mxu0 %v16476_v37 }
0x306f   :  { %14339 = vmatpush3.bf16.msra.mxu0 %v15254_v17 }
0x3070   :  { %14364 = vmatprep.subr.bf16.mxu0 %v16476_v37 }
0x3135   :  { %v7779_v39 = vpop.f32.mrb[208].mxu0 }
0x3136   :  { %v7785_v4 = vpack.c.bf16 %v7779_v39, %v7779_v39  ;;  %v14330_v41 = vpop.f32.mrb[209].mxu0  ;;  %v15266_v39 = vld [vmem:[#allocation43 + $0x58] sm:$0xff]  }
0x3137   :  { %v7782_v5 = vpop.f32.mrb[210].mxu0 }
0x3138   :  { %14341 = vmatmul.mubr.msk.bf16.vlgmr.msra.gmra.mrb[212].mxu0 %vm2605_vm6, %v7785_v4  ;;  %v14331_v44 = vpop.f32.mrb[211].mxu0  ;;  %v15267_v4 = vld [vmem:[#allocation51 + $0x20] sm:$0xff]  }
0x3139   :  { %14372 = vmatprep.mubr.msk.bf16.mxu0 %vm16477_vm2, %v16476_v37  ;;  %14365 = vmatpush3.bf16.msra.mxu0 %v15257_v27 }
0x313a   :  { %14366 = vmatprep.subr.bf16.mxu0 %v16476_v37 }
0x313d   :  { %14367 = vmatpush3.bf16.msra.mxu0 %v15259_v49  ;;  %v15270_v49 = vld [vmem:[#allocation51 + $0x38] sm:$0xff]  }
0x313e   :  { %14368 = vmatprep.subr.bf16.mxu0 %v16476_v37 }
0x3141   :  { %14369 = vmatpush3.bf16.msra.mxu0 %v15261_v53 }
0x3142   :  { %14370 = vmatprep.subr.bf16.mxu0 %v16476_v37 }
0x3145   :  { %14371 = vmatpush3.bf16.msra.mxu0 %v15262_v0 }
0x3146   :  { %14388 = vmatprep.subr.bf16.mxu0 %v16476_v37 }
0x320b   :  { %v7855_v10 = vpop.f32.mrb[212].mxu0 }
0x320c   :  { %v7861_v12 = vsub.f32 0.0, %v7855_v10  ;;  %v14342_v19 = vpop.f32.mrb[213].mxu0 }
0x320d   :  { %v7858_v46 = vpop.f32.mrb[214].mxu0 }
0x320e   :  { %v7862_v2 = vmul.f32 1.442695, %v7861_v12  ;;  %v14343_v33 = vpop.f32.mrb[215].mxu0 }
0x3210   :  { %15473 = vpow2.f32 %v7862_v2 }
0x321a   :  { %v15474_v34 = vpop.eup %15473 }
0x321b   :  { %v7864_v45 = vadd.f32 1.0, %v15474_v34 }
0x321d   :  { %15475 = vrcp.f32 %v7864_v45  ;;  %v12290_v45 = vld [vmem:[%s18673_s8] ss:$0 sm:$0xff] }
0x3227   :  { %v15476_v38 = vpop.eup %15475 }
0x3228   :  { %v7867_v47 = vpack.c.bf16 %v15476_v38, %v15476_v38 }
0x322a   :  { %v7869_v63 = vsel %vm1704_vm4, %v7867_v47, 0 }
0x322b   :  { %14345 = vmatpush3.bf16.msra.mxu1 %v7869_v63 }
0x322c   :  { %14350 = vmatprep.subr.bf16.mxu1 %v16476_v37 }
0x322e   :  { %14347 = vmatmul.mubr.msk.bf16.vlgmr.msra.gmra.mrb[224].mxu1 %vm1697_vm3, %v15510_v57 }
0x322f   :  { %14352 = vmatprep.mubr.msk.bf16.mxu1 %vm16477_vm2, %v16476_v37 }
0x3301   :  { %v7905_v59 = vpop.f32.mrb[224].mxu1 }
0x3302   :  { %v14348_v62 = vpop.f32.mrb[225].mxu1  ;;  %v7912_v56 = vmul.f32 %v7905_v59, %v7742_v31 }
0x3303   :  { %v7908_v3 = vpop.f32.mrb[226].mxu1 }
0x3304   :  { %v7913_v40 = vmul.f32 %v7908_v3, %v7743_v32  ;;  %v14349_v42 = vpop.f32.mrb[227].mxu1  ;;  %v15264_v32 = vld [vmem:[#allocation43 + $0x48] sm:$0xff]  }
0x3306   :  { %v7914_v23 = vpack.c.bf16 %v7913_v40, %v7912_v56 }
0x3308   :  { %14351 = vmatpush3.bf16.msra.mxu1 %v7914_v23  ;;  %v15515_v23 = vld [vmem:[%s18661_s9 + $0x8] sm:$0xff]  }
0x3309   :  { %14376 = vmatprep.subr.bf16.mxu1 %v16476_v37 }
0x330b   :  { %14353 = vmatmul.mubr.msk.bf16.vlgmr.msra.gmra.mrb[228].mxu1 %vm2528_vm5, %v15511_v26  ;;  %v15517_v26 = vld [vmem:[%s18661_s9 + $0x18] sm:$0xff]  }
0x330c   :  { %14356 = vmatprep.mubr.msk.bf16.mxu1 %vm16477_vm2, %v16476_v37  ;;  %14377 = vmatpush3.bf16.msra.mxu1 %v15255_v43  ;;  %v15516_v43 = vld [vmem:[%s18661_s9 + $0x10] sm:$0xff]  }
0x330d   :  { %14378 = vmatprep.subr.bf16.mxu1 %v16476_v37 }
0x3310   :  { %14379 = vmatpush3.bf16.msra.mxu1 %v15256_v36  ;;  %v15518_v36 = vld [vmem:[%s18661_s9 + $0x20] sm:$0xff]  }
0x3311   :  { %14380 = vmatprep.subr.bf16.mxu1 %v16476_v37 }
0x3313   :  { %14357 = vmatmul.mubr.msk.bf16.gmra.mrb[232].mxu1 %vm2528_vm5, %v15512_v60  ;;  %v15268_v60 = vld [vmem:[#allocation51 + $0x28] sm:$0xff]  }
0x3314   :  { %14360 = vmatprep.mubr.msk.bf16.mxu1 %vm16477_vm2, %v16476_v37  ;;  %14381 = vmatpush3.bf16.msra.mxu1 %v15258_v58  ;;  %v15519_v58 = vld [vmem:[%s18661_s9 + $0x28] sm:$0xff]  }
0x3315   :  { %14382 = vmatprep.subr.bf16.mxu1 %v16476_v37 }
0x3318   :  { %14383 = vmatpush3.bf16.msra.mxu1 %v15260_v52  ;;  %v15271_v52 = vld [vmem:[#allocation51] sm:$0xff]  }
0x331b   :  { %14361 = vmatmul.mubr.msk.bf16.gmra.mrb[236].mxu1 %vm2528_vm5, %v15513_v61  ;;  %v15269_v61 = vld [vmem:[#allocation51 + $0x30] sm:$0xff]  }
0x331c   :  { %14384 = vmatprep.mubr.msk.bf16.mxu1 %vm16477_vm2, %v16476_v37 }
0x33de   :  { %v7949_v48 = vpop.f32.mrb[228].mxu1 }
0x33df   :  { %v14354_v50 = vpop.f32.mrb[229].mxu1 }
0x33e0   :  { %v7952_v51 = vpop.f32.mrb[230].mxu1 }
0x33e1   :  { %v7972_v1 = vpack.c.bf16 %v7952_v51, %v7949_v48  ;;  %v14355_v6 = vpop.f32.mrb[231].mxu1 }
0x33e3   :  { %14385 = vmatmul.mubr.msk.bf16.vlgmr.msra.gmra.mrb[240].mxu1 %vm2605_vm6, %v7972_v1 }
0x33e4   :  { %14402 = vmatprep.mubr.msk.bf16.mxu1 %vm2528_vm5, %v15514_v7 }
0x33e6   :  { %v7957_v13 = vpop.f32.mrb[232].mxu1 }
0x33e7   :  { %v14358_v18 = vpop.f32.mrb[233].mxu1 }
0x33e8   :  { %v7960_v21 = vpop.f32.mrb[234].mxu1 }
0x33e9   :  { %v7973_v30 = vpack.c.bf16 %v7960_v21, %v7957_v13  ;;  %v14359_v31 = vpop.f32.mrb[235].mxu1 }
0x33eb   :  { %14373 = vmatmul.mubr.msk.bf16.vlgmr.msra.gmra.mrb[216].mxu0 %vm2605_vm6, %v7973_v30  ;;  %v15272_v30 = vld [vmem:[#allocation51 + $0x8] sm:$0xff]  }
0x33ec   :  { %14389 = vmatpush3.bf16.msra.mxu0 %v15263_v28  ;;  %14396 = vmatprep.mubr.msk.bf16.mxu0 %vm16477_vm2, %v16476_v37 }
0x33ed   :  { %14390 = vmatprep.subr.bf16.mxu0 %v16476_v37 }
0x33ee   :  { %v7965_v25 = vpop.f32.mrb[236].mxu1 }
0x33ef   :  { %v14362_v55 = vpop.f32.mrb[237].mxu1 }
0x33f0   :  { %14391 = vmatpush3.bf16.msra.mxu0 %v15264_v32  ;;  %v7968_v24 = vpop.f32.mrb[238].mxu1  ;;  %v15273_v32 = vld [vmem:[#allocation51 + $0x10] sm:$0xff]  }
0x33f1   :  { %14392 = vmatprep.subr.bf16.mxu0 %v16476_v37  ;;  %v7974_v29 = vpack.c.bf16 %v7968_v24, %v7965_v25  ;;  %v14363_v17 = vpop.f32.mrb[239].mxu1 }
0x33f2   :  { %v15274_v17 = vld [vmem:[#allocation51 + $0x18] sm:$0xff]  }
0x33f4   :  { %14393 = vmatpush3.bf16.msra.mxu0 %v15265_v35 }
0x33f5   :  { %14394 = vmatprep.subr.bf16.mxu0 %v16476_v37 }
0x33f8   :  { %14395 = vmatpush3.bf16.msra.mxu0 %v15266_v39  ;;  %v15275_v39 = vld [vmem:[#allocation51 + $0x40] sm:$0xff]  }
0x33f9   :  { %14414 = vmatprep.subr.bf16.mxu0 %v15267_v4 }
0x33fb   :  { %14397 = vmatmul.mubr.msk.bf16.vlgmr.msra.gmra.mrb[220].mxu0 %vm2605_vm6, %v7974_v29 }
0x33fc   :  { %14415 = vmatpush3.bf16.msra.mxu0 %v15267_v4  ;;  %v15276_v4 = vld [vmem:[#allocation51 + $0x48] sm:$0xff]  }
0x33fd   :  { %14416 = vmatprep.subr.bf16.mxu0 %v15268_v60 }
0x3400   :  { %14417 = vmatpush3.bf16.msra.mxu0 %v15268_v60  ;;  %v15279_v60 = vld [vmem:[%s18674_s10 + $0x40] sm:$0xff]  }
0x3401   :  { %14418 = vmatprep.subr.bf16.mxu0 %v15269_v61 }
0x3404   :  { %14419 = vmatpush3.bf16.msra.mxu0 %v15269_v61  ;;  %v15280_v61 = vld [vmem:[%s18674_s10 + $0x48] sm:$0xff]  }
0x3405   :  { %14420 = vmatprep.subr.bf16.mxu0 %v15270_v49 }
0x3408   :  { %14421 = vmatpush3.bf16.msra.mxu0 %v15270_v49  ;;  %v15281_v49 = vld [vmem:[%s18674_s10 + $0x50] sm:$0xff]  }
0x3409   :  { %14426 = vmatprep.subr.bf16.mxu0 %v15271_v52 }
0x34b6   :  { %v8122_v41 = vpop.f32.mrb[240].mxu1 }
0x34b7   :  { %v14386_v5 = vpop.f32.mrb[241].mxu1 }
0x34b8   :  { %v8125_v44 = vpop.f32.mrb[242].mxu1  ;;  %v15278_v5 = vld [vmem:[#allocation51 + $0x58] sm:$0xff]  }
0x34b9   :  { %v14387_v10 = vpop.f32.mrb[243].mxu1 }
0x34ba   :  { %v8585_v10 = vmax.f32 %v17656_v54, 0.0  ;;  %v15307_v54 = vld [vmem:[#allocation52 + $0xc] sm:$0xff]  }
0x34be   :  { %v8054_v12 = vpop.f32.mrb[216].mxu0 }
0x34bf   :  { %v8123_v19 = vadd.f32 %v8122_v41, %v8054_v12  ;;  %v14374_v46 = vpop.f32.mrb[217].mxu0  ;;  %v15277_v41 = vld [vmem:[#allocation51 + $0x50] sm:$0xff]   ;;  %v8588_v12 = vmax.f32 %v17662_v8, 0.0 }
0x34c0   :  { %v8057_v2 = vpop.f32.mrb[218].mxu0  ;;  %v8587_v46 = vmax.f32 %v17660_v16, 0.0 }
0x34c1   :  { %v8126_v33 = vadd.f32 %v8125_v44, %v8057_v2  ;;  %v14375_v34 = vpop.f32.mrb[219].mxu0  ;;  %v8586_v44 = vmax.f32 %v17658_v22, 0.0  ;;  %v18222_v22 = vld [vmem:[%s18653_s11 + $0x10] sm:$0xff]  }
0x34c2   :  { %v8842_v2 = vpack.c.bf16 %v8588_v12, %v8587_v46  ;;  %v8306_v34 = vld [vmem:[#allocation55] sm:$0xff] }
0x34ce   :  { %v8199_v38 = vpop.f32.mrb[220].mxu0 }
0x34cf   :  { %v8206_v47 = vadd.f32 %v8199_v38, %v8123_v19  ;;  %v14398_v63 = vpop.f32.mrb[221].mxu0  ;;  %v8841_v19 = vpack.c.bf16 %v8586_v44, %v8585_v10 }
0x34d0   :  { %v8202_v57 = vpop.f32.mrb[222].mxu0  ;;  %v8307_v63 = vld [vmem:[#allocation55 + $0x8] sm:$0xff] }
0x34d1   :  { %v8214_v27 = vadd.f32 %v12290_v45, %v8206_v47  ;;  %v8207_v59 = vadd.f32 %v8202_v57, %v8126_v33  ;;  %v14399_v62 = vpop.f32.mrb[223].mxu0  ;;  %v15520_v33 = vld [vmem:[#allocation27] sm:$0x1]  ;;  %v8309_v47 = vld [vmem:[#allocation55 + $0x18] sm:$0xff] }
0x34d3   :  { %v8215_v3 = vadd.f32 %v12290_v45, %v8207_v59  ;;  %v8216_v56 = vmax.f32 %v8214_v27, 0.0  ;;  %v8308_v59 = vld [vmem:[#allocation55 + $0x10] sm:$0xff] }
0x34d5   :  { %v8217_v40 = vmax.f32 %v8215_v3, 0.0 }
0x34d7   :  { %v8218_v42 = vpack.c.bf16 %v8217_v40, %v8216_v56 }
0x34d9   :  { %14400 = vmatprep.subr.bf16.mxu1 %v8218_v42 }
0x34da   :  { %14401 = vmatpush3.bf16.msra.mxu1 %v8218_v42 }
0x34db   :  { %14450 = vmatprep.subr.bf16.mxu1 %v16476_v37 }
0x34dd   :  { %14403 = vmatmul.mubr.msk.bf16.vlgmr.msra.gmra.mrb[244].mxu1 %vm2528_vm5, %v15515_v23 }
0x34de   :  { %14406 = vmatprep.mubr.msk.bf16.mxu1 %vm2528_vm5, %v15516_v43 }
0x34e5   :  { %14407 = vmatmul.mubr.msk.bf16.gmra.mrb[248].mxu1 %vm2528_vm5, %v15517_v26 }
0x34e6   :  { %14410 = vmatprep.mubr.msk.bf16.mxu1 %vm2528_vm5, %v15518_v36 }
0x34ed   :  { %14411 = vmatmul.mubr.msk.bf16.gmra.mrb[252].mxu1 %vm2528_vm5, %v15519_v58 }
0x34ee   :  { %14454 = vmatprep.mubr.msk.bf16.mxu1 %vm16477_vm2, %v16476_v37 }
0x35b0   :  { %v14404_v53 = vpop.f32.mrb[244].mxu1 }
0x35b1   :  { %v8253_v0 = vpop.f32.mrb[245].mxu1 }
0x35b2   :  { %v14405_v48 = vpop.f32.mrb[246].mxu1 }
0x35b3   :  { %v8301_v50 = vpack.c.bf16 %v14405_v48, %v14404_v53  ;;  %v8256_v51 = vpop.f32.mrb[247].mxu1  ;;  %v15283_v53 = vld [vmem:[%s18674_s10 + $0x60] sm:$0xff]   ;;  %v15285_v48 = vld [vmem:[%s18674_s10 + $0x70] sm:$0xff]  }
0x35b4   :  { %v8300_v1 = vpack.c.bf16 %v8256_v51, %v8253_v0  ;;  %v15284_v0 = vld [vmem:[%s18674_s10 + $0x68] sm:$0xff]   ;;  %v15287_v51 = vld [vmem:[%s18674_s10] sm:$0xff]  }
0x35b8   :  { %v14408_v6 = vpop.f32.mrb[248].mxu1 }
0x35b9   :  { %v8269_v7 = vpop.f32.mrb[249].mxu1 }
0x35ba   :  { %v14409_v13 = vpop.f32.mrb[250].mxu1 }
0x35bb   :  { %v8303_v18 = vpack.c.bf16 %v14409_v13, %v14408_v6  ;;  %v8272_v21 = vpop.f32.mrb[251].mxu1  ;;  %v15289_v6 = vld [vmem:[%s18674_s10 + $0x10] sm:$0xff]   ;;  %v15291_v13 = vld [vmem:[%s18674_s10 + $0x20] sm:$0xff]  }
0x35bc   :  { %v8302_v28 = vpack.c.bf16 %v8272_v21, %v8269_v7  ;;  %v15290_v7 = vld [vmem:[%s18674_s10 + $0x18] sm:$0xff]  }
0x35bd   :  { %v15294_v21 = vld [vmem:[%s18674_s10 + $0x38] sm:$0xff]  }
0x35be   :  { %14422 = vmatprep.mubr.msk.bf16.mxu0 %vm2605_vm6, %v8302_v28 }
0x35bf   :  { %14423 = vmatmul.mubr.msk.bf16.vlgmr.msra.gmra.mrb[224].mxu0 %vm2605_vm6, %v8303_v18  ;;  %v15293_v18 = vld [vmem:[%s18674_s10 + $0x30] sm:$0xff]  }
0x35c0   :  { %14427 = vmatpush3.bf16.msra.mxu0 %v15271_v52  ;;  %14434 = vmatprep.mubr.msk.bf16.mxu0 %vm2605_vm6, %v8300_v1  ;;  %v14412_v31 = vpop.f32.mrb[252].mxu1  ;;  %v15282_v52 = vld [vmem:[%s18674_s10 + $0x58] sm:$0xff]   ;;  %v15288_v1 = vld [vmem:[%s18674_s10 + $0x8] sm:$0xff]  }
0x35c1   :  { %14428 = vmatprep.subr.bf16.mxu0 %v15272_v30  ;;  %v8285_v25 = vpop.f32.mrb[253].mxu1 }
0x35c2   :  { %v14413_v55 = vpop.f32.mrb[254].mxu1 }
0x35c3   :  { %v8305_v35 = vpack.c.bf16 %v14413_v55, %v14412_v31  ;;  %v8288_v24 = vpop.f32.mrb[255].mxu1  ;;  %v15295_v55 = vld [vmem:[%s18674_s10 + $0x80] sm:$0xff]  }
0x35c4   :  { %14429 = vmatpush3.bf16.msra.mxu0 %v15272_v30  ;;  %v8304_v29 = vpack.c.bf16 %v8288_v24, %v8285_v25 }
0x35c5   :  { %14430 = vmatprep.subr.bf16.mxu0 %v15273_v32 }
0x35c8   :  { %14431 = vmatpush3.bf16.msra.mxu0 %v15273_v32 }
0x35c9   :  { %14432 = vmatprep.subr.bf16.mxu0 %v15274_v17 }
0x35cc   :  { %14433 = vmatpush3.bf16.msra.mxu0 %v15274_v17 }
0x35cd   :  { %14438 = vmatprep.subr.bf16.mxu0 %v15275_v39 }
0x35cf   :  { %14435 = vmatmul.mubr.msk.bf16.vlgmr.msra.gmra.mrb[224].mxu0 %vm2605_vm6, %v8301_v50  ;;  %v15286_v50 = vld [vmem:[%s18674_s10 + $0x78] sm:$0xff]  }
0x35d0   :  { %14439 = vmatpush3.bf16.msra.mxu0 %v15275_v39  ;;  %14446 = vmatprep.mubr.msk.bf16.mxu0 %vm2605_vm6, %v8304_v29  ;;  %v15296_v39 = vld [vmem:[%s18674_s10 + $0x88] sm:$0xff]  }
0x35d1   :  { %14440 = vmatprep.subr.bf16.mxu0 %v15276_v4 }
0x35d4   :  { %14441 = vmatpush3.bf16.msra.mxu0 %v15276_v4  ;;  %v15297_v4 = vld [vmem:[%s18674_s10 + $0x90] sm:$0xff]  }
0x35d5   :  { %14442 = vmatprep.subr.bf16.mxu0 %v15277_v41 }
0x35d8   :  { %14443 = vmatpush3.bf16.msra.mxu0 %v15277_v41  ;;  %v15298_v41 = vld [vmem:[%s18674_s10 + $0x98] sm:$0xff]  }
0x35d9   :  { %14444 = vmatprep.subr.bf16.mxu0 %v15278_v5 }
0x35dc   :  { %14445 = vmatpush3.bf16.msra.mxu0 %v15278_v5  ;;  %v15299_v5 = vld [vmem:[%s18674_s10 + $0xa0] sm:$0xff]  }
0x35dd   :  { %14498 = vmatprep.subr.bf16.mxu0 %v16476_v37 }
0x35df   :  { %14447 = vmatmul.mubr.msk.bf16.vlgmr.msra.gmra.mrb[224].mxu0 %vm2605_vm6, %v8305_v35 }
0x35e0   :  { %14499 = vmatpush3.bf16.msra.mxu0 %v8841_v19  ;;  %14502 = vmatprep.mubr.msk.bf16.mxu0 %vm16477_vm2, %v16476_v37  ;;  %v15300_v19 = vld [vmem:[%s18674_s10 + $0xa8] sm:$0xff]  }
0x35e1   :  { %14500 = vmatprep.subr.bf16.mxu0 %v16476_v37 }
0x35e4   :  { %14501 = vmatpush3.bf16.msra.mxu0 %v8842_v2  ;;  %v15301_v2 = vld [vmem:[%s18674_s10 + $0xb0] sm:$0xff]  }
0x35e5   :  { %14526 = vmatprep.subr.bf16.mxu0 %v16476_v37 }
0x35e7   :  { %14503 = vmatmul.mubr.msk.bf16.vlgmr.msra.gmra.mrb[228].mxu0 %vm770_vm0, %v15520_v33 }
0x35e8   :  { %14530 = vmatprep.mubr.msk.bf16.mxu0 %vm16477_vm2, %v16476_v37 }
0x36b2   :  { %v14448_v45 = vpop.f32.mrb[224].mxu0 }
0x36b3   :  { %v8558_v38 = vpop.f32.mrb[225].mxu0  ;;  %v18077_v40 = vadd.f32 %v14448_v45, %v8308_v59  ;;  %v15303_v45 = vld [vmem:[#allocation52] sm:$0xff]  }
0x36b4   :  { %v18071_v57 = vadd.f32 %v8558_v38, %v8306_v34  ;;  %v14449_v27 = vpop.f32.mrb[226].mxu0  ;;  %v15304_v38 = vld [vmem:[#allocation52 + $0x18] sm:$0xff]   ;;  %14527 = vmatpush3.bf16.msra.mxu0 %v15303_v45 }
0x36b5   :  { %v8561_v62 = vpop.f32.mrb[227].mxu0  ;;  %v18073_v3 = vadd.f32 %v14449_v27, %v8309_v47  ;;  %v8583_v36 = vmax.f32 %v18077_v40, 0.0  ;;  %14528 = vmatprep.subr.bf16.mxu0 %v16476_v37  ;;  %v15305_v47 = vld [vmem:[#allocation52 + $0x8] ss:$0 sps:$4 sm:$0xff]  }
0x36b6   :  { %v18075_v56 = vadd.f32 %v8561_v62, %v8307_v63  ;;  %v8581_v42 = vmax.f32 %v18071_v57, 0.0  ;;  %v15306_v63 = vld [vmem:[#allocation52 + $0x20] ss:$0 sps:$4 sm:$0xff]   ;;  %v9014_v27 = vsel %vm6047_vm7, %v15305_v47, 0  ;;  %v18217_v57 = vld [vmem:[%s18653_s11 + $0x8] sm:$0xff]  }
0x36b7   :  { %v8584_v43 = vmax.f32 %v18073_v3, 0.0  ;;  %v9418_v59 = vsel %vm6047_vm7, %v15306_v63, 0 }
0x36b8   :  { %v8582_v23 = vmax.f32 %v18075_v56, 0.0  ;;  %14529 = vmatpush3.bf16.msra.mxu0 %v9014_v27  ;;  %v18229_v56 = vld [vmem:[%s18653_s11 + $0x18] sm:$0xff]  }
0x36b9   :  { %v8590_v58 = vpack.c.bf16 %v8584_v43, %v8583_v36 }
0x36ba   :  { %v8589_v26 = vpack.c.bf16 %v8582_v23, %v8581_v42  ;;  %v8877_v28 = vpop.f32.mrb[228].mxu0 }
0x36bb   :  { %v14504_v30 = vpop.f32.mrb[229].mxu0  ;;  %v8883_v34 = vpack.c.bf16 %v8877_v28, %v8877_v28 }
0x36bc   :  { %14451 = vmatpush3.bf16.msra.mxu1 %v8589_v26  ;;  %v8880_v31 = vpop.f32.mrb[230].mxu0 }
0x36bd   :  { %14452 = vmatprep.subr.bf16.mxu1 %v16476_v37  ;;  %v14505_v32 = vpop.f32.mrb[231].mxu0 }
0x36c0   :  { %14453 = vmatpush3.bf16.msra.mxu1 %v8590_v58 }
0x36c1   :  { %14458 = vmatprep.subr.bf16.mxu1 %v16476_v37 }
0x36c3   :  { %14455 = vmatmul.mubr.msk.bf16.vlgmr.msra.gmra.mrb[0].mxu1 %vm770_vm0, %v15520_v33  ;;  %v15302_v33 = vld [vmem:[%s18674_s10 + $0xb8] sm:$0xff]  }
0x36c4   :  { %14459 = vmatpush3.bf16.msra.mxu1 %v15279_v60  ;;  %14474 = vmatprep.mubr.msk.bf16.mxu1 %vm16477_vm2, %v16476_v37 }
0x36c5   :  { %14460 = vmatprep.subr.bf16.mxu1 %v16476_v37 }
0x36c8   :  { %14461 = vmatpush3.bf16.msra.mxu1 %v15280_v61 }
0x36c9   :  { %14462 = vmatprep.subr.bf16.mxu1 %v16476_v37 }
0x36cc   :  { %14463 = vmatpush3.bf16.msra.mxu1 %v15281_v49 }
0x36cd   :  { %14464 = vmatprep.subr.bf16.mxu1 %v16476_v37 }
0x36d0   :  { %14465 = vmatpush3.bf16.msra.mxu1 %v15282_v52 }
0x36d1   :  { %14466 = vmatprep.subr.bf16.mxu1 %v16476_v37 }
0x36d4   :  { %14467 = vmatpush3.bf16.msra.mxu1 %v15283_v53 }
0x36d5   :  { %14468 = vmatprep.subr.bf16.mxu1 %v16476_v37 }
0x36d8   :  { %14469 = vmatpush3.bf16.msra.mxu1 %v15284_v0 }
0x36d9   :  { %14470 = vmatprep.subr.bf16.mxu1 %v16476_v37 }
0x36dc   :  { %14471 = vmatpush3.bf16.msra.mxu1 %v15285_v48 }
0x36dd   :  { %14472 = vmatprep.subr.bf16.mxu1 %v16476_v37 }
0x36e0   :  { %14473 = vmatpush3.bf16.msra.mxu1 %v15286_v50  ;;  %v18162_v50 = vld [vmem:[%s18655_s28] sm:$0xff]  }
0x36e1   :  { %14478 = vmatprep.subr.bf16.mxu1 %v16476_v37 }
0x36e3   :  { %14475 = vmatmul.mubr.bf16.vlgmr.msra.gmra.mrb[4].mxu1 %v17156_v20  ;;  %v15292_v20 = vld [vmem:[%s18674_s10 + $0x28] sm:$0xff]  }
0x36e4   :  { %14479 = vmatpush3.bf16.msra.mxu1 %v15287_v51  ;;  %14494 = vmatprep.mubr.msk.bf16.mxu1 %vm16477_vm2, %v16476_v37 }
0x36e5   :  { %14480 = vmatprep.subr.bf16.mxu1 %v16476_v37 }
0x36e8   :  { %14481 = vmatpush3.bf16.msra.mxu1 %v15288_v1 }
0x36e9   :  { %14482 = vmatprep.subr.bf16.mxu1 %v16476_v37 }
0x36ec   :  { %14483 = vmatpush3.bf16.msra.mxu1 %v15289_v6 }
0x36ed   :  { %14484 = vmatprep.subr.bf16.mxu1 %v16476_v37 }
0x36f0   :  { %14485 = vmatpush3.bf16.msra.mxu1 %v15290_v7 }
0x36f1   :  { %14486 = vmatprep.subr.bf16.mxu1 %v16476_v37 }
0x36f4   :  { %14487 = vmatpush3.bf16.msra.mxu1 %v15291_v13 }
0x36f5   :  { %14488 = vmatprep.subr.bf16.mxu1 %v16476_v37 }
0x36f8   :  { %14489 = vmatpush3.bf16.msra.mxu1 %v15292_v20 }
0x36f9   :  { %14490 = vmatprep.subr.bf16.mxu1 %v16476_v37 }
0x36fc   :  { %14491 = vmatpush3.bf16.msra.mxu1 %v15293_v18 }
0x36fd   :  { %14492 = vmatprep.subr.bf16.mxu1 %v16476_v37 }
0x3700   :  { %14493 = vmatpush3.bf16.msra.mxu1 %v15294_v21 }
0x3701   :  { %14506 = vmatprep.subr.bf16.mxu1 %v16476_v37 }
0x3796   :  { %v8625_v25 = vpop.f32.mrb[0].mxu1 }
0x3797   :  { %v8631_v35 = vpack.c.bf16 %v8625_v25, %v8625_v25  ;;  %v14456_v24 = vpop.f32.mrb[1].mxu1  ;;  %v18173_v25 = vld [vmem:[%s18655_s28 + $0x8] sm:$0xff]  }
0x3798   :  { %v8628_v29 = vpop.f32.mrb[2].mxu1  ;;  %v15310_v24 = vld [vmem:[%s18675_s4] sm:$0xff]  }
0x3799   :  { %14495 = vmatmul.mubr.bf16.vlgmr.msra.gmra.mrb[4].mxu1 %v8631_v35  ;;  %v14457_v17 = vpop.f32.mrb[3].mxu1  ;;  %v15309_v35 = vld [vmem:[%s18675_s4 + $0x40] sm:$0xff]   ;;  %v15311_v29 = vld [vmem:[%s18675_s4 + $0x48] sm:$0xff]  }
0x379a   :  { %14507 = vmatpush3.bf16.msra.mxu1 %v15295_v55  ;;  %14522 = vmatprep.mubr.msk.bf16.mxu1 %vm16477_vm2, %v16476_v37  ;;  %v18180_v55 = vld [vmem:[%s18653_s11] sm:$0xff]   ;;  %v15312_v17 = vld [vmem:[%s18675_s4 + $0x8] sm:$0xff]  }
0x379b   :  { %14508 = vmatprep.subr.bf16.mxu1 %v16476_v37 }
0x379e   :  { %14509 = vmatpush3.bf16.msra.mxu1 %v15296_v39  ;;  %v15313_v39 = vld [vmem:[%s18675_s4 + $0x50] sm:$0xff]  }
0x379f   :  { %14510 = vmatprep.subr.bf16.mxu1 %v16476_v37 }
0x37a2   :  { %14511 = vmatpush3.bf16.msra.mxu1 %v15297_v4  ;;  %v15314_v4 = vld [vmem:[%s18675_s4 + $0x10] sm:$0xff]  }
0x37a3   :  { %14512 = vmatprep.subr.bf16.mxu1 %v16476_v37 }
0x37a6   :  { %14513 = vmatpush3.bf16.msra.mxu1 %v15298_v41  ;;  %v15315_v41 = vld [vmem:[%s18675_s4 + $0x58] sm:$0xff]  }
0x37a7   :  { %14514 = vmatprep.subr.bf16.mxu1 %v16476_v37 }
0x37aa   :  { %14515 = vmatpush3.bf16.msra.mxu1 %v15299_v5  ;;  %v15316_v5 = vld [vmem:[%s18675_s4 + $0x18] sm:$0xff]  }
0x37ab   :  { %14516 = vmatprep.subr.bf16.mxu1 %v16476_v37 }
0x37ae   :  { %14517 = vmatpush3.bf16.msra.mxu1 %v15300_v19  ;;  %v15317_v19 = vld [vmem:[%s18675_s4 + $0x60] sm:$0xff]  }
0x37af   :  { %14518 = vmatprep.subr.bf16.mxu1 %v16476_v37 }
0x37b2   :  { %14519 = vmatpush3.bf16.msra.mxu1 %v15301_v2  ;;  %v15318_v2 = vld [vmem:[%s18675_s4 + $0x20] sm:$0xff]  }
0x37b3   :  { %14520 = vmatprep.subr.bf16.mxu1 %v16476_v37 }
0x37b6   :  { %14521 = vmatpush3.bf16.msra.mxu1 %v15302_v33  ;;  %v15319_v33 = vld [vmem:[%s18675_s4 + $0x68] sm:$0xff]  }
0x37b7   :  { %14586 = vmatprep.subr.bf16.mxu1 %v16476_v37 }
0x37b9   :  { %14523 = vmatmul.mubr.bf16.vlgmr.msra.gmra.mrb[4].mxu1 %v8883_v34 }
0x37ba   :  { %14590 = vmatprep.mubr.msk.bf16.mxu1 %vm16477_vm2, %v16476_v37  ;;  %14587 = vmatpush3.bf16.msra.mxu1 %v15304_v38 }
0x37bb   :  { %14588 = vmatprep.subr.bf16.mxu1 %v16476_v37 }
0x37be   :  { %14589 = vmatpush3.bf16.msra.mxu1 %v9418_v59 }
0x388c   :  { %v8983_v62 = vpop.f32.mrb[4].mxu1 }
0x388d   :  { %v8990_v26 = vsub.f32 0.0, %v8983_v62  ;;  %v14524_v58 = vpop.f32.mrb[5].mxu1 }
0x388e   :  { %v8986_v60 = vpop.f32.mrb[6].mxu1 }
0x388f   :  { %v8991_v61 = vmul.f32 1.442695, %v8990_v26  ;;  %v14525_v49 = vpop.f32.mrb[7].mxu1 }
0x3891   :  { %15477 = vpow2.f32 %v8991_v61 }
0x389b   :  { %v15478_v52 = vpop.eup %15477 }
0x389c   :  { %v8993_v53 = vadd.f32 1.0, %v15478_v52 }
0x389e   :  { %15479 = vrcp.f32 %v8993_v53  ;;  %v15322_v53 = vld [vmem:[%s18675_s4 + $0x30] sm:$0xff]  }
0x38a8   :  { %v15480_v0 = vpop.eup %15479 }
0x38a9   :  { %v18155_v48 = vpack.c.bf16 %v15480_v0, %v15480_v0  ;;  %v15323_v0 = vld [vmem:[%s18675_s4 + $0x78] sm:$0xff]  }
0x38ab   :  { %14531 = vmatmul.mubr.msk.bf16.vlgmr.msra.gmra.mrb[232].mxu0 %vm9009_vm9, %v18155_v48  ;;  %14591 = vmatmul.mubr.msk.bf16.vlgmr.msra.gmra.mrb[8].mxu1 %vm9009_vm9, %v18155_v48 }
0x38ac   :  { %14536 = vmatprep.mubr.msk.bf16.mxu0 %vm1697_vm3, %v18162_v50  ;;  %14596 = vmatprep.mubr.msk.bf16.mxu1 %vm1697_vm3, %v18162_v50 }
0x397e   :  { %v9050_v51 = vpop.f32.mrb[232].mxu0  ;;  %v9454_v1 = vpop.f32.mrb[8].mxu1 }
0x397f   :  { %v9056_v6 = vpack.c.bf16 %v9050_v51, %v9050_v51  ;;  %v9460_v7 = vpack.c.bf16 %v9454_v1, %v9454_v1  ;;  %v14532_v13 = vpop.f32.mrb[233].mxu0  ;;  %v14592_v20 = vpop.f32.mrb[9].mxu1  ;;  %v15324_v51 = vld [vmem:[%s18675_s4 + $0x38] sm:$0xff]  }
0x3980   :  { %v9053_v18 = vpop.f32.mrb[234].mxu0  ;;  %v9457_v21 = vpop.f32.mrb[10].mxu1 }
0x3981   :  { %v9058_v28 = vsel %vm1704_vm4, %v9056_v6, 0  ;;  %v9462_v30 = vsel %vm1704_vm4, %v9460_v7, 0  ;;  %v14533_v31 = vpop.f32.mrb[235].mxu0  ;;  %14821 = vmatprep.subr.msk.bf16.mxu0 %vm1704_vm4, %v9056_v6  ;;  %v14593_v32 = vpop.f32.mrb[11].mxu1  ;;  %14823 = vmatprep.subr.msk.bf16.mxu1 %vm1704_vm4, %v9460_v7 }
0x3982   :  { %14535 = vmatpush3.bf16.msra.mxu0 %v9058_v28  ;;  %14595 = vmatpush3.bf16.msra.mxu1 %v9462_v30 }
0x3983   :  { %13238 = vmatprep.subr.bf16.mxu1 %v15309_v35 }
0x3985   :  { %14537 = vmatmul.mubr.msk.bf16.vlgmr.msra.gmra.mrb[236].mxu0 %vm1697_vm3, %v18173_v25  ;;  %14597 = vmatmul.mubr.msk.bf16.vlgmr.msra.gmra.mrb[12].mxu1 %vm1697_vm3, %v18173_v25 }
0x3986   :  { %14544 = vmatprep.mubr.msk.bf16.mxu0 %vm770_vm0, %v18180_v55  ;;  %13239 = vmatpush3.bf16.msra.mxu1 %v15310_v24 }
0x3987   :  { %13240 = vmatprep.subr.bf16.mxu1 %v15311_v29 }
0x398a   :  { %13241 = vmatpush3.bf16.msra.mxu1 %v15312_v17 }
0x398b   :  { %13242 = vmatprep.subr.bf16.mxu1 %v15313_v39 }
0x398e   :  { %13243 = vmatpush3.bf16.msra.mxu1 %v15314_v4 }
0x398f   :  { %13244 = vmatprep.subr.bf16.mxu1 %v15315_v41 }
0x3992   :  { %13245 = vmatpush3.bf16.msra.mxu1 %v15316_v5 }
0x3993   :  { %13246 = vmatprep.subr.bf16.mxu1 %v15317_v19 }
0x3996   :  { %13247 = vmatpush3.bf16.msra.mxu1 %v15318_v2 }
0x3997   :  { %13248 = vmatprep.subr.bf16.mxu1 %v15319_v33 }
0x3a58   :  { %v14538_v34 = vpop.f32.mrb[236].mxu0  ;;  %v14598_v45 = vpop.f32.mrb[12].mxu1 }
0x3a59   :  { %v9094_v38 = vpop.f32.mrb[237].mxu0  ;;  %v9498_v47 = vpop.f32.mrb[13].mxu1  ;;  %v9111_v59 = vmul.f32 %v14538_v34, %v8583_v36  ;;  %v9515_v62 = vmul.f32 %v14598_v45, %v8587_v46  ;;  %v15321_v36 = vld [vmem:[%s18675_s4 + $0x70] sm:$0xff]   ;;  %v15333_v45 = vld [vmem:[%s18675_s4 + $0x140] sm:$0xff]  }
0x3a5a   :  { %v14539_v63 = vpop.f32.mrb[238].mxu0  ;;  %v14599_v27 = vpop.f32.mrb[14].mxu1  ;;  %v9109_v49 = vmul.f32 %v9094_v38, %v8581_v42  ;;  %v9513_v52 = vmul.f32 %v9498_v47, %v8585_v10  ;;  %v15308_v10 = vld [vmem:[#allocation52 + $0x14] ss:$0 sps:$4 sm:$0xff]   ;;  %v18234_v42 = vld [vmem:[%s18653_s11 + $0x20] sm:$0xff]   ;;  %v15337_v47 = vld [vmem:[%s18675_s4 + $0x148] sm:$0xff]  }
0x3a5b   :  { %v9112_v26 = vmul.f32 %v14539_v63, %v8584_v43  ;;  %v9516_v58 = vmul.f32 %v14599_v27, %v8588_v12  ;;  %v9097_v60 = vpop.f32.mrb[239].mxu0  ;;  %v9501_v61 = vpop.f32.mrb[15].mxu1  ;;  %v15320_v43 = vld [vmem:[%s18675_s4 + $0x28] sm:$0xff]   ;;  %v15335_v38 = vld [vmem:[%s18675_s4 + $0x100] sm:$0xff]   ;;  %v15341_v27 = vld [vmem:[%s18675_s4 + $0x150] sm:$0xff]  }
0x3a5c   :  { %v9110_v16 = vmul.f32 %v9097_v60, %v8582_v23  ;;  %v9514_v46 = vmul.f32 %v9501_v61, %v8586_v44  ;;  %v9216_v44 = vsel %vm6047_vm7, %v15308_v10, 0  ;;  %v18239_v23 = vld [vmem:[%s18653_s11 + $0x28] sm:$0xff]   ;;  %13249 = vmatpush3.bf16.msra.mxu1 %v15320_v43 }
0x3a5d   :  { %v9114_v3 = vpack.c.bf16 %v9112_v26, %v9111_v59  ;;  %v18211_v40 = vpack.c.bf16 %v9516_v58, %v9515_v62  ;;  %13250 = vmatprep.subr.bf16.mxu1 %v15321_v36  ;;  %v15339_v63 = vld [vmem:[%s18675_s4 + $0x108] sm:$0xff]   ;;  %v15343_v59 = vld [vmem:[%s18675_s4 + $0x110] sm:$0xff]  }
0x3a5e   :  { %v9113_v8 = vpack.c.bf16 %v9110_v16, %v9109_v49  ;;  %v18213_v12 = vpack.c.bf16 %v9514_v46, %v9513_v52 }
0x3a60   :  { %14540 = vmatprep.subr.bf16.mxu0 %v9113_v8  ;;  %13251 = vmatpush3.bf16.msra.mxu1 %v15322_v53 }
0x3a61   :  { %14541 = vmatpush3.bf16.msra.mxu0 %v9113_v8  ;;  %13252 = vmatprep.subr.bf16.mxu1 %v15323_v0 }
0x3a62   :  { %14542 = vmatprep.subr.bf16.mxu0 %v9114_v3 }
0x3a64   :  { %13253 = vmatpush3.bf16.msra.mxu1 %v15324_v51 }
0x3a65   :  { %14543 = vmatpush3.bf16.msra.mxu0 %v9114_v3  ;;  %13294 = vmatprep.subr.bf16.mxu1 %v15333_v45  ;;  %v15353_v45 = vld [vmem:[%s18675_s4 + $0x168] sm:$0xff]  }
0x3a66   :  { %14556 = vmatprep.subr.bf16.mxu0 %v16476_v37 }
0x3a68   :  { %14545 = vmatmul.mubr.msk.bf16.vlgmr.msra.gmra.mrb[240].mxu0 %vm770_vm0, %v18217_v57 }
0x3a69   :  { %14548 = vmatprep.mubr.msk.bf16.mxu0 %vm770_vm0, %v18222_v22  ;;  %14557 = vmatpush3.bf16.msra.mxu0 %v15307_v54 }
0x3a6a   :  { %14558 = vmatprep.subr.bf16.mxu0 %v16476_v37 }
0x3a6d   :  { %14559 = vmatpush3.bf16.msra.mxu0 %v9216_v44 }
0x3a70   :  { %14549 = vmatmul.mubr.msk.bf16.gmra.mrb[244].mxu0 %vm770_vm0, %v18229_v56 }
0x3a71   :  { %14552 = vmatprep.mubr.msk.bf16.mxu0 %vm770_vm0, %v18234_v42 }
0x3a78   :  { %14553 = vmatmul.mubr.msk.bf16.gmra.mrb[248].mxu0 %vm770_vm0, %v18239_v23 }
0x3a79   :  { %14560 = vmatprep.mubr.msk.bf16.mxu0 %vm16477_vm2, %v16476_v37 }
0x3a80   :  { %14561 = vmatmul.mubr.msk.bf16.vlgmr.msra.gmra.mrb[252].mxu0 %vm9009_vm9, %v18155_v48 }
0x3a81   :  { %14566 = vmatprep.mubr.msk.bf16.mxu0 %vm1697_vm3, %v18162_v50 }
0x3b3b   :  { %v14546_v1 = vpop.f32.mrb[240].mxu0 }
0x3b3c   :  { %v9149_v6 = vpop.f32.mrb[241].mxu0 }
0x3b3d   :  { %v14547_v7 = vpop.f32.mrb[242].mxu0 }
0x3b3e   :  { %v9197_v13 = vpack.c.bf16 %v14547_v7, %v14546_v1  ;;  %v9152_v20 = vpop.f32.mrb[243].mxu0 }
0x3b3f   :  { %v9196_v18 = vpack.c.bf16 %v9152_v20, %v9149_v6  ;;  %v15332_v20 = vld [vmem:[%s18675_s4 + $0x98] sm:$0xff]  }
0x3b43   :  { %v14550_v48 = vpop.f32.mrb[244].mxu0 }
0x3b44   :  { %v9165_v21 = vpop.f32.mrb[245].mxu0 }
0x3b45   :  { %v14551_v28 = vpop.f32.mrb[246].mxu0 }
0x3b46   :  { %v9199_v30 = vpack.c.bf16 %v14551_v28, %v14550_v48  ;;  %v9168_v31 = vpop.f32.mrb[247].mxu0  ;;  %v15336_v48 = vld [vmem:[%s18675_s4 + $0xa0] sm:$0xff]   ;;  %v15340_v28 = vld [vmem:[%s18675_s4 + $0xa8] sm:$0xff]  }
0x3b47   :  { %v9198_v32 = vpack.c.bf16 %v9168_v31, %v9165_v21  ;;  %v15338_v21 = vld [vmem:[%s18675_s4 + $0xe8] sm:$0xff]   ;;  %v15344_v31 = vld [vmem:[%s18675_s4 + $0xb0] sm:$0xff]  }
0x3b49   :  { %10221 = vmatprep.mubr.bf16.mxu1 %v9198_v32  ;;  %v15345_v32 = vld [vmem:[%s18675_s4 + $0x158] sm:$0xff]  }
0x3b4a   :  { %10222 = vmatmul.mubr.bf16.vlgmr.msra.gmra.mrb[16].mxu1 %v9196_v18  ;;  %v15334_v18 = vld [vmem:[%s18675_s4 + $0xe0] sm:$0xff]  }
0x3b4b   :  { %v18254_v35 = vpop.f32.mrb[248].mxu0  ;;  %10229 = vmatprep.mubr.bf16.mxu1 %v9199_v30  ;;  %13295 = vmatpush3.bf16.msra.mxu1 %v15335_v38  ;;  %v15342_v30 = vld [vmem:[%s18675_s4 + $0xf0] sm:$0xff]   ;;  %v15354_v38 = vld [vmem:[%s18675_s4 + $0x128] sm:$0xff]  }
0x3b4c   :  { %v18256_v24 = vpop.f32.mrb[249].mxu0  ;;  %13296 = vmatprep.subr.bf16.mxu1 %v15337_v47  ;;  %v15357_v47 = vld [vmem:[%s18675_s4 + $0x170] sm:$0xff]  }
0x3b4d   :  { %v18258_v29 = vpop.f32.mrb[250].mxu0 }
0x3b4e   :  { %v9201_v17 = vpack.c.bf16 %v18258_v29, %v18254_v35  ;;  %v18262_v39 = vpop.f32.mrb[251].mxu0  ;;  %v15369_v35 = vld [vmem:[%s18675_s4 + $0x1e8] sm:$0xff]  }
0x3b4f   :  { %v9200_v4 = vpack.c.bf16 %v18262_v39, %v18256_v24  ;;  %13297 = vmatpush3.bf16.msra.mxu1 %v15339_v63  ;;  %v15358_v63 = vld [vmem:[%s18675_s4 + $0x130] sm:$0xff]   ;;  %v15363_v24 = vld [vmem:[%s18675_s4 + $0x1d8] sm:$0xff]  }
0x3b50   :  { %13298 = vmatprep.subr.bf16.mxu1 %v15341_v27  ;;  %v15361_v27 = vld [vmem:[%s18675_s4 + $0x178] sm:$0xff]  }
0x3b52   :  { %10230 = vmatmul.mubr.bf16.gmra.mrb[20].mxu1 %v9197_v13  ;;  %v15331_v13 = vld [vmem:[%s18675_s4 + $0xd8] sm:$0xff]  }
0x3b53   :  { %v9252_v41 = vpop.f32.mrb[252].mxu0  ;;  %13299 = vmatpush3.bf16.msra.mxu1 %v15343_v59  ;;  %v15362_v59 = vld [vmem:[%s18675_s4 + $0x138] sm:$0xff]  }
0x3b54   :  { %v9258_v5 = vpack.c.bf16 %v9252_v41, %v9252_v41  ;;  %v14562_v19 = vpop.f32.mrb[253].mxu0  ;;  %v15346_v41 = vld [vmem:[%s18675_s4 + $0xf8] sm:$0xff]   ;;  %13300 = vmatprep.subr.bf16.mxu1 %v15345_v32 }
0x3b55   :  { %v9255_v2 = vpop.f32.mrb[254].mxu0  ;;  %v15348_v19 = vld [vmem:[%s18675_s4 + $0xb8] sm:$0xff]  }
0x3b56   :  { %v9260_v33 = vsel %vm1704_vm4, %v9258_v5, 0  ;;  %v14563_v34 = vpop.f32.mrb[255].mxu0  ;;  %14822 = vmatprep.subr.msk.bf16.mxu0 %vm1704_vm4, %v9258_v5  ;;  %v15347_v5 = vld [vmem:[%s18675_s4 + $0x118] sm:$0xff]   ;;  %v15349_v2 = vld [vmem:[%s18675_s4 + $0x160] sm:$0xff]  }
0x3b57   :  { %14565 = vmatpush3.bf16.msra.mxu0 %v9260_v33  ;;  %13301 = vmatpush3.bf16.msra.mxu1 %v15347_v5  ;;  %v15350_v33 = vld [vmem:[%s18675_s4 + $0x120] sm:$0xff]   ;;  %v15374_v5 = vld [vmem:[%s18675_s4 + $0x218] sm:$0xff]  }
0x3b58   :  { %v15351_v34 = vld [vmem:[%s18675_s4 + $0x1c0] sm:$0xff]   ;;  %13302 = vmatprep.subr.bf16.mxu1 %v15349_v2 }
0x3b5a   :  { %14567 = vmatmul.mubr.msk.bf16.vlgmr.msra.gmra.mrb[0].mxu0 %vm1697_vm3, %v18173_v25 }
0x3b5b   :  { %14574 = vmatprep.mubr.msk.bf16.mxu0 %vm770_vm0, %v18180_v55  ;;  %13303 = vmatpush3.bf16.msra.mxu1 %v15350_v33  ;;  %v15376_v33 = vld [vmem:[%s18675_s4 + $0x1b8] sm:$0xff]  }
0x3b5c   :  { %13304 = vmatprep.subr.bf16.mxu1 %v15353_v45  ;;  %v15377_v45 = vld [vmem:[%s18675_s4 + $0x220] sm:$0xff]  }
0x3b5f   :  { %13305 = vmatpush3.bf16.msra.mxu1 %v15354_v38 }
0x3b60   :  { %13306 = vmatprep.subr.bf16.mxu1 %v15357_v47 }
0x3b63   :  { %13307 = vmatpush3.bf16.msra.mxu1 %v15358_v63 }
0x3b64   :  { %13308 = vmatprep.subr.bf16.mxu1 %v15361_v27 }
0x3b67   :  { %13309 = vmatpush3.bf16.msra.mxu1 %v15362_v59  ;;  %v15378_v59 = vld [vmem:[%s18675_s4 + $0x228] sm:$0xff]  }
0x3c1d   :  { %v13254_v62 = vpop.f32.mrb[16].mxu1 }
0x3c1e   :  { %v13255_v26 = vpop.f32.mrb[17].mxu1 }
0x3c1f   :  { %v18278_v58 = vadd.f32 %v13255_v26, %v13254_v62  ;;  %v13257_v60 = vpop.f32.mrb[18].mxu1  ;;  %v15365_v62 = vld [vmem:[%s18675_s4 + $0x200] sm:$0xff]  }
0x3c20   :  { %v13258_v61 = vpop.f32.mrb[19].mxu1  ;;  %14616 = vmatprep.subr.bf16.mxu1 %v15365_v62 }
0x3c21   :  { %v18280_v49 = vadd.f32 %v13258_v61, %v13257_v60 }
0x3c25   :  { %v13260_v52 = vpop.f32.mrb[20].mxu1 }
0x3c26   :  { %v13261_v16 = vpop.f32.mrb[21].mxu1 }
0x3c27   :  { %v18282_v46 = vadd.f32 %v13261_v16, %v13260_v52  ;;  %v13263_v3 = vpop.f32.mrb[22].mxu1 }
0x3c28   :  { %v13264_v8 = vpop.f32.mrb[23].mxu1 }
0x3c29   :  { %v18284_v54 = vadd.f32 %v13264_v8, %v13263_v3  ;;  %v15352_v8 = vld [vmem:[%s18675_s4 + $0x180] sm:$0xff]  }
0x3c2d   :  { %v14568_v10 = vpop.f32.mrb[0].mxu0 }
0x3c2e   :  { %v9296_v44 = vpop.f32.mrb[1].mxu0  ;;  %v9313_v36 = vmul.f32 %v14568_v10, %v17145_v14  ;;  %v15327_v14 = vld [vmem:[%s18675_s4 + $0xc8] sm:$0xff]  }
0x3c2f   :  { %v14569_v43 = vpop.f32.mrb[2].mxu0  ;;  %v9311_v51 = vmul.f32 %v9296_v44, %v17139_v9  ;;  %v15325_v9 = vld [vmem:[%s18675_s4 + $0xc0] sm:$0xff]   ;;  %v15355_v10 = vld [vmem:[%s18675_s4 + $0x1c8] sm:$0xff]  }
0x3c30   :  { %v9314_v53 = vmul.f32 %v14569_v43, %v17147_v15  ;;  %v9299_v0 = vpop.f32.mrb[3].mxu0  ;;  %v15328_v15 = vld [vmem:[%s18675_s4 + $0x88] sm:$0xff]  }
0x3c31   :  { %v9312_v1 = vmul.f32 %v9299_v0, %v17141_v11  ;;  %v15326_v11 = vld [vmem:[%s18675_s4 + $0x80] sm:$0xff]   ;;  %v15356_v43 = vld [vmem:[%s18675_s4 + $0x188] sm:$0xff]  }
0x3c32   :  { %v9316_v6 = vpack.c.bf16 %v9314_v53, %v9313_v36  ;;  %v15359_v53 = vld [vmem:[%s18675_s4 + $0x1d0] sm:$0xff]  }
0x3c33   :  { %v9315_v7 = vpack.c.bf16 %v9312_v1, %v9311_v51 }
0x3c35   :  { %14570 = vmatprep.subr.bf16.mxu0 %v9315_v7 }
0x3c36   :  { %14571 = vmatpush3.bf16.msra.mxu0 %v9315_v7  ;;  %v15360_v7 = vld [vmem:[%s18675_s4 + $0x190] sm:$0xff]  }
0x3c37   :  { %14572 = vmatprep.subr.bf16.mxu0 %v9316_v6 }
0x3c3a   :  { %14573 = vmatpush3.bf16.msra.mxu0 %v9316_v6 }
0x3c3b   :  { %14600 = vmatprep.subr.bf16.mxu0 %v18213_v12 }
0x3c3d   :  { %14575 = vmatmul.mubr.msk.bf16.vlgmr.msra.gmra.mrb[4].mxu0 %vm770_vm0, %v18217_v57 }
0x3c3e   :  { %14601 = vmatpush3.bf16.msra.mxu0 %v18213_v12  ;;  %14578 = vmatprep.mubr.msk.bf16.mxu0 %vm770_vm0, %v18222_v22  ;;  %v15330_v12 = vld [vmem:[%s18675_s4 + $0x90] sm:$0xff]  }
0x3c3f   :  { %14602 = vmatprep.subr.bf16.mxu0 %v18211_v40 }
0x3c42   :  { %14603 = vmatpush3.bf16.msra.mxu0 %v18211_v40  ;;  %v15329_v40 = vld [vmem:[%s18675_s4 + $0xd0] sm:$0xff]  }
0x3c43   :  { %13266 = vmatprep.subr.bf16.mxu0 %v15325_v9 }
0x3c45   :  { %14579 = vmatmul.mubr.msk.bf16.gmra.mrb[8].mxu0 %vm770_vm0, %v18229_v56 }
0x3c46   :  { %14582 = vmatprep.mubr.msk.bf16.mxu0 %vm770_vm0, %v18234_v42 }
0x3c4d   :  { %14583 = vmatmul.mubr.msk.bf16.gmra.mrb[12].mxu0 %vm770_vm0, %v18239_v23 }
0x3c4e   :  { %14604 = vmatprep.mubr.msk.bf16.mxu0 %vm770_vm0, %v18180_v55 }
0x3c55   :  { %14605 = vmatmul.mubr.msk.bf16.vlgmr.msra.gmra.mrb[16].mxu0 %vm770_vm0, %v18217_v57 }
0x3c56   :  { %14608 = vmatprep.mubr.msk.bf16.mxu0 %vm770_vm0, %v18222_v22  ;;  %13267 = vmatpush3.bf16.msra.mxu0 %v15326_v11  ;;  %v15366_v11 = vld [vmem:[%s18675_s4 + $0x1e0] sm:$0xff]  }
0x3c57   :  { %13268 = vmatprep.subr.bf16.mxu0 %v15327_v14 }
0x3c5a   :  { %13269 = vmatpush3.bf16.msra.mxu0 %v15328_v15 }
0x3c5b   :  { %13270 = vmatprep.subr.bf16.mxu0 %v15329_v40 }
0x3c5d   :  { %14609 = vmatmul.mubr.msk.bf16.gmra.mrb[20].mxu0 %vm770_vm0, %v18229_v56 }
0x3c5e   :  { %14612 = vmatprep.mubr.msk.bf16.mxu0 %vm770_vm0, %v18234_v42  ;;  %13271 = vmatpush3.bf16.msra.mxu0 %v15330_v12 }
0x3c5f   :  { %13272 = vmatprep.subr.bf16.mxu0 %v15331_v13  ;;  %v15367_v13 = vld [vmem:[%s18675_s4 + $0x1a0] sm:$0xff]  }
0x3c62   :  { %13273 = vmatpush3.bf16.msra.mxu0 %v15332_v20  ;;  %v15368_v20 = vld [vmem:[%s18675_s4 + $0x208] sm:$0xff]  }
0x3c63   :  { %13274 = vmatprep.subr.bf16.mxu0 %v15334_v18 }
0x3c65   :  { %14613 = vmatmul.mubr.msk.bf16.gmra.mrb[24].mxu0 %vm770_vm0, %v18239_v23 }
0x3c66   :  { %13275 = vmatpush3.bf16.msra.mxu0 %v15336_v48  ;;  %v15371_v48 = vld [vmem:[%s18675_s4 + $0x210] sm:$0xff]  }
0x3c67   :  { %13276 = vmatprep.subr.bf16.mxu0 %v15338_v21  ;;  %v15372_v21 = vld [vmem:[%s18675_s4 + $0x1f0] sm:$0xff]  }
0x3c6a   :  { %13277 = vmatpush3.bf16.msra.mxu0 %v15340_v28 }
0x3c6b   :  { %13278 = vmatprep.subr.bf16.mxu0 %v15342_v30 }
0x3c6e   :  { %13279 = vmatpush3.bf16.msra.mxu0 %v15344_v31 }
0x3c6f   :  { %13280 = vmatprep.subr.bf16.mxu0 %v15346_v41  ;;  %v15373_v41 = vld [vmem:[%s18675_s4 + $0x1b0] sm:$0xff]  }
0x3c72   :  { %13281 = vmatpush3.bf16.msra.mxu0 %v15348_v19  ;;  %v15375_v19 = vld [vmem:[%s18675_s4 + $0x1f8] sm:$0xff]  }
0x3c73   :  { %13322 = vmatprep.subr.bf16.mxu0 %v15351_v34 }
0x3d10   :  { %v14576_v26 = vpop.f32.mrb[4].mxu0 }
0x3d11   :  { %v9351_v60 = vpop.f32.mrb[5].mxu0 }
0x3d12   :  { %v14577_v61 = vpop.f32.mrb[6].mxu0 }
0x3d13   :  { %v9399_v52 = vpack.c.bf16 %v14577_v61, %v14576_v26  ;;  %v9354_v16 = vpop.f32.mrb[7].mxu0  ;;  %v15379_v26 = vld [vmem:[%s18675_s4 + $0x230] sm:$0xff]  }
0x3d14   :  { %v9398_v3 = vpack.c.bf16 %v9354_v16, %v9351_v60 }
0x3d16   :  { %10270 = vmatprep.mubr.bf16.mxu0 %v9398_v3 }
0x3d17   :  { %10271 = vmatmul.mubr.bf16.vlgmr.msra.gmra.mrb[28].mxu0 %v9200_v4  ;;  %v15364_v4 = vld [vmem:[%s18675_s4 + $0x198] sm:$0xff]  }
0x3d18   :  { %13323 = vmatpush3.bf16.msra.mxu0 %v15352_v8  ;;  %v14580_v44 = vpop.f32.mrb[8].mxu0  ;;  %10278 = vmatprep.mubr.bf16.mxu0 %v9399_v52  ;;  %v15380_v8 = vld [vmem:[%s18675_s4 + $0x238] sm:$0xff]  }
0x3d19   :  { %13324 = vmatprep.subr.bf16.mxu0 %v15355_v10  ;;  %v9367_v36 = vpop.f32.mrb[9].mxu0  ;;  %v12406_v10 = vld [vmem:[%s16791_s5] ss:$0 sm:$0xff]  ;;  %s18676_s5 = sld [smem:[#allocation118_spill]] }
0x3d1a   :  { %v14581_v0 = vpop.f32.mrb[10].mxu0 }
0x3d1b   :  { %v9401_v51 = vpack.c.bf16 %v14581_v0, %v14580_v44  ;;  %v9370_v1 = vpop.f32.mrb[11].mxu0 }
0x3d1c   :  { %13325 = vmatpush3.bf16.msra.mxu0 %v15356_v43  ;;  %v9400_v6 = vpack.c.bf16 %v9370_v1, %v9367_v36  ;;  %v10224_v36 = vadd.f32 %v18278_v58, %v12406_v10  ;;  %v10227_v1 = vadd.f32 %v18280_v49, %v12406_v10 }
0x3d1d   :  { %13326 = vmatprep.subr.bf16.mxu0 %v15359_v53 }
0x3d1f   :  { %10279 = vmatmul.mubr.bf16.gmra.mrb[32].mxu0 %v9201_v17  ;;  %v15370_v17 = vld [vmem:[%s18675_s4 + $0x1a8] sm:$0xff]  }
0x3d20   :  { %v14584_v39 = vpop.f32.mrb[12].mxu0  ;;  %13327 = vmatpush3.bf16.msra.mxu0 %v15360_v7 }
0x3d21   :  { %v9383_v9 = vpop.f32.mrb[13].mxu0  ;;  %13328 = vmatprep.subr.bf16.mxu0 %v15363_v24 }
0x3d22   :  { %v14585_v14 = vpop.f32.mrb[14].mxu0 }
0x3d23   :  { %v9403_v15 = vpack.c.bf16 %v14585_v14, %v14584_v39  ;;  %v9386_v40 = vpop.f32.mrb[15].mxu0 }
0x3d24   :  { %v9402_v12 = vpack.c.bf16 %v9386_v40, %v9383_v9  ;;  %13329 = vmatpush3.bf16.msra.mxu0 %v15364_v4  ;;  %v10232_v9 = vadd.f32 %v18282_v46, %v12406_v10 }
0x3d25   :  { %13330 = vmatprep.subr.bf16.mxu0 %v15366_v11 }
0x3d26   :  { %10319 = vmatprep.mubr.bf16.mxu1 %v9402_v12 }
0x3d27   :  { %10320 = vmatmul.mubr.bf16.vlgmr.msra.gmra.mrb[24].mxu1 %v9400_v6 }
0x3d28   :  { %14617 = vmatpush3.bf16.msra.mxu1 %v15365_v62  ;;  %13331 = vmatpush3.bf16.msra.mxu0 %v15367_v13  ;;  %v14606_v29 = vpop.f32.mrb[16].mxu0 }
0x3d29   :  { %14618 = vmatprep.subr.bf16.mxu1 %v15368_v20  ;;  %13332 = vmatprep.subr.bf16.mxu0 %v15369_v35  ;;  %v9553_v18 = vpop.f32.mrb[17].mxu0 }
0x3d2a   :  { %v14607_v28 = vpop.f32.mrb[18].mxu0  ;;  %10327 = vmatprep.mubr.bf16.mxu1 %v9403_v15  ;;  %v10235_v15 = vadd.f32 %v18284_v54, %v12406_v10 }
0x3d2b   :  { %v9601_v30 = vpack.c.bf16 %v14607_v28, %v14606_v29  ;;  %v9556_v31 = vpop.f32.mrb[19].mxu0 }
0x3d2c   :  { %14619 = vmatpush3.bf16.msra.mxu1 %v15368_v20  ;;  %13333 = vmatpush3.bf16.msra.mxu0 %v15370_v17  ;;  %v9600_v32 = vpack.c.bf16 %v9556_v31, %v9553_v18 }
0x3d2d   :  { %14620 = vmatprep.subr.bf16.mxu1 %v15371_v48  ;;  %13334 = vmatprep.subr.bf16.mxu0 %v15372_v21 }
0x3d2f   :  { %10328 = vmatmul.mubr.bf16.gmra.mrb[28].mxu1 %v9401_v51 }
0x3d30   :  { %14621 = vmatpush3.bf16.msra.mxu1 %v15371_v48  ;;  %v14610_v2 = vpop.f32.mrb[20].mxu0  ;;  %13335 = vmatpush3.bf16.msra.mxu0 %v15373_v41 }
0x3d31   :  { %v9569_v34 = vpop.f32.mrb[21].mxu0  ;;  %14622 = vmatprep.subr.bf16.mxu1 %v15374_v5  ;;  %13336 = vmatprep.subr.bf16.mxu0 %v15375_v19 }
0x3d32   :  { %v14611_v38 = vpop.f32.mrb[22].mxu0 }
0x3d33   :  { %v9603_v47 = vpack.c.bf16 %v14611_v38, %v14610_v2  ;;  %v9572_v63 = vpop.f32.mrb[23].mxu0 }
0x3d34   :  { %v9602_v27 = vpack.c.bf16 %v9572_v63, %v9569_v34  ;;  %14623 = vmatpush3.bf16.msra.mxu1 %v15374_v5  ;;  %13337 = vmatpush3.bf16.msra.mxu0 %v15376_v33 }
0x3d35   :  { %14624 = vmatprep.subr.bf16.mxu1 %v15377_v45  ;;  %14636 = vmatprep.subr.bf16.mxu0 %v16476_v37 }
0x3d36   :  { %10368 = vmatprep.mubr.bf16.mxu0 %v9602_v27 }
0x3d37   :  { %10369 = vmatmul.mubr.bf16.vlgmr.msra.gmra.mrb[36].mxu0 %v9600_v32 }
0x3d38   :  { %14625 = vmatpush3.bf16.msra.mxu1 %v15377_v45  ;;  %10376 = vmatprep.mubr.bf16.mxu0 %v9603_v47  ;;  %v14614_v62 = vpop.f32.mrb[24].mxu0 }
0x3d39   :  { %14626 = vmatprep.subr.bf16.mxu1 %v15378_v59  ;;  %v9585_v60 = vpop.f32.mrb[25].mxu0 }
0x3d3a   :  { %v14615_v61 = vpop.f32.mrb[26].mxu0 }
0x3d3b   :  { %v9605_v52 = vpack.c.bf16 %v14615_v61, %v14614_v62  ;;  %v9588_v16 = vpop.f32.mrb[27].mxu0 }
0x3d3c   :  { %14627 = vmatpush3.bf16.msra.mxu1 %v15378_v59  ;;  %v9604_v3 = vpack.c.bf16 %v9588_v16, %v9585_v60 }
0x3d3d   :  { %14628 = vmatprep.subr.bf16.mxu1 %v15379_v26 }
0x3d3e   :  { %14632 = vmatprep.mubr.bf16.mxu1 %v9604_v3 }
0x3d3f   :  { %10377 = vmatmul.mubr.bf16.gmra.mrb[40].mxu0 %v9601_v30 }
0x3d40   :  { %14629 = vmatpush3.bf16.msra.mxu1 %v15379_v26  ;;  %14640 = vmatprep.mubr.msk.bf16.mxu0 %vm16477_vm2, %v16476_v37 }
0x3d41   :  { %14630 = vmatprep.subr.bf16.mxu1 %v15380_v8 }
0x3d44   :  { %14631 = vmatpush3.bf16.msra.mxu1 %v15380_v8 }
0x3d47   :  { %14633 = vmatmul.mubr.bf16.vlgmr.msra.gmra.mrb[32].mxu1 %v9605_v52 }
0x3d48   :  { %14666 = vmatprep.mubr.msk.bf16.mxu1 %vm1697_vm3, %v18162_v50 }
0x3dea   :  { %v13282_v44 = vpop.f32.mrb[28].mxu0 }
0x3deb   :  { %v13283_v43 = vpop.f32.mrb[29].mxu0 }
0x3dec   :  { %v13284_v53 = vadd.f32 %v13283_v43, %v13282_v44  ;;  %v13285_v0 = vpop.f32.mrb[30].mxu0 }
0x3ded   :  { %v13286_v51 = vpop.f32.mrb[31].mxu0 }
0x3dee   :  { %v10273_v6 = vadd.f32 %v13284_v53, %v10224_v36  ;;  %v13287_v7 = vadd.f32 %v13286_v51, %v13285_v0 }
0x3df0   :  { %v10276_v24 = vadd.f32 %v13287_v7, %v10227_v1 }
0x3df2   :  { %v13288_v39 = vpop.f32.mrb[32].mxu0 }
0x3df3   :  { %v13289_v4 = vpop.f32.mrb[33].mxu0 }
0x3df4   :  { %v13290_v11 = vadd.f32 %v13289_v4, %v13288_v39  ;;  %v13291_v14 = vpop.f32.mrb[34].mxu0  ;;  %v15381_v39 = vld [vmem:[#allocation54] sm:$0xff]   ;;  %v18404_v4 = vld [vmem:[#allocation27] sm:$0x1] }
0x3df5   :  { %v13292_v50 = vpop.f32.mrb[35].mxu0 }
0x3df6   :  { %v10281_v40 = vadd.f32 %v13290_v11, %v10232_v9  ;;  %v13293_v12 = vadd.f32 %v13292_v50, %v13291_v14  ;;  %v15382_v9 = vld [vmem:[#allocation54 + $0x8] sm:$0xff]   ;;  %v15383_v11 = vld [vmem:[#allocation54 + $0x10] sm:$0xff]   ;;  %v15384_v14 = vld [vmem:[#allocation54 + $0x18] sm:$0xff]  }
0x3df7   :  { %v15385_v50 = vld [vmem:[#allocation54 + $0x20] sm:$0xff]  }
0x3df8   :  { %v10284_v58 = vadd.f32 %v13293_v12, %v10235_v15  ;;  %v15386_v15 = vld [vmem:[#allocation54 + $0x28] sm:$0xff]   ;;  %v15388_v12 = vld [vmem:[#allocation54 + $0x38] sm:$0xff]  }
0x3dfa   :  { %v13310_v13 = vpop.f32.mrb[24].mxu1 }
0x3dfb   :  { %v13311_v20 = vpop.f32.mrb[25].mxu1 }
0x3dfc   :  { %v13312_v35 = vadd.f32 %v13311_v20, %v13310_v13  ;;  %v13313_v29 = vpop.f32.mrb[26].mxu1 }
0x3dfd   :  { %v13314_v49 = vpop.f32.mrb[27].mxu1 }
0x3dfe   :  { %v10322_v17 = vadd.f32 %v13312_v35, %v10273_v6  ;;  %v13315_v18 = vadd.f32 %v13314_v49, %v13313_v29 }
0x3e00   :  { %v10325_v48 = vadd.f32 %v13315_v18, %v10276_v24 }
0x3e02   :  { %v13316_v21 = vpop.f32.mrb[28].mxu1 }
0x3e03   :  { %v13317_v28 = vpop.f32.mrb[29].mxu1 }
0x3e04   :  { %v13318_v30 = vadd.f32 %v13317_v28, %v13316_v21  ;;  %v13319_v46 = vpop.f32.mrb[30].mxu1 }
0x3e05   :  { %v13320_v31 = vpop.f32.mrb[31].mxu1 }
0x3e06   :  { %v10330_v32 = vadd.f32 %v13318_v30, %v10281_v40  ;;  %v13321_v41 = vadd.f32 %v13320_v31, %v13319_v46  ;;  %v15387_v40 = vld [vmem:[#allocation54 + $0x30] sm:$0xff]  }
0x3e08   :  { %v10333_v5 = vadd.f32 %v13321_v41, %v10284_v58 }
0x3e0a   :  { %v13338_v54 = vpop.f32.mrb[36].mxu0 }
0x3e0b   :  { %v13339_v19 = vpop.f32.mrb[37].mxu0 }
0x3e0c   :  { %v13340_v2 = vadd.f32 %v13339_v19, %v13338_v54  ;;  %v13341_v33 = vpop.f32.mrb[38].mxu0  ;;  %v15397_v54 = vld [vmem:[%s18676_s5 + $0x88] sm:$0xff]   ;;  %v15400_v19 = vld [vmem:[%s18676_s5 + $0x90] sm:$0xff]  }
0x3e0d   :  { %v13342_v34 = vpop.f32.mrb[39].mxu0 }
0x3e0e   :  { %v13343_v45 = vadd.f32 %v13342_v34, %v13341_v33  ;;  %v10371_v38 = vadd.f32 %v13340_v2, %v10322_v17  ;;  %v15403_v2 = vld [vmem:[%s18676_s5 + $0x98] sm:$0xff]  }
0x3e10   :  { %v10374_v47 = vadd.f32 %v13343_v45, %v10325_v48 }
0x3e12   :  { %v13344_v63 = vpop.f32.mrb[40].mxu0 }
0x3e13   :  { %v13345_v27 = vpop.f32.mrb[41].mxu0 }
0x3e14   :  { %v13346_v59 = vadd.f32 %v13345_v27, %v13344_v63  ;;  %v13347_v62 = vpop.f32.mrb[42].mxu0 }
0x3e15   :  { %v13348_v26 = vpop.f32.mrb[43].mxu0 }
0x3e16   :  { %v13349_v60 = vadd.f32 %v13348_v26, %v13347_v62  ;;  %v10379_v61 = vadd.f32 %v13346_v59, %v10330_v32  ;;  %v15389_v62 = vld [vmem:[%s18676_s5 + $0x40] sm:$0xff]  }
0x3e17   :  { %v15390_v26 = vld [vmem:[%s18676_s5] sm:$0xff]  }
0x3e18   :  { %v10382_v52 = vadd.f32 %v13349_v60, %v10333_v5  ;;  %v15394_v5 = vld [vmem:[%s18676_s5 + $0x80] sm:$0xff]   ;;  %v15391_v60 = vld [vmem:[%s18676_s5 + $0x48] sm:$0xff]  }
0x3e1a   :  { %v14634_v16 = vpop.f32.mrb[32].mxu1 }
0x3e1b   :  { %v18382_v3 = vadd.f32 %v14634_v16, %v10379_v61  ;;  %v10419_v8 = vpop.f32.mrb[33].mxu1  ;;  %v15392_v61 = vld [vmem:[%s18676_s5 + $0x8] sm:$0xff]   ;;  %v15395_v16 = vld [vmem:[%s18676_s5 + $0x10] sm:$0xff]  }
0x3e1c   :  { %v18384_v10 = vadd.f32 %v10419_v8, %v10371_v38  ;;  %v14635_v44 = vpop.f32.mrb[34].mxu1  ;;  %v15401_v8 = vld [vmem:[%s18676_s5 + $0x20] sm:$0xff]  }
0x3e1d   :  { %v18386_v43 = vadd.f32 %v14635_v44, %v10382_v52  ;;  %v10422_v36 = vpop.f32.mrb[35].mxu1  ;;  %v10436_v7 = vmax.f32 %v18382_v3, 0.0  ;;  %v15393_v52 = vld [vmem:[%s18676_s5 + $0x50] sm:$0xff]   ;;  %v15396_v3 = vld [vmem:[%s18676_s5 + $0x58] sm:$0xff]   ;;  %v15406_v44 = vld [vmem:[%s18676_s5 + $0xa0] sm:$0xff]  }
0x3e1e   :  { %v18388_v53 = vadd.f32 %v10422_v36, %v10374_v47  ;;  %v10434_v0 = vmax.f32 %v18384_v10, 0.0  ;;  %v15402_v10 = vld [vmem:[%s18676_s5 + $0x68] sm:$0xff]   ;;  %v15408_v36 = vld [vmem:[%s18676_s5 + $0x78] sm:$0xff]  }
0x3e1f   :  { %v10437_v1 = vmax.f32 %v18386_v43, 0.0  ;;  %v15407_v43 = vld [vmem:[%s18676_s5 + $0x30] sm:$0xff]  }
0x3e20   :  { %v10435_v51 = vmax.f32 %v18388_v53, 0.0  ;;  %v15409_v53 = vld [vmem:[%s18676_s5 + $0xa8] sm:$0xff]  }
0x3e21   :  { %v10439_v24 = vpack.c.bf16 %v10437_v1, %v10436_v7 }
0x3e22   :  { %v10438_v6 = vpack.c.bf16 %v10435_v51, %v10434_v0 }
0x3e24   :  { %14637 = vmatpush3.bf16.msra.mxu0 %v10438_v6 }
0x3e25   :  { %14638 = vmatprep.subr.bf16.mxu0 %v16476_v37 }
0x3e28   :  { %14639 = vmatpush3.bf16.msra.mxu0 %v10439_v24 }
0x3e29   :  { %14644 = vmatprep.subr.bf16.mxu0 %v16476_v37 }
0x3e2b   :  { %14641 = vmatmul.mubr.msk.bf16.vlgmr.msra.gmra.mrb[44].mxu0 %vm770_vm0, %v18404_v4 }
0x3e2c   :  { %14645 = vmatpush3.bf16.msra.mxu0 %v15381_v39  ;;  %14660 = vmatprep.mubr.msk.bf16.mxu0 %vm16477_vm2, %v16476_v37 }
0x3e2d   :  { %14646 = vmatprep.subr.bf16.mxu0 %v16476_v37 }
0x3e30   :  { %14647 = vmatpush3.bf16.msra.mxu0 %v15382_v9 }
0x3e31   :  { %14648 = vmatprep.subr.bf16.mxu0 %v16476_v37 }
0x3e34   :  { %14649 = vmatpush3.bf16.msra.mxu0 %v15383_v11 }
0x3e35   :  { %14650 = vmatprep.subr.bf16.mxu0 %v16476_v37 }
0x3e38   :  { %14651 = vmatpush3.bf16.msra.mxu0 %v15384_v14 }
0x3e39   :  { %14652 = vmatprep.subr.bf16.mxu0 %v16476_v37 }
0x3e3c   :  { %14653 = vmatpush3.bf16.msra.mxu0 %v15385_v50 }
0x3e3d   :  { %14654 = vmatprep.subr.bf16.mxu0 %v16476_v37 }
0x3e40   :  { %14655 = vmatpush3.bf16.msra.mxu0 %v15386_v15 }
0x3e41   :  { %14656 = vmatprep.subr.bf16.mxu0 %v16476_v37 }
0x3e44   :  { %14657 = vmatpush3.bf16.msra.mxu0 %v15387_v40 }
0x3e45   :  { %14658 = vmatprep.subr.bf16.mxu0 %v16476_v37 }
0x3e48   :  { %14659 = vmatpush3.bf16.msra.mxu0 %v15388_v12 }
0x3e49   :  { %14686 = vmatprep.subr.bf16.mxu0 %v15394_v5 }
0x3efe   :  { %v10474_v58 = vpop.f32.mrb[44].mxu0 }
0x3eff   :  { %v10480_v13 = vpack.c.bf16 %v10474_v58, %v10474_v58  ;;  %v14642_v20 = vpop.f32.mrb[45].mxu0 }
0x3f00   :  { %v10477_v35 = vpop.f32.mrb[46].mxu0 }
0x3f01   :  { %14661 = vmatmul.mubr.bf16.vlgmr.msra.gmra.mrb[48].mxu0 %v10480_v13  ;;  %v14643_v29 = vpop.f32.mrb[47].mxu0 }
0x3f02   :  { %14687 = vmatpush3.bf16.msra.mxu0 %v15394_v5 }
0x3f03   :  { %14688 = vmatprep.subr.bf16.mxu0 %v15397_v54 }
0x3f06   :  { %14689 = vmatpush3.bf16.msra.mxu0 %v15397_v54 }
0x3f07   :  { %14690 = vmatprep.subr.bf16.mxu0 %v15400_v19 }
0x3f0a   :  { %14691 = vmatpush3.bf16.msra.mxu0 %v15400_v19 }
0x3f0b   :  { %14692 = vmatprep.subr.bf16.mxu0 %v15403_v2 }
0x3f0e   :  { %14693 = vmatpush3.bf16.msra.mxu0 %v15403_v2  ;;  %v12496_v2 = vld [vmem:[%s16796_s3] ss:$0 sm:$0xff]  ;;  %s18677_s3 = sld [smem:[#allocation101_spill]] }
0x3f0f   :  { %14694 = vmatprep.subr.bf16.mxu0 %v15406_v44 }
0x3f12   :  { %14695 = vmatpush3.bf16.msra.mxu0 %v15406_v44 }
0x3f13   :  { %14696 = vmatprep.subr.bf16.mxu0 %v15409_v53 }
0x3f16   :  { %14697 = vmatpush3.bf16.msra.mxu0 %v15409_v53 }
0x3fd4   :  { %v10579_v49 = vpop.f32.mrb[48].mxu0 }
0x3fd5   :  { %v10585_v17 = vsub.f32 0.0, %v10579_v49  ;;  %v14662_v18 = vpop.f32.mrb[49].mxu0 }
0x3fd6   :  { %v10582_v48 = vpop.f32.mrb[50].mxu0  ;;  %v15414_v18 = vld [vmem:[#allocation31 + $0x8] sm:$0xff]  }
0x3fd7   :  { %v10586_v21 = vmul.f32 1.442695, %v10585_v17  ;;  %v14663_v28 = vpop.f32.mrb[51].mxu0  ;;  %v15413_v17 = vld [vmem:[#allocation31] sm:$0xff]   ;;  %v15415_v48 = vld [vmem:[#allocation31 + $0x10] sm:$0xff]  }
0x3fd8   :  { %v15417_v28 = vld [vmem:[#allocation31 + $0x20] sm:$0xff]  }
0x3fd9   :  { %15481 = vpow2.f32 %v10586_v21  ;;  %v15416_v21 = vld [vmem:[#allocation31 + $0x18] sm:$0xff]  }
0x3fe3   :  { %v15482_v30 = vpop.eup %15481 }
0x3fe4   :  { %v10588_v46 = vadd.f32 1.0, %v15482_v30  ;;  %v15418_v30 = vld [vmem:[#allocation31 + $0x28] sm:$0xff]  }
0x3fe6   :  { %15483 = vrcp.f32 %v10588_v46  ;;  %v15419_v46 = vld [vmem:[#allocation31 + $0x30] sm:$0xff]  }
0x3ff0   :  { %v15484_v31 = vpop.eup %15483 }
0x3ff1   :  { %v10591_v32 = vpack.c.bf16 %v15484_v31, %v15484_v31 }
0x3ff3   :  { %14824 = vmatprep.subr.msk.bf16.mxu1 %vm1704_vm4, %v10591_v32  ;;  %v10593_v41 = vsel %vm1704_vm4, %v10591_v32, 0 }
0x3ff4   :  { %14665 = vmatpush3.bf16.msra.mxu1 %v10593_v41 }
0x3ff7   :  { %14667 = vmatmul.mubr.msk.bf16.vlgmr.msra.gmra.mrb[36].mxu1 %vm1697_vm3, %v18173_v25 }
0x3ff8   :  { %14674 = vmatprep.mubr.msk.bf16.mxu1 %vm770_vm0, %v18180_v55 }
0x40ca   :  { %v14668_v33 = vpop.f32.mrb[36].mxu1 }
0x40cb   :  { %v10629_v34 = vpop.f32.mrb[37].mxu1  ;;  %v10646_v55 = vmul.f32 %v14668_v33, %v10436_v7 }
0x40cc   :  { %v14669_v25 = vpop.f32.mrb[38].mxu1  ;;  %v10644_v47 = vmul.f32 %v10629_v34, %v10434_v0  ;;  %v15410_v0 = vld [vmem:[%s18676_s5 + $0x38] sm:$0xff]  }
0x40cd   :  { %v10647_v45 = vmul.f32 %v14669_v25, %v10437_v1  ;;  %v10632_v38 = vpop.f32.mrb[39].mxu1 }
0x40ce   :  { %v10645_v63 = vmul.f32 %v10632_v38, %v10435_v51  ;;  %v15412_v51 = vld [vmem:[%s18676_s5 + $0xb8] sm:$0xff]  }
0x40cf   :  { %v10649_v27 = vpack.c.bf16 %v10647_v45, %v10646_v55 }
0x40d0   :  { %v10648_v59 = vpack.c.bf16 %v10645_v63, %v10644_v47 }
0x40d2   :  { %14670 = vmatprep.subr.bf16.mxu1 %v10648_v59 }
0x40d3   :  { %14671 = vmatpush3.bf16.msra.mxu1 %v10648_v59 }
0x40d4   :  { %14672 = vmatprep.subr.bf16.mxu1 %v10649_v27 }
0x40d7   :  { %14673 = vmatpush3.bf16.msra.mxu1 %v10649_v27 }
0x40d8   :  { %13383 = vmatprep.subr.bf16.mxu1 %v15389_v62 }
0x40da   :  { %14675 = vmatmul.mubr.msk.bf16.vlgmr.msra.gmra.mrb[40].mxu1 %vm770_vm0, %v18217_v57  ;;  %v15398_v57 = vld [vmem:[%s18676_s5 + $0x18] sm:$0xff]  }
0x40db   :  { %14678 = vmatprep.mubr.msk.bf16.mxu1 %vm770_vm0, %v18222_v22  ;;  %13384 = vmatpush3.bf16.msra.mxu1 %v15390_v26  ;;  %v15399_v22 = vld [vmem:[%s18676_s5 + $0x60] sm:$0xff]  }
0x40dc   :  { %13385 = vmatprep.subr.bf16.mxu1 %v15391_v60 }
0x40df   :  { %13386 = vmatpush3.bf16.msra.mxu1 %v15392_v61 }
0x40e0   :  { %13387 = vmatprep.subr.bf16.mxu1 %v15393_v52 }
0x40e2   :  { %14679 = vmatmul.mubr.msk.bf16.gmra.mrb[44].mxu1 %vm770_vm0, %v18229_v56  ;;  %v15404_v56 = vld [vmem:[%s18676_s5 + $0x28] sm:$0xff]  }
0x40e3   :  { %14682 = vmatprep.mubr.msk.bf16.mxu1 %vm770_vm0, %v18234_v42  ;;  %13388 = vmatpush3.bf16.msra.mxu1 %v15395_v16  ;;  %v15405_v42 = vld [vmem:[%s18676_s5 + $0x70] sm:$0xff]  }
0x40e4   :  { %13389 = vmatprep.subr.bf16.mxu1 %v15396_v3 }
0x40e7   :  { %13390 = vmatpush3.bf16.msra.mxu1 %v15398_v57 }
0x40e8   :  { %13391 = vmatprep.subr.bf16.mxu1 %v15399_v22 }
0x40ea   :  { %14683 = vmatmul.mubr.msk.bf16.gmra.mrb[48].mxu1 %vm770_vm0, %v18239_v23  ;;  %v15411_v23 = vld [vmem:[%s18676_s5 + $0xb0] sm:$0xff]  }
0x40eb   :  { %13392 = vmatpush3.bf16.msra.mxu1 %v15401_v8  ;;  %14698 = vmatprep.subr.bf16.mxu0 %v15411_v23 }
0x40ec   :  { %13393 = vmatprep.subr.bf16.mxu1 %v15402_v10  ;;  %14699 = vmatpush3.bf16.msra.mxu0 %v15411_v23 }
0x40ed   :  { %14700 = vmatprep.subr.bf16.mxu0 %v15412_v51 }
0x40ef   :  { %13394 = vmatpush3.bf16.msra.mxu1 %v15404_v56 }
0x40f0   :  { %13395 = vmatprep.subr.bf16.mxu1 %v15405_v42  ;;  %14701 = vmatpush3.bf16.msra.mxu0 %v15412_v51 }
0x40f1   :  { %14706 = vmatprep.subr.bf16.mxu0 %v16476_v37 }
0x40f3   :  { %13396 = vmatpush3.bf16.msra.mxu1 %v15407_v43  ;;  %v15530_v43 = vld [vmem:[%s18655_s28] sm:$0xff]  }
0x40f4   :  { %13397 = vmatprep.subr.bf16.mxu1 %v15408_v36  ;;  %v15420_v36 = vld [vmem:[#allocation31 + $0x38] sm:$0xff]  }
0x40f7   :  { %13398 = vmatpush3.bf16.msra.mxu1 %v15410_v0 }
0x40f8   :  { %14714 = vmatprep.subr.bf16.mxu1 %v16476_v37 }
0x41ad   :  { %v14676_v1 = vpop.f32.mrb[40].mxu1 }
0x41ae   :  { %v10684_v6 = vpop.f32.mrb[41].mxu1 }
0x41af   :  { %v14677_v7 = vpop.f32.mrb[42].mxu1 }
0x41b0   :  { %v10732_v24 = vpack.c.bf16 %v14677_v7, %v14676_v1  ;;  %v10687_v39 = vpop.f32.mrb[43].mxu1 }
0x41b1   :  { %v10731_v9 = vpack.c.bf16 %v10687_v39, %v10684_v6 }
0x41b5   :  { %v14680_v11 = vpop.f32.mrb[44].mxu1 }
0x41b6   :  { %v10700_v14 = vpop.f32.mrb[45].mxu1 }
0x41b7   :  { %v14681_v50 = vpop.f32.mrb[46].mxu1 }
0x41b8   :  { %v10734_v15 = vpack.c.bf16 %v14681_v50, %v14680_v11  ;;  %v10703_v40 = vpop.f32.mrb[47].mxu1 }
0x41b9   :  { %v10733_v12 = vpack.c.bf16 %v10703_v40, %v10700_v14  ;;  %v15531_v40 = vld [vmem:[%s18655_s28 + $0x8] sm:$0xff]  }
0x41bb   :  { %10968 = vmatprep.mubr.bf16.mxu1 %v10733_v12  ;;  %v15532_v12 = vld [vmem:[%s18653_s11] sm:$0xff]  }
0x41bc   :  { %10969 = vmatmul.mubr.bf16.vlgmr.msra.gmra.mrb[52].mxu1 %v10731_v9 }
0x41bd   :  { %v14684_v58 = vpop.f32.mrb[48].mxu1  ;;  %10976 = vmatprep.mubr.bf16.mxu1 %v10734_v15  ;;  %14715 = vmatpush3.bf16.msra.mxu1 %v15413_v17 }
0x41be   :  { %v10716_v13 = vpop.f32.mrb[49].mxu1  ;;  %14716 = vmatprep.subr.bf16.mxu1 %v16476_v37 }
0x41bf   :  { %v14685_v20 = vpop.f32.mrb[50].mxu1 }
0x41c0   :  { %v10736_v35 = vpack.c.bf16 %v14685_v20, %v14684_v58  ;;  %v10719_v29 = vpop.f32.mrb[51].mxu1  ;;  %v15427_v58 = vld [vmem:[%s18677_s3 + $0x80] sm:$0xff]   ;;  %v15433_v20 = vld [vmem:[%s18677_s3 + $0x90] sm:$0xff]  }
0x41c1   :  { %v10735_v49 = vpack.c.bf16 %v10719_v29, %v10716_v13  ;;  %14717 = vmatpush3.bf16.msra.mxu1 %v15414_v18  ;;  %v15430_v13 = vld [vmem:[%s18677_s3 + $0x88] sm:$0xff]  }
0x41c2   :  { %14718 = vmatprep.subr.bf16.mxu1 %v16476_v37 }
0x41c3   :  { %14702 = vmatprep.mubr.bf16.mxu0 %v10735_v49 }
0x41c4   :  { %10977 = vmatmul.mubr.bf16.gmra.mrb[56].mxu1 %v10732_v24  ;;  %14703 = vmatmul.mubr.bf16.vlgmr.msra.gmra.mrb[52].mxu0 %v10736_v35 }
0x41c5   :  { %14710 = vmatprep.mubr.msk.bf16.mxu0 %vm16477_vm2, %v16476_v37  ;;  %14730 = vmatprep.mubr.msk.bf16.mxu1 %vm16477_vm2, %v16476_v37 }
0x41c6   :  { %14719 = vmatpush3.bf16.msra.mxu1 %v15415_v48 }
0x41c7   :  { %14720 = vmatprep.subr.bf16.mxu1 %v16476_v37 }
0x41ca   :  { %14721 = vmatpush3.bf16.msra.mxu1 %v15416_v21 }
0x41cb   :  { %14722 = vmatprep.subr.bf16.mxu1 %v16476_v37 }
0x41ce   :  { %14723 = vmatpush3.bf16.msra.mxu1 %v15417_v28 }
0x41cf   :  { %14724 = vmatprep.subr.bf16.mxu1 %v16476_v37 }
0x41d2   :  { %14725 = vmatpush3.bf16.msra.mxu1 %v15418_v30 }
0x41d3   :  { %14726 = vmatprep.subr.bf16.mxu1 %v16476_v37 }
0x41d6   :  { %14727 = vmatpush3.bf16.msra.mxu1 %v15419_v46 }
0x41d7   :  { %14728 = vmatprep.subr.bf16.mxu1 %v16476_v37 }
0x41da   :  { %14729 = vmatpush3.bf16.msra.mxu1 %v15420_v36 }
0x41db   :  { %14756 = vmatprep.subr.bf16.mxu1 %v15427_v58 }
0x428f   :  { %v13399_v31 = vpop.f32.mrb[52].mxu1 }
0x4290   :  { %v13400_v32 = vpop.f32.mrb[53].mxu1 }
0x4291   :  { %v13401_v41 = vadd.f32 %v13400_v32, %v13399_v31  ;;  %v13402_v5 = vpop.f32.mrb[54].mxu1  ;;  %v15421_v31 = vld [vmem:[%s18677_s3 + $0x40] sm:$0xff]  }
0x4292   :  { %v13403_v54 = vpop.f32.mrb[55].mxu1  ;;  %v15422_v32 = vld [vmem:[%s18677_s3] sm:$0xff]  }
0x4293   :  { %v13404_v19 = vadd.f32 %v13403_v54, %v13402_v5  ;;  %v10971_v25 = vadd.f32 %v13401_v41, %v12496_v2  ;;  %v15423_v41 = vld [vmem:[%s18677_s3 + $0x48] sm:$0xff]   ;;  %v15534_v54 = vld [vmem:[%s18653_s11 + $0x10] sm:$0xff]  }
0x4294   :  { %v15533_v5 = vld [vmem:[%s18653_s11 + $0x8] sm:$0xff]  }
0x4295   :  { %v10974_v59 = vadd.f32 %v13404_v19, %v12496_v2  ;;  %v15424_v19 = vld [vmem:[%s18677_s3 + $0x8] sm:$0xff]  }
0x4297   :  { %v13405_v33 = vpop.f32.mrb[56].mxu1  ;;  %v14704_v34 = vpop.f32.mrb[52].mxu0 }
0x4298   :  { %v13406_v55 = vpop.f32.mrb[57].mxu1  ;;  %v11019_v45 = vpop.f32.mrb[53].mxu0 }
0x4299   :  { %v13407_v38 = vadd.f32 %v13406_v55, %v13405_v33  ;;  %v18479_v47 = vadd.f32 %v11019_v45, %v10971_v25  ;;  %v13408_v63 = vpop.f32.mrb[58].mxu1  ;;  %v14705_v27 = vpop.f32.mrb[54].mxu0  ;;  %v15426_v33 = vld [vmem:[%s18677_s3 + $0x10] sm:$0xff]   ;;  %v15535_v25 = vld [vmem:[%s18653_s11 + $0x18] sm:$0xff]   ;;  %v15536_v55 = vld [vmem:[%s18653_s11 + $0x20] sm:$0xff]  }
0x429a   :  { %v13409_v62 = vpop.f32.mrb[59].mxu1  ;;  %v11022_v26 = vpop.f32.mrb[55].mxu0  ;;  %v15429_v45 = vld [vmem:[%s18677_s3 + $0x18] sm:$0xff]  }
0x429b   :  { %v10979_v60 = vadd.f32 %v13407_v38, %v12496_v2  ;;  %v13410_v61 = vadd.f32 %v13409_v62, %v13408_v63  ;;  %v11023_v52 = vadd.f32 %v11022_v26, %v10974_v59  ;;  %v11034_v3 = vmax.f32 %v18479_v47, 0.0  ;;  %v15431_v38 = vld [vmem:[%s18677_s3 + $0x60] sm:$0xff]   ;;  %v15434_v63 = vld [vmem:[%s18677_s3 + $0x68] sm:$0xff]   ;;  %v15436_v62 = vld [vmem:[%s18677_s3 + $0x98] sm:$0xff]  }
0x429c   :  { %v15432_v47 = vld [vmem:[%s18677_s3 + $0x20] sm:$0xff]   ;;  %v15435_v59 = vld [vmem:[%s18677_s3 + $0x28] sm:$0xff]   ;;  %v15437_v26 = vld [vmem:[%s18677_s3 + $0x70] sm:$0xff]  }
0x429d   :  { %v11028_v16 = vadd.f32 %v14704_v34, %v10979_v60  ;;  %v10982_v57 = vadd.f32 %v13410_v61, %v12496_v2  ;;  %v11035_v22 = vmax.f32 %v11023_v52, 0.0  ;;  %v15425_v2 = vld [vmem:[%s18677_s3 + $0x50] sm:$0xff]   ;;  %v15428_v34 = vld [vmem:[%s18677_s3 + $0x58] sm:$0xff]   ;;  %v15439_v60 = vld [vmem:[%s18677_s3 + $0xa0] sm:$0xff]  }
0x429e   :  { %v15438_v61 = vld [vmem:[%s18677_s3 + $0x30] sm:$0xff]   ;;  %v15440_v52 = vld [vmem:[%s18677_s3 + $0x78] sm:$0xff]  }
0x429f   :  { %v11031_v8 = vadd.f32 %v14705_v27, %v10982_v57  ;;  %v11038_v10 = vpack.c.bf16 %v11035_v22, %v11034_v3  ;;  %v11036_v56 = vmax.f32 %v11028_v16, 0.0  ;;  %v15537_v27 = vld [vmem:[%s18653_s11 + $0x28] sm:$0xff]   ;;  %v15443_v57 = vld [vmem:[%s18677_s3 + $0xb0] sm:$0xff]  }
0x42a0   :  { %v15442_v16 = vld [vmem:[%s18677_s3 + $0xa8] sm:$0xff]  }
0x42a1   :  { %v11037_v42 = vmax.f32 %v11031_v8, 0.0  ;;  %14707 = vmatpush3.bf16.msra.mxu0 %v11038_v10 }
0x42a2   :  { %14708 = vmatprep.subr.bf16.mxu0 %v16476_v37 }
0x42a3   :  { %v11039_v44 = vpack.c.bf16 %v11037_v42, %v11036_v56 }
0x42a5   :  { %14709 = vmatpush3.bf16.msra.mxu0 %v11039_v44 }
0x42a8   :  { %14711 = vmatmul.mubr.msk.bf16.vlgmr.msra.gmra.mrb[56].mxu0 %vm770_vm0, %v18404_v4 }
0x42a9   :  { %14736 = vmatprep.mubr.msk.bf16.mxu0 %vm1697_vm3, %v15530_v43 }
0x437b   :  { %v11074_v53 = vpop.f32.mrb[56].mxu0 }
0x437c   :  { %v11080_v0 = vpack.c.bf16 %v11074_v53, %v11074_v53  ;;  %v14712_v23 = vpop.f32.mrb[57].mxu0 }
0x437d   :  { %v11077_v51 = vpop.f32.mrb[58].mxu0 }
0x437e   :  { %14731 = vmatmul.mubr.bf16.vlgmr.msra.gmra.mrb[60].mxu1 %v11080_v0  ;;  %v14713_v1 = vpop.f32.mrb[59].mxu0 }
0x437f   :  { %14757 = vmatpush3.bf16.msra.mxu1 %v15427_v58 }
0x4380   :  { %14758 = vmatprep.subr.bf16.mxu1 %v15430_v13 }
0x4383   :  { %14759 = vmatpush3.bf16.msra.mxu1 %v15430_v13 }
0x4384   :  { %14760 = vmatprep.subr.bf16.mxu1 %v15433_v20 }
0x4387   :  { %14761 = vmatpush3.bf16.msra.mxu1 %v15433_v20 }
0x4388   :  { %14762 = vmatprep.subr.bf16.mxu1 %v15436_v62 }
0x438b   :  { %14763 = vmatpush3.bf16.msra.mxu1 %v15436_v62 }
0x438c   :  { %14764 = vmatprep.subr.bf16.mxu1 %v15439_v60 }
0x438f   :  { %14765 = vmatpush3.bf16.msra.mxu1 %v15439_v60 }
0x4390   :  { %14766 = vmatprep.subr.bf16.mxu1 %v15442_v16 }
0x4393   :  { %14767 = vmatpush3.bf16.msra.mxu1 %v15442_v16 }
0x4394   :  { %14768 = vmatprep.subr.bf16.mxu1 %v15443_v57 }
0x4397   :  { %14769 = vmatpush3.bf16.msra.mxu1 %v15443_v57 }
0x4451   :  { %v11179_v6 = vpop.f32.mrb[60].mxu1 }
0x4452   :  { %v11185_v7 = vsub.f32 0.0, %v11179_v6  ;;  %v14732_v37 = vpop.f32.mrb[61].mxu1 }
0x4453   :  { %v11182_v24 = vpop.f32.mrb[62].mxu1 }
0x4454   :  { %v11186_v39 = vmul.f32 1.442695, %v11185_v7  ;;  %v14733_v4 = vpop.f32.mrb[63].mxu1 }
0x4456   :  { %15485 = vpow2.f32 %v11186_v39 }
0x4460   :  { %v15486_v9 = vpop.eup %15485 }
0x4461   :  { %v11188_v11 = vadd.f32 1.0, %v15486_v9 }
0x4463   :  { %15487 = vrcp.f32 %v11188_v11 }
0x446d   :  { %v15488_v14 = vpop.eup %15487 }
0x446e   :  { %v11191_v50 = vpack.c.bf16 %v15488_v14, %v15488_v14 }
0x4470   :  { %14825 = vmatprep.subr.msk.bf16.mxu0 %vm1704_vm4, %v11191_v50  ;;  %v11193_v15 = vsel %vm1704_vm4, %v11191_v50, 0 }
0x4471   :  { %14735 = vmatpush3.bf16.msra.mxu0 %v11193_v15 }
0x4474   :  { %14737 = vmatmul.mubr.msk.bf16.vlgmr.msra.gmra.mrb[60].mxu0 %vm1697_vm3, %v15531_v40 }
0x4475   :  { %14744 = vmatprep.mubr.msk.bf16.mxu0 %vm770_vm0, %v15532_v12  ;;  %v12538_v12 = vld [vmem:[#allocation33] ss:$0 sm:$0xff] }
0x4547   :  { %v14738_v35 = vpop.f32.mrb[60].mxu0 }
0x4548   :  { %v11229_v29 = vpop.f32.mrb[61].mxu0  ;;  %v11246_v17 = vmul.f32 %v14738_v35, %v11036_v56 }
0x4549   :  { %v14739_v49 = vpop.f32.mrb[62].mxu0  ;;  %v11244_v21 = vmul.f32 %v11229_v29, %v11034_v3  ;;  %v15441_v3 = vld [vmem:[%s18677_s3 + $0x38] sm:$0xff]  }
0x454a   :  { %v11247_v18 = vmul.f32 %v14739_v49, %v11037_v42  ;;  %v11232_v48 = vpop.f32.mrb[63].mxu0 }
0x454b   :  { %v11245_v28 = vmul.f32 %v11232_v48, %v11035_v22  ;;  %v15444_v22 = vld [vmem:[%s18677_s3 + $0xb8] sm:$0xff]  }
0x454c   :  { %v11249_v30 = vpack.c.bf16 %v11247_v18, %v11246_v17  ;;  %14770 = vmatprep.subr.bf16.mxu1 %v15444_v22 }
0x454d   :  { %v11248_v46 = vpack.c.bf16 %v11245_v28, %v11244_v21  ;;  %14771 = vmatpush3.bf16.msra.mxu1 %v15444_v22 }
0x454f   :  { %14740 = vmatprep.subr.bf16.mxu0 %v11248_v46 }
0x4550   :  { %14741 = vmatpush3.bf16.msra.mxu0 %v11248_v46 }
0x4551   :  { %14742 = vmatprep.subr.bf16.mxu0 %v11249_v30 }
0x4554   :  { %14743 = vmatpush3.bf16.msra.mxu0 %v11249_v30 }
0x4555   :  { %13444 = vmatprep.subr.bf16.mxu0 %v15421_v31 }
0x4557   :  { %14745 = vmatmul.mubr.msk.bf16.vlgmr.msra.gmra.mrb[64].mxu0 %vm770_vm0, %v15533_v5 }
0x4558   :  { %14748 = vmatprep.mubr.msk.bf16.mxu0 %vm770_vm0, %v15534_v54  ;;  %13445 = vmatpush3.bf16.msra.mxu0 %v15422_v32  ;;  %v15538_v32 = vld [vmem:[%s18652_s13] sm:$0xff] }
0x4559   :  { %13446 = vmatprep.subr.bf16.mxu0 %v15423_v41 }
0x455c   :  { %13447 = vmatpush3.bf16.msra.mxu0 %v15424_v19 }
0x455d   :  { %13448 = vmatprep.subr.bf16.mxu0 %v15425_v2  ;;  %v15539_v2 = vld [vmem:[%s18652_s13 + $0x8] sm:$0xff] }
0x455f   :  { %14749 = vmatmul.mubr.msk.bf16.gmra.mrb[68].mxu0 %vm770_vm0, %v15535_v25 }
0x4560   :  { %14752 = vmatprep.mubr.msk.bf16.mxu0 %vm770_vm0, %v15536_v55  ;;  %13449 = vmatpush3.bf16.msra.mxu0 %v15426_v33 }
0x4561   :  { %13450 = vmatprep.subr.bf16.mxu0 %v15428_v34  ;;  %v15540_v34 = vld [vmem:[%s18652_s13 + $0x10] sm:$0xff] }
0x4564   :  { %13451 = vmatpush3.bf16.msra.mxu0 %v15429_v45  ;;  %v15541_v45 = vld [vmem:[%s18652_s13 + $0x18] sm:$0xff] }
0x4565   :  { %13452 = vmatprep.subr.bf16.mxu0 %v15431_v38 }
0x4567   :  { %14753 = vmatmul.mubr.msk.bf16.gmra.mrb[72].mxu0 %vm770_vm0, %v15537_v27 }
0x4568   :  { %13453 = vmatpush3.bf16.msra.mxu0 %v15432_v47 }
0x4569   :  { %13454 = vmatprep.subr.bf16.mxu0 %v15434_v63 }
0x456c   :  { %13455 = vmatpush3.bf16.msra.mxu0 %v15435_v59 }
0x456d   :  { %13456 = vmatprep.subr.bf16.mxu0 %v15437_v26 }
0x4570   :  { %13457 = vmatpush3.bf16.msra.mxu0 %v15438_v61 }
0x4571   :  { %13458 = vmatprep.subr.bf16.mxu0 %v15440_v52 }
0x4574   :  { %13459 = vmatpush3.bf16.msra.mxu0 %v15441_v3 }
0x462a   :  { %v14746_v8 = vpop.f32.mrb[64].mxu0 }
0x462b   :  { %v11284_v10 = vpop.f32.mrb[65].mxu0 }
0x462c   :  { %v14747_v56 = vpop.f32.mrb[66].mxu0 }
0x462d   :  { %v11332_v42 = vpack.c.bf16 %v14747_v56, %v14746_v8  ;;  %v11287_v44 = vpop.f32.mrb[67].mxu0 }
0x462e   :  { %v11331_v43 = vpack.c.bf16 %v11287_v44, %v11284_v10 }
0x4632   :  { %v14750_v36 = vpop.f32.mrb[68].mxu0 }
0x4633   :  { %v11300_v53 = vpop.f32.mrb[69].mxu0 }
0x4634   :  { %v14751_v0 = vpop.f32.mrb[70].mxu0 }
0x4635   :  { %v11334_v23 = vpack.c.bf16 %v14751_v0, %v14750_v36  ;;  %v11303_v51 = vpop.f32.mrb[71].mxu0 }
0x4636   :  { %v11333_v1 = vpack.c.bf16 %v11303_v51, %v11300_v53 }
0x4638   :  { %11568 = vmatprep.mubr.bf16.mxu0 %v11333_v1 }
0x4639   :  { %11569 = vmatmul.mubr.bf16.vlgmr.msra.gmra.mrb[76].mxu0 %v11331_v43 }
0x463a   :  { %v14754_v6 = vpop.f32.mrb[72].mxu0  ;;  %11576 = vmatprep.mubr.bf16.mxu0 %v11334_v23 }
0x463b   :  { %v11316_v7 = vpop.f32.mrb[73].mxu0 }
0x463c   :  { %v14755_v37 = vpop.f32.mrb[74].mxu0 }
0x463d   :  { %v11336_v24 = vpack.c.bf16 %v14755_v37, %v14754_v6  ;;  %v11319_v39 = vpop.f32.mrb[75].mxu0 }
0x463e   :  { %v11335_v4 = vpack.c.bf16 %v11319_v39, %v11316_v7 }
0x4640   :  { %14772 = vmatprep.mubr.bf16.mxu1 %v11335_v4 }
0x4641   :  { %11577 = vmatmul.mubr.bf16.gmra.mrb[80].mxu0 %v11332_v42  ;;  %14773 = vmatmul.mubr.bf16.vlgmr.msra.gmra.mrb[64].mxu1 %v11336_v24 }
0x470c   :  { %v13460_v9 = vpop.f32.mrb[76].mxu0 }
0x470d   :  { %v13461_v11 = vpop.f32.mrb[77].mxu0 }
0x470e   :  { %v13462_v14 = vadd.f32 %v13461_v11, %v13460_v9  ;;  %v13463_v50 = vpop.f32.mrb[78].mxu0 }
0x470f   :  { %v13464_v15 = vpop.f32.mrb[79].mxu0 }
0x4710   :  { %v13465_v40 = vadd.f32 %v13464_v15, %v13463_v50  ;;  %v11571_v20 = vadd.f32 %v13462_v14, %v12538_v12 }
0x4712   :  { %v11574_v21 = vadd.f32 %v13465_v40, %v12538_v12 }
0x4714   :  { %v13466_v58 = vpop.f32.mrb[80].mxu0  ;;  %v14774_v13 = vpop.f32.mrb[64].mxu1 }
0x4715   :  { %v13467_v35 = vpop.f32.mrb[81].mxu0  ;;  %v11619_v29 = vpop.f32.mrb[65].mxu1 }
0x4716   :  { %v13468_v49 = vadd.f32 %v13467_v35, %v13466_v58  ;;  %v13469_v17 = vpop.f32.mrb[82].mxu0  ;;  %v11620_v18 = vadd.f32 %v11619_v29, %v11571_v20  ;;  %v14775_v48 = vpop.f32.mrb[66].mxu1 }
0x4717   :  { %v13470_v28 = vpop.f32.mrb[83].mxu0  ;;  %v11622_v30 = vpop.f32.mrb[67].mxu1 }
0x4718   :  { %v11579_v46 = vadd.f32 %v13468_v49, %v12538_v12  ;;  %v13471_v31 = vadd.f32 %v13470_v28, %v13469_v17  ;;  %v11634_v41 = vadd.f32 %v15538_v32, %v11620_v18  ;;  %v11623_v5 = vadd.f32 %v11622_v30, %v11574_v21 }
0x471a   :  { %v11628_v54 = vadd.f32 %v14774_v13, %v11579_v46  ;;  %11638 = vst.msk [vmem:[%s16806_s25] sm:$0xff] %vm908_vm1, %v11634_v41  ;;  %v11582_v19 = vadd.f32 %v13471_v31, %v12538_v12  ;;  %v11635_v33 = vadd.f32 %v15539_v2, %v11623_v5 }
0x471c   :  { %v11636_v25 = vadd.f32 %v15540_v34, %v11628_v54  ;;  %v11631_v55 = vadd.f32 %v14775_v48, %v11582_v19  ;;  %11639 = vst.msk [vmem:[%s16806_s25 + $0x8] sm:$0xff] %vm908_vm1, %v11635_v33 }
0x471e   :  { %11640 = vst.msk [vmem:[%s16806_s25 + $0x10] sm:$0xff] %vm908_vm1, %v11636_v25  ;;  %v11637_v38 = vadd.f32 %v15541_v45, %v11631_v55 }
0x4720   :  { %11641 = vst.msk [vmem:[%s16806_s25 + $0x18] sm:$0xff] %vm908_vm1, %v11637_v38 }
0x4721   :  { %11646 = vsyncpa [#allocation3], 1 }
0x4722   :  { %11647 = vsyncpa [#allocation5], 1 }
0x4723   :  { %11648 = vsyncpa [#allocation8], 1 }
0x4724   :  { %11649 = vsyncpa [#allocation11], 1 }
0x4725   :  { %11650 = vsyncpa [#allocation14], 1 }
0x4726   :  { %11651 = vsyncpa [#allocation17], 1 }
0x4727   :  { %11652 = vsyncpa [#allocation20], 1 }
0x4728   :  { %11653 = vsyncpa [#allocation23], 1 }
0x4729   :  { %11654 = vsyncpa [#allocation26], 1 }
0x472a   :  { %11655 = vsyncpa [#allocation29], 1 }
0x472b   :  { %11656 = vsyncpa [#allocation32], 1 }
0x472c   :  { %11657 = vsyncpa [#allocation35], 1 }
0x472d   :  { %11658 = vsyncpa [#allocation38], 1 }
0x472e   :  { %11659 = vsyncpa [#allocation41], 1 }
0x472f   :  { %11660 = vsyncpa [#allocation44], 1 }
0x4730   :  { %11661 = vsyncpa [#allocation47], 1 }
0x4731   :  { %11662 = vsyncpa [#allocation50], 1 }
0x4732   :  { %11663 = vsyncpa [#allocation53], 1 }
0x4733   :  { %11664 = vsyncpa [#allocation56], 1 }

</bundles_post_ra>
